<compile_context>
chip_gen: v6e
topology: v6e:2x2x1
jax: 0.10.0
libtpu: 0.0.40
codegen_flags: <defaults>
</compile_context>

<pallas_src>
import functools

import jax
import jax.numpy as jnp
from jax.experimental import pallas as pl
from jax.experimental.pallas import tpu as pltpu


# ----------------------------- Pallas kernels --------------------------------

def _mm_fused_kernel(a_ref, b_ref, bias_ref, o_ref, *, activation):
    """Single-K-block matmul + bias + activation (no accumulator round trip)."""
    y = jnp.dot(a_ref[...], b_ref[...], preferred_element_type=jnp.float32)
    y = y + bias_ref[...]                 # (tm,N)+(1,N) or (tm,N)+(tm,N)
    if activation == "relu":
        y = jnp.maximum(y, 0.0)
    elif activation == "tanh":
        y = jnp.tanh(y)
    o_ref[...] = y.astype(o_ref.dtype)


def _mm_ktiled_kernel(a_ref, b_ref, bias_ref, o_ref, *, activation):
    """Fallback for very large K (not exercised by this model): accumulate directly
    into the resident f32 output block (its block index (m, 0) is constant over k)."""
    k = pl.program_id(1)

    @pl.when(k == 0)
    def _():
        o_ref[...] = jnp.zeros_like(o_ref)

    o_ref[...] += jnp.dot(a_ref[...], b_ref[...],
                          preferred_element_type=jnp.float32)

    @pl.when(k == pl.num_programs(1) - 1)
    def _():
        y = o_ref[...] + bias_ref[...]
        if activation == "relu":
            y = jnp.maximum(y, 0.0)
        elif activation == "tanh":
            y = jnp.tanh(y)
        o_ref[...] = y


def _round_up(x, m):
    return ((x + m - 1) // m) * m


_VMEM_LIMIT = 32 * 1024 * 1024       # safe on v5e/v6e/v7x; blocks here are far smaller
_M_CAP = 512                         # single M block up to 512 rows
_SINGLE_K_BYTES = 12 * 1024 * 1024   # bf16 bytes of (A block + weight) allowed per step


def pallas_matmul_bias_act(a, w_pad, bias, activation, out_dtype=jnp.bfloat16):
    """act(a @ w + bias).
    a:     (M, K) bf16 activations (K already padded by _im2col where possible)
    w_pad: (K_pad, N_pad) bf16, pre-transposed / padded / cast in prepare_params
    bias:  (1, N_pad) f32 broadcast bias, or (M, N_pad) f32 per-row bias
    Returns (M, N_pad) in out_dtype."""
    M, K = a.shape
    K_pad, N_pad = w_pad.shape
    assert K <= K_pad and bias.shape[1] == N_pad

    if a.dtype != jnp.bfloat16:
        a = a.astype(jnp.bfloat16)
    if K != K_pad:
        a = jnp.pad(a, ((0, 0), (0, K_pad - K)))

    per_row_bias = bias.shape[0] != 1

    # ---- M (row) tiling: one block up to _M_CAP rows, else 256-row tiles ----
    if M <= _M_CAP:
        tm = M_pad = _round_up(M, 16)
        grid_m = 1
    else:
        tm = 256
        M_pad = _round_up(M, tm)
        grid_m = M_pad // tm
    if M_pad != M:
        a = jnp.pad(a, ((0, M_pad - M), (0, 0)))
        if per_row_bias:
            bias = jnp.pad(bias, ((0, M_pad - M), (0, 0)))

    single_k = K_pad * (tm + N_pad) * 2 <= _SINGLE_K_BYTES

    if single_k:
        bias_block = (tm, N_pad) if per_row_bias else (1, N_pad)
        bias_map = (lambda m: (m, 0)) if per_row_bias else (lambda m: (0, 0))
        out = pl.pallas_call(
            functools.partial(_mm_fused_kernel, activation=activation),
            out_shape=jax.ShapeDtypeStruct((M_pad, N_pad), out_dtype),
            grid_spec=pltpu.PrefetchScalarGridSpec(
                num_scalar_prefetch=0,
                grid=(grid_m,),
                in_specs=[
                    pl.BlockSpec((tm, K_pad), lambda m: (m, 0)),
                    pl.BlockSpec((K_pad, N_pad), lambda m: (0, 0)),
                    pl.BlockSpec(bias_block, bias_map),
                ],
                out_specs=pl.BlockSpec((tm, N_pad), lambda m: (m, 0)),
            ),
            # TODO(synk): on v7x, mark the M axis CORE_PARALLEL when grid_m >= 2 to
            # shard across both TensorCores (no-op on v5e/v6e; grid_m == 1 here).
            compiler_params=pltpu.CompilerParams(
                dimension_semantics=("parallel",),
                vmem_limit_bytes=_VMEM_LIMIT),
        )(a, w_pad, bias)
    else:
        tk = 512
        while K_pad % tk != 0:
            tk -= 128
        grid_k = K_pad // tk
        bias_block = (tm, N_pad) if per_row_bias else (1, N_pad)
        bias_map = (lambda m, k: (m, 0)) if per_row_bias else (lambda m, k: (0, 0))
        out = pl.pallas_call(
            functools.partial(_mm_ktiled_kernel, activation=activation),
            out_shape=jax.ShapeDtypeStruct((M_pad, N_pad), jnp.float32),
            grid_spec=pltpu.PrefetchScalarGridSpec(
                num_scalar_prefetch=0,
                grid=(grid_m, grid_k),
                in_specs=[
                    pl.BlockSpec((tm, tk), lambda m, k: (m, k)),
                    pl.BlockSpec((tk, N_pad), lambda m, k: (k, 0)),
                    pl.BlockSpec(bias_block, bias_map),
                ],
                out_specs=pl.BlockSpec((tm, N_pad), lambda m, k: (m, 0)),
            ),
            compiler_params=pltpu.CompilerParams(
                dimension_semantics=("parallel", "arbitrary"),
                vmem_limit_bytes=_VMEM_LIMIT),
        )(a, w_pad, bias)
        if out.dtype != out_dtype:
            out = out.astype(out_dtype)

    return out[:M]


# ------------------------- conv / deconv wrappers ----------------------------

def _im2col(x, kh, kw, stride, padding, k_pad):
    """x: (N, H, W, C) bf16 -> cols (N*Ho*Wo, k_pad) bf16, feature order (kh, kw, C).
    K-padding (to k_pad) is folded into the single concat so the matmul wrapper gets
    exactly one padded bf16 array."""
    N, H, W, C = x.shape
    if padding:
        x = jnp.pad(x, ((0, 0), (padding, padding), (padding, padding), (0, 0)))
    Ho = (H + 2 * padding - kh) // stride + 1
    Wo = (W + 2 * padding - kw) // stride + 1
    patches = []
    for i in range(kh):
        for j in range(kw):
            patches.append(x[:, i:i + Ho * stride:stride, j:j + Wo * stride:stride, :])
    K = kh * kw * C
    if k_pad > K:
        patches.append(jnp.zeros((N, Ho, Wo, k_pad - K), x.dtype))
    cols = jnp.concatenate(patches, axis=-1)
    # TODO(synk): im2col is still materialized in plain JAX; fusing the kh*kw
    # shifted-window reads into the Pallas kernel would remove the duplicated
    # activation traffic at larger H/W.
    return cols.reshape(N * Ho * Wo, k_pad), Ho, Wo


def conv2d(x, w_pad, b_pad, *, kh, kw, stride, padding, cout, activation,
           out_dtype=jnp.bfloat16, row_bias=None):
    """x: NHWC bf16; w_pad/b_pad prepared by prepare_params; returns NHWC out_dtype.
    row_bias (M, cout-ish) overrides b_pad as a per-row additive term."""
    K_pad, N_pad = w_pad.shape
    cols, Ho, Wo = _im2col(x, kh, kw, stride, padding, K_pad)
    if row_bias is not None:
        if row_bias.shape[1] != N_pad:
            row_bias = jnp.pad(row_bias, ((0, 0), (0, N_pad - row_bias.shape[1])))
        bias = row_bias.astype(jnp.float32)
    else:
        bias = b_pad
    y = pallas_matmul_bias_act(cols, w_pad, bias, activation, out_dtype)
    return y[:, :cout].reshape(x.shape[0], Ho, Wo, cout)


def conv_transpose2d(x, w_pad, b_pad, *, cout, activation, out_dtype=jnp.bfloat16):
    """ConvTranspose2d(k=4, s=2, p=1) via stride^2 sub-kernel decomposition.
    x: NHWC bf16 -> (N, 2H, 2W, cout)."""
    Nb, Hi, Wi, _ = x.shape
    xp = jnp.pad(x, ((0, 0), (1, 1), (1, 1), (0, 0)))
    K_pad = w_pad.shape[0]
    cols, _, _ = _im2col(xp, 2, 2, 1, 0, K_pad)            # (Nb*(Hi+1)*(Wi+1), K_pad)
    y = pallas_matmul_bias_act(cols, w_pad, b_pad, activation, out_dtype)
    res = y[:, :4 * cout].reshape(Nb, Hi + 1, Wi + 1, 2, 2, cout)
    # out[n, 2m+ry, 2w+rx, o] = res[n, m+ry, w+rx, ry, rx, o]
    ee = res[:, :Hi, :Wi, 0, 0, :]
    eo = res[:, :Hi, 1:,  0, 1, :]
    oe = res[:, 1:,  :Wi, 1, 0, :]
    oo = res[:, 1:,  1:,  1, 1, :]
    row_e = jnp.stack([ee, eo], axis=3)                    # (Nb, Hi, Wi, 2, O)
    row_o = jnp.stack([oe, oo], axis=3)
    out = jnp.stack([row_e, row_o], axis=2)                # (Nb, Hi, 2, Wi, 2, O)
    return out.reshape(Nb, 2 * Hi, 2 * Wi, cout)


# ------------------------------ parameters -----------------------------------

def init_params(key):
    def nrm(k, shape, scale=0.05):
        return scale * jax.random.normal(k, shape, jnp.float32)

    ks = jax.random.split(key, 20)
    p = {}
    p["enc1_w"] = nrm(ks[0], (64, 1, 3, 3));    p["enc1_b"] = nrm(ks[1], (64,))
    p["enc2_w"] = nrm(ks[2], (128, 64, 4, 4));  p["enc2_b"] = nrm(ks[3], (128,))
    p["enc3_w"] = nrm(ks[4], (256, 128, 4, 4)); p["enc3_b"] = nrm(ks[5], (256,))
    p["enc4_w"] = nrm(ks[6], (512, 256, 4, 4)); p["enc4_b"] = nrm(ks[7], (512,))
    # Surrogate InceptionV3 feature head (3 -> 2048)
    p["inc_w"] = nrm(ks[8], (3, 2048));         p["inc_b"] = nrm(ks[9], (2048,))
    p["fus_w"] = nrm(ks[10], (256, 512 + 2048, 1, 1)); p["fus_b"] = nrm(ks[11], (256,))
    p["dec1_w"] = nrm(ks[12], (256, 128, 4, 4)); p["dec1_b"] = nrm(ks[13], (128,))
    p["dec2_w"] = nrm(ks[14], (128, 64, 4, 4));  p["dec2_b"] = nrm(ks[15], (64,))
    p["dec3_w"] = nrm(ks[16], (64, 2, 4, 4));    p["dec3_b"] = nrm(ks[17], (2,))
    return p


def _pad_cast_weights(w_mat, b):
    """(K, N) f32 weight + (N,) bias -> bf16 (K_pad, N_pad) weight, f32 (1, N_pad) bias."""
    K, N = w_mat.shape
    K_pad = _round_up(K, 128)
    N_pad = _round_up(N, 128)
    w_p = jnp.pad(w_mat.astype(jnp.bfloat16), ((0, K_pad - K), (0, N_pad - N)))
    b_p = jnp.pad(b.astype(jnp.float32), (0, N_pad - N)).reshape(1, N_pad)
    return w_p, b_p


def _prep_conv(w_oihw, b):
    """PyTorch Conv2d weight (O, I, kh, kw) -> padded bf16 (kh*kw*I, O) matmul weight."""
    O, I, kh, kw = w_oihw.shape
    w_mat = jnp.transpose(w_oihw, (2, 3, 1, 0)).reshape(kh * kw * I, O)
    return _pad_cast_weights(w_mat, b)


def _prep_deconv(w_iohw, b):
    """PyTorch ConvTranspose2d weight (I, O, 4, 4), stride 2, pad 1 -> combined
    (2*2*I, 4*O) sub-kernel weight: 4 output parities (ry, rx) stacked along N."""
    I, O, kh, kw = w_iohw.shape
    assert kh == 4 and kw == 4
    kidx = [jnp.array([3, 1]), jnp.array([2, 0])]   # tap -> original kernel index, per parity
    mats = []
    for ry in range(2):
        for rx in range(2):
            sub = w_iohw[:, :, kidx[ry], :][:, :, :, kidx[rx]]      # (I, O, 2, 2)
            mats.append(jnp.transpose(sub, (2, 3, 0, 1)).reshape(2 * 2 * I, O))
    w_all = jnp.concatenate(mats, axis=1)           # (4*I, 4*O)
    b_all = jnp.tile(b, 4)                          # (4*O,)
    return _pad_cast_weights(w_all, b_all)


def prepare_params(raw):
    """One-time weight prep (transpose / padding / bf16 cast); returns jnp arrays only."""
    p = {}
    p["enc1_w"], p["enc1_b"] = _prep_conv(raw["enc1_w"], raw["enc1_b"])
    p["enc2_w"], p["enc2_b"] = _prep_conv(raw["enc2_w"], raw["enc2_b"])
    p["enc3_w"], p["enc3_b"] = _prep_conv(raw["enc3_w"], raw["enc3_b"])
    p["enc4_w"], p["enc4_b"] = _prep_conv(raw["enc4_w"], raw["enc4_b"])
    # Inception surrogate head stays f32 plain-JAX (tiny: M=batch, K=3, N=2048).
    p["inc_w"] = raw["inc_w"].astype(jnp.float32)
    p["inc_b"] = raw["inc_b"].astype(jnp.float32)
    # Fusion 1x1 conv split:  cat([e(512), feat(2048)]) @ W  ==  e @ W_enc + feat @ W_feat
    fw = raw["fus_w"][:, :, 0, 0]                              # (256, 2560)
    w_enc = jnp.transpose(fw[:, :512])                         # (512, 256)
    p["fus_enc_w"], _ = _pad_cast_weights(w_enc, jnp.zeros((256,), jnp.float32))
    p["fus_feat_w"] = jnp.transpose(fw[:, 512:]).astype(jnp.float32)   # (2048, 256)
    p["fus_b"] = raw["fus_b"].astype(jnp.float32)              # (256,)
    p["dec1_w"], p["dec1_b"] = _prep_deconv(raw["dec1_w"], raw["dec1_b"])
    p["dec2_w"], p["dec2_b"] = _prep_deconv(raw["dec2_w"], raw["dec2_b"])
    p["dec3_w"], p["dec3_b"] = _prep_deconv(raw["dec3_w"], raw["dec3_b"])
    return p


# -------------------------------- forward ------------------------------------

def generator_forward(x_nchw, prep):
    # NCHW at the boundary (PyTorch convention), NHWC bf16 inside the kernels.
    x = jnp.transpose(x_nchw, (0, 2, 3, 1)).astype(jnp.float32)      # (N, H, W, 1)
    N, H, W, _ = x.shape
    x_bf = x.astype(jnp.bfloat16)                                    # single cast

    # --- encoder (bf16 intermediates straight from the kernel) ---
    e = conv2d(x_bf, prep["enc1_w"], prep["enc1_b"], kh=3, kw=3, stride=1, padding=1,
               cout=64, activation="relu")                           # (N, H,   W,   64)
    e = conv2d(e, prep["enc2_w"], prep["enc2_b"], kh=4, kw=4, stride=2, padding=1,
               cout=128, activation="relu")                          # (N, H/2, W/2, 128)
    e = conv2d(e, prep["enc3_w"], prep["enc3_b"], kh=4, kw=4, stride=2, padding=1,
               cout=256, activation="relu")                          # (N, H/4, W/4, 256)
    e = conv2d(e, prep["enc4_w"], prep["enc4_b"], kh=4, kw=4, stride=2, padding=1,
               cout=512, activation="relu")                          # (N, H/8, W/8, 512)

    # --- inception branch: x.repeat(1,3,1,1) -> 2048-dim feature ---
    # TODO(synk): full pretrained InceptionV3 backbone not implemented;
    # surrogate = global-average-pool + linear to 2048 features (tiny -> plain jnp).
    gap = jnp.mean(x, axis=(1, 2))                                   # (N, 1)
    gap3 = jnp.concatenate([gap, gap, gap], axis=-1)                 # (N, 3)
    feat = jnp.maximum(gap3 @ prep["inc_w"] + prep["inc_b"], 0.0)    # (N, 2048) f32

    # --- fusion: cat([e, feat_map]) @ W + b  ==  e @ W_enc + (feat @ W_feat + b) ---
    # The 2048-channel feature broadcast / concat is folded into a per-image additive
    # term applied as a per-row bias inside the fusion matmul kernel epilogue.
    Hf, Wf = e.shape[1], e.shape[2]
    per_img = feat @ prep["fus_feat_w"] + prep["fus_b"]              # (N, 256) f32
    row_bias = jnp.broadcast_to(per_img[:, None, :], (N, Hf * Wf, per_img.shape[-1])
                                ).reshape(N * Hf * Wf, per_img.shape[-1])
    f = conv2d(e, prep["fus_enc_w"], None, kh=1, kw=1, stride=1, padding=0,
               cout=256, activation="relu", row_bias=row_bias)       # (N, Hf, Wf, 256)

    # --- decoder (sub-kernel conv-transpose); final layer in f32 ---
    d = conv_transpose2d(f, prep["dec1_w"], prep["dec1_b"], cout=128, activation="relu")
    d = conv_transpose2d(d, prep["dec2_w"], prep["dec2_b"], cout=64, activation="relu")
    d = conv_transpose2d(d, prep["dec3_w"], prep["dec3_b"], cout=2, activation="tanh",
                         out_dtype=jnp.float32)

    out = jnp.transpose(d, (0, 3, 1, 2))  # NCHW (N, 2, H, W)
    # TODO(synk): F.interpolate(bilinear, align_corners=True) fallback not implemented
    # (output already matches (N, 2, H, W) for H, W divisible by 8).
    return out


# --------------------------------- main ---------------------------------------

if __name__ == "__main__":
    key = jax.random.PRNGKey(0)
    pkey, xkey = jax.random.split(key)
    raw_params = init_params(pkey)
    prep = prepare_params(raw_params)   # one-time weight prep (outside the jitted forward)

    x = jax.random.normal(xkey, (2, 1, 16, 16), jnp.float32)  # NCHW, 1 channel

    fwd = jax.jit(generator_forward)
    y = fwd(x, prep)
    jax.block_until_ready(y)

    assert y.shape == (2, 2, 16, 16), y.shape
    assert y.dtype == jnp.float32
    assert bool(jnp.all(jnp.isfinite(y)))
    assert bool(jnp.all(jnp.abs(y) <= 1.0))  # tanh output range

    print("KERNEL_OK")
</pallas_src>

<mosaic_0001>
module attributes {stable_mosaic.version = 11 : i64} {
  func.func @_mm_fused_kernel(%arg0: i32, %arg1: memref<512x128xbf16, #tpu.memory_space<vmem>>, %arg2: memref<128x128xbf16, #tpu.memory_space<vmem>>, %arg3: memref<1x128xf32, #tpu.memory_space<vmem>>, %arg4: memref<512x128xbf16, #tpu.memory_space<vmem>>) attributes {dimension_semantics = [#tpu.dimension_semantics<parallel>], iteration_bounds = array<i64: 1>, scalar_prefetch = 0 : i64, scratch_operands = 0 : i64, tpu.core_type = #tpu.core_type<tc>, window_params = [{transform_indices = @transform_0, window_bounds = array<i64: 512, 128>}, {pipeline_mode = #tpu.pipeline_mode<synchronous>, transform_indices = @transform_1, window_bounds = array<i64: 128, 128>}, {pipeline_mode = #tpu.pipeline_mode<synchronous>, transform_indices = @transform_2, window_bounds = array<i64: 1, 128>}, {transform_indices = @transform_3, window_bounds = array<i64: 512, 128>}]} {
    %c0 = arith.constant 0 : index
    %c0_0 = arith.constant 0 : index
    %0 = vector.load %arg1[%c0, %c0_0] : memref<512x128xbf16, #tpu.memory_space<vmem>>, vector<512x128xbf16>
    %c0_1 = arith.constant 0 : index
    %c0_2 = arith.constant 0 : index
    %1 = vector.load %arg2[%c0_1, %c0_2] : memref<128x128xbf16, #tpu.memory_space<vmem>>, vector<128x128xbf16>
    %cst = arith.constant dense<0.000000e+00> : vector<512x128xf32>
    %2 = tpu.matmul %0, %1, %cst {dimension_numbers = #tpu.dot_dimension_numbers<[1], [0], [0], [1], [0, 0, 1, 1], [], []>} : vector<512x128xbf16>, vector<128x128xbf16>, vector<512x128xf32> -> vector<512x128xf32>
    %c0_3 = arith.constant 0 : index
    %c0_4 = arith.constant 0 : index
    %3 = vector.load %arg3[%c0_3, %c0_4] : memref<1x128xf32, #tpu.memory_space<vmem>>, vector<1x128xf32>
    %4 = vector.broadcast %3 : vector<1x128xf32> to vector<512x128xf32>
    %5 = arith.addf %2, %4 : vector<512x128xf32>
    %cst_5 = arith.constant 0.000000e+00 : f32
    %6 = vector.broadcast %cst_5 : f32 to vector<512x128xf32>
    %7 = arith.maximumf %5, %6 : vector<512x128xf32>
    %8 = arith.truncf %7 : vector<512x128xf32> to vector<512x128xbf16>
    %c0_6 = arith.constant 0 : index
    %c0_7 = arith.constant 0 : index
    %9 = vector.load %arg4[%c0_6, %c0_7] : memref<512x128xbf16, #tpu.memory_space<vmem>>, vector<512x128xbf16>
    tpu.vector_store %arg4[%c0_6, %c0_7], %8 {strides = array<i32>} : memref<512x128xbf16, #tpu.memory_space<vmem>>, vector<512x128xbf16>,
    return
  }
  func.func @transform_0(%arg0: i32) -> (i32, i32) {
    %c0_i32 = arith.constant 0 : i32
    %c0_i32_0 = arith.constant 0 : i32
    return %arg0, %c0_i32 : i32, i32
  }
  func.func @transform_1(%arg0: i32) -> (i32, i32) {
    %c0_i32 = arith.constant 0 : i32
    %c0_i32_0 = arith.constant 0 : i32
    %c0_i32_1 = arith.constant 0 : i32
    return %c0_i32, %c0_i32_0 : i32, i32
  }
  func.func @transform_2(%arg0: i32) -> (i32, i32) {
    %c0_i32 = arith.constant 0 : i32
    %c0_i32_0 = arith.constant 0 : i32
    %c0_i32_1 = arith.constant 0 : i32
    return %c0_i32, %c0_i32_0 : i32, i32
  }
  func.func @transform_3(%arg0: i32) -> (i32, i32) {
    %c0_i32 = arith.constant 0 : i32
    %c0_i32_0 = arith.constant 0 : i32
    return %arg0, %c0_i32 : i32, i32
  }
}

module attributes {stable_mosaic.version = 11 : i64} {
  func.func @_mm_fused_kernel(%arg0: i32, %arg1: memref<128x1024xbf16, #tpu.memory_space<vmem>>, %arg2: memref<1024x128xbf16, #tpu.memory_space<vmem>>, %arg3: memref<1x128xf32, #tpu.memory_space<vmem>>, %arg4: memref<128x128xbf16, #tpu.memory_space<vmem>>) attributes {dimension_semantics = [#tpu.dimension_semantics<parallel>], iteration_bounds = array<i64: 1>, scalar_prefetch = 0 : i64, scratch_operands = 0 : i64, tpu.core_type = #tpu.core_type<tc>, window_params = [{transform_indices = @transform_0, window_bounds = array<i64: 128, 1024>}, {pipeline_mode = #tpu.pipeline_mode<synchronous>, transform_indices = @transform_1, window_bounds = array<i64: 1024, 128>}, {pipeline_mode = #tpu.pipeline_mode<synchronous>, transform_indices = @transform_2, window_bounds = array<i64: 1, 128>}, {transform_indices = @transform_3, window_bounds = array<i64: 128, 128>}]} {
    %c0 = arith.constant 0 : index
    %c0_0 = arith.constant 0 : index
    %0 = vector.load %arg1[%c0, %c0_0] : memref<128x1024xbf16, #tpu.memory_space<vmem>>, vector<128x1024xbf16>
    %c0_1 = arith.constant 0 : index
    %c0_2 = arith.constant 0 : index
    %1 = vector.load %arg2[%c0_1, %c0_2] : memref<1024x128xbf16, #tpu.memory_space<vmem>>, vector<1024x128xbf16>
    %cst = arith.constant dense<0.000000e+00> : vector<128x128xf32>
    %2 = tpu.matmul %0, %1, %cst {dimension_numbers = #tpu.dot_dimension_numbers<[1], [0], [0], [1], [0, 0, 1, 1], [], []>} : vector<128x1024xbf16>, vector<1024x128xbf16>, vector<128x128xf32> -> vector<128x128xf32>
    %c0_3 = arith.constant 0 : index
    %c0_4 = arith.constant 0 : index
    %3 = vector.load %arg3[%c0_3, %c0_4] : memref<1x128xf32, #tpu.memory_space<vmem>>, vector<1x128xf32>
    %4 = vector.broadcast %3 : vector<1x128xf32> to vector<128x128xf32>
    %5 = arith.addf %2, %4 : vector<128x128xf32>
    %cst_5 = arith.constant 0.000000e+00 : f32
    %6 = vector.broadcast %cst_5 : f32 to vector<128x128xf32>
    %7 = arith.maximumf %5, %6 : vector<128x128xf32>
    %8 = arith.truncf %7 : vector<128x128xf32> to vector<128x128xbf16>
    %c0_6 = arith.constant 0 : index
    %c0_7 = arith.constant 0 : index
    %9 = vector.load %arg4[%c0_6, %c0_7] : memref<128x128xbf16, #tpu.memory_space<vmem>>, vector<128x128xbf16>
    tpu.vector_store %arg4[%c0_6, %c0_7], %8 {strides = array<i32>} : memref<128x128xbf16, #tpu.memory_space<vmem>>, vector<128x128xbf16>,
    return
  }
  func.func @transform_0(%arg0: i32) -> (i32, i32) {
    %c0_i32 = arith.constant 0 : i32
    %c0_i32_0 = arith.constant 0 : i32
    return %arg0, %c0_i32 : i32, i32
  }
  func.func @transform_1(%arg0: i32) -> (i32, i32) {
    %c0_i32 = arith.constant 0 : i32
    %c0_i32_0 = arith.constant 0 : i32
    %c0_i32_1 = arith.constant 0 : i32
    return %c0_i32, %c0_i32_0 : i32, i32
  }
  func.func @transform_2(%arg0: i32) -> (i32, i32) {
    %c0_i32 = arith.constant 0 : i32
    %c0_i32_0 = arith.constant 0 : i32
    %c0_i32_1 = arith.constant 0 : i32
    return %c0_i32, %c0_i32_0 : i32, i32
  }
  func.func @transform_3(%arg0: i32) -> (i32, i32) {
    %c0_i32 = arith.constant 0 : i32
    %c0_i32_0 = arith.constant 0 : i32
    return %arg0, %c0_i32 : i32, i32
  }
}

module attributes {stable_mosaic.version = 11 : i64} {
  func.func @_mm_fused_kernel(%arg0: i32, %arg1: memref<32x2048xbf16, #tpu.memory_space<vmem>>, %arg2: memref<2048x256xbf16, #tpu.memory_space<vmem>>, %arg3: memref<1x256xf32, #tpu.memory_space<vmem>>, %arg4: memref<32x256xbf16, #tpu.memory_space<vmem>>) attributes {dimension_semantics = [#tpu.dimension_semantics<parallel>], iteration_bounds = array<i64: 1>, scalar_prefetch = 0 : i64, scratch_operands = 0 : i64, tpu.core_type = #tpu.core_type<tc>, window_params = [{transform_indices = @transform_0, window_bounds = array<i64: 32, 2048>}, {pipeline_mode = #tpu.pipeline_mode<synchronous>, transform_indices = @transform_1, window_bounds = array<i64: 2048, 256>}, {pipeline_mode = #tpu.pipeline_mode<synchronous>, transform_indices = @transform_2, window_bounds = array<i64: 1, 256>}, {transform_indices = @transform_3, window_bounds = array<i64: 32, 256>}]} {
    %c0 = arith.constant 0 : index
    %c0_0 = arith.constant 0 : index
    %0 = vector.load %arg1[%c0, %c0_0] : memref<32x2048xbf16, #tpu.memory_space<vmem>>, vector<32x2048xbf16>
    %c0_1 = arith.constant 0 : index
    %c0_2 = arith.constant 0 : index
    %1 = vector.load %arg2[%c0_1, %c0_2] : memref<2048x256xbf16, #tpu.memory_space<vmem>>, vector<2048x256xbf16>
    %cst = arith.constant dense<0.000000e+00> : vector<32x256xf32>
    %2 = tpu.matmul %0, %1, %cst {dimension_numbers = #tpu.dot_dimension_numbers<[1], [0], [0], [1], [0, 0, 1, 1], [], []>} : vector<32x2048xbf16>, vector<2048x256xbf16>, vector<32x256xf32> -> vector<32x256xf32>
    %c0_3 = arith.constant 0 : index
    %c0_4 = arith.constant 0 : index
    %3 = vector.load %arg3[%c0_3, %c0_4] : memref<1x256xf32, #tpu.memory_space<vmem>>, vector<1x256xf32>
    %4 = vector.broadcast %3 : vector<1x256xf32> to vector<32x256xf32>
    %5 = arith.addf %2, %4 : vector<32x256xf32>
    %cst_5 = arith.constant 0.000000e+00 : f32
    %6 = vector.broadcast %cst_5 : f32 to vector<32x256xf32>
    %7 = arith.maximumf %5, %6 : vector<32x256xf32>
    %8 = arith.truncf %7 : vector<32x256xf32> to vector<32x256xbf16>
    %c0_6 = arith.constant 0 : index
    %c0_7 = arith.constant 0 : index
    %9 = vector.load %arg4[%c0_6, %c0_7] : memref<32x256xbf16, #tpu.memory_space<vmem>>, vector<32x256xbf16>
    tpu.vector_store %arg4[%c0_6, %c0_7], %8 {strides = array<i32>} : memref<32x256xbf16, #tpu.memory_space<vmem>>, vector<32x256xbf16>,
    return
  }
  func.func @transform_0(%arg0: i32) -> (i32, i32) {
    %c0_i32 = arith.constant 0 : i32
    %c0_i32_0 = arith.constant 0 : i32
    return %arg0, %c0_i32 : i32, i32
  }
  func.func @transform_1(%arg0: i32) -> (i32, i32) {
    %c0_i32 = arith.constant 0 : i32
    %c0_i32_0 = arith.constant 0 : i32
    %c0_i32_1 = arith.constant 0 : i32
    return %c0_i32, %c0_i32_0 : i32, i32
  }
  func.func @transform_2(%arg0: i32) -> (i32, i32) {
    %c0_i32 = arith.constant 0 : i32
    %c0_i32_0 = arith.constant 0 : i32
    %c0_i32_1 = arith.constant 0 : i32
    return %c0_i32, %c0_i32_0 : i32, i32
  }
  func.func @transform_3(%arg0: i32) -> (i32, i32) {
    %c0_i32 = arith.constant 0 : i32
    %c0_i32_0 = arith.constant 0 : i32
    return %arg0, %c0_i32 : i32, i32
  }
}

module attributes {stable_mosaic.version = 11 : i64} {
  func.func @_mm_fused_kernel(%arg0: i32, %arg1: memref<16x4096xbf16, #tpu.memory_space<vmem>>, %arg2: memref<4096x512xbf16, #tpu.memory_space<vmem>>, %arg3: memref<1x512xf32, #tpu.memory_space<vmem>>, %arg4: memref<16x512xbf16, #tpu.memory_space<vmem>>) attributes {dimension_semantics = [#tpu.dimension_semantics<parallel>], iteration_bounds = array<i64: 1>, scalar_prefetch = 0 : i64, scratch_operands = 0 : i64, tpu.core_type = #tpu.core_type<tc>, window_params = [{transform_indices = @transform_0, window_bounds = array<i64: 16, 4096>}, {pipeline_mode = #tpu.pipeline_mode<synchronous>, transform_indices = @transform_1, window_bounds = array<i64: 4096, 512>}, {pipeline_mode = #tpu.pipeline_mode<synchronous>, transform_indices = @transform_2, window_bounds = array<i64: 1, 512>}, {transform_indices = @transform_3, window_bounds = array<i64: 16, 512>}]} {
    %c0 = arith.constant 0 : index
    %c0_0 = arith.constant 0 : index
    %0 = vector.load %arg1[%c0, %c0_0] : memref<16x4096xbf16, #tpu.memory_space<vmem>>, vector<16x4096xbf16>
    %c0_1 = arith.constant 0 : index
    %c0_2 = arith.constant 0 : index
    %1 = vector.load %arg2[%c0_1, %c0_2] : memref<4096x512xbf16, #tpu.memory_space<vmem>>, vector<4096x512xbf16>
    %cst = arith.constant dense<0.000000e+00> : vector<16x512xf32>
    %2 = tpu.matmul %0, %1, %cst {dimension_numbers = #tpu.dot_dimension_numbers<[1], [0], [0], [1], [0, 0, 1, 1], [], []>} : vector<16x4096xbf16>, vector<4096x512xbf16>, vector<16x512xf32> -> vector<16x512xf32>
    %c0_3 = arith.constant 0 : index
    %c0_4 = arith.constant 0 : index
    %3 = vector.load %arg3[%c0_3, %c0_4] : memref<1x512xf32, #tpu.memory_space<vmem>>, vector<1x512xf32>
    %4 = vector.broadcast %3 : vector<1x512xf32> to vector<16x512xf32>
    %5 = arith.addf %2, %4 : vector<16x512xf32>
    %cst_5 = arith.constant 0.000000e+00 : f32
    %6 = vector.broadcast %cst_5 : f32 to vector<16x512xf32>
    %7 = arith.maximumf %5, %6 : vector<16x512xf32>
    %8 = arith.truncf %7 : vector<16x512xf32> to vector<16x512xbf16>
    %c0_6 = arith.constant 0 : index
    %c0_7 = arith.constant 0 : index
    %9 = vector.load %arg4[%c0_6, %c0_7] : memref<16x512xbf16, #tpu.memory_space<vmem>>, vector<16x512xbf16>
    tpu.vector_store %arg4[%c0_6, %c0_7], %8 {strides = array<i32>} : memref<16x512xbf16, #tpu.memory_space<vmem>>, vector<16x512xbf16>,
    return
  }
  func.func @transform_0(%arg0: i32) -> (i32, i32) {
    %c0_i32 = arith.constant 0 : i32
    %c0_i32_0 = arith.constant 0 : i32
    return %arg0, %c0_i32 : i32, i32
  }
  func.func @transform_1(%arg0: i32) -> (i32, i32) {
    %c0_i32 = arith.constant 0 : i32
    %c0_i32_0 = arith.constant 0 : i32
    %c0_i32_1 = arith.constant 0 : i32
    return %c0_i32, %c0_i32_0 : i32, i32
  }
  func.func @transform_2(%arg0: i32) -> (i32, i32) {
    %c0_i32 = arith.constant 0 : i32
    %c0_i32_0 = arith.constant 0 : i32
    %c0_i32_1 = arith.constant 0 : i32
    return %c0_i32, %c0_i32_0 : i32, i32
  }
  func.func @transform_3(%arg0: i32) -> (i32, i32) {
    %c0_i32 = arith.constant 0 : i32
    %c0_i32_0 = arith.constant 0 : i32
    return %arg0, %c0_i32 : i32, i32
  }
}

module attributes {stable_mosaic.version = 11 : i64} {
  func.func @_mm_fused_kernel(%arg0: i32, %arg1: memref<16x512xbf16, #tpu.memory_space<vmem>>, %arg2: memref<512x256xbf16, #tpu.memory_space<vmem>>, %arg3: memref<16x256xf32, #tpu.memory_space<vmem>>, %arg4: memref<16x256xbf16, #tpu.memory_space<vmem>>) attributes {dimension_semantics = [#tpu.dimension_semantics<parallel>], iteration_bounds = array<i64: 1>, scalar_prefetch = 0 : i64, scratch_operands = 0 : i64, tpu.core_type = #tpu.core_type<tc>, window_params = [{transform_indices = @transform_0, window_bounds = array<i64: 16, 512>}, {pipeline_mode = #tpu.pipeline_mode<synchronous>, transform_indices = @transform_1, window_bounds = array<i64: 512, 256>}, {transform_indices = @transform_2, window_bounds = array<i64: 16, 256>}, {transform_indices = @transform_3, window_bounds = array<i64: 16, 256>}]} {
    %c0 = arith.constant 0 : index
    %c0_0 = arith.constant 0 : index
    %0 = vector.load %arg1[%c0, %c0_0] : memref<16x512xbf16, #tpu.memory_space<vmem>>, vector<16x512xbf16>
    %c0_1 = arith.constant 0 : index
    %c0_2 = arith.constant 0 : index
    %1 = vector.load %arg2[%c0_1, %c0_2] : memref<512x256xbf16, #tpu.memory_space<vmem>>, vector<512x256xbf16>
    %cst = arith.constant dense<0.000000e+00> : vector<16x256xf32>
    %2 = tpu.matmul %0, %1, %cst {dimension_numbers = #tpu.dot_dimension_numbers<[1], [0], [0], [1], [0, 0, 1, 1], [], []>} : vector<16x512xbf16>, vector<512x256xbf16>, vector<16x256xf32> -> vector<16x256xf32>
    %c0_3 = arith.constant 0 : index
    %c0_4 = arith.constant 0 : index
    %3 = vector.load %arg3[%c0_3, %c0_4] : memref<16x256xf32, #tpu.memory_space<vmem>>, vector<16x256xf32>
    %4 = arith.addf %2, %3 : vector<16x256xf32>
    %cst_5 = arith.constant 0.000000e+00 : f32
    %5 = vector.broadcast %cst_5 : f32 to vector<16x256xf32>
    %6 = arith.maximumf %4, %5 : vector<16x256xf32>
    %7 = arith.truncf %6 : vector<16x256xf32> to vector<16x256xbf16>
    %c0_6 = arith.constant 0 : index
    %c0_7 = arith.constant 0 : index
    %8 = vector.load %arg4[%c0_6, %c0_7] : memref<16x256xbf16, #tpu.memory_space<vmem>>, vector<16x256xbf16>
    tpu.vector_store %arg4[%c0_6, %c0_7], %7 {strides = array<i32>} : memref<16x256xbf16, #tpu.memory_space<vmem>>, vector<16x256xbf16>,
    return
  }
  func.func @transform_0(%arg0: i32) -> (i32, i32) {
    %c0_i32 = arith.constant 0 : i32
    %c0_i32_0 = arith.constant 0 : i32
    return %arg0, %c0_i32 : i32, i32
  }
  func.func @transform_1(%arg0: i32) -> (i32, i32) {
    %c0_i32 = arith.constant 0 : i32
    %c0_i32_0 = arith.constant 0 : i32
    %c0_i32_1 = arith.constant 0 : i32
    return %c0_i32, %c0_i32_0 : i32, i32
  }
  func.func @transform_2(%arg0: i32) -> (i32, i32) {
    %c0_i32 = arith.constant 0 : i32
    %c0_i32_0 = arith.constant 0 : i32
    return %arg0, %c0_i32 : i32, i32
  }
  func.func @transform_3(%arg0: i32) -> (i32, i32) {
    %c0_i32 = arith.constant 0 : i32
    %c0_i32_0 = arith.constant 0 : i32
    return %arg0, %c0_i32 : i32, i32
  }
}

module attributes {stable_mosaic.version = 11 : i64} {
  func.func @_mm_fused_kernel(%arg0: i32, %arg1: memref<32x1024xbf16, #tpu.memory_space<vmem>>, %arg2: memref<1024x512xbf16, #tpu.memory_space<vmem>>, %arg3: memref<1x512xf32, #tpu.memory_space<vmem>>, %arg4: memref<32x512xbf16, #tpu.memory_space<vmem>>) attributes {dimension_semantics = [#tpu.dimension_semantics<parallel>], iteration_bounds = array<i64: 1>, scalar_prefetch = 0 : i64, scratch_operands = 0 : i64, tpu.core_type = #tpu.core_type<tc>, window_params = [{transform_indices = @transform_0, window_bounds = array<i64: 32, 1024>}, {pipeline_mode = #tpu.pipeline_mode<synchronous>, transform_indices = @transform_1, window_bounds = array<i64: 1024, 512>}, {pipeline_mode = #tpu.pipeline_mode<synchronous>, transform_indices = @transform_2, window_bounds = array<i64: 1, 512>}, {transform_indices = @transform_3, window_bounds = array<i64: 32, 512>}]} {
    %c0 = arith.constant 0 : index
    %c0_0 = arith.constant 0 : index
    %0 = vector.load %arg1[%c0, %c0_0] : memref<32x1024xbf16, #tpu.memory_space<vmem>>, vector<32x1024xbf16>
    %c0_1 = arith.constant 0 : index
    %c0_2 = arith.constant 0 : index
    %1 = vector.load %arg2[%c0_1, %c0_2] : memref<1024x512xbf16, #tpu.memory_space<vmem>>, vector<1024x512xbf16>
    %cst = arith.constant dense<0.000000e+00> : vector<32x512xf32>
    %2 = tpu.matmul %0, %1, %cst {dimension_numbers = #tpu.dot_dimension_numbers<[1], [0], [0], [1], [0, 0, 1, 1], [], []>} : vector<32x1024xbf16>, vector<1024x512xbf16>, vector<32x512xf32> -> vector<32x512xf32>
    %c0_3 = arith.constant 0 : index
    %c0_4 = arith.constant 0 : index
    %3 = vector.load %arg3[%c0_3, %c0_4] : memref<1x512xf32, #tpu.memory_space<vmem>>, vector<1x512xf32>
    %4 = vector.broadcast %3 : vector<1x512xf32> to vector<32x512xf32>
    %5 = arith.addf %2, %4 : vector<32x512xf32>
    %cst_5 = arith.constant 0.000000e+00 : f32
    %6 = vector.broadcast %cst_5 : f32 to vector<32x512xf32>
    %7 = arith.maximumf %5, %6 : vector<32x512xf32>
    %8 = arith.truncf %7 : vector<32x512xf32> to vector<32x512xbf16>
    %c0_6 = arith.constant 0 : index
    %c0_7 = arith.constant 0 : index
    %9 = vector.load %arg4[%c0_6, %c0_7] : memref<32x512xbf16, #tpu.memory_space<vmem>>, vector<32x512xbf16>
    tpu.vector_store %arg4[%c0_6, %c0_7], %8 {strides = array<i32>} : memref<32x512xbf16, #tpu.memory_space<vmem>>, vector<32x512xbf16>,
    return
  }
  func.func @transform_0(%arg0: i32) -> (i32, i32) {
    %c0_i32 = arith.constant 0 : i32
    %c0_i32_0 = arith.constant 0 : i32
    return %arg0, %c0_i32 : i32, i32
  }
  func.func @transform_1(%arg0: i32) -> (i32, i32) {
    %c0_i32 = arith.constant 0 : i32
    %c0_i32_0 = arith.constant 0 : i32
    %c0_i32_1 = arith.constant 0 : i32
    return %c0_i32, %c0_i32_0 : i32, i32
  }
  func.func @transform_2(%arg0: i32) -> (i32, i32) {
    %c0_i32 = arith.constant 0 : i32
    %c0_i32_0 = arith.constant 0 : i32
    %c0_i32_1 = arith.constant 0 : i32
    return %c0_i32, %c0_i32_0 : i32, i32
  }
  func.func @transform_3(%arg0: i32) -> (i32, i32) {
    %c0_i32 = arith.constant 0 : i32
    %c0_i32_0 = arith.constant 0 : i32
    return %arg0, %c0_i32 : i32, i32
  }
}

module attributes {stable_mosaic.version = 11 : i64} {
  func.func @_mm_fused_kernel(%arg0: i32, %arg1: memref<64x512xbf16, #tpu.memory_space<vmem>>, %arg2: memref<512x256xbf16, #tpu.memory_space<vmem>>, %arg3: memref<1x256xf32, #tpu.memory_space<vmem>>, %arg4: memref<64x256xbf16, #tpu.memory_space<vmem>>) attributes {dimension_semantics = [#tpu.dimension_semantics<parallel>], iteration_bounds = array<i64: 1>, scalar_prefetch = 0 : i64, scratch_operands = 0 : i64, tpu.core_type = #tpu.core_type<tc>, window_params = [{transform_indices = @transform_0, window_bounds = array<i64: 64, 512>}, {pipeline_mode = #tpu.pipeline_mode<synchronous>, transform_indices = @transform_1, window_bounds = array<i64: 512, 256>}, {pipeline_mode = #tpu.pipeline_mode<synchronous>, transform_indices = @transform_2, window_bounds = array<i64: 1, 256>}, {transform_indices = @transform_3, window_bounds = array<i64: 64, 256>}]} {
    %c0 = arith.constant 0 : index
    %c0_0 = arith.constant 0 : index
    %0 = vector.load %arg1[%c0, %c0_0] : memref<64x512xbf16, #tpu.memory_space<vmem>>, vector<64x512xbf16>
    %c0_1 = arith.constant 0 : index
    %c0_2 = arith.constant 0 : index
    %1 = vector.load %arg2[%c0_1, %c0_2] : memref<512x256xbf16, #tpu.memory_space<vmem>>, vector<512x256xbf16>
    %cst = arith.constant dense<0.000000e+00> : vector<64x256xf32>
    %2 = tpu.matmul %0, %1, %cst {dimension_numbers = #tpu.dot_dimension_numbers<[1], [0], [0], [1], [0, 0, 1, 1], [], []>} : vector<64x512xbf16>, vector<512x256xbf16>, vector<64x256xf32> -> vector<64x256xf32>
    %c0_3 = arith.constant 0 : index
    %c0_4 = arith.constant 0 : index
    %3 = vector.load %arg3[%c0_3, %c0_4] : memref<1x256xf32, #tpu.memory_space<vmem>>, vector<1x256xf32>
    %4 = vector.broadcast %3 : vector<1x256xf32> to vector<64x256xf32>
    %5 = arith.addf %2, %4 : vector<64x256xf32>
    %cst_5 = arith.constant 0.000000e+00 : f32
    %6 = vector.broadcast %cst_5 : f32 to vector<64x256xf32>
    %7 = arith.maximumf %5, %6 : vector<64x256xf32>
    %8 = arith.truncf %7 : vector<64x256xf32> to vector<64x256xbf16>
    %c0_6 = arith.constant 0 : index
    %c0_7 = arith.constant 0 : index
    %9 = vector.load %arg4[%c0_6, %c0_7] : memref<64x256xbf16, #tpu.memory_space<vmem>>, vector<64x256xbf16>
    tpu.vector_store %arg4[%c0_6, %c0_7], %8 {strides = array<i32>} : memref<64x256xbf16, #tpu.memory_space<vmem>>, vector<64x256xbf16>,
    return
  }
  func.func @transform_0(%arg0: i32) -> (i32, i32) {
    %c0_i32 = arith.constant 0 : i32
    %c0_i32_0 = arith.constant 0 : i32
    return %arg0, %c0_i32 : i32, i32
  }
  func.func @transform_1(%arg0: i32) -> (i32, i32) {
    %c0_i32 = arith.constant 0 : i32
    %c0_i32_0 = arith.constant 0 : i32
    %c0_i32_1 = arith.constant 0 : i32
    return %c0_i32, %c0_i32_0 : i32, i32
  }
  func.func @transform_2(%arg0: i32) -> (i32, i32) {
    %c0_i32 = arith.constant 0 : i32
    %c0_i32_0 = arith.constant 0 : i32
    %c0_i32_1 = arith.constant 0 : i32
    return %c0_i32, %c0_i32_0 : i32, i32
  }
  func.func @transform_3(%arg0: i32) -> (i32, i32) {
    %c0_i32 = arith.constant 0 : i32
    %c0_i32_0 = arith.constant 0 : i32
    return %arg0, %c0_i32 : i32, i32
  }
}

module attributes {stable_mosaic.version = 11 : i64} {
  func.func @_mm_fused_kernel(%arg0: i32, %arg1: memref<176x256xbf16, #tpu.memory_space<vmem>>, %arg2: memref<256x128xbf16, #tpu.memory_space<vmem>>, %arg3: memref<1x128xf32, #tpu.memory_space<vmem>>, %arg4: memref<176x128xf32, #tpu.memory_space<vmem>>) attributes {dimension_semantics = [#tpu.dimension_semantics<parallel>], iteration_bounds = array<i64: 1>, scalar_prefetch = 0 : i64, scratch_operands = 0 : i64, tpu.core_type = #tpu.core_type<tc>, window_params = [{transform_indices = @transform_0, window_bounds = array<i64: 176, 256>}, {pipeline_mode = #tpu.pipeline_mode<synchronous>, transform_indices = @transform_1, window_bounds = array<i64: 256, 128>}, {pipeline_mode = #tpu.pipeline_mode<synchronous>, transform_indices = @transform_2, window_bounds = array<i64: 1, 128>}, {transform_indices = @transform_3, window_bounds = array<i64: 176, 128>}]} {
    %c0 = arith.constant 0 : index
    %c0_0 = arith.constant 0 : index
    %0 = vector.load %arg1[%c0, %c0_0] : memref<176x256xbf16, #tpu.memory_space<vmem>>, vector<176x256xbf16>
    %c0_1 = arith.constant 0 : index
    %c0_2 = arith.constant 0 : index
    %1 = vector.load %arg2[%c0_1, %c0_2] : memref<256x128xbf16, #tpu.memory_space<vmem>>, vector<256x128xbf16>
    %cst = arith.constant dense<0.000000e+00> : vector<176x128xf32>
    %2 = tpu.matmul %0, %1, %cst {dimension_numbers = #tpu.dot_dimension_numbers<[1], [0], [0], [1], [0, 0, 1, 1], [], []>} : vector<176x256xbf16>, vector<256x128xbf16>, vector<176x128xf32> -> vector<176x128xf32>
    %c0_3 = arith.constant 0 : index
    %c0_4 = arith.constant 0 : index
    %3 = vector.load %arg3[%c0_3, %c0_4] : memref<1x128xf32, #tpu.memory_space<vmem>>, vector<1x128xf32>
    %4 = vector.broadcast %3 : vector<1x128xf32> to vector<176x128xf32>
    %5 = arith.addf %2, %4 : vector<176x128xf32>
    %6 = math.tanh %5 : vector<176x128xf32>
    %c0_5 = arith.constant 0 : index
    %c0_6 = arith.constant 0 : index
    %7 = vector.load %arg4[%c0_5, %c0_6] : memref<176x128xf32, #tpu.memory_space<vmem>>, vector<176x128xf32>
    tpu.vector_store %arg4[%c0_5, %c0_6], %6 {strides = array<i32>} : memref<176x128xf32, #tpu.memory_space<vmem>>, vector<176x128xf32>,
    return
  }
  func.func @transform_0(%arg0: i32) -> (i32, i32) {
    %c0_i32 = arith.constant 0 : i32
    %c0_i32_0 = arith.constant 0 : i32
    return %arg0, %c0_i32 : i32, i32
  }
  func.func @transform_1(%arg0: i32) -> (i32, i32) {
    %c0_i32 = arith.constant 0 : i32
    %c0_i32_0 = arith.constant 0 : i32
    %c0_i32_1 = arith.constant 0 : i32
    return %c0_i32, %c0_i32_0 : i32, i32
  }
  func.func @transform_2(%arg0: i32) -> (i32, i32) {
    %c0_i32 = arith.constant 0 : i32
    %c0_i32_0 = arith.constant 0 : i32
    %c0_i32_1 = arith.constant 0 : i32
    return %c0_i32, %c0_i32_0 : i32, i32
  }
  func.func @transform_3(%arg0: i32) -> (i32, i32) {
    %c0_i32 = arith.constant 0 : i32
    %c0_i32_0 = arith.constant 0 : i32
    return %arg0, %c0_i32 : i32, i32
  }
}

</mosaic_0001>

<bundles_post_ra>
// kernel: generator_forward.8
= control target key start
LH: loop header
LB: loop body
LE: loop exit
PB: predicated region body
PF: predicated region fallthrough
CT: control target
= control target key end

     0   :  { %s1860_s1 = inlined_call_operand.vmem [shape: bf16[128,128], index: 1, kind: input, shape index: {}]   ;;  %s1861_s0 = inlined_call_operand.vmem [shape: bf16[512,128], index: 0, kind: input, shape index: {}]   ;;  %s1862_s2 = inlined_call_operand.vmem [shape: f32[1,128], index: 2, kind: input, shape index: {}]   ;;  %s1863_s3 = inlined_call_operand.vmem [shape: bf16[512,128], index: 3, kind: output, shape index: {}]  }
   0x1   :  { %v1515_v0 = vld [vmem:[%s1860_s1 + $0x38] sm:$0xff]   ;;  %v1516_v1 = vld [vmem:[%s1860_s1 + $0x30] sm:$0xff]   ;;  %v1517_v2 = vld [vmem:[%s1860_s1 + $0x28] sm:$0xff]  }
   0x2   :  { %1419 = vmatprep.subr.bf16.mxu0 %v1515_v0  ;;  %1499 = vmatprep.subr.bf16.mxu1 %v1515_v0  ;;  %v1518_v3 = vld [vmem:[%s1860_s1 + $0x20] sm:$0xff]   ;;  %v1519_v6 = vld [vmem:[%s1860_s1 + $0x18] sm:$0xff]   ;;  %v1520_v7 = vld [vmem:[%s1860_s1 + $0x10] sm:$0xff]  }
   0x3   :  { %1420 = vmatpush3.bf16.msra.mxu0 %v1515_v0  ;;  %1507 = vmatpush3.bf16.msra.mxu1 %v1515_v0  ;;  %v1523_v4 = vld [vmem:[%s1861_s0] sm:$0xff]   ;;  %v1521_v8 = vld [vmem:[%s1860_s1 + $0x8] sm:$0xff]   ;;  %v1527_v12 = vld [vmem:[%s1861_s0 + $0x10] sm:$0xff]  }
   0x4   :  { %1421 = vmatprep.subr.bf16.mxu0 %v1516_v1  ;;  %1500 = vmatprep.subr.bf16.mxu1 %v1516_v1  ;;  %v1524_v5 = vld [vmem:[%s1861_s0 + $0x80] sm:$0xff]   ;;  %v1525_v10 = vld [vmem:[%s1861_s0 + $0x8] sm:$0xff]   ;;  %v1528_v13 = vld [vmem:[%s1861_s0 + $0x90] sm:$0xff]  }
   0x5   :  { %1435 = vmatprep.mubr.bf16.mxu0 %v1523_v4  ;;  %1467 = vmatprep.mubr.bf16.mxu1 %v1524_v5  ;;  %v1522_v9 = vld [vmem:[%s1860_s1] sm:$0xff]   ;;  %v1526_v11 = vld [vmem:[%s1861_s0 + $0x88] sm:$0xff]   ;;  %v1529_v14 = vld [vmem:[%s1861_s0 + $0x18] sm:$0xff]  }
   0x6   :  { %v1530_v15 = vld [vmem:[%s1861_s0 + $0x98] sm:$0xff]   ;;  %v1531_v16 = vld [vmem:[%s1861_s0 + $0x20] sm:$0xff]   ;;  %v1533_v18 = vld [vmem:[%s1861_s0 + $0x28] sm:$0xff]  }
   0x7   :  { %1422 = vmatpush3.bf16.msra.mxu0 %v1516_v1  ;;  %1508 = vmatpush3.bf16.msra.mxu1 %v1516_v1  ;;  %v1532_v17 = vld [vmem:[%s1861_s0 + $0xa0] sm:$0xff]   ;;  %v1534_v19 = vld [vmem:[%s1861_s0 + $0xa8] sm:$0xff]   ;;  %v1535_v20 = vld [vmem:[%s1861_s0 + $0x30] sm:$0xff]  }
   0x8   :  { %1423 = vmatprep.subr.bf16.mxu0 %v1517_v2  ;;  %1501 = vmatprep.subr.bf16.mxu1 %v1517_v2  ;;  %v1536_v21 = vld [vmem:[%s1861_s0 + $0xb0] sm:$0xff]   ;;  %v1537_v22 = vld [vmem:[%s1861_s0 + $0x38] sm:$0xff]   ;;  %v1539_v24 = vld [vmem:[%s1861_s0 + $0x40] sm:$0xff]  }
   0x9   :  { %v1538_v23 = vld [vmem:[%s1861_s0 + $0xb8] sm:$0xff]   ;;  %v1540_v25 = vld [vmem:[%s1861_s0 + $0xc0] sm:$0xff]   ;;  %v1541_v26 = vld [vmem:[%s1861_s0 + $0x48] sm:$0xff]  }
   0xa   :  { %v1542_v27 = vld [vmem:[%s1861_s0 + $0xc8] sm:$0xff]   ;;  %v1543_v28 = vld [vmem:[%s1861_s0 + $0x50] sm:$0xff]   ;;  %v1545_v30 = vld [vmem:[%s1861_s0 + $0x58] sm:$0xff]  }
   0xb   :  { %1424 = vmatpush3.bf16.msra.mxu0 %v1517_v2  ;;  %1509 = vmatpush3.bf16.msra.mxu1 %v1517_v2  ;;  %v1544_v29 = vld [vmem:[%s1861_s0 + $0xd0] sm:$0xff]   ;;  %v1546_v31 = vld [vmem:[%s1861_s0 + $0xd8] sm:$0xff]   ;;  %v1547_v32 = vld [vmem:[%s1861_s0 + $0x60] sm:$0xff]  }
   0xc   :  { %1425 = vmatprep.subr.bf16.mxu0 %v1518_v3  ;;  %1502 = vmatprep.subr.bf16.mxu1 %v1518_v3  ;;  %v1548_v33 = vld [vmem:[%s1861_s0 + $0xe0] sm:$0xff]   ;;  %v1549_v34 = vld [vmem:[%s1861_s0 + $0x68] sm:$0xff]   ;;  %v1551_v36 = vld [vmem:[%s1861_s0 + $0x70] sm:$0xff]  }
   0xd   :  { %v1550_v35 = vld [vmem:[%s1861_s0 + $0xe8] sm:$0xff]   ;;  %v1552_v37 = vld [vmem:[%s1861_s0 + $0xf0] sm:$0xff]   ;;  %v1553_v38 = vld [vmem:[%s1861_s0 + $0x78] sm:$0xff]  }
   0xe   :  { %v1554_v39 = vld [vmem:[%s1861_s0 + $0xf8] sm:$0xff]   ;;  %v1698_v40 = vld [vmem:[%s1862_s2] ss:$0 sm:$0xff] }
   0xf   :  { %1426 = vmatpush3.bf16.msra.mxu0 %v1518_v3  ;;  %1510 = vmatpush3.bf16.msra.mxu1 %v1518_v3 }
  0x10   :  { %1427 = vmatprep.subr.bf16.mxu0 %v1519_v6  ;;  %1503 = vmatprep.subr.bf16.mxu1 %v1519_v6 }
  0x13   :  { %1428 = vmatpush3.bf16.msra.mxu0 %v1519_v6  ;;  %1511 = vmatpush3.bf16.msra.mxu1 %v1519_v6 }
  0x14   :  { %1429 = vmatprep.subr.bf16.mxu0 %v1520_v7  ;;  %1504 = vmatprep.subr.bf16.mxu1 %v1520_v7 }
  0x17   :  { %1430 = vmatpush3.bf16.msra.mxu0 %v1520_v7  ;;  %1512 = vmatpush3.bf16.msra.mxu1 %v1520_v7 }
  0x18   :  { %1431 = vmatprep.subr.bf16.mxu0 %v1521_v8  ;;  %1505 = vmatprep.subr.bf16.mxu1 %v1521_v8 }
  0x1b   :  { %1432 = vmatpush3.bf16.msra.mxu0 %v1521_v8  ;;  %1513 = vmatpush3.bf16.msra.mxu1 %v1521_v8 }
  0x1c   :  { %1433 = vmatprep.subr.bf16.mxu0 %v1522_v9  ;;  %1506 = vmatprep.subr.bf16.mxu1 %v1522_v9 }
  0x1f   :  { %1434 = vmatpush3.bf16.msra.mxu0 %v1522_v9  ;;  %1514 = vmatpush3.bf16.msra.mxu1 %v1522_v9 }
  0x22   :  { %1436 = vmatmul.mubr.bf16.vlgmr.msra.gmra.mxu0 %v1525_v10  ;;  %1468 = vmatmul.mubr.bf16.vlgmr.msra.gmra.mxu1 %v1526_v11 }
  0x23   :  { %1439 = vmatprep.mubr.bf16.mxu0 %v1527_v12  ;;  %1471 = vmatprep.mubr.bf16.mxu1 %v1528_v13 }
  0x2a   :  { %1440 = vmatmul.mubr.bf16.gmra.mxu0 %v1529_v14  ;;  %1472 = vmatmul.mubr.bf16.gmra.mxu1 %v1530_v15 }
  0x2b   :  { %1443 = vmatprep.mubr.bf16.mxu0 %v1531_v16  ;;  %1475 = vmatprep.mubr.bf16.mxu1 %v1532_v17 }
  0x32   :  { %1444 = vmatmul.mubr.bf16.gmra.mxu0 %v1533_v18  ;;  %1476 = vmatmul.mubr.bf16.gmra.mxu1 %v1534_v19 }
  0x33   :  { %1447 = vmatprep.mubr.bf16.mxu0 %v1535_v20  ;;  %1479 = vmatprep.mubr.bf16.mxu1 %v1536_v21 }
  0x3a   :  { %1448 = vmatmul.mubr.bf16.gmra.mxu0 %v1537_v22  ;;  %1480 = vmatmul.mubr.bf16.gmra.mxu1 %v1538_v23 }
  0x3b   :  { %1451 = vmatprep.mubr.bf16.mxu0 %v1539_v24  ;;  %1483 = vmatprep.mubr.bf16.mxu1 %v1540_v25 }
  0x42   :  { %1452 = vmatmul.mubr.bf16.gmra.mxu0 %v1541_v26  ;;  %1484 = vmatmul.mubr.bf16.gmra.mxu1 %v1542_v27 }
  0x43   :  { %1455 = vmatprep.mubr.bf16.mxu0 %v1543_v28  ;;  %1487 = vmatprep.mubr.bf16.mxu1 %v1544_v29 }
  0x4a   :  { %1456 = vmatmul.mubr.bf16.gmra.mxu0 %v1545_v30  ;;  %1488 = vmatmul.mubr.bf16.gmra.mxu1 %v1546_v31 }
  0x4b   :  { %1459 = vmatprep.mubr.bf16.mxu0 %v1547_v32  ;;  %1491 = vmatprep.mubr.bf16.mxu1 %v1548_v33 }
  0x52   :  { %1460 = vmatmul.mubr.bf16.gmra.mxu0 %v1549_v34  ;;  %1492 = vmatmul.mubr.bf16.gmra.mxu1 %v1550_v35 }
  0x53   :  { %1463 = vmatprep.mubr.bf16.mxu0 %v1551_v36  ;;  %1495 = vmatprep.mubr.bf16.mxu1 %v1552_v37 }
  0x5a   :  { %1464 = vmatmul.mubr.bf16.gmra.mxu0 %v1553_v38  ;;  %1496 = vmatmul.mubr.bf16.gmra.mxu1 %v1554_v39 }
  0xe2   :  { %v1437_v41 = vpop.f32.mrf.mxu0  ;;  %v1469_v42 = vpop.f32.mrf.mxu1 }
  0xe3   :  { %v385_v43 = vadd.f32 %v1437_v41, %v1698_v40  ;;  %v513_v44 = vadd.f32 %v1469_v42, %v1698_v40 }
  0xe4   :  { %v376_v45 = vpop.f32.mrf.mxu0  ;;  %v504_v46 = vpop.f32.mrf.mxu1 }
  0xe5   :  { %v377_v47 = vadd.f32 %v1698_v40, %v376_v45  ;;  %v505_v48 = vadd.f32 %v1698_v40, %v504_v46  ;;  %v633_v53 = vmax.f32 %v385_v43, 0.0  ;;  %v665_v54 = vmax.f32 %v513_v44, 0.0 }
  0xe6   :  { %v1438_v49 = vpop.f32.mrf.mxu0  ;;  %v1470_v50 = vpop.f32.mrf.mxu1 }
  0xe7   :  { %v388_v51 = vadd.f32 %v1438_v49, %v1698_v40  ;;  %v516_v52 = vadd.f32 %v1470_v50, %v1698_v40  ;;  %v631_v61 = vmax.f32 %v377_v47, 0.0  ;;  %v663_v62 = vmax.f32 %v505_v48, 0.0 }
  0xe8   :  { %v379_v55 = vpop.f32.mrf.mxu0  ;;  %v507_v56 = vpop.f32.mrf.mxu1 }
  0xe9   :  { %v634_v57 = vmax.f32 %v388_v51, 0.0  ;;  %v666_v58 = vmax.f32 %v516_v52, 0.0  ;;  %v380_v59 = vadd.f32 %v1698_v40, %v379_v55  ;;  %v508_v60 = vadd.f32 %v1698_v40, %v507_v56 }
  0xea   :  { %v1441_v63 = vpop.f32.mrf.mxu0  ;;  %v1473_v0 = vpop.f32.mrf.mxu1 }
  0xeb   :  { %v1196_v1 = vpack.c.bf16 %v634_v57, %v633_v53  ;;  %v1276_v2 = vpack.c.bf16 %v666_v58, %v665_v54  ;;  %v632_v3 = vmax.f32 %v380_v59, 0.0  ;;  %v664_v4 = vmax.f32 %v508_v60, 0.0 }
  0xec   :  { %v401_v5 = vadd.f32 %v1441_v63, %v1698_v40  ;;  %v529_v6 = vadd.f32 %v1473_v0, %v1698_v40  ;;  %v392_v7 = vpop.f32.mrf.mxu0  ;;  %v520_v8 = vpop.f32.mrf.mxu1 }
  0xed   :  { %1348 = vst [vmem:[%s1863_s3 + $0x8] sm:$0xff] %v1196_v1   ;;  %1364 = vst [vmem:[%s1863_s3 + $0x88] sm:$0xff] %v1276_v2   ;;  %v1191_v9 = vpack.c.bf16 %v632_v3, %v631_v61  ;;  %v1271_v10 = vpack.c.bf16 %v664_v4, %v663_v62  ;;  %v393_v11 = vadd.f32 %v1698_v40, %v392_v7 }
  0xee   :  { %v521_v12 = vadd.f32 %v1698_v40, %v520_v8  ;;  %v1442_v13 = vpop.f32.mrf.mxu0  ;;  %v1474_v14 = vpop.f32.mrf.mxu1  ;;  %v637_v17 = vmax.f32 %v401_v5, 0.0  ;;  %v669_v18 = vmax.f32 %v529_v6, 0.0 }
  0xef   :  { %1192 = vst [vmem:[%s1863_s3] sm:$0xff] %v1191_v9   ;;  %1363 = vst [vmem:[%s1863_s3 + $0x80] sm:$0xff] %v1271_v10   ;;  %v404_v15 = vadd.f32 %v1442_v13, %v1698_v40  ;;  %v532_v16 = vadd.f32 %v1474_v14, %v1698_v40  ;;  %v635_v25 = vmax.f32 %v393_v11, 0.0 }
  0xf0   :  { %v395_v19 = vpop.f32.mrf.mxu0  ;;  %v523_v20 = vpop.f32.mrf.mxu1  ;;  %v667_v26 = vmax.f32 %v521_v12, 0.0 }
  0xf1   :  { %v638_v21 = vmax.f32 %v404_v15, 0.0  ;;  %v670_v22 = vmax.f32 %v532_v16, 0.0  ;;  %v396_v23 = vadd.f32 %v1698_v40, %v395_v19  ;;  %v524_v24 = vadd.f32 %v1698_v40, %v523_v20 }
  0xf2   :  { %v1445_v27 = vpop.f32.mrf.mxu0  ;;  %v1477_v28 = vpop.f32.mrf.mxu1 }
  0xf3   :  { %v1206_v29 = vpack.c.bf16 %v638_v21, %v637_v17  ;;  %v1286_v30 = vpack.c.bf16 %v670_v22, %v669_v18  ;;  %v636_v31 = vmax.f32 %v396_v23, 0.0  ;;  %v668_v32 = vmax.f32 %v524_v24, 0.0 }
  0xf4   :  { %v417_v33 = vadd.f32 %v1445_v27, %v1698_v40  ;;  %v545_v34 = vadd.f32 %v1477_v28, %v1698_v40  ;;  %v408_v35 = vpop.f32.mrf.mxu0  ;;  %v536_v36 = vpop.f32.mrf.mxu1 }
  0xf5   :  { %1350 = vst [vmem:[%s1863_s3 + $0x18] sm:$0xff] %v1206_v29   ;;  %1366 = vst [vmem:[%s1863_s3 + $0x98] sm:$0xff] %v1286_v30   ;;  %v1201_v37 = vpack.c.bf16 %v636_v31, %v635_v25  ;;  %v1281_v38 = vpack.c.bf16 %v668_v32, %v667_v26  ;;  %v409_v39 = vadd.f32 %v1698_v40, %v408_v35 }
  0xf6   :  { %v537_v41 = vadd.f32 %v1698_v40, %v536_v36  ;;  %v1446_v42 = vpop.f32.mrf.mxu0  ;;  %v1478_v43 = vpop.f32.mrf.mxu1  ;;  %v641_v46 = vmax.f32 %v417_v33, 0.0  ;;  %v673_v47 = vmax.f32 %v545_v34, 0.0 }
  0xf7   :  { %1349 = vst [vmem:[%s1863_s3 + $0x10] sm:$0xff] %v1201_v37   ;;  %1365 = vst [vmem:[%s1863_s3 + $0x90] sm:$0xff] %v1281_v38   ;;  %v420_v44 = vadd.f32 %v1446_v42, %v1698_v40  ;;  %v548_v45 = vadd.f32 %v1478_v43, %v1698_v40  ;;  %v639_v54 = vmax.f32 %v409_v39, 0.0 }
  0xf8   :  { %v411_v48 = vpop.f32.mrf.mxu0  ;;  %v539_v49 = vpop.f32.mrf.mxu1  ;;  %v671_v55 = vmax.f32 %v537_v41, 0.0 }
  0xf9   :  { %v642_v50 = vmax.f32 %v420_v44, 0.0  ;;  %v674_v51 = vmax.f32 %v548_v45, 0.0  ;;  %v412_v52 = vadd.f32 %v1698_v40, %v411_v48  ;;  %v540_v53 = vadd.f32 %v1698_v40, %v539_v49 }
  0xfa   :  { %v1449_v56 = vpop.f32.mrf.mxu0  ;;  %v1481_v57 = vpop.f32.mrf.mxu1 }
  0xfb   :  { %v1216_v58 = vpack.c.bf16 %v642_v50, %v641_v46  ;;  %v1296_v59 = vpack.c.bf16 %v674_v51, %v673_v47  ;;  %v640_v60 = vmax.f32 %v412_v52, 0.0  ;;  %v672_v61 = vmax.f32 %v540_v53, 0.0 }
  0xfc   :  { %v433_v62 = vadd.f32 %v1449_v56, %v1698_v40  ;;  %v561_v63 = vadd.f32 %v1481_v57, %v1698_v40  ;;  %v424_v0 = vpop.f32.mrf.mxu0  ;;  %v552_v1 = vpop.f32.mrf.mxu1 }
  0xfd   :  { %1352 = vst [vmem:[%s1863_s3 + $0x28] sm:$0xff] %v1216_v58   ;;  %1368 = vst [vmem:[%s1863_s3 + $0xa8] sm:$0xff] %v1296_v59   ;;  %v1211_v2 = vpack.c.bf16 %v640_v60, %v639_v54  ;;  %v1291_v3 = vpack.c.bf16 %v672_v61, %v671_v55  ;;  %v425_v4 = vadd.f32 %v1698_v40, %v424_v0 }
  0xfe   :  { %v553_v5 = vadd.f32 %v1698_v40, %v552_v1  ;;  %v1450_v6 = vpop.f32.mrf.mxu0  ;;  %v1482_v7 = vpop.f32.mrf.mxu1  ;;  %v645_v10 = vmax.f32 %v433_v62, 0.0  ;;  %v677_v11 = vmax.f32 %v561_v63, 0.0 }
  0xff   :  { %1351 = vst [vmem:[%s1863_s3 + $0x20] sm:$0xff] %v1211_v2   ;;  %1367 = vst [vmem:[%s1863_s3 + $0xa0] sm:$0xff] %v1291_v3   ;;  %v436_v8 = vadd.f32 %v1450_v6, %v1698_v40  ;;  %v564_v9 = vadd.f32 %v1482_v7, %v1698_v40  ;;  %v643_v18 = vmax.f32 %v425_v4, 0.0 }
 0x100   :  { %v427_v12 = vpop.f32.mrf.mxu0  ;;  %v555_v13 = vpop.f32.mrf.mxu1  ;;  %v675_v19 = vmax.f32 %v553_v5, 0.0 }
 0x101   :  { %v646_v14 = vmax.f32 %v436_v8, 0.0  ;;  %v678_v15 = vmax.f32 %v564_v9, 0.0  ;;  %v428_v16 = vadd.f32 %v1698_v40, %v427_v12  ;;  %v556_v17 = vadd.f32 %v1698_v40, %v555_v13 }
 0x102   :  { %v1453_v20 = vpop.f32.mrf.mxu0  ;;  %v1485_v21 = vpop.f32.mrf.mxu1 }
 0x103   :  { %v1226_v22 = vpack.c.bf16 %v646_v14, %v645_v10  ;;  %v1306_v23 = vpack.c.bf16 %v678_v15, %v677_v11  ;;  %v644_v24 = vmax.f32 %v428_v16, 0.0  ;;  %v676_v25 = vmax.f32 %v556_v17, 0.0 }
 0x104   :  { %v449_v26 = vadd.f32 %v1453_v20, %v1698_v40  ;;  %v577_v27 = vadd.f32 %v1485_v21, %v1698_v40  ;;  %v440_v28 = vpop.f32.mrf.mxu0  ;;  %v568_v29 = vpop.f32.mrf.mxu1 }
 0x105   :  { %1354 = vst [vmem:[%s1863_s3 + $0x38] sm:$0xff] %v1226_v22   ;;  %1370 = vst [vmem:[%s1863_s3 + $0xb8] sm:$0xff] %v1306_v23   ;;  %v1221_v30 = vpack.c.bf16 %v644_v24, %v643_v18  ;;  %v1301_v31 = vpack.c.bf16 %v676_v25, %v675_v19  ;;  %v441_v32 = vadd.f32 %v1698_v40, %v440_v28 }
 0x106   :  { %v569_v33 = vadd.f32 %v1698_v40, %v568_v29  ;;  %v1454_v34 = vpop.f32.mrf.mxu0  ;;  %v1486_v35 = vpop.f32.mrf.mxu1  ;;  %v649_v38 = vmax.f32 %v449_v26, 0.0  ;;  %v681_v39 = vmax.f32 %v577_v27, 0.0 }
 0x107   :  { %1353 = vst [vmem:[%s1863_s3 + $0x30] sm:$0xff] %v1221_v30   ;;  %1369 = vst [vmem:[%s1863_s3 + $0xb0] sm:$0xff] %v1301_v31   ;;  %v452_v36 = vadd.f32 %v1454_v34, %v1698_v40  ;;  %v580_v37 = vadd.f32 %v1486_v35, %v1698_v40  ;;  %v647_v47 = vmax.f32 %v441_v32, 0.0 }
 0x108   :  { %v443_v41 = vpop.f32.mrf.mxu0  ;;  %v571_v42 = vpop.f32.mrf.mxu1  ;;  %v679_v48 = vmax.f32 %v569_v33, 0.0 }
 0x109   :  { %v650_v43 = vmax.f32 %v452_v36, 0.0  ;;  %v682_v44 = vmax.f32 %v580_v37, 0.0  ;;  %v444_v45 = vadd.f32 %v1698_v40, %v443_v41  ;;  %v572_v46 = vadd.f32 %v1698_v40, %v571_v42 }
 0x10a   :  { %v1457_v49 = vpop.f32.mrf.mxu0  ;;  %v1489_v50 = vpop.f32.mrf.mxu1 }
 0x10b   :  { %v1236_v51 = vpack.c.bf16 %v650_v43, %v649_v38  ;;  %v1316_v52 = vpack.c.bf16 %v682_v44, %v681_v39  ;;  %v648_v53 = vmax.f32 %v444_v45, 0.0  ;;  %v680_v54 = vmax.f32 %v572_v46, 0.0 }
 0x10c   :  { %v465_v55 = vadd.f32 %v1457_v49, %v1698_v40  ;;  %v593_v56 = vadd.f32 %v1489_v50, %v1698_v40  ;;  %v456_v57 = vpop.f32.mrf.mxu0  ;;  %v584_v58 = vpop.f32.mrf.mxu1 }
 0x10d   :  { %1356 = vst [vmem:[%s1863_s3 + $0x48] sm:$0xff] %v1236_v51   ;;  %1372 = vst [vmem:[%s1863_s3 + $0xc8] sm:$0xff] %v1316_v52   ;;  %v1231_v59 = vpack.c.bf16 %v648_v53, %v647_v47  ;;  %v1311_v60 = vpack.c.bf16 %v680_v54, %v679_v48  ;;  %v457_v61 = vadd.f32 %v1698_v40, %v456_v57 }
 0x10e   :  { %v585_v62 = vadd.f32 %v1698_v40, %v584_v58  ;;  %v1458_v63 = vpop.f32.mrf.mxu0  ;;  %v1490_v0 = vpop.f32.mrf.mxu1  ;;  %v653_v3 = vmax.f32 %v465_v55, 0.0  ;;  %v685_v4 = vmax.f32 %v593_v56, 0.0 }
 0x10f   :  { %1355 = vst [vmem:[%s1863_s3 + $0x40] sm:$0xff] %v1231_v59   ;;  %1371 = vst [vmem:[%s1863_s3 + $0xc0] sm:$0xff] %v1311_v60   ;;  %v468_v1 = vadd.f32 %v1458_v63, %v1698_v40  ;;  %v596_v2 = vadd.f32 %v1490_v0, %v1698_v40  ;;  %v651_v11 = vmax.f32 %v457_v61, 0.0 }
 0x110   :  { %v459_v5 = vpop.f32.mrf.mxu0  ;;  %v587_v6 = vpop.f32.mrf.mxu1  ;;  %v683_v12 = vmax.f32 %v585_v62, 0.0 }
 0x111   :  { %v654_v7 = vmax.f32 %v468_v1, 0.0  ;;  %v686_v8 = vmax.f32 %v596_v2, 0.0  ;;  %v460_v9 = vadd.f32 %v1698_v40, %v459_v5  ;;  %v588_v10 = vadd.f32 %v1698_v40, %v587_v6 }
 0x112   :  { %v1461_v13 = vpop.f32.mrf.mxu0  ;;  %v1493_v14 = vpop.f32.mrf.mxu1 }
 0x113   :  { %v1246_v15 = vpack.c.bf16 %v654_v7, %v653_v3  ;;  %v1326_v16 = vpack.c.bf16 %v686_v8, %v685_v4  ;;  %v652_v17 = vmax.f32 %v460_v9, 0.0  ;;  %v684_v18 = vmax.f32 %v588_v10, 0.0 }
 0x114   :  { %v481_v19 = vadd.f32 %v1461_v13, %v1698_v40  ;;  %v609_v20 = vadd.f32 %v1493_v14, %v1698_v40  ;;  %v472_v21 = vpop.f32.mrf.mxu0  ;;  %v600_v22 = vpop.f32.mrf.mxu1 }
 0x115   :  { %1358 = vst [vmem:[%s1863_s3 + $0x58] sm:$0xff] %v1246_v15   ;;  %1374 = vst [vmem:[%s1863_s3 + $0xd8] sm:$0xff] %v1326_v16   ;;  %v1241_v23 = vpack.c.bf16 %v652_v17, %v651_v11  ;;  %v1321_v24 = vpack.c.bf16 %v684_v18, %v683_v12  ;;  %v473_v25 = vadd.f32 %v1698_v40, %v472_v21 }
 0x116   :  { %v601_v26 = vadd.f32 %v1698_v40, %v600_v22  ;;  %v1462_v27 = vpop.f32.mrf.mxu0  ;;  %v1494_v28 = vpop.f32.mrf.mxu1  ;;  %v657_v31 = vmax.f32 %v481_v19, 0.0  ;;  %v689_v32 = vmax.f32 %v609_v20, 0.0 }
 0x117   :  { %1357 = vst [vmem:[%s1863_s3 + $0x50] sm:$0xff] %v1241_v23   ;;  %1373 = vst [vmem:[%s1863_s3 + $0xd0] sm:$0xff] %v1321_v24   ;;  %v484_v29 = vadd.f32 %v1462_v27, %v1698_v40  ;;  %v612_v30 = vadd.f32 %v1494_v28, %v1698_v40  ;;  %v655_v39 = vmax.f32 %v473_v25, 0.0 }
 0x118   :  { %v475_v33 = vpop.f32.mrf.mxu0  ;;  %v603_v34 = vpop.f32.mrf.mxu1  ;;  %v687_v41 = vmax.f32 %v601_v26, 0.0 }
 0x119   :  { %v658_v35 = vmax.f32 %v484_v29, 0.0  ;;  %v690_v36 = vmax.f32 %v612_v30, 0.0  ;;  %v476_v37 = vadd.f32 %v1698_v40, %v475_v33  ;;  %v604_v38 = vadd.f32 %v1698_v40, %v603_v34 }
 0x11a   :  { %v1465_v42 = vpop.f32.mrf.mxu0  ;;  %v1497_v43 = vpop.f32.mrf.mxu1 }
 0x11b   :  { %v1256_v44 = vpack.c.bf16 %v658_v35, %v657_v31  ;;  %v1336_v45 = vpack.c.bf16 %v690_v36, %v689_v32  ;;  %v656_v46 = vmax.f32 %v476_v37, 0.0  ;;  %v688_v47 = vmax.f32 %v604_v38, 0.0 }
 0x11c   :  { %v497_v48 = vadd.f32 %v1465_v42, %v1698_v40  ;;  %v625_v49 = vadd.f32 %v1497_v43, %v1698_v40  ;;  %v488_v50 = vpop.f32.mrf.mxu0  ;;  %v616_v51 = vpop.f32.mrf.mxu1 }
 0x11d   :  { %1360 = vst [vmem:[%s1863_s3 + $0x68] sm:$0xff] %v1256_v44   ;;  %1376 = vst [vmem:[%s1863_s3 + $0xe8] sm:$0xff] %v1336_v45   ;;  %v1251_v52 = vpack.c.bf16 %v656_v46, %v655_v39  ;;  %v1331_v53 = vpack.c.bf16 %v688_v47, %v687_v41  ;;  %v489_v54 = vadd.f32 %v1698_v40, %v488_v50 }
 0x11e   :  { %v617_v55 = vadd.f32 %v1698_v40, %v616_v51  ;;  %v1466_v56 = vpop.f32.mrf.mxu0  ;;  %v1498_v57 = vpop.f32.mrf.mxu1  ;;  %v661_v60 = vmax.f32 %v497_v48, 0.0  ;;  %v693_v61 = vmax.f32 %v625_v49, 0.0 }
 0x11f   :  { %1359 = vst [vmem:[%s1863_s3 + $0x60] sm:$0xff] %v1251_v52   ;;  %1375 = vst [vmem:[%s1863_s3 + $0xe0] sm:$0xff] %v1331_v53   ;;  %v500_v58 = vadd.f32 %v1466_v56, %v1698_v40  ;;  %v628_v59 = vadd.f32 %v1498_v57, %v1698_v40  ;;  %v659_v4 = vmax.f32 %v489_v54, 0.0 }
 0x120   :  { %v491_v62 = vpop.f32.mrf.mxu0  ;;  %v619_v63 = vpop.f32.mrf.mxu1  ;;  %v691_v5 = vmax.f32 %v617_v55, 0.0 }
 0x121   :  { %v662_v0 = vmax.f32 %v500_v58, 0.0  ;;  %v694_v1 = vmax.f32 %v628_v59, 0.0  ;;  %v492_v2 = vadd.f32 %v1698_v40, %v491_v62  ;;  %v620_v3 = vadd.f32 %v1698_v40, %v619_v63 }
 0x123   :  { %v1266_v6 = vpack.c.bf16 %v662_v0, %v661_v60  ;;  %v1346_v7 = vpack.c.bf16 %v694_v1, %v693_v61  ;;  %v660_v8 = vmax.f32 %v492_v2, 0.0  ;;  %v692_v9 = vmax.f32 %v620_v3, 0.0 }
 0x125   :  { %1362 = vst [vmem:[%s1863_s3 + $0x78] sm:$0xff] %v1266_v6   ;;  %1378 = vst [vmem:[%s1863_s3 + $0xf8] sm:$0xff] %v1346_v7   ;;  %v1261_v10 = vpack.c.bf16 %v660_v8, %v659_v4  ;;  %v1341_v11 = vpack.c.bf16 %v692_v9, %v691_v5 }
 0x127   :  { %1361 = vst [vmem:[%s1863_s3 + $0x70] sm:$0xff] %v1261_v10   ;;  %1377 = vst [vmem:[%s1863_s3 + $0xf0] sm:$0xff] %v1341_v11  }

// kernel: generator_forward.9
= control target key start
LH: loop header
LB: loop body
LE: loop exit
PB: predicated region body
PF: predicated region fallthrough
CT: control target
= control target key end

     0   :  { %s2503_s1 = inlined_call_operand.vmem [shape: bf16[1024,128], index: 1, kind: input, shape index: {}]   ;;  %s2504_s0 = inlined_call_operand.vmem [shape: bf16[128,1024], index: 0, kind: input, shape index: {}]   ;;  %s2505_s2 = inlined_call_operand.vmem [shape: f32[1,128], index: 2, kind: input, shape index: {}]   ;;  %s2506_s3 = inlined_call_operand.vmem [shape: bf16[128,128], index: 3, kind: output, shape index: {}]  }
   0x1   :  { %v1870_v0 = vld [vmem:[%s2503_s1 + $0x78] sm:$0xff]   ;;  %v1874_v4 = vld [vmem:[%s2503_s1 + $0x70] sm:$0xff]   ;;  %v1878_v8 = vld [vmem:[%s2503_s1 + $0x68] sm:$0xff]  }
   0x2   :  { %v1871_v1 = vld [vmem:[%s2503_s1 + $0xf8] sm:$0xff]   ;;  %1614 = vmatprep.subr.bf16.mxu0 %v1870_v0  ;;  %v1875_v5 = vld [vmem:[%s2503_s1 + $0xf0] sm:$0xff]   ;;  %v1879_v9 = vld [vmem:[%s2503_s1 + $0xe8] sm:$0xff]  }
   0x3   :  { %v1872_v2 = vld [vmem:[%s2503_s1 + $0x38] sm:$0xff]   ;;  %1678 = vmatprep.subr.bf16.mxu1 %v1871_v1  ;;  %v1876_v6 = vld [vmem:[%s2503_s1 + $0x30] sm:$0xff]   ;;  %v1880_v10 = vld [vmem:[%s2503_s1 + $0x28] sm:$0xff]  }
   0x4   :  { %v1873_v3 = vld [vmem:[%s2503_s1 + $0xb8] sm:$0xff]   ;;  %1615 = vmatpush3.bf16.msra.mxu0 %v1872_v2  ;;  %v1877_v7 = vld [vmem:[%s2503_s1 + $0xb0] sm:$0xff]   ;;  %v1881_v11 = vld [vmem:[%s2503_s1 + $0xa8] sm:$0xff]  }
   0x5   :  { %1679 = vmatpush3.bf16.msra.mxu1 %v1873_v3  ;;  %1616 = vmatprep.subr.bf16.mxu0 %v1874_v4  ;;  %v1882_v12 = vld [vmem:[%s2503_s1 + $0x60] sm:$0xff]   ;;  %v1886_v16 = vld [vmem:[%s2503_s1 + $0x58] sm:$0xff]   ;;  %v1890_v20 = vld [vmem:[%s2503_s1 + $0x50] sm:$0xff]  }
   0x6   :  { %1680 = vmatprep.subr.bf16.mxu1 %v1875_v5  ;;  %v1883_v13 = vld [vmem:[%s2503_s1 + $0xe0] sm:$0xff]   ;;  %v1887_v17 = vld [vmem:[%s2503_s1 + $0xd8] sm:$0xff]   ;;  %v1891_v21 = vld [vmem:[%s2503_s1 + $0xd0] sm:$0xff]  }
   0x7   :  { %v1884_v14 = vld [vmem:[%s2503_s1 + $0x20] sm:$0xff]   ;;  %v1888_v18 = vld [vmem:[%s2503_s1 + $0x18] sm:$0xff]   ;;  %v1892_v22 = vld [vmem:[%s2503_s1 + $0x10] sm:$0xff]  }
   0x8   :  { %1617 = vmatpush3.bf16.msra.mxu0 %v1876_v6  ;;  %v1885_v15 = vld [vmem:[%s2503_s1 + $0xa0] sm:$0xff]   ;;  %v1889_v19 = vld [vmem:[%s2503_s1 + $0x98] sm:$0xff]   ;;  %v1893_v23 = vld [vmem:[%s2503_s1 + $0x90] sm:$0xff]  }
   0x9   :  { %1681 = vmatpush3.bf16.msra.mxu1 %v1877_v7  ;;  %1618 = vmatprep.subr.bf16.mxu0 %v1878_v8  ;;  %v1894_v24 = vld [vmem:[%s2503_s1 + $0x48] sm:$0xff]   ;;  %v1898_v28 = vld [vmem:[%s2503_s1 + $0x40] sm:$0xff]   ;;  %v1902_v40 = vld [vmem:[%s2503_s1 + $0x178] sm:$0xff]  }
   0xa   :  { %1682 = vmatprep.subr.bf16.mxu1 %v1879_v9  ;;  %v1895_v25 = vld [vmem:[%s2503_s1 + $0xc8] sm:$0xff]   ;;  %v1899_v29 = vld [vmem:[%s2503_s1 + $0xc0] sm:$0xff]   ;;  %v1903_v41 = vld [vmem:[%s2503_s1 + $0x138] sm:$0xff]  }
   0xb   :  { %v1896_v26 = vld [vmem:[%s2503_s1 + $0x8] sm:$0xff]   ;;  %v1900_v30 = vld [vmem:[%s2503_s1] sm:$0xff]   ;;  %v1904_v42 = vld [vmem:[%s2503_s1 + $0x1f8] sm:$0xff]  }
   0xc   :  { %1619 = vmatpush3.bf16.msra.mxu0 %v1880_v10  ;;  %v1897_v27 = vld [vmem:[%s2503_s1 + $0x88] sm:$0xff]   ;;  %v1901_v31 = vld [vmem:[%s2503_s1 + $0x80] sm:$0xff]   ;;  %v1905_v43 = vld [vmem:[%s2503_s1 + $0x1b8] sm:$0xff]  }
   0xd   :  { %1683 = vmatpush3.bf16.msra.mxu1 %v1881_v11  ;;  %1620 = vmatprep.subr.bf16.mxu0 %v1882_v12  ;;  %v15_v32 = vld [vmem:[%s2504_s0] sm:$0xff]  ;;  %v16_v34 = vld [vmem:[%s2504_s0 + $0x8] sm:$0xff]  ;;  %v1906_v50 = vld [vmem:[%s2503_s1 + $0x170] sm:$0xff]  }
   0xe   :  { %1684 = vmatprep.subr.bf16.mxu1 %v1883_v13  ;;  %v19_v33 = vld [vmem:[%s2504_s0 + $0x20] sm:$0xff]  ;;  %v20_v37 = vld [vmem:[%s2504_s0 + $0x28] sm:$0xff]  ;;  %v1907_v52 = vld [vmem:[%s2503_s1 + $0x130] sm:$0xff]  }
   0xf   :  { %v1407_v35 = vcombine.low %v15_v32, %v19_v33  ;;  %v1408_v36 = vcombine.high %v15_v32, %v19_v33  ;;  %v1409_v38 = vcombine.low %v16_v34, %v20_v37  ;;  %v1410_v39 = vcombine.high %v16_v34, %v20_v37  ;;  %v23_v44 = vld [vmem:[%s2504_s0 + $0x40] sm:$0xff]  ;;  %v24_v47 = vld [vmem:[%s2504_s0 + $0x48] sm:$0xff]  ;;  %v1908_v54 = vld [vmem:[%s2503_s1 + $0x1f0] sm:$0xff]  }
  0x10   :  { %1621 = vmatpush3.bf16.msra.mxu0 %v1884_v14  ;;  %v27_v45 = vld [vmem:[%s2504_s0 + $0x60] sm:$0xff]  ;;  %v28_v48 = vld [vmem:[%s2504_s0 + $0x68] sm:$0xff]  ;;  %v1909_v55 = vld [vmem:[%s2503_s1 + $0x1b0] sm:$0xff]  }
  0x11   :  { %1685 = vmatpush3.bf16.msra.mxu1 %v1885_v15  ;;  %1622 = vmatprep.subr.bf16.mxu0 %v1886_v16  ;;  %v1416_v46 = vcombine.high %v23_v44, %v27_v45  ;;  %v1418_v49 = vcombine.high %v24_v47, %v28_v48  ;;  %v1415_v51 = vcombine.low %v23_v44, %v27_v45  ;;  %v31_v56 = vld [vmem:[%s2504_s0 + $0x80] sm:$0xff]  ;;  %v32_v58 = vld [vmem:[%s2504_s0 + $0x88] sm:$0xff]  ;;  %v1924_v32 = vld [vmem:[%s2503_s1 + $0x1d0] sm:$0xff]  }
  0x12   :  { %1686 = vmatprep.subr.bf16.mxu1 %v1887_v17  ;;  %950 = vmatprep.mubr.bf16.mxu0 %v1408_v36  ;;  %v1417_v53 = vcombine.low %v24_v47, %v28_v48  ;;  %v35_v57 = vld [vmem:[%s2504_s0 + $0xa0] sm:$0xff]  ;;  %v36_v59 = vld [vmem:[%s2504_s0 + $0xa8] sm:$0xff]  ;;  %v1925_v33 = vld [vmem:[%s2503_s1 + $0x190] sm:$0xff]  }
  0x13   :  { %1047 = vmatprep.mubr.bf16.mxu1 %v1410_v39  ;;  %v1424_v60 = vcombine.high %v31_v56, %v35_v57  ;;  %v1426_v61 = vcombine.high %v32_v58, %v36_v59  ;;  %v1910_v62 = vld [vmem:[%s2503_s1 + $0x168] sm:$0xff]   ;;  %v1423_v2 = vcombine.low %v31_v56, %v35_v57  ;;  %v39_v3 = vld [vmem:[%s2504_s0 + $0xc0] sm:$0xff]  ;;  %v1425_v6 = vcombine.low %v32_v58, %v36_v59 }
  0x14   :  { %1623 = vmatpush3.bf16.msra.mxu0 %v1888_v18  ;;  %v1911_v63 = vld [vmem:[%s2503_s1 + $0x128] sm:$0xff]   ;;  %v43_v4 = vld [vmem:[%s2504_s0 + $0xe0] sm:$0xff]  ;;  %v1918_v18 = vld [vmem:[%s2503_s1 + $0x158] sm:$0xff]  }
  0x15   :  { %1687 = vmatpush3.bf16.msra.mxu1 %v1889_v19  ;;  %1624 = vmatprep.subr.bf16.mxu0 %v1890_v20  ;;  %v1912_v0 = vld [vmem:[%s2503_s1 + $0x1e8] sm:$0xff]   ;;  %v1432_v7 = vcombine.high %v39_v3, %v43_v4  ;;  %v1914_v10 = vld [vmem:[%s2503_s1 + $0x160] sm:$0xff]   ;;  %v1431_v19 = vcombine.low %v39_v3, %v43_v4  ;;  %v1919_v20 = vld [vmem:[%s2503_s1 + $0x118] sm:$0xff]  }
  0x16   :  { %1688 = vmatprep.subr.bf16.mxu1 %v1891_v21  ;;  %v1913_v1 = vld [vmem:[%s2503_s1 + $0x1a8] sm:$0xff]   ;;  %v1915_v11 = vld [vmem:[%s2503_s1 + $0x120] sm:$0xff]  }
  0x17   :  { %v40_v5 = vld [vmem:[%s2504_s0 + $0xc8] sm:$0xff]  ;;  %v1916_v12 = vld [vmem:[%s2503_s1 + $0x1e0] sm:$0xff]  }
  0x18   :  { %1625 = vmatpush3.bf16.msra.mxu0 %v1892_v22  ;;  %v44_v8 = vld [vmem:[%s2504_s0 + $0xe8] sm:$0xff]  ;;  %v1917_v13 = vld [vmem:[%s2503_s1 + $0x1a0] sm:$0xff]  }
  0x19   :  { %1689 = vmatpush3.bf16.msra.mxu1 %v1893_v23  ;;  %1626 = vmatprep.subr.bf16.mxu0 %v1894_v24  ;;  %v1434_v9 = vcombine.high %v40_v5, %v44_v8  ;;  %v47_v14 = vld [vmem:[%s2504_s0 + $0x100] sm:$0xff]  ;;  %v48_v16 = vld [vmem:[%s2504_s0 + $0x108] sm:$0xff]  ;;  %v1433_v21 = vcombine.low %v40_v5, %v44_v8  ;;  %v1920_v23 = vld [vmem:[%s2503_s1 + $0x1d8] sm:$0xff]  }
  0x1a   :  { %1690 = vmatprep.subr.bf16.mxu1 %v1895_v25  ;;  %v51_v15 = vld [vmem:[%s2504_s0 + $0x120] sm:$0xff]  ;;  %v52_v17 = vld [vmem:[%s2504_s0 + $0x128] sm:$0xff]  ;;  %v1921_v25 = vld [vmem:[%s2503_s1 + $0x198] sm:$0xff]  }
  0x1b   :  { %v1440_v22 = vcombine.high %v47_v14, %v51_v15  ;;  %v1442_v24 = vcombine.high %v48_v16, %v52_v17  ;;  %v1439_v34 = vcombine.low %v47_v14, %v51_v15  ;;  %v1927_v39 = vld [vmem:[%s2503_s1 + $0x108] sm:$0xff]   ;;  %v1931_v48 = vld [vmem:[%s2503_s1 + $0x100] sm:$0xff]   ;;  %v26_v8 = vld [vmem:[%s2504_s0 + $0x58] sm:$0xff] }
  0x1c   :  { %1627 = vmatpush3.bf16.msra.mxu0 %v1896_v26  ;;  %v55_v26 = vld [vmem:[%s2504_s0 + $0x140] sm:$0xff]  ;;  %v64_v44 = vld [vmem:[%s2504_s0 + $0x188] sm:$0xff]  ;;  %v33_v14 = vld [vmem:[%s2504_s0 + $0x90] sm:$0xff] }
  0x1d   :  { %1691 = vmatpush3.bf16.msra.mxu1 %v1897_v27  ;;  %1628 = vmatprep.subr.bf16.mxu0 %v1898_v28  ;;  %v59_v27 = vld [vmem:[%s2504_s0 + $0x160] sm:$0xff]  ;;  %v1922_v28 = vld [vmem:[%s2503_s1 + $0x150] sm:$0xff]   ;;  %v68_v45 = vld [vmem:[%s2504_s0 + $0x1a8] sm:$0xff] }
  0x1e   :  { %1692 = vmatprep.subr.bf16.mxu1 %v1899_v29  ;;  %v56_v29 = vld [vmem:[%s2504_s0 + $0x148] sm:$0xff]  ;;  %v1448_v36 = vcombine.high %v55_v26, %v59_v27  ;;  %v1447_v47 = vcombine.low %v55_v26, %v59_v27  ;;  %v1457_v59 = vcombine.low %v64_v44, %v68_v45  ;;  %v37_v15 = vld [vmem:[%s2504_s0 + $0xb0] sm:$0xff] }
  0x1f   :  { %v72_v56 = vld [vmem:[%s2504_s0 + $0x1c8] sm:$0xff]  ;;  %v1427_v26 = vcombine.low %v33_v14, %v37_v15 }
  0x20   :  { %1629 = vmatpush3.bf16.msra.mxu0 %v1900_v30  ;;  %v60_v30 = vld [vmem:[%s2504_s0 + $0x168] sm:$0xff] }
  0x21   :  { %1693 = vmatpush3.bf16.msra.mxu1 %v1901_v31  ;;  %1742 = vmatprep.subr.bf16.mxu0 %v1902_v40  ;;  %v1923_v31 = vld [vmem:[%s2503_s1 + $0x110] sm:$0xff]   ;;  %v1450_v37 = vcombine.high %v56_v29, %v60_v30  ;;  %v1928_v40 = vld [vmem:[%s2503_s1 + $0x1c8] sm:$0xff]  }
  0x22   :  { %1806 = vmatprep.subr.bf16.mxu1 %v1904_v42  ;;  %v67_v42 = vld [vmem:[%s2504_s0 + $0x1a0] sm:$0xff]  ;;  %v76_v57 = vld [vmem:[%s2504_s0 + $0x1e8] sm:$0xff] }
  0x23   :  { %951 = vmatmul.mubr.bf16.vlgmr.msra.gmra.mxu0 %v1407_v35  ;;  %v1441_v35 = vcombine.low %v48_v16, %v52_v17  ;;  %v1465_v3 = vcombine.low %v72_v56, %v76_v57  ;;  %v34_v16 = vld [vmem:[%s2504_s0 + $0x98] sm:$0xff] }
  0x24   :  { %1048 = vmatmul.mubr.bf16.vlgmr.msra.gmra.mxu1 %v1409_v38  ;;  %1743 = vmatpush3.bf16.msra.mxu0 %v1903_v41  ;;  %v1926_v38 = vld [vmem:[%s2503_s1 + $0x148] sm:$0xff]   ;;  %v63_v41 = vld [vmem:[%s2504_s0 + $0x180] sm:$0xff]  ;;  %v38_v17 = vld [vmem:[%s2504_s0 + $0xb8] sm:$0xff] }
  0x25   :  { %1807 = vmatpush3.bf16.msra.mxu1 %v1905_v43  ;;  %958 = vmatprep.mubr.bf16.mxu0 %v1416_v46  ;;  %v1929_v43 = vld [vmem:[%s2503_s1 + $0x188] sm:$0xff]   ;;  %v1930_v46 = vld [vmem:[%s2503_s1 + $0x140] sm:$0xff]   ;;  %v1455_v58 = vcombine.low %v63_v41, %v67_v42  ;;  %v1429_v27 = vcombine.low %v34_v16, %v38_v17 }
  0x26   :  { %1055 = vmatprep.mubr.bf16.mxu1 %v1418_v49  ;;  %1744 = vmatprep.subr.bf16.mxu0 %v1906_v50  ;;  %v1449_v49 = vcombine.low %v56_v29, %v60_v30  ;;  %v1456_v50 = vcombine.high %v63_v41, %v67_v42  ;;  %v49_v30 = vld [vmem:[%s2504_s0 + $0x110] sm:$0xff]  ;;  %v62_v41 = vld [vmem:[%s2504_s0 + $0x178] sm:$0xff] }
  0x27   :  { %1808 = vmatprep.subr.bf16.mxu1 %v1908_v54  ;;  %v71_v54 = vld [vmem:[%s2504_s0 + $0x1c0] sm:$0xff] }
  0x28   :  { %1745 = vmatpush3.bf16.msra.mxu0 %v1907_v52  ;;  %v1458_v52 = vcombine.high %v64_v44, %v68_v45 }
  0x29   :  { %1809 = vmatpush3.bf16.msra.mxu1 %v1909_v55  ;;  %1746 = vmatprep.subr.bf16.mxu0 %v1910_v62  ;;  %v75_v55 = vld [vmem:[%s2504_s0 + $0x1e0] sm:$0xff]  ;;  %v17_v62 = vld [vmem:[%s2504_s0 + $0x10] sm:$0xff] }
  0x2a   :  { %1810 = vmatprep.subr.bf16.mxu1 %v1912_v0  ;;  %v18_v0 = vld [vmem:[%s2504_s0 + $0x18] sm:$0xff] }
  0x2b   :  { %959 = vmatmul.mubr.bf16.gmra.mxu0 %v1415_v51  ;;  %v1932_v51 = vld [vmem:[%s2503_s1 + $0x1c0] sm:$0xff]  }
  0x2c   :  { %1056 = vmatmul.mubr.bf16.gmra.mxu1 %v1417_v53  ;;  %966 = vmatprep.mubr.bf16.mxu0 %v1424_v60  ;;  %v1933_v53 = vld [vmem:[%s2503_s1 + $0x180] sm:$0xff]   ;;  %v1464_v60 = vcombine.high %v71_v54, %v75_v55 }
  0x2d   :  { %1063 = vmatprep.mubr.bf16.mxu1 %v1426_v61  ;;  %1747 = vmatpush3.bf16.msra.mxu0 %v1911_v63  ;;  %v1466_v61 = vcombine.high %v72_v56, %v76_v57  ;;  %v21_v63 = vld [vmem:[%s2504_s0 + $0x30] sm:$0xff]  ;;  %v74_v56 = vld [vmem:[%s2504_s0 + $0x1d8] sm:$0xff] }
  0x2e   :  { %1811 = vmatpush3.bf16.msra.mxu1 %v1913_v1  ;;  %1748 = vmatprep.subr.bf16.mxu0 %v1914_v10  ;;  %v22_v1 = vld [vmem:[%s2504_s0 + $0x38] sm:$0xff]  ;;  %v1412_v4 = vcombine.high %v17_v62, %v21_v63  ;;  %v1411_v10 = vcombine.low %v17_v62, %v21_v63 }
  0x2f   :  { %1812 = vmatprep.subr.bf16.mxu1 %v1916_v12  ;;  %v1414_v5 = vcombine.high %v18_v0, %v22_v1  ;;  %v78_v57 = vld [vmem:[%s2504_s0 + $0x1f8] sm:$0xff] }
  0x30   :  { %v1469_v63 = vcombine.low %v74_v56, %v78_v57 }
  0x31   :  { %1749 = vmatpush3.bf16.msra.mxu0 %v1915_v11  ;;  %v1413_v11 = vcombine.low %v18_v0, %v22_v1 }
  0x32   :  { %1813 = vmatpush3.bf16.msra.mxu1 %v1917_v13  ;;  %1750 = vmatprep.subr.bf16.mxu0 %v1918_v18 }
  0x33   :  { %967 = vmatmul.mubr.bf16.gmra.mxu0 %v1423_v2  ;;  %1814 = vmatprep.subr.bf16.mxu1 %v1920_v23  ;;  %v1463_v2 = vcombine.low %v71_v54, %v75_v55  ;;  %v45_v23 = vld [vmem:[%s2504_s0 + $0xf0] sm:$0xff] }
  0x34   :  { %1064 = vmatmul.mubr.bf16.gmra.mxu1 %v1425_v6  ;;  %974 = vmatprep.mubr.bf16.mxu0 %v1432_v7  ;;  %v25_v6 = vld [vmem:[%s2504_s0 + $0x50] sm:$0xff] }
  0x35   :  { %1071 = vmatprep.mubr.bf16.mxu1 %v1434_v9  ;;  %1751 = vmatpush3.bf16.msra.mxu0 %v1919_v20  ;;  %v29_v7 = vld [vmem:[%s2504_s0 + $0x70] sm:$0xff]  ;;  %v30_v9 = vld [vmem:[%s2504_s0 + $0x78] sm:$0xff]  ;;  %v1428_v20 = vcombine.high %v33_v14, %v37_v15 }
  0x36   :  { %1815 = vmatpush3.bf16.msra.mxu1 %v1921_v25  ;;  %1752 = vmatprep.subr.bf16.mxu0 %v1922_v28  ;;  %v1420_v12 = vcombine.high %v25_v6, %v29_v7  ;;  %v1422_v13 = vcombine.high %v26_v8, %v30_v9  ;;  %v1419_v18 = vcombine.low %v25_v6, %v29_v7  ;;  %v46_v25 = vld [vmem:[%s2504_s0 + $0xf8] sm:$0xff]  ;;  %v73_v54 = vld [vmem:[%s2504_s0 + $0x1d0] sm:$0xff] }
  0x37   :  { %1816 = vmatprep.subr.bf16.mxu1 %v1924_v32  ;;  %v50_v32 = vld [vmem:[%s2504_s0 + $0x118] sm:$0xff]  ;;  %v77_v55 = vld [vmem:[%s2504_s0 + $0x1f0] sm:$0xff] }
  0x38   :  { %v1467_v62 = vcombine.low %v73_v54, %v77_v55 }
  0x39   :  { %1753 = vmatpush3.bf16.msra.mxu0 %v1923_v31  ;;  %v53_v31 = vld [vmem:[%s2504_s0 + $0x130] sm:$0xff] }
  0x3a   :  { %1817 = vmatpush3.bf16.msra.mxu1 %v1925_v33  ;;  %1754 = vmatprep.subr.bf16.mxu0 %v1926_v38  ;;  %v54_v33 = vld [vmem:[%s2504_s0 + $0x138] sm:$0xff]  ;;  %v57_v38 = vld [vmem:[%s2504_s0 + $0x150] sm:$0xff]  ;;  %v1443_v42 = vcombine.low %v49_v30, %v53_v31 }
  0x3b   :  { %975 = vmatmul.mubr.bf16.gmra.mxu0 %v1431_v19  ;;  %1818 = vmatprep.subr.bf16.mxu1 %v1928_v40  ;;  %v1421_v19 = vcombine.low %v26_v8, %v30_v9  ;;  %v58_v40 = vld [vmem:[%s2504_s0 + $0x158] sm:$0xff] }
  0x3c   :  { %1072 = vmatmul.mubr.bf16.gmra.mxu1 %v1433_v21  ;;  %982 = vmatprep.mubr.bf16.mxu0 %v1440_v22  ;;  %v1430_v21 = vcombine.high %v34_v16, %v38_v17  ;;  %v41_v22 = vld [vmem:[%s2504_s0 + $0xd0] sm:$0xff]  ;;  %v1454_v45 = vcombine.high %v58_v40, %v62_v41 }
  0x3d   :  { %1079 = vmatprep.mubr.bf16.mxu1 %v1442_v24  ;;  %1755 = vmatpush3.bf16.msra.mxu0 %v1927_v39  ;;  %v42_v24 = vld [vmem:[%s2504_s0 + $0xd8] sm:$0xff]  ;;  %v1436_v28 = vcombine.high %v41_v22, %v45_v23  ;;  %v61_v39 = vld [vmem:[%s2504_s0 + $0x170] sm:$0xff] }
  0x3e   :  { %1819 = vmatpush3.bf16.msra.mxu1 %v1929_v43  ;;  %1756 = vmatprep.subr.bf16.mxu0 %v1930_v46  ;;  %v1438_v29 = vcombine.high %v42_v24, %v46_v25  ;;  %v1445_v43 = vcombine.low %v50_v32, %v54_v33  ;;  %v1452_v44 = vcombine.high %v57_v38, %v61_v39  ;;  %v65_v46 = vld [vmem:[%s2504_s0 + $0x190] sm:$0xff] }
  0x3f   :  { %1820 = vmatprep.subr.bf16.mxu1 %v1932_v51  ;;  %v1453_v51 = vcombine.low %v58_v40, %v62_v41 }
  0x41   :  { %1757 = vmatpush3.bf16.msra.mxu0 %v1931_v48  ;;  %v66_v48 = vld [vmem:[%s2504_s0 + $0x198] sm:$0xff] }
  0x42   :  { %1821 = vmatpush3.bf16.msra.mxu1 %v1933_v53 }
  0x43   :  { %983 = vmatmul.mubr.bf16.gmra.mxu0 %v1439_v34  ;;  %v1435_v34 = vcombine.low %v41_v22, %v45_v23 }
  0x44   :  { %1080 = vmatmul.mubr.bf16.gmra.mxu1 %v1441_v35  ;;  %990 = vmatprep.mubr.bf16.mxu0 %v1448_v36  ;;  %v1437_v35 = vcombine.low %v42_v24, %v46_v25  ;;  %v1444_v36 = vcombine.high %v49_v30, %v53_v31 }
  0x45   :  { %1087 = vmatprep.mubr.bf16.mxu1 %v1450_v37  ;;  %v1446_v37 = vcombine.high %v50_v32, %v54_v33 }
  0x4b   :  { %991 = vmatmul.mubr.bf16.gmra.mxu0 %v1447_v47  ;;  %v69_v47 = vld [vmem:[%s2504_s0 + $0x1b0] sm:$0xff] }
  0x4c   :  { %1088 = vmatmul.mubr.bf16.gmra.mxu1 %v1449_v49  ;;  %998 = vmatprep.mubr.bf16.mxu0 %v1456_v50  ;;  %v70_v49 = vld [vmem:[%s2504_s0 + $0x1b8] sm:$0xff]  ;;  %v1451_v50 = vcombine.low %v57_v38, %v61_v39 }
  0x4d   :  { %1095 = vmatprep.mubr.bf16.mxu1 %v1458_v52  ;;  %v1460_v52 = vcombine.high %v65_v46, %v69_v47  ;;  %v1462_v53 = vcombine.high %v66_v48, %v70_v49 }
  0x53   :  { %999 = vmatmul.mubr.bf16.gmra.mxu0 %v1455_v58  ;;  %v1459_v58 = vcombine.low %v65_v46, %v69_v47 }
  0x54   :  { %1096 = vmatmul.mubr.bf16.gmra.mxu1 %v1457_v59  ;;  %1006 = vmatprep.mubr.bf16.mxu0 %v1464_v60  ;;  %v1461_v59 = vcombine.low %v66_v48, %v70_v49  ;;  %v1468_v60 = vcombine.high %v73_v54, %v77_v55 }
  0x55   :  { %1103 = vmatprep.mubr.bf16.mxu1 %v1466_v61  ;;  %v1470_v61 = vcombine.high %v74_v56, %v78_v57 }
  0x5b   :  { %1007 = vmatmul.mubr.bf16.gmra.mxu0 %v1463_v2  ;;  %v2341_v2 = vld [vmem:[%s2505_s2] ss:$0 sm:$0xff] }
  0x5c   :  { %1104 = vmatmul.mubr.bf16.gmra.mxu1 %v1465_v3  ;;  %1144 = vmatprep.mubr.bf16.mxu0 %v1412_v4 }
  0x5d   :  { %1241 = vmatprep.mubr.bf16.mxu1 %v1414_v5 }
  0x63   :  { %1145 = vmatmul.mubr.bf16.vlgmr.msra.gmra.mxu0 %v1411_v10 }
  0x64   :  { %1242 = vmatmul.mubr.bf16.vlgmr.msra.gmra.mxu1 %v1413_v11  ;;  %1152 = vmatprep.mubr.bf16.mxu0 %v1420_v12 }
  0x65   :  { %1249 = vmatprep.mubr.bf16.mxu1 %v1422_v13 }
  0x6b   :  { %1153 = vmatmul.mubr.bf16.gmra.mxu0 %v1419_v18 }
  0x6c   :  { %1250 = vmatmul.mubr.bf16.gmra.mxu1 %v1421_v19  ;;  %1160 = vmatprep.mubr.bf16.mxu0 %v1428_v20 }
  0x6d   :  { %1257 = vmatprep.mubr.bf16.mxu1 %v1430_v21 }
  0x73   :  { %1161 = vmatmul.mubr.bf16.gmra.mxu0 %v1427_v26 }
  0x74   :  { %1258 = vmatmul.mubr.bf16.gmra.mxu1 %v1429_v27  ;;  %1168 = vmatprep.mubr.bf16.mxu0 %v1436_v28 }
  0x75   :  { %1265 = vmatprep.mubr.bf16.mxu1 %v1438_v29 }
  0x7b   :  { %1169 = vmatmul.mubr.bf16.gmra.mxu0 %v1435_v34 }
  0x7c   :  { %1266 = vmatmul.mubr.bf16.gmra.mxu1 %v1437_v35  ;;  %1176 = vmatprep.mubr.bf16.mxu0 %v1444_v36 }
  0x7d   :  { %1273 = vmatprep.mubr.bf16.mxu1 %v1446_v37 }
  0x83   :  { %1177 = vmatmul.mubr.bf16.gmra.mxu0 %v1443_v42 }
  0x84   :  { %1274 = vmatmul.mubr.bf16.gmra.mxu1 %v1445_v43  ;;  %1184 = vmatprep.mubr.bf16.mxu0 %v1452_v44 }
  0x85   :  { %1281 = vmatprep.mubr.bf16.mxu1 %v1454_v45 }
  0x8b   :  { %1185 = vmatmul.mubr.bf16.gmra.mxu0 %v1451_v50 }
  0x8c   :  { %1282 = vmatmul.mubr.bf16.gmra.mxu1 %v1453_v51  ;;  %1192 = vmatprep.mubr.bf16.mxu0 %v1460_v52 }
  0x8d   :  { %1289 = vmatprep.mubr.bf16.mxu1 %v1462_v53 }
  0x93   :  { %1193 = vmatmul.mubr.bf16.gmra.mxu0 %v1459_v58 }
  0x94   :  { %1290 = vmatmul.mubr.bf16.gmra.mxu1 %v1461_v59  ;;  %1200 = vmatprep.mubr.bf16.mxu0 %v1468_v60 }
  0x95   :  { %1297 = vmatprep.mubr.bf16.mxu1 %v1470_v61 }
  0x9b   :  { %1201 = vmatmul.mubr.bf16.gmra.mxu0 %v1467_v62 }
  0x9c   :  { %1298 = vmatmul.mubr.bf16.gmra.mxu1 %v1469_v63 }
  0xe3   :  { %v1630_v0 = vpop.f32.mrf.mxu0 }
  0xe4   :  { %v1694_v1 = vpop.f32.mrf.mxu1 }
  0xe5   :  { %v1631_v3 = vpop.f32.mrf.mxu0 }
  0xe6   :  { %v1632_v4 = vadd.f32 %v1631_v3, %v1630_v0  ;;  %v1695_v5 = vpop.f32.mrf.mxu1 }
  0xe7   :  { %v1696_v6 = vadd.f32 %v1695_v5, %v1694_v1  ;;  %v2343_v7 = vpop.f32.mrf.mxu0 }
  0xe8   :  { %v953_v8 = vadd.f32 %v1632_v4, %v2341_v2  ;;  %v2346_v9 = vpop.f32.mrf.mxu1 }
  0xe9   :  { %v2348_v10 = vpop.f32.mrf.mxu0 }
  0xea   :  { %v2350_v11 = vadd.f32 %v1696_v6, %v953_v8  ;;  %v2352_v12 = vpop.f32.mrf.mxu1 }
  0xeb   :  { %v1636_v13 = vpop.f32.mrf.mxu0 }
  0xec   :  { %v1700_v14 = vpop.f32.mrf.mxu1 }
  0xed   :  { %v1637_v15 = vpop.f32.mrf.mxu0 }
  0xee   :  { %v1638_v16 = vadd.f32 %v1637_v15, %v1636_v13  ;;  %v1701_v17 = vpop.f32.mrf.mxu1 }
  0xef   :  { %v1702_v18 = vadd.f32 %v1701_v17, %v1700_v14  ;;  %v2354_v19 = vpop.f32.mrf.mxu0 }
  0xf0   :  { %v961_v20 = vadd.f32 %v1638_v16, %v2341_v2  ;;  %v2357_v21 = vpop.f32.mrf.mxu1 }
  0xf1   :  { %v2359_v22 = vpop.f32.mrf.mxu0 }
  0xf2   :  { %v2361_v23 = vadd.f32 %v1702_v18, %v961_v20  ;;  %v2363_v24 = vpop.f32.mrf.mxu1 }
  0xf3   :  { %v1642_v25 = vpop.f32.mrf.mxu0 }
  0xf4   :  { %v1706_v26 = vpop.f32.mrf.mxu1 }
  0xf5   :  { %v1643_v27 = vpop.f32.mrf.mxu0 }
  0xf6   :  { %v1644_v28 = vadd.f32 %v1643_v27, %v1642_v25  ;;  %v1707_v29 = vpop.f32.mrf.mxu1 }
  0xf7   :  { %v1708_v30 = vadd.f32 %v1707_v29, %v1706_v26  ;;  %v2365_v31 = vpop.f32.mrf.mxu0 }
  0xf8   :  { %v969_v32 = vadd.f32 %v1644_v28, %v2341_v2  ;;  %v2368_v33 = vpop.f32.mrf.mxu1 }
  0xf9   :  { %v2370_v34 = vpop.f32.mrf.mxu0 }
  0xfa   :  { %v2372_v35 = vadd.f32 %v1708_v30, %v969_v32  ;;  %v2374_v36 = vpop.f32.mrf.mxu1 }
  0xfb   :  { %v1648_v37 = vpop.f32.mrf.mxu0 }
  0xfc   :  { %v1712_v38 = vpop.f32.mrf.mxu1 }
  0xfd   :  { %v1649_v39 = vpop.f32.mrf.mxu0 }
  0xfe   :  { %v1650_v40 = vadd.f32 %v1649_v39, %v1648_v37  ;;  %v1713_v41 = vpop.f32.mrf.mxu1 }
  0xff   :  { %v1714_v42 = vadd.f32 %v1713_v41, %v1712_v38  ;;  %v2376_v43 = vpop.f32.mrf.mxu0 }
 0x100   :  { %v977_v44 = vadd.f32 %v1650_v40, %v2341_v2  ;;  %v2379_v45 = vpop.f32.mrf.mxu1 }
 0x101   :  { %v2381_v46 = vpop.f32.mrf.mxu0 }
 0x102   :  { %v2383_v47 = vadd.f32 %v1714_v42, %v977_v44  ;;  %v2385_v48 = vpop.f32.mrf.mxu1 }
 0x103   :  { %v1654_v49 = vpop.f32.mrf.mxu0 }
 0x104   :  { %v1718_v50 = vpop.f32.mrf.mxu1 }
 0x105   :  { %v1655_v51 = vpop.f32.mrf.mxu0 }
 0x106   :  { %v1656_v52 = vadd.f32 %v1655_v51, %v1654_v49  ;;  %v1719_v53 = vpop.f32.mrf.mxu1 }
 0x107   :  { %v1720_v54 = vadd.f32 %v1719_v53, %v1718_v50  ;;  %v2387_v55 = vpop.f32.mrf.mxu0 }
 0x108   :  { %v985_v56 = vadd.f32 %v1656_v52, %v2341_v2  ;;  %v2390_v57 = vpop.f32.mrf.mxu1  ;;  %v1635_v52 = vadd.f32 %v2348_v10, %v2343_v7  ;;  %v1641_v10 = vadd.f32 %v2359_v22, %v2354_v19 }
 0x109   :  { %v2392_v58 = vpop.f32.mrf.mxu0 }
 0x10a   :  { %v2394_v59 = vadd.f32 %v1720_v54, %v985_v56  ;;  %v2396_v60 = vpop.f32.mrf.mxu1 }
 0x10b   :  { %v1660_v61 = vpop.f32.mrf.mxu0 }
 0x10c   :  { %v1724_v62 = vpop.f32.mrf.mxu1 }
 0x10d   :  { %v1661_v63 = vpop.f32.mrf.mxu0 }
 0x10e   :  { %v1662_v0 = vadd.f32 %v1661_v63, %v1660_v61  ;;  %v1725_v1 = vpop.f32.mrf.mxu1  ;;  %v956_v63 = vadd.f32 %v1635_v52, %v2341_v2  ;;  %v1705_v52 = vadd.f32 %v2363_v24, %v2357_v21 }
 0x10f   :  { %v1726_v3 = vadd.f32 %v1725_v1, %v1724_v62  ;;  %v2398_v4 = vpop.f32.mrf.mxu0 }
 0x110   :  { %v993_v5 = vadd.f32 %v1662_v0, %v2341_v2  ;;  %v2401_v6 = vpop.f32.mrf.mxu1 }
 0x111   :  { %v2403_v8 = vpop.f32.mrf.mxu0 }
 0x112   :  { %v2405_v13 = vadd.f32 %v1726_v3, %v993_v5  ;;  %v2407_v14 = vpop.f32.mrf.mxu1  ;;  %v1699_v5 = vadd.f32 %v2352_v12, %v2346_v9 }
 0x113   :  { %v1666_v15 = vpop.f32.mrf.mxu0 }
 0x114   :  { %v1730_v16 = vpop.f32.mrf.mxu1  ;;  %v1053_v7 = vadd.f32 %v1699_v5, %v956_v63 }
 0x115   :  { %v1667_v17 = vpop.f32.mrf.mxu0 }
 0x116   :  { %v1668_v18 = vadd.f32 %v1667_v17, %v1666_v15  ;;  %v1731_v20 = vpop.f32.mrf.mxu1 }
 0x117   :  { %v1732_v25 = vadd.f32 %v1731_v20, %v1730_v16  ;;  %v2409_v26 = vpop.f32.mrf.mxu0 }
 0x118   :  { %v1001_v27 = vadd.f32 %v1668_v18, %v2341_v2  ;;  %v2412_v28 = vpop.f32.mrf.mxu1 }
 0x119   :  { %v2414_v29 = vpop.f32.mrf.mxu0 }
 0x11a   :  { %v2416_v30 = vadd.f32 %v1732_v25, %v1001_v27  ;;  %v2418_v32 = vpop.f32.mrf.mxu1 }
 0x11b   :  { %v1672_v37 = vpop.f32.mrf.mxu0 }
 0x11c   :  { %v1736_v38 = vpop.f32.mrf.mxu1 }
 0x11d   :  { %v1673_v39 = vpop.f32.mrf.mxu0 }
 0x11e   :  { %v1674_v40 = vadd.f32 %v1673_v39, %v1672_v37  ;;  %v1737_v41 = vpop.f32.mrf.mxu1 }
 0x11f   :  { %v1738_v42 = vadd.f32 %v1737_v41, %v1736_v38  ;;  %v2420_v44 = vpop.f32.mrf.mxu0 }
 0x120   :  { %v1009_v49 = vadd.f32 %v1674_v40, %v2341_v2  ;;  %v2423_v50 = vpop.f32.mrf.mxu1 }
 0x121   :  { %v2425_v51 = vpop.f32.mrf.mxu0 }
 0x122   :  { %v2429_v53 = vadd.f32 %v1738_v42, %v1009_v49  ;;  %v2431_v54 = vpop.f32.mrf.mxu1  ;;  %v964_v42 = vadd.f32 %v1641_v10, %v2341_v2 }
 0x123   :  { %v1758_v56 = vpop.f32.mrf.mxu0 }
 0x124   :  { %v1822_v61 = vpop.f32.mrf.mxu1 }
 0x125   :  { %v1759_v62 = vpop.f32.mrf.mxu0 }
 0x126   :  { %v1760_v0 = vadd.f32 %v1759_v62, %v1758_v56  ;;  %v1823_v1 = vpop.f32.mrf.mxu1  ;;  %v1647_v62 = vadd.f32 %v2370_v34, %v2365_v31 }
 0x127   :  { %v1761_v3 = vpop.f32.mrf.mxu0  ;;  %v1824_v18 = vadd.f32 %v1823_v1, %v1822_v61 }
 0x128   :  { %v1147_v15 = vadd.f32 %v1760_v0, %v2350_v11  ;;  %v1825_v16 = vpop.f32.mrf.mxu1  ;;  %v1061_v0 = vadd.f32 %v1705_v52, %v964_v42  ;;  %v1653_v42 = vadd.f32 %v2381_v46, %v2376_v43  ;;  %v1717_v46 = vadd.f32 %v2385_v48, %v2379_v45 }
 0x129   :  { %v1762_v17 = vpop.f32.mrf.mxu0 }
 0x12a   :  { %v1763_v20 = vadd.f32 %v1762_v17, %v1761_v3  ;;  %v1826_v25 = vpop.f32.mrf.mxu1  ;;  %v1244_v37 = vadd.f32 %v1824_v18, %v1147_v15 }
 0x12b   :  { %v1764_v27 = vpop.f32.mrf.mxu0  ;;  %v1827_v39 = vadd.f32 %v1826_v25, %v1825_v16 }
 0x12c   :  { %v1150_v38 = vadd.f32 %v1763_v20, %v1053_v7  ;;  %v1828_v40 = vpop.f32.mrf.mxu1  ;;  %v1306_v56 = vmax.f32 %v1244_v37, 0.0  ;;  %v1711_v20 = vadd.f32 %v2374_v36, %v2368_v33 }
 0x12d   :  { %v1765_v41 = vpop.f32.mrf.mxu0 }
 0x12e   :  { %v1247_v9 = vadd.f32 %v1827_v39, %v1150_v38  ;;  %v1766_v12 = vadd.f32 %v1765_v41, %v1764_v27  ;;  %v1829_v11 = vpop.f32.mrf.mxu1 }
 0x12f   :  { %v1767_v49 = vpop.f32.mrf.mxu0  ;;  %v1830_v3 = vadd.f32 %v1829_v11, %v1828_v40 }
 0x130   :  { %v1307_v19 = vmax.f32 %v1247_v9, 0.0  ;;  %v1155_v22 = vadd.f32 %v1766_v12, %v2361_v23  ;;  %v1831_v61 = vpop.f32.mrf.mxu1  ;;  %v972_v23 = vadd.f32 %v1647_v62, %v2341_v2 }
 0x131   :  { %v1768_v63 = vpop.f32.mrf.mxu0 }
 0x132   :  { %v1570_v1 = vpack.c.bf16 %v1307_v19, %v1306_v56  ;;  %v1769_v5 = vadd.f32 %v1768_v63, %v1767_v49  ;;  %v1832_v15 = vpop.f32.mrf.mxu1  ;;  %v1252_v21 = vadd.f32 %v1830_v3, %v1155_v22  ;;  %v1069_v40 = vadd.f32 %v1711_v20, %v972_v23 }
 0x133   :  { %v1770_v16 = vpop.f32.mrf.mxu0  ;;  %v1833_v17 = vadd.f32 %v1832_v15, %v1831_v61  ;;  %v980_v22 = vadd.f32 %v1653_v42, %v2341_v2  ;;  %v1659_v15 = vadd.f32 %v2392_v58, %v2387_v55 }
 0x134   :  { %1571 = vst [vmem:[%s2506_s3] sm:$0xff] %v1570_v1   ;;  %v1158_v24 = vadd.f32 %v1769_v5, %v1061_v0  ;;  %v1834_v7 = vpop.f32.mrf.mxu1  ;;  %v1308_v27 = vmax.f32 %v1252_v21, 0.0 }
 0x135   :  { %v1771_v10 = vpop.f32.mrf.mxu0  ;;  %v1077_v21 = vadd.f32 %v1717_v46, %v980_v22 }
 0x136   :  { %v1255_v18 = vadd.f32 %v1833_v17, %v1158_v24  ;;  %v1772_v31 = vadd.f32 %v1771_v10, %v1770_v16  ;;  %v1835_v34 = vpop.f32.mrf.mxu1 }
 0x137   :  { %v1773_v25 = vpop.f32.mrf.mxu0  ;;  %v1836_v12 = vadd.f32 %v1835_v34, %v1834_v7 }
 0x138   :  { %v1309_v37 = vmax.f32 %v1255_v18, 0.0  ;;  %v1163_v38 = vadd.f32 %v1772_v31, %v2372_v35  ;;  %v1837_v39 = vpop.f32.mrf.mxu1 }
 0x139   :  { %v1774_v41 = vpop.f32.mrf.mxu0 }
 0x13a   :  { %v1575_v9 = vpack.c.bf16 %v1309_v37, %v1308_v27  ;;  %v1775_v11 = vadd.f32 %v1774_v41, %v1773_v25  ;;  %v1838_v49 = vpop.f32.mrf.mxu1  ;;  %v1260_v33 = vadd.f32 %v1836_v12, %v1163_v38  ;;  %v1723_v25 = vadd.f32 %v2396_v60, %v2390_v57 }
 0x13b   :  { %v1776_v52 = vpop.f32.mrf.mxu0  ;;  %v1839_v56 = vadd.f32 %v1838_v49, %v1837_v39 }
 0x13c   :  { %1607 = vst [vmem:[%s2506_s3 + $0x8] sm:$0xff] %v1575_v9   ;;  %v1166_v36 = vadd.f32 %v1775_v11, %v1069_v40  ;;  %v1840_v19 = vpop.f32.mrf.mxu1  ;;  %v1310_v0 = vmax.f32 %v1260_v33, 0.0  ;;  %v1665_v9 = vadd.f32 %v2403_v8, %v2398_v4  ;;  %v1729_v8 = vadd.f32 %v2407_v14, %v2401_v6 }
 0x13d   :  { %v1777_v35 = vpop.f32.mrf.mxu0 }
 0x13e   :  { %v1263_v61 = vadd.f32 %v1839_v56, %v1166_v36  ;;  %v1778_v62 = vadd.f32 %v1777_v35, %v1776_v52  ;;  %v1841_v63 = vpop.f32.mrf.mxu1 }
 0x13f   :  { %v1779_v43 = vpop.f32.mrf.mxu0  ;;  %v1842_v17 = vadd.f32 %v1841_v63, %v1840_v19  ;;  %v996_v19 = vadd.f32 %v1665_v9, %v2341_v2 }
 0x140   :  { %v1311_v1 = vmax.f32 %v1263_v61, 0.0  ;;  %v1171_v3 = vadd.f32 %v1778_v62, %v2383_v47  ;;  %v1843_v5 = vpop.f32.mrf.mxu1  ;;  %v988_v47 = vadd.f32 %v1659_v15, %v2341_v2 }
 0x141   :  { %v1780_v16 = vpop.f32.mrf.mxu0 }
 0x142   :  { %v1580_v24 = vpack.c.bf16 %v1311_v1, %v1310_v0  ;;  %v1781_v7 = vadd.f32 %v1780_v16, %v1779_v43  ;;  %v1844_v23 = vpop.f32.mrf.mxu1  ;;  %v1268_v45 = vadd.f32 %v1842_v17, %v1171_v3  ;;  %v1085_v41 = vadd.f32 %v1723_v25, %v988_v47 }
 0x143   :  { %v1782_v10 = vpop.f32.mrf.mxu0  ;;  %v1845_v18 = vadd.f32 %v1844_v23, %v1843_v5  ;;  %v1671_v0 = vadd.f32 %v2414_v29, %v2409_v26  ;;  %v1093_v3 = vadd.f32 %v1729_v8, %v996_v19 }
 0x144   :  { %1608 = vst [vmem:[%s2506_s3 + $0x10] sm:$0xff] %v1580_v24   ;;  %v1174_v48 = vadd.f32 %v1781_v7, %v1077_v21  ;;  %v1846_v31 = vpop.f32.mrf.mxu1  ;;  %v1312_v37 = vmax.f32 %v1268_v45, 0.0  ;;  %v1735_v45 = vadd.f32 %v2418_v32, %v2412_v28 }
 0x145   :  { %v1783_v34 = vpop.f32.mrf.mxu0 }
 0x146   :  { %v1271_v20 = vadd.f32 %v1845_v18, %v1174_v48  ;;  %v1784_v55 = vadd.f32 %v1783_v34, %v1782_v10  ;;  %v1847_v58 = vpop.f32.mrf.mxu1 }
 0x147   :  { %v1785_v27 = vpop.f32.mrf.mxu0  ;;  %v1848_v11 = vadd.f32 %v1847_v58, %v1846_v31  ;;  %v1677_v58 = vadd.f32 %v2425_v51, %v2420_v44  ;;  %v1741_v51 = vadd.f32 %v2431_v54, %v2423_v50 }
 0x148   :  { %v1313_v38 = vmax.f32 %v1271_v20, 0.0  ;;  %v1179_v39 = vadd.f32 %v1784_v55, %v2394_v59  ;;  %v1849_v40 = vpop.f32.mrf.mxu1 }
 0x149   :  { %v1786_v42 = vpop.f32.mrf.mxu0 }
 0x14a   :  { %v1585_v12 = vpack.c.bf16 %v1313_v38, %v1312_v37  ;;  %v1787_v49 = vadd.f32 %v1786_v42, %v1785_v27  ;;  %v1850_v52 = vpop.f32.mrf.mxu1  ;;  %v1276_v57 = vadd.f32 %v1848_v11, %v1179_v39  ;;  %v1012_v42 = vadd.f32 %v1677_v58, %v2341_v2 }
 0x14b   :  { %v1788_v33 = vpop.f32.mrf.mxu0  ;;  %v1851_v36 = vadd.f32 %v1850_v52, %v1849_v40 }
 0x14c   :  { %1609 = vst [vmem:[%s2506_s3 + $0x18] sm:$0xff] %v1585_v12   ;;  %v1182_v60 = vadd.f32 %v1787_v49, %v1085_v41  ;;  %v1852_v56 = vpop.f32.mrf.mxu1  ;;  %v1314_v62 = vmax.f32 %v1276_v57, 0.0 }
 0x14d   :  { %v1789_v59 = vpop.f32.mrf.mxu0 }
 0x14e   :  { %v1279_v35 = vadd.f32 %v1851_v36, %v1182_v60  ;;  %v1790_v22 = vadd.f32 %v1789_v59, %v1788_v33  ;;  %v1853_v61 = vpop.f32.mrf.mxu1  ;;  %v1109_v36 = vadd.f32 %v1741_v51, %v1012_v42 }
 0x14f   :  { %v1791_v4 = vpop.f32.mrf.mxu0  ;;  %v1854_v15 = vadd.f32 %v1853_v61, %v1852_v56 }
 0x150   :  { %v1315_v63 = vmax.f32 %v1279_v35, 0.0  ;;  %v1187_v43 = vadd.f32 %v1790_v22, %v2405_v13  ;;  %v1855_v46 = vpop.f32.mrf.mxu1  ;;  %v1004_v13 = vadd.f32 %v1671_v0, %v2341_v2 }
 0x151   :  { %v1792_v1 = vpop.f32.mrf.mxu0 }
 0x152   :  { %v1590_v5 = vpack.c.bf16 %v1315_v63, %v1314_v62  ;;  %v1793_v16 = vadd.f32 %v1792_v1, %v1791_v4  ;;  %v1856_v21 = vpop.f32.mrf.mxu1  ;;  %v1284_v6 = vadd.f32 %v1854_v15, %v1187_v43  ;;  %v1101_v20 = vadd.f32 %v1735_v45, %v1004_v13 }
 0x153   :  { %v1794_v24 = vpop.f32.mrf.mxu0  ;;  %v1857_v17 = vadd.f32 %v1856_v21, %v1855_v46 }
 0x154   :  { %1610 = vst [vmem:[%s2506_s3 + $0x20] sm:$0xff] %v1590_v5   ;;  %v1190_v14 = vadd.f32 %v1793_v16, %v1093_v3  ;;  %v1858_v7 = vpop.f32.mrf.mxu1  ;;  %v1316_v18 = vmax.f32 %v1284_v6, 0.0 }
 0x155   :  { %v1795_v23 = vpop.f32.mrf.mxu0 }
 0x156   :  { %v1287_v10 = vadd.f32 %v1857_v17, %v1190_v14  ;;  %v1796_v26 = vadd.f32 %v1795_v23, %v1794_v24  ;;  %v1859_v29 = vpop.f32.mrf.mxu1 }
 0x157   :  { %v1797_v48 = vpop.f32.mrf.mxu0  ;;  %v1860_v27 = vadd.f32 %v1859_v29, %v1858_v7 }
 0x158   :  { %v1317_v31 = vmax.f32 %v1287_v10, 0.0  ;;  %v1195_v47 = vadd.f32 %v1796_v26, %v2416_v30  ;;  %v1861_v34 = vpop.f32.mrf.mxu1 }
 0x159   :  { %v1798_v55 = vpop.f32.mrf.mxu0 }
 0x15a   :  { %v1595_v25 = vpack.c.bf16 %v1317_v31, %v1316_v18  ;;  %v1799_v37 = vadd.f32 %v1798_v55, %v1797_v48  ;;  %v1862_v38 = vpop.f32.mrf.mxu1  ;;  %v1292_v28 = vadd.f32 %v1860_v27, %v1195_v47 }
 0x15b   :  { %v1800_v39 = vpop.f32.mrf.mxu0  ;;  %v1863_v40 = vadd.f32 %v1862_v38, %v1861_v34 }
 0x15c   :  { %1611 = vst [vmem:[%s2506_s3 + $0x28] sm:$0xff] %v1595_v25   ;;  %v1198_v32 = vadd.f32 %v1799_v37, %v1101_v20  ;;  %v1864_v41 = vpop.f32.mrf.mxu1  ;;  %v1318_v49 = vmax.f32 %v1292_v28, 0.0 }
 0x15d   :  { %v1801_v30 = vpop.f32.mrf.mxu0 }
 0x15e   :  { %v1295_v9 = vadd.f32 %v1863_v40, %v1198_v32  ;;  %v1802_v12 = vadd.f32 %v1801_v30, %v1800_v39  ;;  %v1865_v11 = vpop.f32.mrf.mxu1 }
 0x15f   :  { %v1803_v44 = vpop.f32.mrf.mxu0  ;;  %v1866_v59 = vadd.f32 %v1865_v11, %v1864_v41 }
 0x160   :  { %v1319_v52 = vmax.f32 %v1295_v9, 0.0  ;;  %v1203_v33 = vadd.f32 %v1802_v12, %v2429_v53  ;;  %v1867_v57 = vpop.f32.mrf.mxu1 }
 0x161   :  { %v1804_v60 = vpop.f32.mrf.mxu0 }
 0x162   :  { %v1600_v56 = vpack.c.bf16 %v1319_v52, %v1318_v49  ;;  %v1805_v19 = vadd.f32 %v1804_v60, %v1803_v44  ;;  %v1868_v35 = vpop.f32.mrf.mxu1  ;;  %v1300_v2 = vadd.f32 %v1866_v59, %v1203_v33 }
 0x163   :  { %v1869_v61 = vadd.f32 %v1868_v35, %v1867_v57 }
 0x164   :  { %1612 = vst [vmem:[%s2506_s3 + $0x30] sm:$0xff] %v1600_v56   ;;  %v1206_v22 = vadd.f32 %v1805_v19, %v1109_v36  ;;  %v1320_v50 = vmax.f32 %v1300_v2, 0.0 }
 0x166   :  { %v1303_v4 = vadd.f32 %v1869_v61, %v1206_v22 }
 0x168   :  { %v1321_v54 = vmax.f32 %v1303_v4, 0.0 }
 0x16a   :  { %v1605_v8 = vpack.c.bf16 %v1321_v54, %v1320_v50 }
 0x16c   :  { %1613 = vst [vmem:[%s2506_s3 + $0x38] sm:$0xff] %v1605_v8  }

// kernel: generator_forward.10
= control target key start
LH: loop header
LB: loop body
LE: loop exit
PB: predicated region body
PF: predicated region fallthrough
CT: control target
= control target key end

     0   :  { %s3863_s1 = inlined_call_operand.vmem [shape: bf16[2048,256], index: 1, kind: input, shape index: {}]   ;;  %s3864_s0 = inlined_call_operand.vmem [shape: bf16[32,2048], index: 0, kind: input, shape index: {}]   ;;  %s3865_s2 = inlined_call_operand.vmem [shape: f32[1,256], index: 2, kind: input, shape index: {}]   ;;  %s3866_s3 = inlined_call_operand.vmem [shape: bf16[32,256], index: 3, kind: output, shape index: {}]  }
   0x1   :  { %v2514_v0 = vld [vmem:[%s3863_s1 + $0x74] ss:$8 sps:$4 sm:$0xff]   ;;  %v2518_v2 = vld [vmem:[%s3863_s1 + $0x70] ss:$8 sps:$4 sm:$0xff]   ;;  %v2520_v4 = vld [vmem:[%s3863_s1 + $0x64] ss:$8 sps:$4 sm:$0xff]  }
   0x2   :  { %v2516_v1 = vld [vmem:[%s3863_s1 + $0x174] ss:$8 sps:$4 sm:$0xff]   ;;  %1754 = vmatprep.subr.bf16.mxu0 %v2514_v0  ;;  %v2519_v3 = vld [vmem:[%s3863_s1 + $0x170] ss:$8 sps:$4 sm:$0xff]   ;;  %v2522_v5 = vld [vmem:[%s3863_s1 + $0x164] ss:$8 sps:$4 sm:$0xff]  }
   0x3   :  { %1807 = vmatprep.subr.bf16.mxu1 %v2516_v1  ;;  %1755 = vmatpush1.bf16.msra.mxu0 %v2518_v2  ;;  %v2524_v6 = vld [vmem:[%s3863_s1 + $0x60] ss:$8 sps:$4 sm:$0xff]   ;;  %v2526_v8 = vld [vmem:[%s3863_s1 + $0x54] ss:$8 sps:$4 sm:$0xff]   ;;  %v2530_v10 = vld [vmem:[%s3863_s1 + $0x50] ss:$8 sps:$4 sm:$0xff]  }
   0x4   :  { %1808 = vmatpush1.bf16.msra.mxu1 %v2519_v3  ;;  %1756 = vmatprep.subr.bf16.mxu0 %v2520_v4  ;;  %v2525_v7 = vld [vmem:[%s3863_s1 + $0x160] ss:$8 sps:$4 sm:$0xff]   ;;  %v2528_v9 = vld [vmem:[%s3863_s1 + $0x154] ss:$8 sps:$4 sm:$0xff]   ;;  %v2531_v11 = vld [vmem:[%s3863_s1 + $0x150] ss:$8 sps:$4 sm:$0xff]  }
   0x5   :  { %1809 = vmatprep.subr.bf16.mxu1 %v2522_v5  ;;  %v2532_v12 = vld [vmem:[%s3863_s1 + $0x44] ss:$8 sps:$4 sm:$0xff]   ;;  %v2536_v14 = vld [vmem:[%s3863_s1 + $0x40] ss:$8 sps:$4 sm:$0xff]   ;;  %v2538_v16 = vld [vmem:[%s3863_s1 + $0x34] ss:$8 sps:$4 sm:$0xff]  }
   0x6   :  { %v2534_v13 = vld [vmem:[%s3863_s1 + $0x144] ss:$8 sps:$4 sm:$0xff]   ;;  %v2537_v15 = vld [vmem:[%s3863_s1 + $0x140] ss:$8 sps:$4 sm:$0xff]   ;;  %v2540_v17 = vld [vmem:[%s3863_s1 + $0x134] ss:$8 sps:$4 sm:$0xff]  }
   0x7   :  { %1757 = vmatpush1.bf16.msra.mxu0 %v2524_v6  ;;  %v2542_v18 = vld [vmem:[%s3863_s1 + $0x30] ss:$8 sps:$4 sm:$0xff]   ;;  %v2544_v20 = vld [vmem:[%s3863_s1 + $0x24] ss:$8 sps:$4 sm:$0xff]   ;;  %v2548_v22 = vld [vmem:[%s3863_s1 + $0x20] ss:$8 sps:$4 sm:$0xff]  }
   0x8   :  { %1810 = vmatpush1.bf16.msra.mxu1 %v2525_v7  ;;  %1758 = vmatprep.subr.bf16.mxu0 %v2526_v8  ;;  %v2543_v19 = vld [vmem:[%s3863_s1 + $0x130] ss:$8 sps:$4 sm:$0xff]   ;;  %v2546_v21 = vld [vmem:[%s3863_s1 + $0x124] ss:$8 sps:$4 sm:$0xff]   ;;  %v2549_v23 = vld [vmem:[%s3863_s1 + $0x120] ss:$8 sps:$4 sm:$0xff]  }
   0x9   :  { %1811 = vmatprep.subr.bf16.mxu1 %v2528_v9  ;;  %v2550_v24 = vld [vmem:[%s3863_s1 + $0x14] ss:$8 sps:$4 sm:$0xff]   ;;  %v2554_v26 = vld [vmem:[%s3863_s1 + $0x10] ss:$8 sps:$4 sm:$0xff]   ;;  %v2556_v28 = vld [vmem:[%s3863_s1 + $0x4] ss:$8 sps:$4 sm:$0xff]  }
   0xa   :  { %v2552_v25 = vld [vmem:[%s3863_s1 + $0x114] ss:$8 sps:$4 sm:$0xff]   ;;  %v2555_v27 = vld [vmem:[%s3863_s1 + $0x110] ss:$8 sps:$4 sm:$0xff]   ;;  %v2558_v29 = vld [vmem:[%s3863_s1 + $0x104] ss:$8 sps:$4 sm:$0xff]  }
   0xb   :  { %1759 = vmatpush1.bf16.msra.mxu0 %v2530_v10  ;;  %v2560_v30 = vld [vmem:[%s3863_s1] ss:$8 sps:$4 sm:$0xff]   ;;  %v2562_v32 = vld [vmem:[%s3863_s1 + $0xf4] ss:$8 sps:$4 sm:$0xff]   ;;  %v2566_v34 = vld [vmem:[%s3863_s1 + $0xf0] ss:$8 sps:$4 sm:$0xff]  }
   0xc   :  { %1812 = vmatpush1.bf16.msra.mxu1 %v2531_v11  ;;  %1760 = vmatprep.subr.bf16.mxu0 %v2532_v12  ;;  %v2561_v31 = vld [vmem:[%s3863_s1 + $0x100] ss:$8 sps:$4 sm:$0xff]   ;;  %v2564_v33 = vld [vmem:[%s3863_s1 + $0x1f4] ss:$8 sps:$4 sm:$0xff]   ;;  %v2567_v35 = vld [vmem:[%s3863_s1 + $0x1f0] ss:$8 sps:$4 sm:$0xff]  }
   0xd   :  { %1813 = vmatprep.subr.bf16.mxu1 %v2534_v13  ;;  %v2568_v36 = vld [vmem:[%s3863_s1 + $0xe4] ss:$8 sps:$4 sm:$0xff]   ;;  %v2572_v38 = vld [vmem:[%s3863_s1 + $0xe0] ss:$8 sps:$4 sm:$0xff]   ;;  %v2574_v40 = vld [vmem:[%s3863_s1 + $0xd4] ss:$8 sps:$4 sm:$0xff]  }
   0xe   :  { %v2570_v37 = vld [vmem:[%s3863_s1 + $0x1e4] ss:$8 sps:$4 sm:$0xff]   ;;  %v2573_v39 = vld [vmem:[%s3863_s1 + $0x1e0] ss:$8 sps:$4 sm:$0xff]   ;;  %v2576_v41 = vld [vmem:[%s3863_s1 + $0x1d4] ss:$8 sps:$4 sm:$0xff]  }
   0xf   :  { %1761 = vmatpush1.bf16.msra.mxu0 %v2536_v14  ;;  %v2578_v42 = vld [vmem:[%s3863_s1 + $0xd0] ss:$8 sps:$4 sm:$0xff]   ;;  %v2580_v44 = vld [vmem:[%s3863_s1 + $0xc4] ss:$8 sps:$4 sm:$0xff]   ;;  %v2584_v46 = vld [vmem:[%s3863_s1 + $0xc0] ss:$8 sps:$4 sm:$0xff]  }
  0x10   :  { %1814 = vmatpush1.bf16.msra.mxu1 %v2537_v15  ;;  %1762 = vmatprep.subr.bf16.mxu0 %v2538_v16  ;;  %v2579_v43 = vld [vmem:[%s3863_s1 + $0x1d0] ss:$8 sps:$4 sm:$0xff]   ;;  %v2582_v45 = vld [vmem:[%s3863_s1 + $0x1c4] ss:$8 sps:$4 sm:$0xff]   ;;  %v2585_v47 = vld [vmem:[%s3863_s1 + $0x1c0] ss:$8 sps:$4 sm:$0xff]  }
  0x11   :  { %1815 = vmatprep.subr.bf16.mxu1 %v2540_v17  ;;  %v14_v48 = vld [vmem:[%s3864_s0] sm:$0xff]  ;;  %v15_v50 = vld [vmem:[%s3864_s0 + $0x8] sm:$0xff]  ;;  %v2586_v52 = vld [vmem:[%s3863_s1 + $0xb4] ss:$8 sps:$4 sm:$0xff]  }
  0x12   :  { %v22_v49 = vld [vmem:[%s3864_s0 + $0x40] sm:$0xff]  ;;  %v23_v51 = vld [vmem:[%s3864_s0 + $0x48] sm:$0xff]  ;;  %v2588_v54 = vld [vmem:[%s3863_s1 + $0x1b4] ss:$8 sps:$4 sm:$0xff]  }
  0x13   :  { %1763 = vmatpush1.bf16.msra.mxu0 %v2542_v18  ;;  %v2219_v53 = vcombine.high %v14_v48, %v22_v49  ;;  %v2221_v55 = vcombine.high %v15_v50, %v23_v51  ;;  %v2590_v56 = vld [vmem:[%s3863_s1 + $0xb0] ss:$8 sps:$4 sm:$0xff]   ;;  %v2592_v58 = vld [vmem:[%s3863_s1 + $0xa4] ss:$8 sps:$4 sm:$0xff]   ;;  %v2596_v60 = vld [vmem:[%s3863_s1 + $0xa0] ss:$8 sps:$4 sm:$0xff]   ;;  %v2218_v8 = vcombine.low %v14_v48, %v22_v49  ;;  %v2220_v9 = vcombine.low %v15_v50, %v23_v51 }
  0x14   :  { %1816 = vmatpush1.bf16.msra.mxu1 %v2543_v19  ;;  %1764 = vmatprep.subr.bf16.mxu0 %v2544_v20  ;;  %v2591_v57 = vld [vmem:[%s3863_s1 + $0x1b0] ss:$8 sps:$4 sm:$0xff]   ;;  %v2594_v59 = vld [vmem:[%s3863_s1 + $0x1a4] ss:$8 sps:$4 sm:$0xff]   ;;  %v2597_v61 = vld [vmem:[%s3863_s1 + $0x1a0] ss:$8 sps:$4 sm:$0xff]  }
  0x15   :  { %1817 = vmatprep.subr.bf16.mxu1 %v2546_v21  ;;  %1786 = vmatprep.mubr.bf16.mxu0 %v2219_v53  ;;  %v2598_v62 = vld [vmem:[%s3863_s1 + $0x94] ss:$8 sps:$4 sm:$0xff]   ;;  %v2602_v0 = vld [vmem:[%s3863_s1 + $0x90] ss:$8 sps:$4 sm:$0xff]   ;;  %v2604_v2 = vld [vmem:[%s3863_s1 + $0x84] ss:$8 sps:$4 sm:$0xff]  }
  0x16   :  { %1839 = vmatprep.mubr.bf16.mxu1 %v2221_v55  ;;  %v2600_v63 = vld [vmem:[%s3863_s1 + $0x194] ss:$8 sps:$4 sm:$0xff]   ;;  %v2603_v1 = vld [vmem:[%s3863_s1 + $0x190] ss:$8 sps:$4 sm:$0xff]   ;;  %v2606_v3 = vld [vmem:[%s3863_s1 + $0x184] ss:$8 sps:$4 sm:$0xff]  }
  0x17   :  { %1765 = vmatpush1.bf16.msra.mxu0 %v2548_v22  ;;  %v2608_v4 = vld [vmem:[%s3863_s1 + $0x80] ss:$8 sps:$4 sm:$0xff]   ;;  %v2612_v6 = vld [vmem:[%s3863_s1 + $0x274] ss:$8 sps:$4 sm:$0xff]   ;;  %v2610_v10 = vld [vmem:[%s3863_s1 + $0x270] ss:$8 sps:$4 sm:$0xff]  }
  0x18   :  { %1818 = vmatpush1.bf16.msra.mxu1 %v2549_v23  ;;  %1766 = vmatprep.subr.bf16.mxu0 %v2550_v24  ;;  %v2609_v5 = vld [vmem:[%s3863_s1 + $0x180] ss:$8 sps:$4 sm:$0xff]   ;;  %v2615_v7 = vld [vmem:[%s3863_s1 + $0x374] ss:$8 sps:$4 sm:$0xff]   ;;  %v2613_v11 = vld [vmem:[%s3863_s1 + $0x370] ss:$8 sps:$4 sm:$0xff]  }
  0x19   :  { %1819 = vmatprep.subr.bf16.mxu1 %v2552_v25  ;;  %v2618_v12 = vld [vmem:[%s3863_s1 + $0x264] ss:$8 sps:$4 sm:$0xff]   ;;  %v2616_v14 = vld [vmem:[%s3863_s1 + $0x260] ss:$8 sps:$4 sm:$0xff]   ;;  %v2624_v16 = vld [vmem:[%s3863_s1 + $0x254] ss:$8 sps:$4 sm:$0xff]  }
  0x1a   :  { %v2621_v13 = vld [vmem:[%s3863_s1 + $0x364] ss:$8 sps:$4 sm:$0xff]   ;;  %v2619_v15 = vld [vmem:[%s3863_s1 + $0x360] ss:$8 sps:$4 sm:$0xff]   ;;  %v2627_v17 = vld [vmem:[%s3863_s1 + $0x354] ss:$8 sps:$4 sm:$0xff]  }
  0x1b   :  { %1767 = vmatpush1.bf16.msra.mxu0 %v2554_v26  ;;  %v2622_v18 = vld [vmem:[%s3863_s1 + $0x250] ss:$8 sps:$4 sm:$0xff]   ;;  %v2630_v20 = vld [vmem:[%s3863_s1 + $0x244] ss:$8 sps:$4 sm:$0xff]   ;;  %v2628_v22 = vld [vmem:[%s3863_s1 + $0x240] ss:$8 sps:$4 sm:$0xff]  }
  0x1c   :  { %1820 = vmatpush1.bf16.msra.mxu1 %v2555_v27  ;;  %1768 = vmatprep.subr.bf16.mxu0 %v2556_v28  ;;  %v2625_v19 = vld [vmem:[%s3863_s1 + $0x350] ss:$8 sps:$4 sm:$0xff]   ;;  %v2633_v21 = vld [vmem:[%s3863_s1 + $0x344] ss:$8 sps:$4 sm:$0xff]   ;;  %v2631_v23 = vld [vmem:[%s3863_s1 + $0x340] ss:$8 sps:$4 sm:$0xff]  }
  0x1d   :  { %1821 = vmatprep.subr.bf16.mxu1 %v2558_v29  ;;  %v2636_v24 = vld [vmem:[%s3863_s1 + $0x234] ss:$8 sps:$4 sm:$0xff]   ;;  %v2634_v26 = vld [vmem:[%s3863_s1 + $0x230] ss:$8 sps:$4 sm:$0xff]   ;;  %v30_v28 = vld [vmem:[%s3864_s0 + $0x80] sm:$0xff] }
  0x1e   :  { %v2639_v25 = vld [vmem:[%s3863_s1 + $0x334] ss:$8 sps:$4 sm:$0xff]   ;;  %v2637_v27 = vld [vmem:[%s3863_s1 + $0x330] ss:$8 sps:$4 sm:$0xff]   ;;  %v38_v29 = vld [vmem:[%s3864_s0 + $0xc0] sm:$0xff] }
  0x1f   :  { %1769 = vmatpush1.bf16.msra.mxu0 %v2560_v30  ;;  %v31_v30 = vld [vmem:[%s3864_s0 + $0x88] sm:$0xff]  ;;  %v3237_v48 = vld [vmem:[%s3864_s0 + $0x18] sm:$0xff] }
  0x20   :  { %1822 = vmatpush1.bf16.msra.mxu1 %v2561_v31  ;;  %1770 = vmatprep.subr.bf16.mxu0 %v2562_v32  ;;  %v39_v31 = vld [vmem:[%s3864_s0 + $0xc8] sm:$0xff]  ;;  %v3244_v50 = vld [vmem:[%s3864_s0 + $0x58] sm:$0xff] }
  0x21   :  { %1823 = vmatprep.subr.bf16.mxu1 %v2564_v33  ;;  %v2642_v32 = vld [vmem:[%s3863_s1 + $0x224] ss:$8 sps:$4 sm:$0xff]   ;;  %v2235_v33 = vcombine.high %v30_v28, %v38_v29  ;;  %v2225_v51 = vcombine.high %v3237_v48, %v3244_v50  ;;  %v2655_v53 = vld [vmem:[%s3863_s1 + $0x300] ss:$8 sps:$4 sm:$0xff]   ;;  %v2663_v55 = vld [vmem:[%s3863_s1 + $0x3f4] ss:$8 sps:$4 sm:$0xff]  }
  0x23   :  { %1771 = vmatpush2.bf16.msra.mxu0 %v2566_v34  ;;  %v2234_v34 = vcombine.low %v30_v28, %v38_v29  ;;  %v2224_v29 = vcombine.low %v3237_v48, %v3244_v50  ;;  %v2726_v48 = vld [vmem:[%s3863_s1 + $0x444] ss:$8 sps:$4 sm:$0xff]  }
  0x24   :  { %1824 = vmatpush2.bf16.msra.mxu1 %v2567_v35  ;;  %1772 = vmatprep.subr.bf16.mxu0 %v2568_v36  ;;  %v2237_v35 = vcombine.high %v31_v30, %v39_v31  ;;  %v2645_v36 = vld [vmem:[%s3863_s1 + $0x324] ss:$8 sps:$4 sm:$0xff]  }
  0x25   :  { %1825 = vmatprep.subr.bf16.mxu1 %v2570_v37  ;;  %v2236_v37 = vcombine.low %v31_v30, %v39_v31  ;;  %v33_v30 = vld [vmem:[%s3864_s0 + $0x98] sm:$0xff] }
  0x26   :  { %v41_v31 = vld [vmem:[%s3864_s0 + $0xd8] sm:$0xff] }
  0x27   :  { %1773 = vmatpush2.bf16.msra.mxu0 %v2572_v38  ;;  %v2640_v38 = vld [vmem:[%s3863_s1 + $0x220] ss:$8 sps:$4 sm:$0xff]  }
  0x28   :  { %1826 = vmatpush2.bf16.msra.mxu1 %v2573_v39  ;;  %1774 = vmatprep.subr.bf16.mxu0 %v2574_v40  ;;  %v2643_v39 = vld [vmem:[%s3863_s1 + $0x320] ss:$8 sps:$4 sm:$0xff]   ;;  %v2648_v40 = vld [vmem:[%s3863_s1 + $0x214] ss:$8 sps:$4 sm:$0xff]  }
  0x29   :  { %1827 = vmatprep.subr.bf16.mxu1 %v2576_v41  ;;  %v2651_v41 = vld [vmem:[%s3863_s1 + $0x314] ss:$8 sps:$4 sm:$0xff]  }
  0x2b   :  { %1775 = vmatpush2.bf16.msra.mxu0 %v2578_v42  ;;  %v2646_v42 = vld [vmem:[%s3863_s1 + $0x210] ss:$8 sps:$4 sm:$0xff]  }
  0x2c   :  { %1828 = vmatpush2.bf16.msra.mxu1 %v2579_v43  ;;  %1776 = vmatprep.subr.bf16.mxu0 %v2580_v44  ;;  %v2649_v43 = vld [vmem:[%s3863_s1 + $0x310] ss:$8 sps:$4 sm:$0xff]   ;;  %v2654_v44 = vld [vmem:[%s3863_s1 + $0x204] ss:$8 sps:$4 sm:$0xff]  }
  0x2d   :  { %1829 = vmatprep.subr.bf16.mxu1 %v2582_v45  ;;  %v2657_v45 = vld [vmem:[%s3863_s1 + $0x304] ss:$8 sps:$4 sm:$0xff]  }
  0x2f   :  { %1777 = vmatpush2.bf16.msra.mxu0 %v2584_v46  ;;  %v3227_v46 = vld [vmem:[%s3864_s0 + $0x10] sm:$0xff] }
  0x30   :  { %1830 = vmatpush2.bf16.msra.mxu1 %v2585_v47  ;;  %1778 = vmatprep.subr.bf16.mxu0 %v2586_v52  ;;  %v3232_v47 = vld [vmem:[%s3864_s0 + $0x50] sm:$0xff]  ;;  %v2652_v52 = vld [vmem:[%s3863_s1 + $0x200] ss:$8 sps:$4 sm:$0xff]  }
  0x31   :  { %1831 = vmatprep.subr.bf16.mxu1 %v2588_v54  ;;  %v2223_v49 = vcombine.high %v3227_v46, %v3232_v47  ;;  %v2660_v54 = vld [vmem:[%s3863_s1 + $0x2f4] ss:$8 sps:$4 sm:$0xff]   ;;  %v2222_v28 = vcombine.low %v3227_v46, %v3232_v47  ;;  %v3415_v46 = vld [vmem:[%s3864_s0 + $0x28] sm:$0xff] }
  0x32   :  { %v3420_v47 = vld [vmem:[%s3864_s0 + $0x68] sm:$0xff] }
  0x33   :  { %1779 = vmatpush2.bf16.msra.mxu0 %v2590_v56  ;;  %v2658_v56 = vld [vmem:[%s3863_s1 + $0x2f0] ss:$8 sps:$4 sm:$0xff]  }
  0x34   :  { %1832 = vmatpush2.bf16.msra.mxu1 %v2591_v57  ;;  %1780 = vmatprep.subr.bf16.mxu0 %v2592_v58  ;;  %v2661_v57 = vld [vmem:[%s3863_s1 + $0x3f0] ss:$8 sps:$4 sm:$0xff]   ;;  %v2666_v58 = vld [vmem:[%s3863_s1 + $0x2e4] ss:$8 sps:$4 sm:$0xff]  }
  0x35   :  { %1833 = vmatprep.subr.bf16.mxu1 %v2594_v59  ;;  %v2669_v59 = vld [vmem:[%s3863_s1 + $0x3e4] ss:$8 sps:$4 sm:$0xff]  }
  0x37   :  { %1781 = vmatpush2.bf16.msra.mxu0 %v2596_v60  ;;  %v2664_v60 = vld [vmem:[%s3863_s1 + $0x2e0] ss:$8 sps:$4 sm:$0xff]  }
  0x38   :  { %1834 = vmatpush2.bf16.msra.mxu1 %v2597_v61  ;;  %1782 = vmatprep.subr.bf16.mxu0 %v2598_v62  ;;  %v2667_v61 = vld [vmem:[%s3863_s1 + $0x3e0] ss:$8 sps:$4 sm:$0xff]   ;;  %v2672_v62 = vld [vmem:[%s3863_s1 + $0x2d4] ss:$8 sps:$4 sm:$0xff]  }
  0x39   :  { %1835 = vmatprep.subr.bf16.mxu1 %v2600_v63  ;;  %v2675_v63 = vld [vmem:[%s3863_s1 + $0x3d4] ss:$8 sps:$4 sm:$0xff]  }
  0x3b   :  { %1783 = vmatpush2.bf16.msra.mxu0 %v2602_v0  ;;  %v2670_v0 = vld [vmem:[%s3863_s1 + $0x2d0] ss:$8 sps:$4 sm:$0xff]  }
  0x3c   :  { %1836 = vmatpush2.bf16.msra.mxu1 %v2603_v1  ;;  %1784 = vmatprep.subr.bf16.mxu0 %v2604_v2  ;;  %v2673_v1 = vld [vmem:[%s3863_s1 + $0x3d0] ss:$8 sps:$4 sm:$0xff]   ;;  %v2678_v2 = vld [vmem:[%s3863_s1 + $0x2c4] ss:$8 sps:$4 sm:$0xff]  }
  0x3d   :  { %1837 = vmatprep.subr.bf16.mxu1 %v2606_v3  ;;  %v2681_v3 = vld [vmem:[%s3863_s1 + $0x3c4] ss:$8 sps:$4 sm:$0xff]  }
  0x3f   :  { %1785 = vmatpush2.bf16.msra.mxu0 %v2608_v4  ;;  %v2676_v4 = vld [vmem:[%s3863_s1 + $0x2c0] ss:$8 sps:$4 sm:$0xff]  }
  0x40   :  { %1838 = vmatpush2.bf16.msra.mxu1 %v2609_v5  ;;  %1860 = vmatprep.subr.bf16.mxu0 %v2612_v6  ;;  %v2679_v5 = vld [vmem:[%s3863_s1 + $0x3c0] ss:$8 sps:$4 sm:$0xff]   ;;  %v2684_v6 = vld [vmem:[%s3863_s1 + $0x2b4] ss:$8 sps:$4 sm:$0xff]  }
  0x41   :  { %1913 = vmatprep.subr.bf16.mxu1 %v2615_v7  ;;  %v2687_v7 = vld [vmem:[%s3863_s1 + $0x3b4] ss:$8 sps:$4 sm:$0xff]  }
  0x42   :  { %1787 = vmatmul.mubr.bf16.vlgmr.msra.gmra.mxu0 %v2218_v8  ;;  %v2682_v8 = vld [vmem:[%s3863_s1 + $0x2b0] ss:$8 sps:$4 sm:$0xff]  }
  0x43   :  { %1840 = vmatmul.mubr.bf16.vlgmr.msra.gmra.mxu1 %v2220_v9  ;;  %1861 = vmatpush1.bf16.msra.mxu0 %v2610_v10  ;;  %v2685_v9 = vld [vmem:[%s3863_s1 + $0x3b0] ss:$8 sps:$4 sm:$0xff]   ;;  %v2690_v10 = vld [vmem:[%s3863_s1 + $0x2a4] ss:$8 sps:$4 sm:$0xff]  }
  0x44   :  { %1914 = vmatpush1.bf16.msra.mxu1 %v2613_v11  ;;  %1862 = vmatprep.subr.bf16.mxu0 %v2618_v12  ;;  %v2693_v11 = vld [vmem:[%s3863_s1 + $0x3a4] ss:$8 sps:$4 sm:$0xff]   ;;  %v2688_v12 = vld [vmem:[%s3863_s1 + $0x2a0] ss:$8 sps:$4 sm:$0xff]  }
  0x45   :  { %1915 = vmatprep.subr.bf16.mxu1 %v2621_v13  ;;  %1796 = vmatprep.mubr.bf16.mxu0 %v2235_v33  ;;  %v2691_v13 = vld [vmem:[%s3863_s1 + $0x3a0] ss:$8 sps:$4 sm:$0xff]   ;;  %v2717_v33 = vld [vmem:[%s3863_s1 + $0x564] ss:$8 sps:$4 sm:$0xff]  }
  0x46   :  { %1849 = vmatprep.mubr.bf16.mxu1 %v2237_v35  ;;  %v2241_v35 = vcombine.high %v33_v30, %v41_v31 }
  0x47   :  { %1863 = vmatpush1.bf16.msra.mxu0 %v2616_v14  ;;  %v2696_v14 = vld [vmem:[%s3863_s1 + $0x294] ss:$8 sps:$4 sm:$0xff]  }
  0x48   :  { %1916 = vmatpush1.bf16.msra.mxu1 %v2619_v15  ;;  %1864 = vmatprep.subr.bf16.mxu0 %v2624_v16  ;;  %v2699_v15 = vld [vmem:[%s3863_s1 + $0x394] ss:$8 sps:$4 sm:$0xff]   ;;  %v2694_v16 = vld [vmem:[%s3863_s1 + $0x290] ss:$8 sps:$4 sm:$0xff]  }
  0x49   :  { %1917 = vmatprep.subr.bf16.mxu1 %v2627_v17  ;;  %v2697_v17 = vld [vmem:[%s3863_s1 + $0x390] ss:$8 sps:$4 sm:$0xff]  }
  0x4a   :  { %1797 = vmatmul.mubr.bf16.gmra.mxu0 %v2234_v34 }
  0x4b   :  { %1865 = vmatpush1.bf16.msra.mxu0 %v2622_v18  ;;  %1850 = vmatmul.mubr.bf16.gmra.mxu1 %v2236_v37  ;;  %v2702_v18 = vld [vmem:[%s3863_s1 + $0x284] ss:$8 sps:$4 sm:$0xff]   ;;  %v2715_v37 = vld [vmem:[%s3863_s1 + $0x560] ss:$8 sps:$4 sm:$0xff]  }
  0x4c   :  { %1918 = vmatpush1.bf16.msra.mxu1 %v2625_v19  ;;  %1866 = vmatprep.subr.bf16.mxu0 %v2630_v20  ;;  %v2705_v19 = vld [vmem:[%s3863_s1 + $0x384] ss:$8 sps:$4 sm:$0xff]   ;;  %v2700_v20 = vld [vmem:[%s3863_s1 + $0x280] ss:$8 sps:$4 sm:$0xff]  }
  0x4d   :  { %1919 = vmatprep.subr.bf16.mxu1 %v2633_v21  ;;  %1892 = vmatprep.mubr.bf16.mxu0 %v2223_v49  ;;  %v2703_v21 = vld [vmem:[%s3863_s1 + $0x380] ss:$8 sps:$4 sm:$0xff]   ;;  %v2729_v49 = vld [vmem:[%s3863_s1 + $0x544] ss:$8 sps:$4 sm:$0xff]  }
  0x4e   :  { %1945 = vmatprep.mubr.bf16.mxu1 %v2225_v51  ;;  %v2229_v51 = vcombine.high %v3415_v46, %v3420_v47 }
  0x4f   :  { %1867 = vmatpush1.bf16.msra.mxu0 %v2628_v22  ;;  %v2708_v22 = vld [vmem:[%s3863_s1 + $0x474] ss:$8 sps:$4 sm:$0xff]  }
  0x50   :  { %1920 = vmatpush1.bf16.msra.mxu1 %v2631_v23  ;;  %1868 = vmatprep.subr.bf16.mxu0 %v2636_v24  ;;  %v2711_v23 = vld [vmem:[%s3863_s1 + $0x574] ss:$8 sps:$4 sm:$0xff]   ;;  %v2706_v24 = vld [vmem:[%s3863_s1 + $0x470] ss:$8 sps:$4 sm:$0xff]  }
  0x51   :  { %1921 = vmatprep.subr.bf16.mxu1 %v2639_v25  ;;  %v2709_v25 = vld [vmem:[%s3863_s1 + $0x570] ss:$8 sps:$4 sm:$0xff]  }
  0x53   :  { %1869 = vmatpush1.bf16.msra.mxu0 %v2634_v26  ;;  %v32_v26 = vld [vmem:[%s3864_s0 + $0x90] sm:$0xff] }
  0x54   :  { %1922 = vmatpush1.bf16.msra.mxu1 %v2637_v27  ;;  %1870 = vmatprep.subr.bf16.mxu0 %v2642_v32  ;;  %v40_v27 = vld [vmem:[%s3864_s0 + $0xd0] sm:$0xff]  ;;  %v2714_v32 = vld [vmem:[%s3863_s1 + $0x464] ss:$8 sps:$4 sm:$0xff]  }
  0x55   :  { %1923 = vmatprep.subr.bf16.mxu1 %v2645_v36  ;;  %v2239_v34 = vcombine.high %v32_v26, %v40_v27  ;;  %v2712_v36 = vld [vmem:[%s3863_s1 + $0x460] ss:$8 sps:$4 sm:$0xff]  }
  0x57   :  { %1871 = vmatpush1.bf16.msra.mxu0 %v2640_v38  ;;  %v2720_v38 = vld [vmem:[%s3863_s1 + $0x454] ss:$8 sps:$4 sm:$0xff]  }
  0x58   :  { %1924 = vmatpush1.bf16.msra.mxu1 %v2643_v39  ;;  %1872 = vmatprep.subr.bf16.mxu0 %v2648_v40  ;;  %v2723_v39 = vld [vmem:[%s3863_s1 + $0x554] ss:$8 sps:$4 sm:$0xff]   ;;  %v2718_v40 = vld [vmem:[%s3863_s1 + $0x450] ss:$8 sps:$4 sm:$0xff]  }
  0x59   :  { %1925 = vmatprep.subr.bf16.mxu1 %v2651_v41  ;;  %v2721_v41 = vld [vmem:[%s3863_s1 + $0x550] ss:$8 sps:$4 sm:$0xff]  }
  0x5b   :  { %1873 = vmatpush1.bf16.msra.mxu0 %v2646_v42  ;;  %v3405_v42 = vld [vmem:[%s3864_s0 + $0x20] sm:$0xff] }
  0x5c   :  { %1926 = vmatpush1.bf16.msra.mxu1 %v2649_v43  ;;  %1874 = vmatprep.subr.bf16.mxu0 %v2654_v44  ;;  %v3410_v43 = vld [vmem:[%s3864_s0 + $0x60] sm:$0xff]  ;;  %v2238_v44 = vcombine.low %v32_v26, %v40_v27 }
  0x5d   :  { %1927 = vmatprep.subr.bf16.mxu1 %v2657_v45  ;;  %v2240_v45 = vcombine.low %v33_v30, %v41_v31  ;;  %v2227_v50 = vcombine.high %v3405_v42, %v3410_v43  ;;  %v2786_v26 = vld [vmem:[%s3863_s1 + $0x4a4] ss:$8 sps:$4 sm:$0xff]   ;;  %v2792_v30 = vld [vmem:[%s3863_s1 + $0x494] ss:$8 sps:$4 sm:$0xff]  }
  0x5e   :  { %v2789_v27 = vld [vmem:[%s3863_s1 + $0x5a4] ss:$8 sps:$4 sm:$0xff]   ;;  %v2795_v31 = vld [vmem:[%s3863_s1 + $0x594] ss:$8 sps:$4 sm:$0xff]  }
  0x5f   :  { %1875 = vmatpush1.bf16.msra.mxu0 %v2652_v52  ;;  %v2724_v52 = vld [vmem:[%s3863_s1 + $0x440] ss:$8 sps:$4 sm:$0xff]  }
  0x60   :  { %1928 = vmatpush1.bf16.msra.mxu1 %v2655_v53  ;;  %1876 = vmatprep.subr.bf16.mxu0 %v2660_v54  ;;  %v2727_v53 = vld [vmem:[%s3863_s1 + $0x540] ss:$8 sps:$4 sm:$0xff]   ;;  %v2732_v54 = vld [vmem:[%s3863_s1 + $0x434] ss:$8 sps:$4 sm:$0xff]  }
  0x61   :  { %1929 = vmatprep.subr.bf16.mxu1 %v2663_v55  ;;  %v2735_v55 = vld [vmem:[%s3863_s1 + $0x534] ss:$8 sps:$4 sm:$0xff]  }
  0x63   :  { %1877 = vmatpush2.bf16.msra.mxu0 %v2658_v56  ;;  %v2730_v56 = vld [vmem:[%s3863_s1 + $0x430] ss:$8 sps:$4 sm:$0xff]  }
  0x64   :  { %1930 = vmatpush2.bf16.msra.mxu1 %v2661_v57  ;;  %1878 = vmatprep.subr.bf16.mxu0 %v2666_v58  ;;  %v2733_v57 = vld [vmem:[%s3863_s1 + $0x530] ss:$8 sps:$4 sm:$0xff]   ;;  %v2738_v58 = vld [vmem:[%s3863_s1 + $0x424] ss:$8 sps:$4 sm:$0xff]  }
  0x65   :  { %1931 = vmatprep.subr.bf16.mxu1 %v2669_v59  ;;  %v2741_v59 = vld [vmem:[%s3863_s1 + $0x524] ss:$8 sps:$4 sm:$0xff]  }
  0x67   :  { %1879 = vmatpush2.bf16.msra.mxu0 %v2664_v60  ;;  %v2736_v60 = vld [vmem:[%s3863_s1 + $0x420] ss:$8 sps:$4 sm:$0xff]  }
  0x68   :  { %1932 = vmatpush2.bf16.msra.mxu1 %v2667_v61  ;;  %1880 = vmatprep.subr.bf16.mxu0 %v2672_v62  ;;  %v2739_v61 = vld [vmem:[%s3863_s1 + $0x520] ss:$8 sps:$4 sm:$0xff]   ;;  %v2744_v62 = vld [vmem:[%s3863_s1 + $0x414] ss:$8 sps:$4 sm:$0xff]  }
  0x69   :  { %1933 = vmatprep.subr.bf16.mxu1 %v2675_v63  ;;  %v2747_v63 = vld [vmem:[%s3863_s1 + $0x514] ss:$8 sps:$4 sm:$0xff]  }
  0x6b   :  { %1881 = vmatpush2.bf16.msra.mxu0 %v2670_v0  ;;  %v2742_v0 = vld [vmem:[%s3863_s1 + $0x410] ss:$8 sps:$4 sm:$0xff]  }
  0x6c   :  { %1934 = vmatpush2.bf16.msra.mxu1 %v2673_v1  ;;  %1882 = vmatprep.subr.bf16.mxu0 %v2678_v2  ;;  %v2745_v1 = vld [vmem:[%s3863_s1 + $0x510] ss:$8 sps:$4 sm:$0xff]   ;;  %v2750_v2 = vld [vmem:[%s3863_s1 + $0x404] ss:$8 sps:$4 sm:$0xff]  }
  0x6d   :  { %1935 = vmatprep.subr.bf16.mxu1 %v2681_v3  ;;  %v2753_v3 = vld [vmem:[%s3863_s1 + $0x504] ss:$8 sps:$4 sm:$0xff]  }
  0x6f   :  { %1883 = vmatpush2.bf16.msra.mxu0 %v2676_v4  ;;  %v2748_v4 = vld [vmem:[%s3863_s1 + $0x400] ss:$8 sps:$4 sm:$0xff]  }
  0x70   :  { %1936 = vmatpush2.bf16.msra.mxu1 %v2679_v5  ;;  %1884 = vmatprep.subr.bf16.mxu0 %v2684_v6  ;;  %v2751_v5 = vld [vmem:[%s3863_s1 + $0x500] ss:$8 sps:$4 sm:$0xff]   ;;  %v2756_v6 = vld [vmem:[%s3863_s1 + $0x4f4] ss:$8 sps:$4 sm:$0xff]  }
  0x71   :  { %1937 = vmatprep.subr.bf16.mxu1 %v2687_v7  ;;  %v2759_v7 = vld [vmem:[%s3863_s1 + $0x5f4] ss:$8 sps:$4 sm:$0xff]  }
  0x73   :  { %1885 = vmatpush2.bf16.msra.mxu0 %v2682_v8  ;;  %v2754_v8 = vld [vmem:[%s3863_s1 + $0x4f0] ss:$8 sps:$4 sm:$0xff]  }
  0x74   :  { %1938 = vmatpush2.bf16.msra.mxu1 %v2685_v9  ;;  %1886 = vmatprep.subr.bf16.mxu0 %v2690_v10  ;;  %v2757_v9 = vld [vmem:[%s3863_s1 + $0x5f0] ss:$8 sps:$4 sm:$0xff]   ;;  %v2762_v10 = vld [vmem:[%s3863_s1 + $0x4e4] ss:$8 sps:$4 sm:$0xff]  }
  0x75   :  { %1939 = vmatprep.subr.bf16.mxu1 %v2693_v11  ;;  %v2765_v11 = vld [vmem:[%s3863_s1 + $0x5e4] ss:$8 sps:$4 sm:$0xff]  }
  0x77   :  { %1887 = vmatpush2.bf16.msra.mxu0 %v2688_v12  ;;  %v2760_v12 = vld [vmem:[%s3863_s1 + $0x4e0] ss:$8 sps:$4 sm:$0xff]  }
  0x78   :  { %1940 = vmatpush2.bf16.msra.mxu1 %v2691_v13  ;;  %1888 = vmatprep.subr.bf16.mxu0 %v2696_v14  ;;  %v2763_v13 = vld [vmem:[%s3863_s1 + $0x5e0] ss:$8 sps:$4 sm:$0xff]   ;;  %v2768_v14 = vld [vmem:[%s3863_s1 + $0x4d4] ss:$8 sps:$4 sm:$0xff]  }
  0x79   :  { %1941 = vmatprep.subr.bf16.mxu1 %v2699_v15  ;;  %v2771_v15 = vld [vmem:[%s3863_s1 + $0x5d4] ss:$8 sps:$4 sm:$0xff]  }
  0x7b   :  { %1889 = vmatpush2.bf16.msra.mxu0 %v2694_v16  ;;  %v2766_v16 = vld [vmem:[%s3863_s1 + $0x4d0] ss:$8 sps:$4 sm:$0xff]  }
  0x7c   :  { %1942 = vmatpush2.bf16.msra.mxu1 %v2697_v17  ;;  %1890 = vmatprep.subr.bf16.mxu0 %v2702_v18  ;;  %v2769_v17 = vld [vmem:[%s3863_s1 + $0x5d0] ss:$8 sps:$4 sm:$0xff]   ;;  %v2774_v18 = vld [vmem:[%s3863_s1 + $0x4c4] ss:$8 sps:$4 sm:$0xff]  }
  0x7d   :  { %1943 = vmatprep.subr.bf16.mxu1 %v2705_v19  ;;  %v2777_v19 = vld [vmem:[%s3863_s1 + $0x5c4] ss:$8 sps:$4 sm:$0xff]  }
  0x7f   :  { %1891 = vmatpush2.bf16.msra.mxu0 %v2700_v20  ;;  %v2772_v20 = vld [vmem:[%s3863_s1 + $0x4c0] ss:$8 sps:$4 sm:$0xff]  }
  0x80   :  { %1944 = vmatpush2.bf16.msra.mxu1 %v2703_v21  ;;  %1966 = vmatprep.subr.bf16.mxu0 %v2708_v22  ;;  %v2775_v21 = vld [vmem:[%s3863_s1 + $0x5c0] ss:$8 sps:$4 sm:$0xff]   ;;  %v2780_v22 = vld [vmem:[%s3863_s1 + $0x4b4] ss:$8 sps:$4 sm:$0xff]  }
  0x81   :  { %2019 = vmatprep.subr.bf16.mxu1 %v2711_v23  ;;  %v2783_v23 = vld [vmem:[%s3863_s1 + $0x5b4] ss:$8 sps:$4 sm:$0xff]  }
  0x82   :  { %1893 = vmatmul.mubr.bf16.vlgmr.msra.gmra.mxu0 %v2222_v28  ;;  %v2784_v28 = vld [vmem:[%s3863_s1 + $0x4a0] ss:$8 sps:$4 sm:$0xff]  }
  0x83   :  { %1946 = vmatmul.mubr.bf16.vlgmr.msra.gmra.mxu1 %v2224_v29  ;;  %1967 = vmatpush1.bf16.msra.mxu0 %v2706_v24  ;;  %v2778_v24 = vld [vmem:[%s3863_s1 + $0x4b0] ss:$8 sps:$4 sm:$0xff]   ;;  %v2787_v29 = vld [vmem:[%s3863_s1 + $0x5a0] ss:$8 sps:$4 sm:$0xff]  }
  0x84   :  { %2020 = vmatpush1.bf16.msra.mxu1 %v2709_v25  ;;  %1968 = vmatprep.subr.bf16.mxu0 %v2714_v32  ;;  %v2781_v25 = vld [vmem:[%s3863_s1 + $0x5b0] ss:$8 sps:$4 sm:$0xff]  }
  0x85   :  { %2021 = vmatprep.subr.bf16.mxu1 %v2717_v33  ;;  %1902 = vmatprep.mubr.bf16.mxu0 %v2239_v34  ;;  %v2790_v32 = vld [vmem:[%s3863_s1 + $0x490] ss:$8 sps:$4 sm:$0xff]   ;;  %v2798_v34 = vld [vmem:[%s3863_s1 + $0x484] ss:$8 sps:$4 sm:$0xff]  }
  0x86   :  { %1955 = vmatprep.mubr.bf16.mxu1 %v2241_v35  ;;  %v2793_v33 = vld [vmem:[%s3863_s1 + $0x590] ss:$8 sps:$4 sm:$0xff]   ;;  %v2801_v35 = vld [vmem:[%s3863_s1 + $0x584] ss:$8 sps:$4 sm:$0xff]  }
  0x87   :  { %1969 = vmatpush1.bf16.msra.mxu0 %v2712_v36  ;;  %v2796_v36 = vld [vmem:[%s3863_s1 + $0x480] ss:$8 sps:$4 sm:$0xff]  }
  0x88   :  { %2022 = vmatpush1.bf16.msra.mxu1 %v2715_v37  ;;  %1970 = vmatprep.subr.bf16.mxu0 %v2720_v38  ;;  %v2799_v37 = vld [vmem:[%s3863_s1 + $0x580] ss:$8 sps:$4 sm:$0xff]   ;;  %v2804_v38 = vld [vmem:[%s3863_s1 + $0x674] ss:$8 sps:$4 sm:$0xff]  }
  0x89   :  { %2023 = vmatprep.subr.bf16.mxu1 %v2723_v39  ;;  %v2807_v39 = vld [vmem:[%s3863_s1 + $0x774] ss:$8 sps:$4 sm:$0xff]  }
  0x8a   :  { %1903 = vmatmul.mubr.bf16.gmra.mxu0 %v2238_v44  ;;  %v2228_v44 = vcombine.low %v3415_v46, %v3420_v47  ;;  %v2810_v46 = vld [vmem:[%s3863_s1 + $0x664] ss:$8 sps:$4 sm:$0xff]  }
  0x8b   :  { %1956 = vmatmul.mubr.bf16.gmra.mxu1 %v2240_v45  ;;  %1971 = vmatpush1.bf16.msra.mxu0 %v2718_v40  ;;  %v34_v40 = vld [vmem:[%s3864_s0 + $0xa0] sm:$0xff] }
  0x8c   :  { %2024 = vmatpush1.bf16.msra.mxu1 %v2721_v41  ;;  %1972 = vmatprep.subr.bf16.mxu0 %v2726_v48  ;;  %v2226_v41 = vcombine.low %v3405_v42, %v3410_v43  ;;  %v42_v45 = vld [vmem:[%s3864_s0 + $0xe0] sm:$0xff]  ;;  %v35_v48 = vld [vmem:[%s3864_s0 + $0xa8] sm:$0xff]  ;;  %v2802_v42 = vld [vmem:[%s3863_s1 + $0x670] ss:$8 sps:$4 sm:$0xff]  }
  0x8d   :  { %2025 = vmatprep.subr.bf16.mxu1 %v2729_v49  ;;  %1998 = vmatprep.mubr.bf16.mxu0 %v2227_v50  ;;  %v43_v49 = vld [vmem:[%s3864_s0 + $0xe8] sm:$0xff]  ;;  %v2805_v43 = vld [vmem:[%s3863_s1 + $0x770] ss:$8 sps:$4 sm:$0xff]   ;;  %v2243_v50 = vcombine.high %v34_v40, %v42_v45 }
  0x8e   :  { %2051 = vmatprep.mubr.bf16.mxu1 %v2229_v51  ;;  %v2813_v47 = vld [vmem:[%s3863_s1 + $0x764] ss:$8 sps:$4 sm:$0xff]   ;;  %v2245_v51 = vcombine.high %v35_v48, %v43_v49 }
  0x8f   :  { %1973 = vmatpush1.bf16.msra.mxu0 %v2724_v52  ;;  %v2808_v52 = vld [vmem:[%s3863_s1 + $0x660] ss:$8 sps:$4 sm:$0xff]  }
  0x90   :  { %2026 = vmatpush1.bf16.msra.mxu1 %v2727_v53  ;;  %1974 = vmatprep.subr.bf16.mxu0 %v2732_v54  ;;  %v2811_v53 = vld [vmem:[%s3863_s1 + $0x760] ss:$8 sps:$4 sm:$0xff]   ;;  %v2816_v54 = vld [vmem:[%s3863_s1 + $0x654] ss:$8 sps:$4 sm:$0xff]  }
  0x91   :  { %2027 = vmatprep.subr.bf16.mxu1 %v2735_v55  ;;  %v2819_v55 = vld [vmem:[%s3863_s1 + $0x754] ss:$8 sps:$4 sm:$0xff]  }
  0x93   :  { %1975 = vmatpush1.bf16.msra.mxu0 %v2730_v56  ;;  %v3631_v56 = vld [vmem:[%s3864_s0 + $0x30] sm:$0xff] }
  0x94   :  { %2028 = vmatpush1.bf16.msra.mxu1 %v2733_v57  ;;  %1976 = vmatprep.subr.bf16.mxu0 %v2738_v58  ;;  %v2242_v57 = vcombine.low %v34_v40, %v42_v45  ;;  %v2244_v58 = vcombine.low %v35_v48, %v43_v49  ;;  %v2874_v40 = vld [vmem:[%s3863_s1 + $0x6b0] ss:$8 sps:$4 sm:$0xff]   ;;  %v2885_v45 = vld [vmem:[%s3863_s1 + $0x7a4] ss:$8 sps:$4 sm:$0xff]   ;;  %v2880_v48 = vld [vmem:[%s3863_s1 + $0x6a0] ss:$8 sps:$4 sm:$0xff]  }
  0x95   :  { %2029 = vmatprep.subr.bf16.mxu1 %v2741_v59  ;;  %v3636_v59 = vld [vmem:[%s3864_s0 + $0x70] sm:$0xff]  ;;  %v2883_v49 = vld [vmem:[%s3863_s1 + $0x7a0] ss:$8 sps:$4 sm:$0xff]  }
  0x97   :  { %1977 = vmatpush1.bf16.msra.mxu0 %v2736_v60  ;;  %v3641_v60 = vld [vmem:[%s3864_s0 + $0x38] sm:$0xff] }
  0x98   :  { %2030 = vmatpush1.bf16.msra.mxu1 %v2739_v61  ;;  %1978 = vmatprep.subr.bf16.mxu0 %v2744_v62  ;;  %v3646_v61 = vld [vmem:[%s3864_s0 + $0x78] sm:$0xff] }
  0x99   :  { %2031 = vmatprep.subr.bf16.mxu1 %v2747_v63  ;;  %v2814_v62 = vld [vmem:[%s3863_s1 + $0x650] ss:$8 sps:$4 sm:$0xff]  }
  0x9a   :  { %v2817_v63 = vld [vmem:[%s3863_s1 + $0x750] ss:$8 sps:$4 sm:$0xff]  }
  0x9b   :  { %1979 = vmatpush1.bf16.msra.mxu0 %v2742_v0  ;;  %v2822_v0 = vld [vmem:[%s3863_s1 + $0x644] ss:$8 sps:$4 sm:$0xff]  }
  0x9c   :  { %2032 = vmatpush1.bf16.msra.mxu1 %v2745_v1  ;;  %1980 = vmatprep.subr.bf16.mxu0 %v2750_v2  ;;  %v2825_v1 = vld [vmem:[%s3863_s1 + $0x744] ss:$8 sps:$4 sm:$0xff]   ;;  %v2231_v2 = vcombine.high %v3631_v56, %v3636_v59 }
  0x9d   :  { %2033 = vmatprep.subr.bf16.mxu1 %v2753_v3  ;;  %v2233_v3 = vcombine.high %v3641_v60, %v3646_v61 }
  0x9f   :  { %1981 = vmatpush1.bf16.msra.mxu0 %v2748_v4  ;;  %v2820_v4 = vld [vmem:[%s3863_s1 + $0x640] ss:$8 sps:$4 sm:$0xff]  }
  0xa0   :  { %2034 = vmatpush1.bf16.msra.mxu1 %v2751_v5  ;;  %1982 = vmatprep.subr.bf16.mxu0 %v2756_v6  ;;  %v2823_v5 = vld [vmem:[%s3863_s1 + $0x740] ss:$8 sps:$4 sm:$0xff]   ;;  %v2828_v6 = vld [vmem:[%s3863_s1 + $0x634] ss:$8 sps:$4 sm:$0xff]  }
  0xa1   :  { %2035 = vmatprep.subr.bf16.mxu1 %v2759_v7  ;;  %v2831_v7 = vld [vmem:[%s3863_s1 + $0x734] ss:$8 sps:$4 sm:$0xff]  }
  0xa3   :  { %1983 = vmatpush2.bf16.msra.mxu0 %v2754_v8  ;;  %v2826_v8 = vld [vmem:[%s3863_s1 + $0x630] ss:$8 sps:$4 sm:$0xff]  }
  0xa4   :  { %2036 = vmatpush2.bf16.msra.mxu1 %v2757_v9  ;;  %1984 = vmatprep.subr.bf16.mxu0 %v2762_v10  ;;  %v2829_v9 = vld [vmem:[%s3863_s1 + $0x730] ss:$8 sps:$4 sm:$0xff]   ;;  %v2834_v10 = vld [vmem:[%s3863_s1 + $0x624] ss:$8 sps:$4 sm:$0xff]  }
  0xa5   :  { %2037 = vmatprep.subr.bf16.mxu1 %v2765_v11  ;;  %v2837_v11 = vld [vmem:[%s3863_s1 + $0x724] ss:$8 sps:$4 sm:$0xff]  }
  0xa7   :  { %1985 = vmatpush2.bf16.msra.mxu0 %v2760_v12  ;;  %v2832_v12 = vld [vmem:[%s3863_s1 + $0x620] ss:$8 sps:$4 sm:$0xff]  }
  0xa8   :  { %2038 = vmatpush2.bf16.msra.mxu1 %v2763_v13  ;;  %1986 = vmatprep.subr.bf16.mxu0 %v2768_v14  ;;  %v2835_v13 = vld [vmem:[%s3863_s1 + $0x720] ss:$8 sps:$4 sm:$0xff]   ;;  %v2840_v14 = vld [vmem:[%s3863_s1 + $0x614] ss:$8 sps:$4 sm:$0xff]  }
  0xa9   :  { %2039 = vmatprep.subr.bf16.mxu1 %v2771_v15  ;;  %v2843_v15 = vld [vmem:[%s3863_s1 + $0x714] ss:$8 sps:$4 sm:$0xff]  }
  0xab   :  { %1987 = vmatpush2.bf16.msra.mxu0 %v2766_v16  ;;  %v2838_v16 = vld [vmem:[%s3863_s1 + $0x610] ss:$8 sps:$4 sm:$0xff]  }
  0xac   :  { %2040 = vmatpush2.bf16.msra.mxu1 %v2769_v17  ;;  %1988 = vmatprep.subr.bf16.mxu0 %v2774_v18  ;;  %v2841_v17 = vld [vmem:[%s3863_s1 + $0x710] ss:$8 sps:$4 sm:$0xff]   ;;  %v2846_v18 = vld [vmem:[%s3863_s1 + $0x604] ss:$8 sps:$4 sm:$0xff]  }
  0xad   :  { %2041 = vmatprep.subr.bf16.mxu1 %v2777_v19  ;;  %v2849_v19 = vld [vmem:[%s3863_s1 + $0x704] ss:$8 sps:$4 sm:$0xff]  }
  0xaf   :  { %1989 = vmatpush2.bf16.msra.mxu0 %v2772_v20  ;;  %v2844_v20 = vld [vmem:[%s3863_s1 + $0x600] ss:$8 sps:$4 sm:$0xff]  }
  0xb0   :  { %2042 = vmatpush2.bf16.msra.mxu1 %v2775_v21  ;;  %1990 = vmatprep.subr.bf16.mxu0 %v2780_v22  ;;  %v2847_v21 = vld [vmem:[%s3863_s1 + $0x700] ss:$8 sps:$4 sm:$0xff]   ;;  %v2852_v22 = vld [vmem:[%s3863_s1 + $0x6f4] ss:$8 sps:$4 sm:$0xff]  }
  0xb1   :  { %2043 = vmatprep.subr.bf16.mxu1 %v2783_v23  ;;  %v2855_v23 = vld [vmem:[%s3863_s1 + $0x7f4] ss:$8 sps:$4 sm:$0xff]  }
  0xb3   :  { %1991 = vmatpush2.bf16.msra.mxu0 %v2778_v24  ;;  %v2850_v24 = vld [vmem:[%s3863_s1 + $0x6f0] ss:$8 sps:$4 sm:$0xff]  }
  0xb4   :  { %2044 = vmatpush2.bf16.msra.mxu1 %v2781_v25  ;;  %1992 = vmatprep.subr.bf16.mxu0 %v2786_v26  ;;  %v2853_v25 = vld [vmem:[%s3863_s1 + $0x7f0] ss:$8 sps:$4 sm:$0xff]   ;;  %v2858_v26 = vld [vmem:[%s3863_s1 + $0x6e4] ss:$8 sps:$4 sm:$0xff]  }
  0xb5   :  { %2045 = vmatprep.subr.bf16.mxu1 %v2789_v27  ;;  %v2861_v27 = vld [vmem:[%s3863_s1 + $0x7e4] ss:$8 sps:$4 sm:$0xff]  }
  0xb7   :  { %1993 = vmatpush2.bf16.msra.mxu0 %v2784_v28  ;;  %v2856_v28 = vld [vmem:[%s3863_s1 + $0x6e0] ss:$8 sps:$4 sm:$0xff]  }
  0xb8   :  { %2046 = vmatpush2.bf16.msra.mxu1 %v2787_v29  ;;  %1994 = vmatprep.subr.bf16.mxu0 %v2792_v30  ;;  %v2859_v29 = vld [vmem:[%s3863_s1 + $0x7e0] ss:$8 sps:$4 sm:$0xff]   ;;  %v2864_v30 = vld [vmem:[%s3863_s1 + $0x6d4] ss:$8 sps:$4 sm:$0xff]  }
  0xb9   :  { %2047 = vmatprep.subr.bf16.mxu1 %v2795_v31  ;;  %v2867_v31 = vld [vmem:[%s3863_s1 + $0x7d4] ss:$8 sps:$4 sm:$0xff]  }
  0xbb   :  { %1995 = vmatpush2.bf16.msra.mxu0 %v2790_v32  ;;  %v2862_v32 = vld [vmem:[%s3863_s1 + $0x6d0] ss:$8 sps:$4 sm:$0xff]  }
  0xbc   :  { %2048 = vmatpush2.bf16.msra.mxu1 %v2793_v33  ;;  %1996 = vmatprep.subr.bf16.mxu0 %v2798_v34  ;;  %v2865_v33 = vld [vmem:[%s3863_s1 + $0x7d0] ss:$8 sps:$4 sm:$0xff]   ;;  %v2870_v34 = vld [vmem:[%s3863_s1 + $0x6c4] ss:$8 sps:$4 sm:$0xff]  }
  0xbd   :  { %2049 = vmatprep.subr.bf16.mxu1 %v2801_v35  ;;  %v2873_v35 = vld [vmem:[%s3863_s1 + $0x7c4] ss:$8 sps:$4 sm:$0xff]  }
  0xbf   :  { %1997 = vmatpush2.bf16.msra.mxu0 %v2796_v36  ;;  %v2868_v36 = vld [vmem:[%s3863_s1 + $0x6c0] ss:$8 sps:$4 sm:$0xff]  }
  0xc0   :  { %2050 = vmatpush2.bf16.msra.mxu1 %v2799_v37  ;;  %2072 = vmatprep.subr.bf16.mxu0 %v2804_v38  ;;  %v2871_v37 = vld [vmem:[%s3863_s1 + $0x7c0] ss:$8 sps:$4 sm:$0xff]   ;;  %v2876_v38 = vld [vmem:[%s3863_s1 + $0x6b4] ss:$8 sps:$4 sm:$0xff]  }
  0xc1   :  { %2125 = vmatprep.subr.bf16.mxu1 %v2807_v39  ;;  %v2879_v39 = vld [vmem:[%s3863_s1 + $0x7b4] ss:$8 sps:$4 sm:$0xff]  }
  0xc2   :  { %1999 = vmatmul.mubr.bf16.vlgmr.msra.gmra.mxu0 %v2226_v41  ;;  %v2877_v41 = vld [vmem:[%s3863_s1 + $0x7b0] ss:$8 sps:$4 sm:$0xff]  }
  0xc3   :  { %2052 = vmatmul.mubr.bf16.vlgmr.msra.gmra.mxu1 %v2228_v44  ;;  %2073 = vmatpush1.bf16.msra.mxu0 %v2802_v42  ;;  %v2882_v44 = vld [vmem:[%s3863_s1 + $0x6a4] ss:$8 sps:$4 sm:$0xff]   ;;  %v2888_v42 = vld [vmem:[%s3863_s1 + $0x694] ss:$8 sps:$4 sm:$0xff]  }
  0xc4   :  { %2126 = vmatpush1.bf16.msra.mxu1 %v2805_v43  ;;  %2074 = vmatprep.subr.bf16.mxu0 %v2810_v46  ;;  %v2891_v43 = vld [vmem:[%s3863_s1 + $0x794] ss:$8 sps:$4 sm:$0xff]   ;;  %v2886_v46 = vld [vmem:[%s3863_s1 + $0x690] ss:$8 sps:$4 sm:$0xff]  }
  0xc5   :  { %2127 = vmatprep.subr.bf16.mxu1 %v2813_v47  ;;  %2008 = vmatprep.mubr.bf16.mxu0 %v2243_v50  ;;  %v2889_v47 = vld [vmem:[%s3863_s1 + $0x790] ss:$8 sps:$4 sm:$0xff]   ;;  %v2894_v50 = vld [vmem:[%s3863_s1 + $0x684] ss:$8 sps:$4 sm:$0xff]  }
  0xc6   :  { %2061 = vmatprep.mubr.bf16.mxu1 %v2245_v51  ;;  %v2897_v51 = vld [vmem:[%s3863_s1 + $0x784] ss:$8 sps:$4 sm:$0xff]  }
  0xc7   :  { %2075 = vmatpush1.bf16.msra.mxu0 %v2808_v52  ;;  %v2892_v52 = vld [vmem:[%s3863_s1 + $0x680] ss:$8 sps:$4 sm:$0xff]  }
  0xc8   :  { %2128 = vmatpush1.bf16.msra.mxu1 %v2811_v53  ;;  %2076 = vmatprep.subr.bf16.mxu0 %v2816_v54  ;;  %v2895_v53 = vld [vmem:[%s3863_s1 + $0x780] ss:$8 sps:$4 sm:$0xff]   ;;  %v36_v54 = vld [vmem:[%s3864_s0 + $0xb0] sm:$0xff] }
  0xc9   :  { %2129 = vmatprep.subr.bf16.mxu1 %v2819_v55  ;;  %v44_v55 = vld [vmem:[%s3864_s0 + $0xf0] sm:$0xff] }
  0xca   :  { %2009 = vmatmul.mubr.bf16.gmra.mxu0 %v2242_v57  ;;  %v37_v57 = vld [vmem:[%s3864_s0 + $0xb8] sm:$0xff] }
  0xcb   :  { %2062 = vmatmul.mubr.bf16.gmra.mxu1 %v2244_v58  ;;  %2077 = vmatpush1.bf16.msra.mxu0 %v2814_v62  ;;  %v45_v58 = vld [vmem:[%s3864_s0 + $0xf8] sm:$0xff]  ;;  %v2230_v62 = vcombine.low %v3631_v56, %v3636_v59 }
  0xcc   :  { %2130 = vmatpush1.bf16.msra.mxu1 %v2817_v63  ;;  %2078 = vmatprep.subr.bf16.mxu0 %v2822_v0  ;;  %v2232_v63 = vcombine.low %v3641_v60, %v3646_v61  ;;  %v2247_v0 = vcombine.high %v36_v54, %v44_v55 }
  0xcd   :  { %2131 = vmatprep.subr.bf16.mxu1 %v2825_v1  ;;  %2104 = vmatprep.mubr.bf16.mxu0 %v2231_v2  ;;  %v2249_v1 = vcombine.high %v37_v57, %v45_v58  ;;  %v2246_v2 = vcombine.low %v36_v54, %v44_v55 }
  0xce   :  { %2157 = vmatprep.mubr.bf16.mxu1 %v2233_v3  ;;  %v2248_v3 = vcombine.low %v37_v57, %v45_v58 }
  0xcf   :  { %2079 = vmatpush1.bf16.msra.mxu0 %v2820_v4 }
  0xd0   :  { %2132 = vmatpush1.bf16.msra.mxu1 %v2823_v5  ;;  %2080 = vmatprep.subr.bf16.mxu0 %v2828_v6 }
  0xd1   :  { %2133 = vmatprep.subr.bf16.mxu1 %v2831_v7 }
  0xd3   :  { %2081 = vmatpush1.bf16.msra.mxu0 %v2826_v8 }
  0xd4   :  { %2134 = vmatpush1.bf16.msra.mxu1 %v2829_v9  ;;  %2082 = vmatprep.subr.bf16.mxu0 %v2834_v10 }
  0xd5   :  { %2135 = vmatprep.subr.bf16.mxu1 %v2837_v11 }
  0xd7   :  { %2083 = vmatpush1.bf16.msra.mxu0 %v2832_v12 }
  0xd8   :  { %2136 = vmatpush1.bf16.msra.mxu1 %v2835_v13  ;;  %2084 = vmatprep.subr.bf16.mxu0 %v2840_v14 }
  0xd9   :  { %2137 = vmatprep.subr.bf16.mxu1 %v2843_v15 }
  0xdb   :  { %2085 = vmatpush1.bf16.msra.mxu0 %v2838_v16 }
  0xdc   :  { %2138 = vmatpush1.bf16.msra.mxu1 %v2841_v17  ;;  %2086 = vmatprep.subr.bf16.mxu0 %v2846_v18 }
  0xdd   :  { %2139 = vmatprep.subr.bf16.mxu1 %v2849_v19 }
  0xdf   :  { %2087 = vmatpush1.bf16.msra.mxu0 %v2844_v20 }
  0xe0   :  { %2140 = vmatpush1.bf16.msra.mxu1 %v2847_v21  ;;  %2088 = vmatprep.subr.bf16.mxu0 %v2852_v22 }
  0xe1   :  { %2141 = vmatprep.subr.bf16.mxu1 %v2855_v23 }
  0xe3   :  { %2089 = vmatpush2.bf16.msra.mxu0 %v2850_v24 }
  0xe4   :  { %2142 = vmatpush2.bf16.msra.mxu1 %v2853_v25  ;;  %2090 = vmatprep.subr.bf16.mxu0 %v2858_v26 }
  0xe5   :  { %2143 = vmatprep.subr.bf16.mxu1 %v2861_v27 }
  0xe7   :  { %2091 = vmatpush2.bf16.msra.mxu0 %v2856_v28 }
  0xe8   :  { %2144 = vmatpush2.bf16.msra.mxu1 %v2859_v29  ;;  %2092 = vmatprep.subr.bf16.mxu0 %v2864_v30  ;;  %v304_v30 = vlaneseq }
  0xe9   :  { %2145 = vmatprep.subr.bf16.mxu1 %v2867_v31 }
  0xeb   :  { %2093 = vmatpush2.bf16.msra.mxu0 %v2862_v32 }
  0xec   :  { %2146 = vmatpush2.bf16.msra.mxu1 %v2865_v33  ;;  %2094 = vmatprep.subr.bf16.mxu0 %v2870_v34  ;;  %v305_v34 = vshrl.u32 %v304_v30, 7 }
  0xed   :  { %2147 = vmatprep.subr.bf16.mxu1 %v2873_v35 }
  0xef   :  { %2095 = vmatpush2.bf16.msra.mxu0 %v2868_v36 }
  0xf0   :  { %2148 = vmatpush2.bf16.msra.mxu1 %v2871_v37  ;;  %2096 = vmatprep.subr.bf16.mxu0 %v2876_v38  ;;  %v306_v37 = vsub.s32 0, %v305_v34  ;;  %v302_v38 = vld [vmem:[%s3865_s2] sm:$0x3] }
  0xf1   :  { %2149 = vmatprep.subr.bf16.mxu1 %v2879_v39 }
  0xf3   :  { %2097 = vmatpush2.bf16.msra.mxu0 %v2874_v40  ;;  %v310_v40 = vsub.s32 1, %v305_v34 }
  0xf4   :  { %2150 = vmatpush2.bf16.msra.mxu1 %v2877_v41  ;;  %2098 = vmatprep.subr.bf16.mxu0 %v2882_v44  ;;  %v307_v44 = vrot.slane %v302_v38, %v306_v37 }
  0xf5   :  { %2151 = vmatprep.subr.bf16.mxu1 %v2885_v45 }
  0xf7   :  { %2099 = vmatpush2.bf16.msra.mxu0 %v2880_v48  ;;  %v311_v48 = vrot.slane %v302_v38, %v310_v40 }
  0xf8   :  { %2152 = vmatpush2.bf16.msra.mxu1 %v2883_v49  ;;  %2100 = vmatprep.subr.bf16.mxu0 %v2888_v42 }
  0xf9   :  { %2153 = vmatprep.subr.bf16.mxu1 %v2891_v43 }
  0xfb   :  { %2101 = vmatpush2.bf16.msra.mxu0 %v2886_v46 }
  0xfc   :  { %2154 = vmatpush2.bf16.msra.mxu1 %v2889_v47  ;;  %2102 = vmatprep.subr.bf16.mxu0 %v2894_v50 }
  0xfd   :  { %2155 = vmatprep.subr.bf16.mxu1 %v2897_v51 }
  0xff   :  { %2103 = vmatpush2.bf16.msra.mxu0 %v2892_v52 }
 0x100   :  { %2156 = vmatpush2.bf16.msra.mxu1 %v2895_v53 }
 0x102   :  { %2105 = vmatmul.mubr.bf16.vlgmr.msra.gmra.mxu0 %v2230_v62  ;;  %v1788_v4 = vpop.f32.mrf.mxu0 }
 0x103   :  { %2158 = vmatmul.mubr.bf16.vlgmr.msra.gmra.mxu1 %v2232_v63  ;;  %2114 = vmatprep.mubr.bf16.mxu0 %v2247_v0  ;;  %v1841_v5 = vpop.f32.mrf.mxu1  ;;  %v1789_v42 = vadd.f32 %v1788_v4, %v307_v44 }
 0x104   :  { %2167 = vmatprep.mubr.bf16.mxu1 %v2249_v1  ;;  %v1790_v6 = vpop.f32.mrf.mxu0 }
 0x105   :  { %v1843_v7 = vpop.f32.mrf.mxu1  ;;  %v1791_v46 = vadd.f32 %v1790_v6, %v311_v48  ;;  %v1842_v51 = vadd.f32 %v1841_v5, %v1789_v42 }
 0x106   :  { %v1792_v56 = vpop.f32.mrf.mxu0 }
 0x107   :  { %v1845_v59 = vpop.f32.mrf.mxu1  ;;  %v1793_v52 = vadd.f32 %v1792_v56, %v307_v44  ;;  %v1844_v53 = vadd.f32 %v1843_v7, %v1791_v46 }
 0x108   :  { %v1794_v8 = vpop.f32.mrf.mxu0 }
 0x109   :  { %v1847_v61 = vpop.f32.mrf.mxu1  ;;  %v1795_v54 = vadd.f32 %v1794_v8, %v311_v48  ;;  %v1846_v63 = vadd.f32 %v1845_v59, %v1793_v52 }
 0x10a   :  { %2115 = vmatmul.mubr.bf16.gmra.mxu0 %v2246_v2  ;;  %v1798_v60 = vpop.f32.mrf.mxu0 }
 0x10b   :  { %2168 = vmatmul.mubr.bf16.gmra.mxu1 %v2248_v3  ;;  %v1851_v10 = vpop.f32.mrf.mxu1  ;;  %v1799_v57 = vadd.f32 %v1798_v60, %v307_v44  ;;  %v1848_v2 = vadd.f32 %v1847_v61, %v1795_v54 }
 0x10c   :  { %v1800_v9 = vpop.f32.mrf.mxu0 }
 0x10d   :  { %v1853_v12 = vpop.f32.mrf.mxu1  ;;  %v1801_v1 = vadd.f32 %v1800_v9, %v311_v48  ;;  %v1852_v34 = vadd.f32 %v1851_v10, %v1799_v57 }
 0x10e   :  { %v1802_v11 = vpop.f32.mrf.mxu0 }
 0x10f   :  { %v3830_v14 = vpop.f32.mrf.mxu1  ;;  %v1803_v4 = vadd.f32 %v1802_v11, %v307_v44  ;;  %v1854_v56 = vadd.f32 %v1853_v12, %v1801_v1 }
 0x110   :  { %v1804_v13 = vpop.f32.mrf.mxu0 }
 0x111   :  { %v3832_v16 = vpop.f32.mrf.mxu1  ;;  %v1805_v7 = vadd.f32 %v1804_v13, %v311_v48  ;;  %v1856_v42 = vadd.f32 %v3830_v14, %v1803_v4 }
 0x113   :  { %v1858_v10 = vadd.f32 %v3832_v16, %v1805_v7 }
 0x142   :  { %v1894_v15 = vpop.f32.mrf.mxu0 }
 0x143   :  { %v1947_v17 = vpop.f32.mrf.mxu1  ;;  %v1895_v55 = vadd.f32 %v1894_v15, %v1842_v51 }
 0x144   :  { %v1896_v18 = vpop.f32.mrf.mxu0 }
 0x145   :  { %v1949_v19 = vpop.f32.mrf.mxu1  ;;  %v1897_v0 = vadd.f32 %v1896_v18, %v1844_v53  ;;  %v1948_v3 = vadd.f32 %v1947_v17, %v1895_v55 }
 0x146   :  { %v1898_v20 = vpop.f32.mrf.mxu0 }
 0x147   :  { %v1951_v21 = vpop.f32.mrf.mxu1  ;;  %v1899_v30 = vadd.f32 %v1898_v20, %v1846_v63  ;;  %v1950_v38 = vadd.f32 %v1949_v19, %v1897_v0 }
 0x148   :  { %v1900_v22 = vpop.f32.mrf.mxu0 }
 0x149   :  { %v1953_v23 = vpop.f32.mrf.mxu1  ;;  %v1901_v40 = vadd.f32 %v1900_v22, %v1848_v2  ;;  %v1952_v15 = vadd.f32 %v1951_v21, %v1899_v30 }
 0x14a   :  { %v1904_v24 = vpop.f32.mrf.mxu0 }
 0x14b   :  { %v1957_v25 = vpop.f32.mrf.mxu1  ;;  %v1905_v8 = vadd.f32 %v1904_v24, %v1852_v34  ;;  %v1954_v61 = vadd.f32 %v1953_v23, %v1901_v40 }
 0x14c   :  { %v1906_v26 = vpop.f32.mrf.mxu0 }
 0x14d   :  { %v3834_v27 = vpop.f32.mrf.mxu1  ;;  %v1907_v59 = vadd.f32 %v1906_v26, %v1854_v56  ;;  %v1958_v11 = vadd.f32 %v1957_v25, %v1905_v8 }
 0x14e   :  { %v1908_v28 = vpop.f32.mrf.mxu0 }
 0x14f   :  { %v3836_v29 = vpop.f32.mrf.mxu1  ;;  %v1909_v44 = vadd.f32 %v1908_v28, %v1856_v42  ;;  %v1960_v21 = vadd.f32 %v3834_v27, %v1907_v59 }
 0x150   :  { %v3838_v31 = vpop.f32.mrf.mxu0 }
 0x151   :  { %v3840_v32 = vpop.f32.mrf.mxu1  ;;  %v1911_v24 = vadd.f32 %v3838_v31, %v1858_v10 }
 0x182   :  { %v2000_v33 = vpop.f32.mrf.mxu0 }
 0x183   :  { %v2053_v35 = vpop.f32.mrf.mxu1  ;;  %v2001_v5 = vadd.f32 %v2000_v33, %v1948_v3 }
 0x184   :  { %v2002_v36 = vpop.f32.mrf.mxu0 }
 0x185   :  { %v2055_v39 = vpop.f32.mrf.mxu1  ;;  %v2003_v60 = vadd.f32 %v2002_v36, %v1950_v38  ;;  %v2054_v17 = vadd.f32 %v2053_v35, %v2001_v5 }
 0x186   :  { %v2004_v41 = vpop.f32.mrf.mxu0 }
 0x187   :  { %v2057_v45 = vpop.f32.mrf.mxu1  ;;  %v2005_v20 = vadd.f32 %v2004_v41, %v1952_v15  ;;  %v2056_v33 = vadd.f32 %v2055_v39, %v2003_v60  ;;  %v1962_v41 = vadd.f32 %v3836_v29, %v1909_v44 }
 0x188   :  { %v2006_v49 = vpop.f32.mrf.mxu0 }
 0x189   :  { %v2059_v43 = vpop.f32.mrf.mxu1  ;;  %v2007_v12 = vadd.f32 %v2006_v49, %v1954_v61  ;;  %v2058_v48 = vadd.f32 %v2057_v45, %v2005_v20  ;;  %v1964_v49 = vadd.f32 %v3840_v32, %v1911_v24 }
 0x18a   :  { %v2010_v47 = vpop.f32.mrf.mxu0 }
 0x18b   :  { %v2063_v50 = vpop.f32.mrf.mxu1  ;;  %v2011_v14 = vadd.f32 %v2010_v47, %v1958_v11  ;;  %v2060_v46 = vadd.f32 %v2059_v43, %v2007_v12 }
 0x18c   :  { %v2012_v58 = vpop.f32.mrf.mxu0 }
 0x18d   :  { %v2065_v62 = vpop.f32.mrf.mxu1  ;;  %v2013_v16 = vadd.f32 %v2012_v58, %v1960_v21  ;;  %v2064_v52 = vadd.f32 %v2063_v50, %v2011_v14 }
 0x18e   :  { %v2014_v37 = vpop.f32.mrf.mxu0 }
 0x18f   :  { %v2067_v6 = vpop.f32.mrf.mxu1  ;;  %v2015_v27 = vadd.f32 %v2014_v37, %v1962_v41  ;;  %v2066_v57 = vadd.f32 %v2065_v62, %v2013_v16 }
 0x190   :  { %v2016_v18 = vpop.f32.mrf.mxu0 }
 0x191   :  { %v2069_v9 = vpop.f32.mrf.mxu1  ;;  %v2017_v29 = vadd.f32 %v2016_v18, %v1964_v49  ;;  %v2068_v43 = vadd.f32 %v2067_v6, %v2015_v27 }
 0x193   :  { %v2070_v62 = vadd.f32 %v2069_v9, %v2017_v29 }
 0x1c2   :  { %v2106_v19 = vpop.f32.mrf.mxu0 }
 0x1c3   :  { %v2159_v22 = vpop.f32.mrf.mxu1  ;;  %v2107_v13 = vadd.f32 %v2106_v19, %v2054_v17 }
 0x1c4   :  { %v2108_v26 = vpop.f32.mrf.mxu0 }
 0x1c5   :  { %v2161_v36 = vpop.f32.mrf.mxu1  ;;  %v2160_v23 = vadd.f32 %v2159_v22, %v2107_v13  ;;  %v2109_v35 = vadd.f32 %v2108_v26, %v2056_v33 }
 0x1c6   :  { %v2110_v25 = vpop.f32.mrf.mxu0 }
 0x1c7   :  { %v2163_v28 = vpop.f32.mrf.mxu1  ;;  %v2162_v51 = vadd.f32 %v2161_v36, %v2109_v35  ;;  %v2111_v39 = vadd.f32 %v2110_v25, %v2058_v48  ;;  %v2178_v47 = vmax.f32 %v2160_v23, 0.0 }
 0x1c8   :  { %v2112_v53 = vpop.f32.mrf.mxu0 }
 0x1c9   :  { %v2165_v31 = vpop.f32.mrf.mxu1  ;;  %v2179_v54 = vmax.f32 %v2162_v51, 0.0  ;;  %v2164_v55 = vadd.f32 %v2163_v28, %v2111_v39  ;;  %v2113_v45 = vadd.f32 %v2112_v53, %v2060_v46 }
 0x1ca   :  { %v2116_v63 = vpop.f32.mrf.mxu0 }
 0x1cb   :  { %v2169_v0 = vpop.f32.mrf.mxu1  ;;  %v2510_v58 = vpack.c.bf16 %v2179_v54, %v2178_v47  ;;  %v2166_v1 = vadd.f32 %v2165_v31, %v2113_v45  ;;  %v2117_v2 = vadd.f32 %v2116_v63, %v2064_v52  ;;  %v2180_v32 = vmax.f32 %v2164_v55, 0.0 }
 0x1cc   :  { %v2118_v3 = vpop.f32.mrf.mxu0 }
 0x1cd   :  { %v2171_v30 = vpop.f32.mrf.mxu1  ;;  %2210 = vst [vmem:[%s3866_s3] sm:$0xff] %v2510_v58  ;;  %v2181_v50 = vmax.f32 %v2166_v1, 0.0  ;;  %v2170_v34 = vadd.f32 %v2169_v0, %v2117_v2  ;;  %v2119_v4 = vadd.f32 %v2118_v3, %v2066_v57 }
 0x1ce   :  { %v2120_v37 = vpop.f32.mrf.mxu0 }
 0x1cf   :  { %v2173_v38 = vpop.f32.mrf.mxu1  ;;  %v2511_v40 = vpack.c.bf16 %v2181_v50, %v2180_v32  ;;  %v2172_v5 = vadd.f32 %v2171_v30, %v2119_v4  ;;  %v2121_v56 = vadd.f32 %v2120_v37, %v2068_v43  ;;  %v2182_v6 = vmax.f32 %v2170_v34, 0.0 }
 0x1d0   :  { %v2122_v7 = vpop.f32.mrf.mxu0 }
 0x1d1   :  { %2211 = vst [vmem:[%s3866_s3 + $0x8] sm:$0xff] %v2511_v40  ;;  %v2183_v8 = vmax.f32 %v2172_v5, 0.0  ;;  %v2174_v15 = vadd.f32 %v2173_v38, %v2121_v56  ;;  %v2123_v60 = vadd.f32 %v2122_v7, %v2070_v62  ;;  %v2175_v42 = vpop.f32.mrf.mxu1 }
 0x1d3   :  { %v2512_v59 = vpack.c.bf16 %v2183_v8, %v2182_v6  ;;  %v2176_v18 = vadd.f32 %v2175_v42, %v2123_v60  ;;  %v2184_v9 = vmax.f32 %v2174_v15, 0.0 }
 0x1d5   :  { %2212 = vst [vmem:[%s3866_s3 + $0x10] sm:$0xff] %v2512_v59  ;;  %v2185_v61 = vmax.f32 %v2176_v18, 0.0 }
 0x1d7   :  { %v2513_v17 = vpack.c.bf16 %v2185_v61, %v2184_v9 }
 0x1d9   :  { %2213 = vst [vmem:[%s3866_s3 + $0x18] sm:$0xff] %v2513_v17 }

// kernel: generator_forward.12
= control target key start
LH: loop header
LB: loop body
LE: loop exit
PB: predicated region body
PF: predicated region fallthrough
CT: control target
= control target key end

     0   :  { %s950_s1 = inlined_call_operand.vmem [shape: bf16[512,256], index: 1, kind: input, shape index: {}]   ;;  %s951_s0 = inlined_call_operand.vmem [shape: bf16[16,512], index: 0, kind: input, shape index: {}]   ;;  %s952_s2 = inlined_call_operand.vmem [shape: f32[16,256], index: 2, kind: input, shape index: {}]   ;;  %s953_s3 = inlined_call_operand.vmem [shape: bf16[16,256], index: 3, kind: output, shape index: {}]  }
   0x1   :  { %v606_v0 = vld [vmem:[%s950_s1 + $0x74] ss:$8 sps:$4 sm:$0xff]   ;;  %v610_v2 = vld [vmem:[%s950_s1 + $0x70] ss:$8 sps:$4 sm:$0xff]   ;;  %v612_v4 = vld [vmem:[%s950_s1 + $0x64] ss:$8 sps:$4 sm:$0xff]  }
   0x2   :  { %v608_v1 = vld [vmem:[%s950_s1 + $0x174] ss:$8 sps:$4 sm:$0xff]   ;;  %426 = vmatprep.subr.bf16.mxu0 %v606_v0  ;;  %v611_v3 = vld [vmem:[%s950_s1 + $0x170] ss:$8 sps:$4 sm:$0xff]   ;;  %v614_v5 = vld [vmem:[%s950_s1 + $0x164] ss:$8 sps:$4 sm:$0xff]  }
   0x3   :  { %469 = vmatprep.subr.bf16.mxu1 %v608_v1  ;;  %427 = vmatpush1.bf16.msra.mxu0 %v610_v2  ;;  %v616_v6 = vld [vmem:[%s950_s1 + $0x60] ss:$8 sps:$4 sm:$0xff]   ;;  %v618_v8 = vld [vmem:[%s950_s1 + $0x54] ss:$8 sps:$4 sm:$0xff]   ;;  %v622_v10 = vld [vmem:[%s950_s1 + $0x50] ss:$8 sps:$4 sm:$0xff]  }
   0x4   :  { %470 = vmatpush1.bf16.msra.mxu1 %v611_v3  ;;  %428 = vmatprep.subr.bf16.mxu0 %v612_v4  ;;  %v617_v7 = vld [vmem:[%s950_s1 + $0x160] ss:$8 sps:$4 sm:$0xff]   ;;  %v620_v9 = vld [vmem:[%s950_s1 + $0x154] ss:$8 sps:$4 sm:$0xff]   ;;  %v623_v11 = vld [vmem:[%s950_s1 + $0x150] ss:$8 sps:$4 sm:$0xff]  }
   0x5   :  { %471 = vmatprep.subr.bf16.mxu1 %v614_v5  ;;  %v624_v12 = vld [vmem:[%s950_s1 + $0x44] ss:$8 sps:$4 sm:$0xff]   ;;  %v628_v14 = vld [vmem:[%s950_s1 + $0x40] ss:$8 sps:$4 sm:$0xff]   ;;  %v630_v16 = vld [vmem:[%s950_s1 + $0x34] ss:$8 sps:$4 sm:$0xff]  }
   0x6   :  { %v626_v13 = vld [vmem:[%s950_s1 + $0x144] ss:$8 sps:$4 sm:$0xff]   ;;  %v629_v15 = vld [vmem:[%s950_s1 + $0x140] ss:$8 sps:$4 sm:$0xff]   ;;  %v632_v17 = vld [vmem:[%s950_s1 + $0x134] ss:$8 sps:$4 sm:$0xff]  }
   0x7   :  { %429 = vmatpush1.bf16.msra.mxu0 %v616_v6  ;;  %v634_v18 = vld [vmem:[%s950_s1 + $0x30] ss:$8 sps:$4 sm:$0xff]   ;;  %v636_v20 = vld [vmem:[%s950_s1 + $0x24] ss:$8 sps:$4 sm:$0xff]   ;;  %v640_v22 = vld [vmem:[%s950_s1 + $0x20] ss:$8 sps:$4 sm:$0xff]  }
   0x8   :  { %472 = vmatpush1.bf16.msra.mxu1 %v617_v7  ;;  %430 = vmatprep.subr.bf16.mxu0 %v618_v8  ;;  %v635_v19 = vld [vmem:[%s950_s1 + $0x130] ss:$8 sps:$4 sm:$0xff]   ;;  %v638_v21 = vld [vmem:[%s950_s1 + $0x124] ss:$8 sps:$4 sm:$0xff]   ;;  %v641_v23 = vld [vmem:[%s950_s1 + $0x120] ss:$8 sps:$4 sm:$0xff]  }
   0x9   :  { %473 = vmatprep.subr.bf16.mxu1 %v620_v9  ;;  %v642_v24 = vld [vmem:[%s950_s1 + $0x14] ss:$8 sps:$4 sm:$0xff]   ;;  %v646_v26 = vld [vmem:[%s950_s1 + $0x10] ss:$8 sps:$4 sm:$0xff]   ;;  %v648_v28 = vld [vmem:[%s950_s1 + $0x4] ss:$8 sps:$4 sm:$0xff]  }
   0xa   :  { %v644_v25 = vld [vmem:[%s950_s1 + $0x114] ss:$8 sps:$4 sm:$0xff]   ;;  %v647_v27 = vld [vmem:[%s950_s1 + $0x110] ss:$8 sps:$4 sm:$0xff]   ;;  %v650_v29 = vld [vmem:[%s950_s1 + $0x104] ss:$8 sps:$4 sm:$0xff]  }
   0xb   :  { %431 = vmatpush1.bf16.msra.mxu0 %v622_v10  ;;  %v652_v30 = vld [vmem:[%s950_s1] ss:$8 sps:$4 sm:$0xff]   ;;  %v654_v32 = vld [vmem:[%s950_s1 + $0xf4] ss:$8 sps:$4 sm:$0xff]   ;;  %v658_v34 = vld [vmem:[%s950_s1 + $0xf0] ss:$8 sps:$4 sm:$0xff]  }
   0xc   :  { %474 = vmatpush1.bf16.msra.mxu1 %v623_v11  ;;  %432 = vmatprep.subr.bf16.mxu0 %v624_v12  ;;  %v653_v31 = vld [vmem:[%s950_s1 + $0x100] ss:$8 sps:$4 sm:$0xff]   ;;  %v656_v33 = vld [vmem:[%s950_s1 + $0x1f4] ss:$8 sps:$4 sm:$0xff]   ;;  %v659_v35 = vld [vmem:[%s950_s1 + $0x1f0] ss:$8 sps:$4 sm:$0xff]  }
   0xd   :  { %475 = vmatprep.subr.bf16.mxu1 %v626_v13  ;;  %v660_v36 = vld [vmem:[%s950_s1 + $0xe4] ss:$8 sps:$4 sm:$0xff]   ;;  %v664_v38 = vld [vmem:[%s950_s1 + $0xe0] ss:$8 sps:$4 sm:$0xff]   ;;  %v666_v40 = vld [vmem:[%s950_s1 + $0xd4] ss:$8 sps:$4 sm:$0xff]  }
   0xe   :  { %v662_v37 = vld [vmem:[%s950_s1 + $0x1e4] ss:$8 sps:$4 sm:$0xff]   ;;  %v665_v39 = vld [vmem:[%s950_s1 + $0x1e0] ss:$8 sps:$4 sm:$0xff]   ;;  %v668_v41 = vld [vmem:[%s950_s1 + $0x1d4] ss:$8 sps:$4 sm:$0xff]  }
   0xf   :  { %433 = vmatpush1.bf16.msra.mxu0 %v628_v14  ;;  %v670_v42 = vld [vmem:[%s950_s1 + $0xd0] ss:$8 sps:$4 sm:$0xff]   ;;  %v672_v44 = vld [vmem:[%s950_s1 + $0xc4] ss:$8 sps:$4 sm:$0xff]   ;;  %v676_v46 = vld [vmem:[%s950_s1 + $0xc0] ss:$8 sps:$4 sm:$0xff]  }
  0x10   :  { %476 = vmatpush1.bf16.msra.mxu1 %v629_v15  ;;  %434 = vmatprep.subr.bf16.mxu0 %v630_v16  ;;  %v671_v43 = vld [vmem:[%s950_s1 + $0x1d0] ss:$8 sps:$4 sm:$0xff]   ;;  %v674_v45 = vld [vmem:[%s950_s1 + $0x1c4] ss:$8 sps:$4 sm:$0xff]   ;;  %v677_v48 = vld [vmem:[%s950_s1 + $0x1c0] ss:$8 sps:$4 sm:$0xff]  }
  0x11   :  { %477 = vmatprep.subr.bf16.mxu1 %v632_v17  ;;  %v704_v47 = vld [vmem:[%s951_s0 + $0x4] ss:$16 sps:$4 sm:$0xff]   ;;  %v707_v51 = vld [vmem:[%s951_s0 + $0xc] ss:$16 sps:$4 sm:$0xff]   ;;  %v682_v52 = vld [vmem:[%s950_s1 + $0xb0] ss:$8 sps:$4 sm:$0xff]  }
  0x12   :  { %v678_v49 = vld [vmem:[%s950_s1 + $0xb4] ss:$8 sps:$4 sm:$0xff]   ;;  %458 = vmatprep.mubr.bf16.mxu0 %v704_v47  ;;  %501 = vmatprep.mubr.bf16.mxu1 %v707_v51  ;;  %v683_v53 = vld [vmem:[%s950_s1 + $0x1b0] ss:$8 sps:$4 sm:$0xff]   ;;  %v684_v54 = vld [vmem:[%s950_s1 + $0xa4] ss:$8 sps:$4 sm:$0xff]  }
  0x13   :  { %435 = vmatpush1.bf16.msra.mxu0 %v634_v18  ;;  %v680_v50 = vld [vmem:[%s950_s1 + $0x1b4] ss:$8 sps:$4 sm:$0xff]   ;;  %v686_v55 = vld [vmem:[%s950_s1 + $0x1a4] ss:$8 sps:$4 sm:$0xff]   ;;  %v688_v56 = vld [vmem:[%s950_s1 + $0xa0] ss:$8 sps:$4 sm:$0xff]  }
  0x14   :  { %478 = vmatpush1.bf16.msra.mxu1 %v635_v19  ;;  %436 = vmatprep.subr.bf16.mxu0 %v636_v20  ;;  %v689_v57 = vld [vmem:[%s950_s1 + $0x1a0] ss:$8 sps:$4 sm:$0xff]   ;;  %v690_v58 = vld [vmem:[%s950_s1 + $0x94] ss:$8 sps:$4 sm:$0xff]   ;;  %v694_v60 = vld [vmem:[%s950_s1 + $0x90] ss:$8 sps:$4 sm:$0xff]  }
  0x15   :  { %479 = vmatprep.subr.bf16.mxu1 %v638_v21  ;;  %v692_v59 = vld [vmem:[%s950_s1 + $0x194] ss:$8 sps:$4 sm:$0xff]   ;;  %v695_v61 = vld [vmem:[%s950_s1 + $0x190] ss:$8 sps:$4 sm:$0xff]   ;;  %v696_v62 = vld [vmem:[%s950_s1 + $0x84] ss:$8 sps:$4 sm:$0xff]  }
  0x16   :  { %v698_v63 = vld [vmem:[%s950_s1 + $0x184] ss:$8 sps:$4 sm:$0xff]   ;;  %v700_v0 = vld [vmem:[%s950_s1 + $0x80] ss:$8 sps:$4 sm:$0xff]   ;;  %v84_v11 = vld [vmem:[%s952_s2 + $0x10] sm:$0xff] }
  0x17   :  { %437 = vmatpush1.bf16.msra.mxu0 %v640_v22  ;;  %v701_v1 = vld [vmem:[%s950_s1 + $0x180] ss:$8 sps:$4 sm:$0xff]   ;;  %v85_v16 = vld [vmem:[%s952_s2 + $0x18] sm:$0xff] }
  0x18   :  { %480 = vmatpush1.bf16.msra.mxu1 %v641_v23  ;;  %438 = vmatprep.subr.bf16.mxu0 %v642_v24  ;;  %v702_v2 = vld [vmem:[%s951_s0] ss:$16 sps:$4 sm:$0xff]   ;;  %v705_v3 = vld [vmem:[%s951_s0 + $0x8] ss:$16 sps:$4 sm:$0xff]  }
  0x19   :  { %481 = vmatprep.subr.bf16.mxu1 %v644_v25  ;;  %v82_v4 = vld [vmem:[%s952_s2] sm:$0xff]  ;;  %v83_v7 = vld [vmem:[%s952_s2 + $0x8] sm:$0xff] }
  0x1b   :  { %439 = vmatpush1.bf16.msra.mxu0 %v646_v26 }
  0x1c   :  { %482 = vmatpush1.bf16.msra.mxu1 %v647_v27  ;;  %440 = vmatprep.subr.bf16.mxu0 %v648_v28 }
  0x1d   :  { %483 = vmatprep.subr.bf16.mxu1 %v650_v29 }
  0x1f   :  { %441 = vmatpush1.bf16.msra.mxu0 %v652_v30 }
  0x20   :  { %484 = vmatpush1.bf16.msra.mxu1 %v653_v31  ;;  %442 = vmatprep.subr.bf16.mxu0 %v654_v32 }
  0x21   :  { %485 = vmatprep.subr.bf16.mxu1 %v656_v33 }
  0x23   :  { %443 = vmatpush2.bf16.msra.mxu0 %v658_v34 }
  0x24   :  { %486 = vmatpush2.bf16.msra.mxu1 %v659_v35  ;;  %444 = vmatprep.subr.bf16.mxu0 %v660_v36 }
  0x25   :  { %487 = vmatprep.subr.bf16.mxu1 %v662_v37 }
  0x27   :  { %445 = vmatpush2.bf16.msra.mxu0 %v664_v38 }
  0x28   :  { %488 = vmatpush2.bf16.msra.mxu1 %v665_v39  ;;  %446 = vmatprep.subr.bf16.mxu0 %v666_v40 }
  0x29   :  { %489 = vmatprep.subr.bf16.mxu1 %v668_v41 }
  0x2b   :  { %447 = vmatpush2.bf16.msra.mxu0 %v670_v42 }
  0x2c   :  { %490 = vmatpush2.bf16.msra.mxu1 %v671_v43  ;;  %448 = vmatprep.subr.bf16.mxu0 %v672_v44 }
  0x2d   :  { %491 = vmatprep.subr.bf16.mxu1 %v674_v45 }
  0x2f   :  { %449 = vmatpush2.bf16.msra.mxu0 %v676_v46 }
  0x30   :  { %492 = vmatpush2.bf16.msra.mxu1 %v677_v48  ;;  %450 = vmatprep.subr.bf16.mxu0 %v678_v49 }
  0x31   :  { %493 = vmatprep.subr.bf16.mxu1 %v680_v50 }
  0x33   :  { %451 = vmatpush2.bf16.msra.mxu0 %v682_v52 }
  0x34   :  { %494 = vmatpush2.bf16.msra.mxu1 %v683_v53  ;;  %452 = vmatprep.subr.bf16.mxu0 %v684_v54 }
  0x35   :  { %495 = vmatprep.subr.bf16.mxu1 %v686_v55 }
  0x37   :  { %453 = vmatpush2.bf16.msra.mxu0 %v688_v56 }
  0x38   :  { %496 = vmatpush2.bf16.msra.mxu1 %v689_v57  ;;  %454 = vmatprep.subr.bf16.mxu0 %v690_v58 }
  0x39   :  { %497 = vmatprep.subr.bf16.mxu1 %v692_v59 }
  0x3b   :  { %455 = vmatpush2.bf16.msra.mxu0 %v694_v60 }
  0x3c   :  { %498 = vmatpush2.bf16.msra.mxu1 %v695_v61  ;;  %456 = vmatprep.subr.bf16.mxu0 %v696_v62 }
  0x3d   :  { %499 = vmatprep.subr.bf16.mxu1 %v698_v63 }
  0x3f   :  { %457 = vmatpush2.bf16.msra.mxu0 %v700_v0 }
  0x40   :  { %500 = vmatpush2.bf16.msra.mxu1 %v701_v1 }
  0x42   :  { %459 = vmatmul.mubr.bf16.vlgmr.msra.gmra.mxu0 %v702_v2 }
  0x43   :  { %502 = vmatmul.mubr.bf16.vlgmr.msra.gmra.mxu1 %v705_v3 }
 0x102   :  { %v460_v5 = vpop.f32.mrf.mxu0 }
 0x103   :  { %v503_v6 = vpop.f32.mrf.mxu1  ;;  %v461_v8 = vadd.f32 %v460_v5, %v82_v4 }
 0x104   :  { %v462_v9 = vpop.f32.mrf.mxu0 }
 0x105   :  { %v505_v10 = vpop.f32.mrf.mxu1  ;;  %v504_v12 = vadd.f32 %v503_v6, %v461_v8  ;;  %v463_v13 = vadd.f32 %v462_v9, %v83_v7 }
 0x106   :  { %v464_v14 = vpop.f32.mrf.mxu0 }
 0x107   :  { %v507_v15 = vpop.f32.mrf.mxu1  ;;  %v506_v17 = vadd.f32 %v505_v10, %v463_v13  ;;  %v465_v18 = vadd.f32 %v464_v14, %v84_v11  ;;  %v512_v20 = vmax.f32 %v504_v12, 0.0 }
 0x108   :  { %v466_v19 = vpop.f32.mrf.mxu0 }
 0x109   :  { %v513_v21 = vmax.f32 %v506_v17, 0.0  ;;  %v508_v22 = vadd.f32 %v507_v15, %v465_v18  ;;  %v467_v23 = vadd.f32 %v466_v19, %v85_v16  ;;  %v509_v24 = vpop.f32.mrf.mxu1 }
 0x10b   :  { %v604_v25 = vpack.c.bf16 %v513_v21, %v512_v20  ;;  %v510_v26 = vadd.f32 %v509_v24, %v467_v23  ;;  %v514_v27 = vmax.f32 %v508_v22, 0.0 }
 0x10d   :  { %528 = vst [vmem:[%s953_s3] sm:$0xff] %v604_v25  ;;  %v515_v28 = vmax.f32 %v510_v26, 0.0 }
 0x10f   :  { %v605_v29 = vpack.c.bf16 %v515_v28, %v514_v27 }
 0x111   :  { %529 = vst [vmem:[%s953_s3 + $0x8] sm:$0xff] %v605_v29 }

// kernel: generator_forward.14
= control target key start
LH: loop header
LB: loop body
LE: loop exit
PB: predicated region body
PF: predicated region fallthrough
CT: control target
= control target key end

     0   :  { %s1251_s1 = inlined_call_operand.vmem [shape: bf16[512,256], index: 1, kind: input, shape index: {}]   ;;  %s1252_s0 = inlined_call_operand.vmem [shape: bf16[64,512], index: 0, kind: input, shape index: {}]   ;;  %s1253_s2 = inlined_call_operand.vmem [shape: f32[1,256], index: 2, kind: input, shape index: {}]   ;;  %s1254_s3 = inlined_call_operand.vmem [shape: bf16[64,256], index: 3, kind: output, shape index: {}]  }
   0x1   :  { %v824_v0 = vld [vmem:[%s1251_s1 + $0x74] ss:$8 sps:$4 sm:$0xff]   ;;  %v828_v2 = vld [vmem:[%s1251_s1 + $0x70] ss:$8 sps:$4 sm:$0xff]   ;;  %v830_v4 = vld [vmem:[%s1251_s1 + $0x64] ss:$8 sps:$4 sm:$0xff]  }
   0x2   :  { %v826_v1 = vld [vmem:[%s1251_s1 + $0x174] ss:$8 sps:$4 sm:$0xff]   ;;  %506 = vmatprep.subr.bf16.mxu0 %v824_v0  ;;  %v829_v3 = vld [vmem:[%s1251_s1 + $0x170] ss:$8 sps:$4 sm:$0xff]   ;;  %v832_v5 = vld [vmem:[%s1251_s1 + $0x164] ss:$8 sps:$4 sm:$0xff]  }
   0x3   :  { %579 = vmatprep.subr.bf16.mxu1 %v826_v1  ;;  %507 = vmatpush1.bf16.msra.mxu0 %v828_v2  ;;  %v834_v6 = vld [vmem:[%s1251_s1 + $0x60] ss:$8 sps:$4 sm:$0xff]   ;;  %v836_v8 = vld [vmem:[%s1251_s1 + $0x54] ss:$8 sps:$4 sm:$0xff]   ;;  %v840_v10 = vld [vmem:[%s1251_s1 + $0x50] ss:$8 sps:$4 sm:$0xff]  }
   0x4   :  { %580 = vmatpush1.bf16.msra.mxu1 %v829_v3  ;;  %508 = vmatprep.subr.bf16.mxu0 %v830_v4  ;;  %v835_v7 = vld [vmem:[%s1251_s1 + $0x160] ss:$8 sps:$4 sm:$0xff]   ;;  %v838_v9 = vld [vmem:[%s1251_s1 + $0x154] ss:$8 sps:$4 sm:$0xff]   ;;  %v841_v11 = vld [vmem:[%s1251_s1 + $0x150] ss:$8 sps:$4 sm:$0xff]  }
   0x5   :  { %581 = vmatprep.subr.bf16.mxu1 %v832_v5  ;;  %v842_v12 = vld [vmem:[%s1251_s1 + $0x44] ss:$8 sps:$4 sm:$0xff]   ;;  %v846_v14 = vld [vmem:[%s1251_s1 + $0x40] ss:$8 sps:$4 sm:$0xff]   ;;  %v848_v16 = vld [vmem:[%s1251_s1 + $0x34] ss:$8 sps:$4 sm:$0xff]  }
   0x6   :  { %v844_v13 = vld [vmem:[%s1251_s1 + $0x144] ss:$8 sps:$4 sm:$0xff]   ;;  %v847_v15 = vld [vmem:[%s1251_s1 + $0x140] ss:$8 sps:$4 sm:$0xff]   ;;  %v850_v17 = vld [vmem:[%s1251_s1 + $0x134] ss:$8 sps:$4 sm:$0xff]  }
   0x7   :  { %509 = vmatpush1.bf16.msra.mxu0 %v834_v6  ;;  %v852_v18 = vld [vmem:[%s1251_s1 + $0x30] ss:$8 sps:$4 sm:$0xff]   ;;  %v854_v20 = vld [vmem:[%s1251_s1 + $0x24] ss:$8 sps:$4 sm:$0xff]   ;;  %v858_v22 = vld [vmem:[%s1251_s1 + $0x20] ss:$8 sps:$4 sm:$0xff]  }
   0x8   :  { %582 = vmatpush1.bf16.msra.mxu1 %v835_v7  ;;  %510 = vmatprep.subr.bf16.mxu0 %v836_v8  ;;  %v853_v19 = vld [vmem:[%s1251_s1 + $0x130] ss:$8 sps:$4 sm:$0xff]   ;;  %v856_v21 = vld [vmem:[%s1251_s1 + $0x124] ss:$8 sps:$4 sm:$0xff]   ;;  %v859_v23 = vld [vmem:[%s1251_s1 + $0x120] ss:$8 sps:$4 sm:$0xff]  }
   0x9   :  { %583 = vmatprep.subr.bf16.mxu1 %v838_v9  ;;  %v860_v24 = vld [vmem:[%s1251_s1 + $0x14] ss:$8 sps:$4 sm:$0xff]   ;;  %v864_v26 = vld [vmem:[%s1251_s1 + $0x10] ss:$8 sps:$4 sm:$0xff]   ;;  %v866_v28 = vld [vmem:[%s1251_s1 + $0x4] ss:$8 sps:$4 sm:$0xff]  }
   0xa   :  { %v862_v25 = vld [vmem:[%s1251_s1 + $0x114] ss:$8 sps:$4 sm:$0xff]   ;;  %v865_v27 = vld [vmem:[%s1251_s1 + $0x110] ss:$8 sps:$4 sm:$0xff]   ;;  %v868_v29 = vld [vmem:[%s1251_s1 + $0x104] ss:$8 sps:$4 sm:$0xff]  }
   0xb   :  { %511 = vmatpush1.bf16.msra.mxu0 %v840_v10  ;;  %v870_v30 = vld [vmem:[%s1251_s1] ss:$8 sps:$4 sm:$0xff]   ;;  %v872_v32 = vld [vmem:[%s1251_s1 + $0xf4] ss:$8 sps:$4 sm:$0xff]   ;;  %v876_v34 = vld [vmem:[%s1251_s1 + $0xf0] ss:$8 sps:$4 sm:$0xff]  }
   0xc   :  { %584 = vmatpush1.bf16.msra.mxu1 %v841_v11  ;;  %512 = vmatprep.subr.bf16.mxu0 %v842_v12  ;;  %v871_v31 = vld [vmem:[%s1251_s1 + $0x100] ss:$8 sps:$4 sm:$0xff]   ;;  %v874_v33 = vld [vmem:[%s1251_s1 + $0x1f4] ss:$8 sps:$4 sm:$0xff]   ;;  %v877_v35 = vld [vmem:[%s1251_s1 + $0x1f0] ss:$8 sps:$4 sm:$0xff]  }
   0xd   :  { %585 = vmatprep.subr.bf16.mxu1 %v844_v13  ;;  %v878_v36 = vld [vmem:[%s1251_s1 + $0xe4] ss:$8 sps:$4 sm:$0xff]   ;;  %v882_v38 = vld [vmem:[%s1251_s1 + $0xe0] ss:$8 sps:$4 sm:$0xff]   ;;  %v884_v40 = vld [vmem:[%s1251_s1 + $0xd4] ss:$8 sps:$4 sm:$0xff]  }
   0xe   :  { %v880_v37 = vld [vmem:[%s1251_s1 + $0x1e4] ss:$8 sps:$4 sm:$0xff]   ;;  %v883_v39 = vld [vmem:[%s1251_s1 + $0x1e0] ss:$8 sps:$4 sm:$0xff]   ;;  %v886_v41 = vld [vmem:[%s1251_s1 + $0x1d4] ss:$8 sps:$4 sm:$0xff]  }
   0xf   :  { %513 = vmatpush1.bf16.msra.mxu0 %v846_v14  ;;  %v888_v42 = vld [vmem:[%s1251_s1 + $0xd0] ss:$8 sps:$4 sm:$0xff]   ;;  %v890_v44 = vld [vmem:[%s1251_s1 + $0xc4] ss:$8 sps:$4 sm:$0xff]   ;;  %v894_v46 = vld [vmem:[%s1251_s1 + $0xc0] ss:$8 sps:$4 sm:$0xff]  }
  0x10   :  { %586 = vmatpush1.bf16.msra.mxu1 %v847_v15  ;;  %514 = vmatprep.subr.bf16.mxu0 %v848_v16  ;;  %v889_v43 = vld [vmem:[%s1251_s1 + $0x1d0] ss:$8 sps:$4 sm:$0xff]   ;;  %v892_v45 = vld [vmem:[%s1251_s1 + $0x1c4] ss:$8 sps:$4 sm:$0xff]   ;;  %v895_v47 = vld [vmem:[%s1251_s1 + $0x1c0] ss:$8 sps:$4 sm:$0xff]   ;;  %v96_v16 = vlaneseq }
  0x11   :  { %587 = vmatprep.subr.bf16.mxu1 %v850_v17  ;;  %v896_v48 = vld [vmem:[%s1251_s1 + $0xb4] ss:$8 sps:$4 sm:$0xff]   ;;  %v900_v52 = vld [vmem:[%s1251_s1 + $0xb0] ss:$8 sps:$4 sm:$0xff]   ;;  %v902_v54 = vld [vmem:[%s1251_s1 + $0xa4] ss:$8 sps:$4 sm:$0xff]  }
  0x12   :  { %v922_v49 = vld [vmem:[%s1252_s0 + $0x4] ss:$16 sps:$4 sm:$0xff]   ;;  %v925_v51 = vld [vmem:[%s1252_s0 + $0xc] ss:$16 sps:$4 sm:$0xff]   ;;  %v901_v53 = vld [vmem:[%s1251_s1 + $0x1b0] ss:$8 sps:$4 sm:$0xff]  }
  0x13   :  { %515 = vmatpush1.bf16.msra.mxu0 %v852_v18  ;;  %v898_v50 = vld [vmem:[%s1251_s1 + $0x1b4] ss:$8 sps:$4 sm:$0xff]   ;;  %538 = vmatprep.mubr.bf16.mxu0 %v922_v49  ;;  %v904_v55 = vld [vmem:[%s1251_s1 + $0x1a4] ss:$8 sps:$4 sm:$0xff]   ;;  %v906_v56 = vld [vmem:[%s1251_s1 + $0xa0] ss:$8 sps:$4 sm:$0xff]  }
  0x14   :  { %588 = vmatpush1.bf16.msra.mxu1 %v853_v19  ;;  %516 = vmatprep.subr.bf16.mxu0 %v854_v20  ;;  %v907_v57 = vld [vmem:[%s1251_s1 + $0x1a0] ss:$8 sps:$4 sm:$0xff]   ;;  %v908_v58 = vld [vmem:[%s1251_s1 + $0x94] ss:$8 sps:$4 sm:$0xff]   ;;  %v912_v60 = vld [vmem:[%s1251_s1 + $0x90] ss:$8 sps:$4 sm:$0xff]  }
  0x15   :  { %589 = vmatprep.subr.bf16.mxu1 %v856_v21  ;;  %611 = vmatprep.mubr.bf16.mxu1 %v925_v51  ;;  %v910_v59 = vld [vmem:[%s1251_s1 + $0x194] ss:$8 sps:$4 sm:$0xff]   ;;  %v913_v61 = vld [vmem:[%s1251_s1 + $0x190] ss:$8 sps:$4 sm:$0xff]   ;;  %v914_v62 = vld [vmem:[%s1251_s1 + $0x84] ss:$8 sps:$4 sm:$0xff]  }
  0x16   :  { %v916_v63 = vld [vmem:[%s1251_s1 + $0x184] ss:$8 sps:$4 sm:$0xff]   ;;  %v918_v0 = vld [vmem:[%s1251_s1 + $0x80] ss:$8 sps:$4 sm:$0xff]   ;;  %v97_v17 = vshrl.u32 %v96_v16, 7 }
  0x17   :  { %517 = vmatpush1.bf16.msra.mxu0 %v858_v22  ;;  %v919_v1 = vld [vmem:[%s1251_s1 + $0x180] ss:$8 sps:$4 sm:$0xff]   ;;  %v926_v4 = vld [vmem:[%s1252_s0 + $0x24] ss:$16 sps:$4 sm:$0xff]   ;;  %v928_v5 = vld [vmem:[%s1252_s0 + $0x2c] ss:$16 sps:$4 sm:$0xff]  }
  0x18   :  { %590 = vmatpush1.bf16.msra.mxu1 %v859_v23  ;;  %518 = vmatprep.subr.bf16.mxu0 %v860_v24  ;;  %v920_v2 = vld [vmem:[%s1252_s0] ss:$16 sps:$4 sm:$0xff]   ;;  %v923_v3 = vld [vmem:[%s1252_s0 + $0x8] ss:$16 sps:$4 sm:$0xff]   ;;  %v932_v8 = vld [vmem:[%s1252_s0 + $0x44] ss:$16 sps:$4 sm:$0xff]  }
  0x19   :  { %591 = vmatprep.subr.bf16.mxu1 %v862_v25  ;;  %v930_v6 = vld [vmem:[%s1252_s0 + $0x20] ss:$16 sps:$4 sm:$0xff]   ;;  %v931_v7 = vld [vmem:[%s1252_s0 + $0x28] ss:$16 sps:$4 sm:$0xff]   ;;  %v934_v9 = vld [vmem:[%s1252_s0 + $0x4c] ss:$16 sps:$4 sm:$0xff]  }
  0x1a   :  { %v936_v10 = vld [vmem:[%s1252_s0 + $0x40] ss:$16 sps:$4 sm:$0xff]   ;;  %v937_v11 = vld [vmem:[%s1252_s0 + $0x48] ss:$16 sps:$4 sm:$0xff]   ;;  %v938_v12 = vld [vmem:[%s1252_s0 + $0x64] ss:$16 sps:$4 sm:$0xff]  }
  0x1b   :  { %519 = vmatpush1.bf16.msra.mxu0 %v864_v26  ;;  %v940_v13 = vld [vmem:[%s1252_s0 + $0x6c] ss:$16 sps:$4 sm:$0xff]   ;;  %v942_v14 = vld [vmem:[%s1252_s0 + $0x60] ss:$16 sps:$4 sm:$0xff]   ;;  %v943_v15 = vld [vmem:[%s1252_s0 + $0x68] ss:$16 sps:$4 sm:$0xff]  }
  0x1c   :  { %592 = vmatpush1.bf16.msra.mxu1 %v865_v27  ;;  %520 = vmatprep.subr.bf16.mxu0 %v866_v28  ;;  %v98_v18 = vsub.s32 0, %v97_v17  ;;  %v94_v19 = vld [vmem:[%s1253_s2] sm:$0x3]  ;;  %v102_v20 = vsub.s32 1, %v97_v17 }
  0x1d   :  { %593 = vmatprep.subr.bf16.mxu1 %v868_v29 }
  0x1e   :  { %v1207_v21 = vrot.slane %v94_v19, %v98_v18  ;;  %v1209_v22 = vrot.slane %v94_v19, %v102_v20 }
  0x1f   :  { %521 = vmatpush1.bf16.msra.mxu0 %v870_v30 }
  0x20   :  { %594 = vmatpush1.bf16.msra.mxu1 %v871_v31  ;;  %522 = vmatprep.subr.bf16.mxu0 %v872_v32 }
  0x21   :  { %595 = vmatprep.subr.bf16.mxu1 %v874_v33 }
  0x23   :  { %523 = vmatpush2.bf16.msra.mxu0 %v876_v34 }
  0x24   :  { %596 = vmatpush2.bf16.msra.mxu1 %v877_v35  ;;  %524 = vmatprep.subr.bf16.mxu0 %v878_v36 }
  0x25   :  { %597 = vmatprep.subr.bf16.mxu1 %v880_v37 }
  0x27   :  { %525 = vmatpush2.bf16.msra.mxu0 %v882_v38 }
  0x28   :  { %598 = vmatpush2.bf16.msra.mxu1 %v883_v39  ;;  %526 = vmatprep.subr.bf16.mxu0 %v884_v40 }
  0x29   :  { %599 = vmatprep.subr.bf16.mxu1 %v886_v41 }
  0x2b   :  { %527 = vmatpush2.bf16.msra.mxu0 %v888_v42 }
  0x2c   :  { %600 = vmatpush2.bf16.msra.mxu1 %v889_v43  ;;  %528 = vmatprep.subr.bf16.mxu0 %v890_v44 }
  0x2d   :  { %601 = vmatprep.subr.bf16.mxu1 %v892_v45 }
  0x2f   :  { %529 = vmatpush2.bf16.msra.mxu0 %v894_v46 }
  0x30   :  { %602 = vmatpush2.bf16.msra.mxu1 %v895_v47  ;;  %530 = vmatprep.subr.bf16.mxu0 %v896_v48 }
  0x31   :  { %603 = vmatprep.subr.bf16.mxu1 %v898_v50 }
  0x33   :  { %531 = vmatpush2.bf16.msra.mxu0 %v900_v52 }
  0x34   :  { %604 = vmatpush2.bf16.msra.mxu1 %v901_v53  ;;  %532 = vmatprep.subr.bf16.mxu0 %v902_v54 }
  0x35   :  { %605 = vmatprep.subr.bf16.mxu1 %v904_v55 }
  0x37   :  { %533 = vmatpush2.bf16.msra.mxu0 %v906_v56 }
  0x38   :  { %606 = vmatpush2.bf16.msra.mxu1 %v907_v57  ;;  %534 = vmatprep.subr.bf16.mxu0 %v908_v58 }
  0x39   :  { %607 = vmatprep.subr.bf16.mxu1 %v910_v59 }
  0x3b   :  { %535 = vmatpush2.bf16.msra.mxu0 %v912_v60 }
  0x3c   :  { %608 = vmatpush2.bf16.msra.mxu1 %v913_v61  ;;  %536 = vmatprep.subr.bf16.mxu0 %v914_v62 }
  0x3d   :  { %609 = vmatprep.subr.bf16.mxu1 %v916_v63 }
  0x3f   :  { %537 = vmatpush2.bf16.msra.mxu0 %v918_v0 }
  0x40   :  { %610 = vmatpush2.bf16.msra.mxu1 %v919_v1 }
  0x42   :  { %539 = vmatmul.mubr.bf16.vlgmr.msra.gmra.mxu0 %v920_v2 }
  0x43   :  { %612 = vmatmul.mubr.bf16.vlgmr.msra.gmra.mxu1 %v923_v3  ;;  %548 = vmatprep.mubr.bf16.mxu0 %v926_v4 }
  0x44   :  { %621 = vmatprep.mubr.bf16.mxu1 %v928_v5 }
  0x4a   :  { %549 = vmatmul.mubr.bf16.gmra.mxu0 %v930_v6 }
  0x4b   :  { %622 = vmatmul.mubr.bf16.gmra.mxu1 %v931_v7  ;;  %558 = vmatprep.mubr.bf16.mxu0 %v932_v8 }
  0x4c   :  { %631 = vmatprep.mubr.bf16.mxu1 %v934_v9 }
  0x52   :  { %559 = vmatmul.mubr.bf16.gmra.mxu0 %v936_v10 }
  0x53   :  { %632 = vmatmul.mubr.bf16.gmra.mxu1 %v937_v11  ;;  %568 = vmatprep.mubr.bf16.mxu0 %v938_v12 }
  0x54   :  { %641 = vmatprep.mubr.bf16.mxu1 %v940_v13 }
  0x5a   :  { %569 = vmatmul.mubr.bf16.gmra.mxu0 %v942_v14 }
  0x5b   :  { %642 = vmatmul.mubr.bf16.gmra.mxu1 %v943_v15 }
 0x102   :  { %v540_v23 = vpop.f32.mrf.mxu0 }
 0x103   :  { %v613_v24 = vpop.f32.mrf.mxu1  ;;  %v541_v25 = vadd.f32 %v540_v23, %v1207_v21 }
 0x104   :  { %v542_v26 = vpop.f32.mrf.mxu0 }
 0x105   :  { %v615_v27 = vpop.f32.mrf.mxu1  ;;  %v614_v28 = vadd.f32 %v613_v24, %v541_v25  ;;  %v543_v29 = vadd.f32 %v542_v26, %v1209_v22 }
 0x106   :  { %v544_v30 = vpop.f32.mrf.mxu0 }
 0x107   :  { %v617_v31 = vpop.f32.mrf.mxu1  ;;  %v616_v32 = vadd.f32 %v615_v27, %v543_v29  ;;  %v545_v33 = vadd.f32 %v544_v30, %v1207_v21  ;;  %v652_v36 = vmax.f32 %v614_v28, 0.0 }
 0x108   :  { %v546_v34 = vpop.f32.mrf.mxu0 }
 0x109   :  { %v619_v35 = vpop.f32.mrf.mxu1  ;;  %v653_v37 = vmax.f32 %v616_v32, 0.0  ;;  %v618_v38 = vadd.f32 %v617_v31, %v545_v33  ;;  %v547_v39 = vadd.f32 %v546_v34, %v1209_v22 }
 0x10a   :  { %v550_v40 = vpop.f32.mrf.mxu0 }
 0x10b   :  { %v623_v41 = vpop.f32.mrf.mxu1  ;;  %v816_v42 = vpack.c.bf16 %v653_v37, %v652_v36  ;;  %v620_v43 = vadd.f32 %v619_v35, %v547_v39  ;;  %v551_v44 = vadd.f32 %v550_v40, %v1207_v21  ;;  %v654_v47 = vmax.f32 %v618_v38, 0.0 }
 0x10c   :  { %v552_v45 = vpop.f32.mrf.mxu0 }
 0x10d   :  { %v625_v46 = vpop.f32.mrf.mxu1  ;;  %716 = vst [vmem:[%s1254_s3] sm:$0xff] %v816_v42  ;;  %v655_v48 = vmax.f32 %v620_v43, 0.0  ;;  %v624_v49 = vadd.f32 %v623_v41, %v551_v44  ;;  %v553_v50 = vadd.f32 %v552_v45, %v1209_v22 }
 0x10e   :  { %v554_v51 = vpop.f32.mrf.mxu0 }
 0x10f   :  { %v627_v52 = vpop.f32.mrf.mxu1  ;;  %v817_v53 = vpack.c.bf16 %v655_v48, %v654_v47  ;;  %v626_v54 = vadd.f32 %v625_v46, %v553_v50  ;;  %v555_v55 = vadd.f32 %v554_v51, %v1207_v21  ;;  %v656_v58 = vmax.f32 %v624_v49, 0.0 }
 0x110   :  { %v556_v56 = vpop.f32.mrf.mxu0 }
 0x111   :  { %v629_v57 = vpop.f32.mrf.mxu1  ;;  %717 = vst [vmem:[%s1254_s3 + $0x8] sm:$0xff] %v817_v53  ;;  %v657_v59 = vmax.f32 %v626_v54, 0.0  ;;  %v628_v60 = vadd.f32 %v627_v52, %v555_v55  ;;  %v557_v61 = vadd.f32 %v556_v56, %v1209_v22 }
 0x112   :  { %v560_v62 = vpop.f32.mrf.mxu0 }
 0x113   :  { %v633_v63 = vpop.f32.mrf.mxu1  ;;  %v818_v0 = vpack.c.bf16 %v657_v59, %v656_v58  ;;  %v630_v1 = vadd.f32 %v629_v57, %v557_v61  ;;  %v561_v2 = vadd.f32 %v560_v62, %v1207_v21  ;;  %v658_v5 = vmax.f32 %v628_v60, 0.0 }
 0x114   :  { %v562_v3 = vpop.f32.mrf.mxu0 }
 0x115   :  { %v635_v4 = vpop.f32.mrf.mxu1  ;;  %718 = vst [vmem:[%s1254_s3 + $0x10] sm:$0xff] %v818_v0  ;;  %v659_v6 = vmax.f32 %v630_v1, 0.0  ;;  %v634_v7 = vadd.f32 %v633_v63, %v561_v2  ;;  %v563_v8 = vadd.f32 %v562_v3, %v1209_v22 }
 0x116   :  { %v564_v9 = vpop.f32.mrf.mxu0 }
 0x117   :  { %v637_v10 = vpop.f32.mrf.mxu1  ;;  %v819_v11 = vpack.c.bf16 %v659_v6, %v658_v5  ;;  %v636_v12 = vadd.f32 %v635_v4, %v563_v8  ;;  %v565_v13 = vadd.f32 %v564_v9, %v1207_v21  ;;  %v660_v16 = vmax.f32 %v634_v7, 0.0 }
 0x118   :  { %v566_v14 = vpop.f32.mrf.mxu0 }
 0x119   :  { %v639_v15 = vpop.f32.mrf.mxu1  ;;  %719 = vst [vmem:[%s1254_s3 + $0x18] sm:$0xff] %v819_v11  ;;  %v661_v17 = vmax.f32 %v636_v12, 0.0  ;;  %v638_v18 = vadd.f32 %v637_v10, %v565_v13  ;;  %v567_v19 = vadd.f32 %v566_v14, %v1209_v22 }
 0x11a   :  { %v570_v20 = vpop.f32.mrf.mxu0 }
 0x11b   :  { %v643_v23 = vpop.f32.mrf.mxu1  ;;  %v820_v24 = vpack.c.bf16 %v661_v17, %v660_v16  ;;  %v640_v25 = vadd.f32 %v639_v15, %v567_v19  ;;  %v571_v26 = vadd.f32 %v570_v20, %v1207_v21  ;;  %v662_v29 = vmax.f32 %v638_v18, 0.0 }
 0x11c   :  { %v572_v27 = vpop.f32.mrf.mxu0 }
 0x11d   :  { %v645_v28 = vpop.f32.mrf.mxu1  ;;  %720 = vst [vmem:[%s1254_s3 + $0x20] sm:$0xff] %v820_v24  ;;  %v663_v30 = vmax.f32 %v640_v25, 0.0  ;;  %v644_v31 = vadd.f32 %v643_v23, %v571_v26  ;;  %v573_v32 = vadd.f32 %v572_v27, %v1209_v22 }
 0x11e   :  { %v574_v33 = vpop.f32.mrf.mxu0 }
 0x11f   :  { %v647_v34 = vpop.f32.mrf.mxu1  ;;  %v821_v35 = vpack.c.bf16 %v663_v30, %v662_v29  ;;  %v646_v36 = vadd.f32 %v645_v28, %v573_v32  ;;  %v575_v37 = vadd.f32 %v574_v33, %v1207_v21  ;;  %v664_v39 = vmax.f32 %v644_v31, 0.0 }
 0x120   :  { %v576_v38 = vpop.f32.mrf.mxu0 }
 0x121   :  { %721 = vst [vmem:[%s1254_s3 + $0x28] sm:$0xff] %v821_v35  ;;  %v665_v40 = vmax.f32 %v646_v36, 0.0  ;;  %v648_v41 = vadd.f32 %v647_v34, %v575_v37  ;;  %v577_v42 = vadd.f32 %v576_v38, %v1209_v22  ;;  %v649_v43 = vpop.f32.mrf.mxu1 }
 0x123   :  { %v822_v44 = vpack.c.bf16 %v665_v40, %v664_v39  ;;  %v650_v45 = vadd.f32 %v649_v43, %v577_v42  ;;  %v666_v46 = vmax.f32 %v648_v41, 0.0 }
 0x125   :  { %722 = vst [vmem:[%s1254_s3 + $0x30] sm:$0xff] %v822_v44  ;;  %v667_v47 = vmax.f32 %v650_v45, 0.0 }
 0x127   :  { %v823_v21 = vpack.c.bf16 %v667_v47, %v666_v46 }
 0x129   :  { %723 = vst [vmem:[%s1254_s3 + $0x38] sm:$0xff] %v823_v21 }

// kernel: generator_forward.13
= control target key start
LH: loop header
LB: loop body
LE: loop exit
PB: predicated region body
PF: predicated region fallthrough
CT: control target
= control target key end

     0   :  { %s3795_s1 = inlined_call_operand.vmem [shape: bf16[1024,512], index: 1, kind: input, shape index: {}]   ;;  %s3796_s0 = inlined_call_operand.vmem [shape: bf16[32,1024], index: 0, kind: input, shape index: {}]   ;;  %s3797_s2 = inlined_call_operand.vmem [shape: f32[1,512], index: 2, kind: input, shape index: {}]   ;;  %s3798_s3 = inlined_call_operand.vmem [shape: bf16[32,512], index: 3, kind: output, shape index: {}]  }
   0x1   :  { %v2456_v0 = vld [vmem:[%s3795_s1 + $0xe4] ss:$16 sps:$4 sm:$0xff]   ;;  %v2460_v2 = vld [vmem:[%s3795_s1 + $0xe0] ss:$16 sps:$4 sm:$0xff]   ;;  %v15_v50 = vld [vmem:[%s3796_s0 + $0x8] sm:$0xff] }
   0x2   :  { %v2458_v1 = vld [vmem:[%s3795_s1 + $0x2e4] ss:$16 sps:$4 sm:$0xff]   ;;  %1668 = vmatprep.subr.bf16.mxu0 %v2456_v0  ;;  %v2461_v3 = vld [vmem:[%s3795_s1 + $0x2e0] ss:$16 sps:$4 sm:$0xff]   ;;  %v19_v51 = vld [vmem:[%s3796_s0 + $0x28] sm:$0xff] }
   0x3   :  { %1721 = vmatprep.subr.bf16.mxu1 %v2458_v1  ;;  %v2462_v4 = vld [vmem:[%s3795_s1 + $0xc4] ss:$16 sps:$4 sm:$0xff]   ;;  %1669 = vmatpush1.bf16.msra.mxu0 %v2460_v2  ;;  %v2466_v6 = vld [vmem:[%s3795_s1 + $0xc0] ss:$16 sps:$4 sm:$0xff]   ;;  %v3024_v55 = vcombine.high %v15_v50, %v19_v51 }
   0x4   :  { %1722 = vmatpush1.bf16.msra.mxu1 %v2461_v3  ;;  %v2464_v5 = vld [vmem:[%s3795_s1 + $0x2c4] ss:$16 sps:$4 sm:$0xff]   ;;  %1670 = vmatprep.subr.bf16.mxu0 %v2462_v4  ;;  %v2467_v7 = vld [vmem:[%s3795_s1 + $0x2c0] ss:$16 sps:$4 sm:$0xff]  }
   0x5   :  { %1723 = vmatprep.subr.bf16.mxu1 %v2464_v5  ;;  %v2468_v8 = vld [vmem:[%s3795_s1 + $0xa4] ss:$16 sps:$4 sm:$0xff]   ;;  %v2472_v10 = vld [vmem:[%s3795_s1 + $0xa0] ss:$16 sps:$4 sm:$0xff]   ;;  %1753 = vmatprep.mubr.bf16.mxu1 %v3024_v55 }
   0x6   :  { %v2470_v9 = vld [vmem:[%s3795_s1 + $0x2a4] ss:$16 sps:$4 sm:$0xff]   ;;  %v2473_v11 = vld [vmem:[%s3795_s1 + $0x2a0] ss:$16 sps:$4 sm:$0xff]  }
   0x7   :  { %1671 = vmatpush1.bf16.msra.mxu0 %v2466_v6  ;;  %v2474_v12 = vld [vmem:[%s3795_s1 + $0x84] ss:$16 sps:$4 sm:$0xff]   ;;  %v2478_v14 = vld [vmem:[%s3795_s1 + $0x80] ss:$16 sps:$4 sm:$0xff]  }
   0x8   :  { %1724 = vmatpush1.bf16.msra.mxu1 %v2467_v7  ;;  %1672 = vmatprep.subr.bf16.mxu0 %v2468_v8  ;;  %v2476_v13 = vld [vmem:[%s3795_s1 + $0x284] ss:$16 sps:$4 sm:$0xff]   ;;  %v2479_v15 = vld [vmem:[%s3795_s1 + $0x280] ss:$16 sps:$4 sm:$0xff]  }
   0x9   :  { %1725 = vmatprep.subr.bf16.mxu1 %v2470_v9  ;;  %v2480_v16 = vld [vmem:[%s3795_s1 + $0x64] ss:$16 sps:$4 sm:$0xff]   ;;  %v2484_v18 = vld [vmem:[%s3795_s1 + $0x60] ss:$16 sps:$4 sm:$0xff]   ;;  %v3078_v9 = vcombine.low %v15_v50, %v19_v51  ;;  %v3212_v50 = vld [vmem:[%s3796_s0 + $0x38] sm:$0xff] }
   0xa   :  { %v2482_v17 = vld [vmem:[%s3795_s1 + $0x264] ss:$16 sps:$4 sm:$0xff]   ;;  %v2485_v19 = vld [vmem:[%s3795_s1 + $0x260] ss:$16 sps:$4 sm:$0xff]  }
   0xb   :  { %1673 = vmatpush1.bf16.msra.mxu0 %v2472_v10  ;;  %v2486_v20 = vld [vmem:[%s3795_s1 + $0x44] ss:$16 sps:$4 sm:$0xff]   ;;  %v2490_v22 = vld [vmem:[%s3795_s1 + $0x40] ss:$16 sps:$4 sm:$0xff]  }
   0xc   :  { %1726 = vmatpush1.bf16.msra.mxu1 %v2473_v11  ;;  %1674 = vmatprep.subr.bf16.mxu0 %v2474_v12  ;;  %v2488_v21 = vld [vmem:[%s3795_s1 + $0x244] ss:$16 sps:$4 sm:$0xff]   ;;  %v2491_v23 = vld [vmem:[%s3795_s1 + $0x240] ss:$16 sps:$4 sm:$0xff]  }
   0xd   :  { %1727 = vmatprep.subr.bf16.mxu1 %v2476_v13  ;;  %v2492_v24 = vld [vmem:[%s3795_s1 + $0x24] ss:$16 sps:$4 sm:$0xff]   ;;  %v2496_v26 = vld [vmem:[%s3795_s1 + $0x20] ss:$16 sps:$4 sm:$0xff]  }
   0xe   :  { %v2494_v25 = vld [vmem:[%s3795_s1 + $0x224] ss:$16 sps:$4 sm:$0xff]   ;;  %v2497_v27 = vld [vmem:[%s3795_s1 + $0x220] ss:$16 sps:$4 sm:$0xff]  }
   0xf   :  { %1675 = vmatpush1.bf16.msra.mxu0 %v2478_v14  ;;  %v2498_v28 = vld [vmem:[%s3795_s1 + $0x4] ss:$16 sps:$4 sm:$0xff]   ;;  %v2502_v30 = vld [vmem:[%s3795_s1] ss:$16 sps:$4 sm:$0xff]  }
  0x10   :  { %1728 = vmatpush1.bf16.msra.mxu1 %v2479_v15  ;;  %1676 = vmatprep.subr.bf16.mxu0 %v2480_v16  ;;  %v2500_v29 = vld [vmem:[%s3795_s1 + $0x204] ss:$16 sps:$4 sm:$0xff]   ;;  %v2503_v31 = vld [vmem:[%s3795_s1 + $0x200] ss:$16 sps:$4 sm:$0xff]  }
  0x11   :  { %1729 = vmatprep.subr.bf16.mxu1 %v2482_v17  ;;  %v2504_v32 = vld [vmem:[%s3795_s1 + $0x1e4] ss:$16 sps:$4 sm:$0xff]   ;;  %v2508_v34 = vld [vmem:[%s3795_s1 + $0x1e0] ss:$16 sps:$4 sm:$0xff]  }
  0x12   :  { %v2506_v33 = vld [vmem:[%s3795_s1 + $0x3e4] ss:$16 sps:$4 sm:$0xff]   ;;  %v2509_v35 = vld [vmem:[%s3795_s1 + $0x3e0] ss:$16 sps:$4 sm:$0xff]  }
  0x13   :  { %1677 = vmatpush1.bf16.msra.mxu0 %v2484_v18  ;;  %v2510_v36 = vld [vmem:[%s3795_s1 + $0x1c4] ss:$16 sps:$4 sm:$0xff]   ;;  %v2514_v38 = vld [vmem:[%s3795_s1 + $0x1c0] ss:$16 sps:$4 sm:$0xff]  }
  0x14   :  { %1730 = vmatpush1.bf16.msra.mxu1 %v2485_v19  ;;  %1678 = vmatprep.subr.bf16.mxu0 %v2486_v20  ;;  %v2512_v37 = vld [vmem:[%s3795_s1 + $0x3c4] ss:$16 sps:$4 sm:$0xff]   ;;  %v2515_v39 = vld [vmem:[%s3795_s1 + $0x3c0] ss:$16 sps:$4 sm:$0xff]  }
  0x15   :  { %1731 = vmatprep.subr.bf16.mxu1 %v2488_v21  ;;  %v2516_v40 = vld [vmem:[%s3795_s1 + $0x1a4] ss:$16 sps:$4 sm:$0xff]   ;;  %v2520_v42 = vld [vmem:[%s3795_s1 + $0x1a0] ss:$16 sps:$4 sm:$0xff]  }
  0x16   :  { %v2518_v41 = vld [vmem:[%s3795_s1 + $0x3a4] ss:$16 sps:$4 sm:$0xff]   ;;  %v2521_v43 = vld [vmem:[%s3795_s1 + $0x3a0] ss:$16 sps:$4 sm:$0xff]  }
  0x17   :  { %1679 = vmatpush1.bf16.msra.mxu0 %v2490_v22  ;;  %v2522_v44 = vld [vmem:[%s3795_s1 + $0x184] ss:$16 sps:$4 sm:$0xff]   ;;  %v2526_v46 = vld [vmem:[%s3795_s1 + $0x180] ss:$16 sps:$4 sm:$0xff]  }
  0x18   :  { %1732 = vmatpush1.bf16.msra.mxu1 %v2491_v23  ;;  %1680 = vmatprep.subr.bf16.mxu0 %v2492_v24  ;;  %v2524_v45 = vld [vmem:[%s3795_s1 + $0x384] ss:$16 sps:$4 sm:$0xff]   ;;  %v2527_v47 = vld [vmem:[%s3795_s1 + $0x380] ss:$16 sps:$4 sm:$0xff]  }
  0x19   :  { %1733 = vmatprep.subr.bf16.mxu1 %v2494_v25  ;;  %v14_v48 = vld [vmem:[%s3796_s0] sm:$0xff] }
  0x1a   :  { %v18_v49 = vld [vmem:[%s3796_s0 + $0x20] sm:$0xff] }
  0x1b   :  { %1681 = vmatpush1.bf16.msra.mxu0 %v2496_v26  ;;  %v2528_v52 = vld [vmem:[%s3795_s1 + $0x164] ss:$16 sps:$4 sm:$0xff]   ;;  %v3019_v53 = vcombine.high %v14_v48, %v18_v49  ;;  %v2532_v56 = vld [vmem:[%s3795_s1 + $0x160] ss:$16 sps:$4 sm:$0xff]   ;;  %v3076_v8 = vcombine.low %v14_v48, %v18_v49  ;;  %v3203_v48 = vld [vmem:[%s3796_s0 + $0x18] sm:$0xff] }
  0x1c   :  { %1734 = vmatpush1.bf16.msra.mxu1 %v2497_v27  ;;  %1682 = vmatprep.subr.bf16.mxu0 %v2498_v28  ;;  %v2530_v54 = vld [vmem:[%s3795_s1 + $0x364] ss:$16 sps:$4 sm:$0xff]   ;;  %v2533_v57 = vld [vmem:[%s3795_s1 + $0x360] ss:$16 sps:$4 sm:$0xff]   ;;  %v3216_v51 = vcombine.high %v3203_v48, %v3212_v50 }
  0x1d   :  { %1735 = vmatprep.subr.bf16.mxu1 %v2500_v29  ;;  %1700 = vmatprep.mubr.bf16.mxu0 %v3019_v53  ;;  %v2534_v58 = vld [vmem:[%s3795_s1 + $0x144] ss:$16 sps:$4 sm:$0xff]   ;;  %v2538_v60 = vld [vmem:[%s3795_s1 + $0x140] ss:$16 sps:$4 sm:$0xff]  }
  0x1e   :  { %v2536_v59 = vld [vmem:[%s3795_s1 + $0x344] ss:$16 sps:$4 sm:$0xff]   ;;  %v2539_v61 = vld [vmem:[%s3795_s1 + $0x340] ss:$16 sps:$4 sm:$0xff]  }
  0x1f   :  { %1683 = vmatpush1.bf16.msra.mxu0 %v2502_v30  ;;  %v2540_v62 = vld [vmem:[%s3795_s1 + $0x124] ss:$16 sps:$4 sm:$0xff]   ;;  %v2544_v0 = vld [vmem:[%s3795_s1 + $0x120] ss:$16 sps:$4 sm:$0xff]   ;;  %v23_v30 = vld [vmem:[%s3796_s0 + $0x48] sm:$0xff] }
  0x20   :  { %1736 = vmatpush1.bf16.msra.mxu1 %v2503_v31  ;;  %1684 = vmatprep.subr.bf16.mxu0 %v2504_v32  ;;  %v2542_v63 = vld [vmem:[%s3795_s1 + $0x324] ss:$16 sps:$4 sm:$0xff]   ;;  %v2545_v1 = vld [vmem:[%s3795_s1 + $0x320] ss:$16 sps:$4 sm:$0xff]   ;;  %v27_v31 = vld [vmem:[%s3796_s0 + $0x68] sm:$0xff] }
  0x21   :  { %1737 = vmatprep.subr.bf16.mxu1 %v2506_v33  ;;  %v2546_v2 = vld [vmem:[%s3795_s1 + $0x104] ss:$16 sps:$4 sm:$0xff]   ;;  %v2550_v4 = vld [vmem:[%s3795_s1 + $0x100] ss:$16 sps:$4 sm:$0xff]  }
  0x22   :  { %v2548_v3 = vld [vmem:[%s3795_s1 + $0x304] ss:$16 sps:$4 sm:$0xff]   ;;  %v2551_v5 = vld [vmem:[%s3795_s1 + $0x300] ss:$16 sps:$4 sm:$0xff]  }
  0x23   :  { %1685 = vmatpush2.bf16.msra.mxu0 %v2508_v34  ;;  %v2554_v6 = vld [vmem:[%s3795_s1 + $0x4e4] ss:$16 sps:$4 sm:$0xff]   ;;  %v2552_v10 = vld [vmem:[%s3795_s1 + $0x4e0] ss:$16 sps:$4 sm:$0xff]  }
  0x24   :  { %1738 = vmatpush2.bf16.msra.mxu1 %v2509_v35  ;;  %1686 = vmatprep.subr.bf16.mxu0 %v2510_v36  ;;  %v2557_v7 = vld [vmem:[%s3795_s1 + $0x6e4] ss:$16 sps:$4 sm:$0xff]   ;;  %v2555_v11 = vld [vmem:[%s3795_s1 + $0x6e0] ss:$16 sps:$4 sm:$0xff]   ;;  %v3155_v35 = vcombine.high %v23_v30, %v27_v31 }
  0x25   :  { %1739 = vmatprep.subr.bf16.mxu1 %v2512_v37  ;;  %v2560_v12 = vld [vmem:[%s3795_s1 + $0x4c4] ss:$16 sps:$4 sm:$0xff]   ;;  %v2558_v14 = vld [vmem:[%s3795_s1 + $0x4c0] ss:$16 sps:$4 sm:$0xff]   ;;  %v3160_v37 = vcombine.low %v23_v30, %v27_v31 }
  0x26   :  { %v2563_v13 = vld [vmem:[%s3795_s1 + $0x6c4] ss:$16 sps:$4 sm:$0xff]   ;;  %v2561_v15 = vld [vmem:[%s3795_s1 + $0x6c0] ss:$16 sps:$4 sm:$0xff]  }
  0x27   :  { %1687 = vmatpush2.bf16.msra.mxu0 %v2514_v38  ;;  %v2566_v16 = vld [vmem:[%s3795_s1 + $0x4a4] ss:$16 sps:$4 sm:$0xff]   ;;  %v2564_v18 = vld [vmem:[%s3795_s1 + $0x4a0] ss:$16 sps:$4 sm:$0xff]  }
  0x28   :  { %1740 = vmatpush2.bf16.msra.mxu1 %v2515_v39  ;;  %1688 = vmatprep.subr.bf16.mxu0 %v2516_v40  ;;  %v2569_v17 = vld [vmem:[%s3795_s1 + $0x6a4] ss:$16 sps:$4 sm:$0xff]   ;;  %v2567_v19 = vld [vmem:[%s3795_s1 + $0x6a0] ss:$16 sps:$4 sm:$0xff]  }
  0x29   :  { %1741 = vmatprep.subr.bf16.mxu1 %v2518_v41  ;;  %v2572_v20 = vld [vmem:[%s3795_s1 + $0x484] ss:$16 sps:$4 sm:$0xff]   ;;  %v2570_v22 = vld [vmem:[%s3795_s1 + $0x480] ss:$16 sps:$4 sm:$0xff]  }
  0x2a   :  { %v2575_v21 = vld [vmem:[%s3795_s1 + $0x684] ss:$16 sps:$4 sm:$0xff]   ;;  %v2573_v23 = vld [vmem:[%s3795_s1 + $0x680] ss:$16 sps:$4 sm:$0xff]  }
  0x2b   :  { %1689 = vmatpush2.bf16.msra.mxu0 %v2520_v42  ;;  %v2578_v24 = vld [vmem:[%s3795_s1 + $0x464] ss:$16 sps:$4 sm:$0xff]   ;;  %v2576_v26 = vld [vmem:[%s3795_s1 + $0x460] ss:$16 sps:$4 sm:$0xff]  }
  0x2c   :  { %1742 = vmatpush2.bf16.msra.mxu1 %v2521_v43  ;;  %1690 = vmatprep.subr.bf16.mxu0 %v2522_v44  ;;  %v2581_v25 = vld [vmem:[%s3795_s1 + $0x664] ss:$16 sps:$4 sm:$0xff]   ;;  %v2579_v27 = vld [vmem:[%s3795_s1 + $0x660] ss:$16 sps:$4 sm:$0xff]  }
  0x2d   :  { %1743 = vmatprep.subr.bf16.mxu1 %v2524_v45  ;;  %v22_v28 = vld [vmem:[%s3796_s0 + $0x40] sm:$0xff]  ;;  %v24_v30 = vld [vmem:[%s3796_s0 + $0x50] sm:$0xff] }
  0x2e   :  { %v26_v29 = vld [vmem:[%s3796_s0 + $0x60] sm:$0xff]  ;;  %v28_v31 = vld [vmem:[%s3796_s0 + $0x70] sm:$0xff] }
  0x2f   :  { %1691 = vmatpush2.bf16.msra.mxu0 %v2526_v46  ;;  %v2584_v32 = vld [vmem:[%s3795_s1 + $0x444] ss:$16 sps:$4 sm:$0xff]   ;;  %v3151_v33 = vcombine.high %v22_v28, %v26_v29  ;;  %v3153_v34 = vcombine.low %v22_v28, %v26_v29  ;;  %v2582_v38 = vld [vmem:[%s3795_s1 + $0x440] ss:$16 sps:$4 sm:$0xff]   ;;  %v2648_v28 = vld [vmem:[%s3795_s1 + $0xe8] ss:$16 sps:$4 sm:$0xff]  }
  0x30   :  { %1744 = vmatpush2.bf16.msra.mxu1 %v2527_v47  ;;  %1692 = vmatprep.subr.bf16.mxu0 %v2528_v52  ;;  %v2587_v36 = vld [vmem:[%s3795_s1 + $0x644] ss:$16 sps:$4 sm:$0xff]   ;;  %v2585_v39 = vld [vmem:[%s3795_s1 + $0x640] ss:$16 sps:$4 sm:$0xff]   ;;  %v2651_v29 = vld [vmem:[%s3795_s1 + $0x2e8] ss:$16 sps:$4 sm:$0xff]  }
  0x31   :  { %1745 = vmatprep.subr.bf16.mxu1 %v2530_v54  ;;  %v2590_v40 = vld [vmem:[%s3795_s1 + $0x424] ss:$16 sps:$4 sm:$0xff]   ;;  %v2588_v42 = vld [vmem:[%s3795_s1 + $0x420] ss:$16 sps:$4 sm:$0xff]  }
  0x32   :  { %v2593_v41 = vld [vmem:[%s3795_s1 + $0x624] ss:$16 sps:$4 sm:$0xff]   ;;  %v2591_v43 = vld [vmem:[%s3795_s1 + $0x620] ss:$16 sps:$4 sm:$0xff]  }
  0x33   :  { %1693 = vmatpush2.bf16.msra.mxu0 %v2532_v56  ;;  %v2596_v44 = vld [vmem:[%s3795_s1 + $0x404] ss:$16 sps:$4 sm:$0xff]   ;;  %v2594_v52 = vld [vmem:[%s3795_s1 + $0x400] ss:$16 sps:$4 sm:$0xff]  }
  0x34   :  { %1746 = vmatpush2.bf16.msra.mxu1 %v2533_v57  ;;  %1694 = vmatprep.subr.bf16.mxu0 %v2534_v58  ;;  %v2599_v45 = vld [vmem:[%s3795_s1 + $0x604] ss:$16 sps:$4 sm:$0xff]   ;;  %v2597_v54 = vld [vmem:[%s3795_s1 + $0x600] ss:$16 sps:$4 sm:$0xff]  }
  0x35   :  { %1747 = vmatprep.subr.bf16.mxu1 %v2536_v59  ;;  %v3193_v46 = vld [vmem:[%s3796_s0 + $0x10] sm:$0xff] }
  0x36   :  { %v3198_v47 = vld [vmem:[%s3796_s0 + $0x30] sm:$0xff] }
  0x37   :  { %1695 = vmatpush2.bf16.msra.mxu0 %v2538_v60  ;;  %v3207_v49 = vcombine.high %v3193_v46, %v3198_v47  ;;  %v2602_v56 = vld [vmem:[%s3795_s1 + $0x5e4] ss:$16 sps:$4 sm:$0xff]   ;;  %v2600_v58 = vld [vmem:[%s3795_s1 + $0x5e0] ss:$16 sps:$4 sm:$0xff]  }
  0x38   :  { %1748 = vmatpush2.bf16.msra.mxu1 %v2539_v61  ;;  %1696 = vmatprep.subr.bf16.mxu0 %v2540_v62  ;;  %v2605_v57 = vld [vmem:[%s3795_s1 + $0x7e4] ss:$16 sps:$4 sm:$0xff]   ;;  %v2603_v59 = vld [vmem:[%s3795_s1 + $0x7e0] ss:$16 sps:$4 sm:$0xff]  }
  0x39   :  { %1749 = vmatprep.subr.bf16.mxu1 %v2542_v63  ;;  %v2608_v60 = vld [vmem:[%s3795_s1 + $0x5c4] ss:$16 sps:$4 sm:$0xff]   ;;  %v2606_v62 = vld [vmem:[%s3795_s1 + $0x5c0] ss:$16 sps:$4 sm:$0xff]  }
  0x3a   :  { %v2611_v61 = vld [vmem:[%s3795_s1 + $0x7c4] ss:$16 sps:$4 sm:$0xff]   ;;  %v2609_v63 = vld [vmem:[%s3795_s1 + $0x7c0] ss:$16 sps:$4 sm:$0xff]  }
  0x3b   :  { %1697 = vmatpush2.bf16.msra.mxu0 %v2544_v0  ;;  %v2614_v0 = vld [vmem:[%s3795_s1 + $0x5a4] ss:$16 sps:$4 sm:$0xff]  }
  0x3c   :  { %1750 = vmatpush2.bf16.msra.mxu1 %v2545_v1  ;;  %1698 = vmatprep.subr.bf16.mxu0 %v2546_v2  ;;  %v2617_v1 = vld [vmem:[%s3795_s1 + $0x7a4] ss:$16 sps:$4 sm:$0xff]   ;;  %v2612_v2 = vld [vmem:[%s3795_s1 + $0x5a0] ss:$16 sps:$4 sm:$0xff]  }
  0x3d   :  { %1751 = vmatprep.subr.bf16.mxu1 %v2548_v3  ;;  %v2615_v3 = vld [vmem:[%s3795_s1 + $0x7a0] ss:$16 sps:$4 sm:$0xff]  }
  0x3f   :  { %1699 = vmatpush2.bf16.msra.mxu0 %v2550_v4  ;;  %v2620_v4 = vld [vmem:[%s3795_s1 + $0x584] ss:$16 sps:$4 sm:$0xff]  }
  0x40   :  { %1752 = vmatpush2.bf16.msra.mxu1 %v2551_v5  ;;  %1774 = vmatprep.subr.bf16.mxu0 %v2554_v6  ;;  %v2623_v5 = vld [vmem:[%s3795_s1 + $0x784] ss:$16 sps:$4 sm:$0xff]   ;;  %v2618_v6 = vld [vmem:[%s3795_s1 + $0x580] ss:$16 sps:$4 sm:$0xff]  }
  0x41   :  { %1827 = vmatprep.subr.bf16.mxu1 %v2557_v7  ;;  %v2621_v7 = vld [vmem:[%s3795_s1 + $0x780] ss:$16 sps:$4 sm:$0xff]  }
  0x42   :  { %1701 = vmatmul.mubr.bf16.vlgmr.msra.gmra.mxu0 %v3076_v8 }
  0x43   :  { %1754 = vmatmul.mubr.bf16.vlgmr.msra.gmra.mxu1 %v3078_v9  ;;  %1775 = vmatpush1.bf16.msra.mxu0 %v2552_v10  ;;  %v2626_v10 = vld [vmem:[%s3795_s1 + $0x564] ss:$16 sps:$4 sm:$0xff]  }
  0x44   :  { %1828 = vmatpush1.bf16.msra.mxu1 %v2555_v11  ;;  %1776 = vmatprep.subr.bf16.mxu0 %v2560_v12  ;;  %v2629_v11 = vld [vmem:[%s3795_s1 + $0x764] ss:$16 sps:$4 sm:$0xff]   ;;  %v2624_v12 = vld [vmem:[%s3795_s1 + $0x560] ss:$16 sps:$4 sm:$0xff]  }
  0x45   :  { %1829 = vmatprep.subr.bf16.mxu1 %v2563_v13  ;;  %1710 = vmatprep.mubr.bf16.mxu0 %v3151_v33  ;;  %v2627_v13 = vld [vmem:[%s3795_s1 + $0x760] ss:$16 sps:$4 sm:$0xff]  }
  0x46   :  { %1763 = vmatprep.mubr.bf16.mxu1 %v3155_v35 }
  0x47   :  { %1777 = vmatpush1.bf16.msra.mxu0 %v2558_v14  ;;  %v2632_v14 = vld [vmem:[%s3795_s1 + $0x544] ss:$16 sps:$4 sm:$0xff]  }
  0x48   :  { %1830 = vmatpush1.bf16.msra.mxu1 %v2561_v15  ;;  %1778 = vmatprep.subr.bf16.mxu0 %v2566_v16  ;;  %v2635_v15 = vld [vmem:[%s3795_s1 + $0x744] ss:$16 sps:$4 sm:$0xff]   ;;  %v2630_v16 = vld [vmem:[%s3795_s1 + $0x540] ss:$16 sps:$4 sm:$0xff]  }
  0x49   :  { %1831 = vmatprep.subr.bf16.mxu1 %v2569_v17  ;;  %v2633_v17 = vld [vmem:[%s3795_s1 + $0x740] ss:$16 sps:$4 sm:$0xff]  }
  0x4a   :  { %1711 = vmatmul.mubr.bf16.gmra.mxu0 %v3153_v34 }
  0x4b   :  { %1779 = vmatpush1.bf16.msra.mxu0 %v2564_v18  ;;  %1764 = vmatmul.mubr.bf16.gmra.mxu1 %v3160_v37  ;;  %v2638_v18 = vld [vmem:[%s3795_s1 + $0x524] ss:$16 sps:$4 sm:$0xff]  }
  0x4c   :  { %1832 = vmatpush1.bf16.msra.mxu1 %v2567_v19  ;;  %1780 = vmatprep.subr.bf16.mxu0 %v2572_v20  ;;  %v2641_v19 = vld [vmem:[%s3795_s1 + $0x724] ss:$16 sps:$4 sm:$0xff]   ;;  %v2636_v20 = vld [vmem:[%s3795_s1 + $0x520] ss:$16 sps:$4 sm:$0xff]  }
  0x4d   :  { %1833 = vmatprep.subr.bf16.mxu1 %v2575_v21  ;;  %1806 = vmatprep.mubr.bf16.mxu0 %v3207_v49  ;;  %v2639_v21 = vld [vmem:[%s3795_s1 + $0x720] ss:$16 sps:$4 sm:$0xff]  }
  0x4e   :  { %1859 = vmatprep.mubr.bf16.mxu1 %v3216_v51 }
  0x4f   :  { %1781 = vmatpush1.bf16.msra.mxu0 %v2570_v22  ;;  %v2644_v22 = vld [vmem:[%s3795_s1 + $0x504] ss:$16 sps:$4 sm:$0xff]  }
  0x50   :  { %1834 = vmatpush1.bf16.msra.mxu1 %v2573_v23  ;;  %1782 = vmatprep.subr.bf16.mxu0 %v2578_v24  ;;  %v2647_v23 = vld [vmem:[%s3795_s1 + $0x704] ss:$16 sps:$4 sm:$0xff]   ;;  %v2642_v24 = vld [vmem:[%s3795_s1 + $0x500] ss:$16 sps:$4 sm:$0xff]  }
  0x51   :  { %1835 = vmatprep.subr.bf16.mxu1 %v2581_v25  ;;  %v2645_v25 = vld [vmem:[%s3795_s1 + $0x700] ss:$16 sps:$4 sm:$0xff]  }
  0x53   :  { %1783 = vmatpush1.bf16.msra.mxu0 %v2576_v26  ;;  %v2650_v26 = vld [vmem:[%s3795_s1 + $0xec] ss:$16 sps:$4 sm:$0xff]  }
  0x54   :  { %1836 = vmatpush1.bf16.msra.mxu1 %v2579_v27  ;;  %1784 = vmatprep.subr.bf16.mxu0 %v2584_v32  ;;  %v2653_v27 = vld [vmem:[%s3795_s1 + $0x2ec] ss:$16 sps:$4 sm:$0xff]   ;;  %v3342_v32 = vcombine.low %v3193_v46, %v3198_v47 }
  0x55   :  { %1837 = vmatprep.subr.bf16.mxu1 %v2587_v36  ;;  %v3346_v36 = vcombine.low %v3203_v48, %v3212_v50  ;;  %v2662_v46 = vld [vmem:[%s3795_s1 + $0xac] ss:$16 sps:$4 sm:$0xff]   ;;  %v3380_v48 = vcombine.low %v24_v30, %v28_v31  ;;  %v2660_v50 = vld [vmem:[%s3795_s1 + $0xa8] ss:$16 sps:$4 sm:$0xff]  }
  0x56   :  { %v2665_v47 = vld [vmem:[%s3795_s1 + $0x2ac] ss:$16 sps:$4 sm:$0xff]  }
  0x57   :  { %1785 = vmatpush1.bf16.msra.mxu0 %v2582_v38  ;;  %v25_v38 = vld [vmem:[%s3796_s0 + $0x58] sm:$0xff] }
  0x58   :  { %1838 = vmatpush1.bf16.msra.mxu1 %v2585_v39  ;;  %1786 = vmatprep.subr.bf16.mxu0 %v2590_v40  ;;  %v29_v39 = vld [vmem:[%s3796_s0 + $0x78] sm:$0xff] }
  0x59   :  { %1839 = vmatprep.subr.bf16.mxu1 %v2593_v41  ;;  %v2656_v40 = vld [vmem:[%s3795_s1 + $0xcc] ss:$16 sps:$4 sm:$0xff]  }
  0x5a   :  { %v2659_v41 = vld [vmem:[%s3795_s1 + $0x2cc] ss:$16 sps:$4 sm:$0xff]  }
  0x5b   :  { %1787 = vmatpush1.bf16.msra.mxu0 %v2588_v42  ;;  %v3360_v42 = vcombine.high %v24_v30, %v28_v31  ;;  %v2720_v30 = vld [vmem:[%s3795_s1 + $0x168] ss:$16 sps:$4 sm:$0xff]  }
  0x5c   :  { %1840 = vmatpush1.bf16.msra.mxu1 %v2591_v43  ;;  %1788 = vmatprep.subr.bf16.mxu0 %v2596_v44  ;;  %v3362_v43 = vcombine.high %v25_v38, %v29_v39  ;;  %v2654_v44 = vld [vmem:[%s3795_s1 + $0xc8] ss:$16 sps:$4 sm:$0xff]  }
  0x5d   :  { %1841 = vmatprep.subr.bf16.mxu1 %v2599_v45  ;;  %v2657_v45 = vld [vmem:[%s3795_s1 + $0x2c8] ss:$16 sps:$4 sm:$0xff]  }
  0x5e   :  { %v2723_v31 = vld [vmem:[%s3795_s1 + $0x368] ss:$16 sps:$4 sm:$0xff]  }
  0x5f   :  { %1789 = vmatpush1.bf16.msra.mxu0 %v2594_v52  ;;  %v2663_v52 = vld [vmem:[%s3795_s1 + $0x2a8] ss:$16 sps:$4 sm:$0xff]  }
  0x60   :  { %1842 = vmatpush1.bf16.msra.mxu1 %v2597_v54  ;;  %1790 = vmatprep.subr.bf16.mxu0 %v2602_v56  ;;  %v3388_v54 = vcombine.low %v25_v38, %v29_v39  ;;  %v2668_v56 = vld [vmem:[%s3795_s1 + $0x8c] ss:$16 sps:$4 sm:$0xff]  }
  0x61   :  { %1843 = vmatprep.subr.bf16.mxu1 %v2605_v57  ;;  %v2671_v57 = vld [vmem:[%s3795_s1 + $0x28c] ss:$16 sps:$4 sm:$0xff]  }
  0x62   :  { %v2728_v38 = vld [vmem:[%s3795_s1 + $0x14c] ss:$16 sps:$4 sm:$0xff]  }
  0x63   :  { %1791 = vmatpush2.bf16.msra.mxu0 %v2600_v58  ;;  %v2666_v58 = vld [vmem:[%s3795_s1 + $0x88] ss:$16 sps:$4 sm:$0xff]   ;;  %v2731_v39 = vld [vmem:[%s3795_s1 + $0x34c] ss:$16 sps:$4 sm:$0xff]  }
  0x64   :  { %1844 = vmatpush2.bf16.msra.mxu1 %v2603_v59  ;;  %1792 = vmatprep.subr.bf16.mxu0 %v2608_v60  ;;  %v2669_v59 = vld [vmem:[%s3795_s1 + $0x288] ss:$16 sps:$4 sm:$0xff]   ;;  %v2674_v60 = vld [vmem:[%s3795_s1 + $0x6c] ss:$16 sps:$4 sm:$0xff]  }
  0x65   :  { %1845 = vmatprep.subr.bf16.mxu1 %v2611_v61  ;;  %v2677_v61 = vld [vmem:[%s3795_s1 + $0x26c] ss:$16 sps:$4 sm:$0xff]  }
  0x67   :  { %1793 = vmatpush2.bf16.msra.mxu0 %v2606_v62  ;;  %v2672_v62 = vld [vmem:[%s3795_s1 + $0x68] ss:$16 sps:$4 sm:$0xff]  }
  0x68   :  { %1846 = vmatpush2.bf16.msra.mxu1 %v2609_v63  ;;  %1794 = vmatprep.subr.bf16.mxu0 %v2614_v0  ;;  %v2675_v63 = vld [vmem:[%s3795_s1 + $0x268] ss:$16 sps:$4 sm:$0xff]   ;;  %v2680_v0 = vld [vmem:[%s3795_s1 + $0x4c] ss:$16 sps:$4 sm:$0xff]  }
  0x69   :  { %1847 = vmatprep.subr.bf16.mxu1 %v2617_v1  ;;  %v2681_v1 = vld [vmem:[%s3795_s1 + $0x248] ss:$16 sps:$4 sm:$0xff]  }
  0x6b   :  { %1795 = vmatpush2.bf16.msra.mxu0 %v2612_v2  ;;  %v2686_v2 = vld [vmem:[%s3795_s1 + $0x2c] ss:$16 sps:$4 sm:$0xff]  }
  0x6c   :  { %1848 = vmatpush2.bf16.msra.mxu1 %v2615_v3  ;;  %1796 = vmatprep.subr.bf16.mxu0 %v2620_v4  ;;  %v2689_v3 = vld [vmem:[%s3795_s1 + $0x22c] ss:$16 sps:$4 sm:$0xff]   ;;  %v2684_v4 = vld [vmem:[%s3795_s1 + $0x28] ss:$16 sps:$4 sm:$0xff]  }
  0x6d   :  { %1849 = vmatprep.subr.bf16.mxu1 %v2623_v5  ;;  %v2687_v5 = vld [vmem:[%s3795_s1 + $0x228] ss:$16 sps:$4 sm:$0xff]  }
  0x6f   :  { %1797 = vmatpush2.bf16.msra.mxu0 %v2618_v6  ;;  %v2692_v6 = vld [vmem:[%s3795_s1 + $0xc] ss:$16 sps:$4 sm:$0xff]  }
  0x70   :  { %1850 = vmatpush2.bf16.msra.mxu1 %v2621_v7  ;;  %1798 = vmatprep.subr.bf16.mxu0 %v2626_v10  ;;  %v2695_v7 = vld [vmem:[%s3795_s1 + $0x20c] ss:$16 sps:$4 sm:$0xff]   ;;  %v2690_v10 = vld [vmem:[%s3795_s1 + $0x8] ss:$16 sps:$4 sm:$0xff]  }
  0x71   :  { %1851 = vmatprep.subr.bf16.mxu1 %v2629_v11  ;;  %v2693_v11 = vld [vmem:[%s3795_s1 + $0x208] ss:$16 sps:$4 sm:$0xff]  }
  0x73   :  { %1799 = vmatpush2.bf16.msra.mxu0 %v2624_v12  ;;  %v2698_v12 = vld [vmem:[%s3795_s1 + $0x1ec] ss:$16 sps:$4 sm:$0xff]  }
  0x74   :  { %1852 = vmatpush2.bf16.msra.mxu1 %v2627_v13  ;;  %1800 = vmatprep.subr.bf16.mxu0 %v2632_v14  ;;  %v2701_v13 = vld [vmem:[%s3795_s1 + $0x3ec] ss:$16 sps:$4 sm:$0xff]   ;;  %v2696_v14 = vld [vmem:[%s3795_s1 + $0x1e8] ss:$16 sps:$4 sm:$0xff]  }
  0x75   :  { %1853 = vmatprep.subr.bf16.mxu1 %v2635_v15  ;;  %v2699_v15 = vld [vmem:[%s3795_s1 + $0x3e8] ss:$16 sps:$4 sm:$0xff]  }
  0x77   :  { %1801 = vmatpush2.bf16.msra.mxu0 %v2630_v16  ;;  %v2704_v16 = vld [vmem:[%s3795_s1 + $0x1cc] ss:$16 sps:$4 sm:$0xff]  }
  0x78   :  { %1854 = vmatpush2.bf16.msra.mxu1 %v2633_v17  ;;  %1802 = vmatprep.subr.bf16.mxu0 %v2638_v18  ;;  %v2707_v17 = vld [vmem:[%s3795_s1 + $0x3cc] ss:$16 sps:$4 sm:$0xff]   ;;  %v2702_v18 = vld [vmem:[%s3795_s1 + $0x1c8] ss:$16 sps:$4 sm:$0xff]  }
  0x79   :  { %1855 = vmatprep.subr.bf16.mxu1 %v2641_v19  ;;  %v2705_v19 = vld [vmem:[%s3795_s1 + $0x3c8] ss:$16 sps:$4 sm:$0xff]  }
  0x7b   :  { %1803 = vmatpush2.bf16.msra.mxu0 %v2636_v20  ;;  %v2710_v20 = vld [vmem:[%s3795_s1 + $0x1ac] ss:$16 sps:$4 sm:$0xff]  }
  0x7c   :  { %1856 = vmatpush2.bf16.msra.mxu1 %v2639_v21  ;;  %1804 = vmatprep.subr.bf16.mxu0 %v2644_v22  ;;  %v2713_v21 = vld [vmem:[%s3795_s1 + $0x3ac] ss:$16 sps:$4 sm:$0xff]   ;;  %v2708_v22 = vld [vmem:[%s3795_s1 + $0x1a8] ss:$16 sps:$4 sm:$0xff]  }
  0x7d   :  { %1857 = vmatprep.subr.bf16.mxu1 %v2647_v23  ;;  %v2711_v23 = vld [vmem:[%s3795_s1 + $0x3a8] ss:$16 sps:$4 sm:$0xff]  }
  0x7f   :  { %1805 = vmatpush2.bf16.msra.mxu0 %v2642_v24  ;;  %v2716_v24 = vld [vmem:[%s3795_s1 + $0x18c] ss:$16 sps:$4 sm:$0xff]  }
  0x80   :  { %1858 = vmatpush2.bf16.msra.mxu1 %v2645_v25  ;;  %1880 = vmatprep.subr.bf16.mxu0 %v2650_v26  ;;  %v2719_v25 = vld [vmem:[%s3795_s1 + $0x38c] ss:$16 sps:$4 sm:$0xff]   ;;  %v2714_v26 = vld [vmem:[%s3795_s1 + $0x188] ss:$16 sps:$4 sm:$0xff]  }
  0x81   :  { %1933 = vmatprep.subr.bf16.mxu1 %v2653_v27  ;;  %v2717_v27 = vld [vmem:[%s3795_s1 + $0x388] ss:$16 sps:$4 sm:$0xff]  }
  0x82   :  { %1807 = vmatmul.mubr.bf16.vlgmr.msra.gmra.mxu0 %v3342_v32 }
  0x83   :  { %1860 = vmatmul.mubr.bf16.vlgmr.msra.gmra.mxu1 %v3346_v36  ;;  %1881 = vmatpush1.bf16.msra.mxu0 %v2648_v28  ;;  %v2722_v28 = vld [vmem:[%s3795_s1 + $0x16c] ss:$16 sps:$4 sm:$0xff]  }
  0x84   :  { %1934 = vmatpush1.bf16.msra.mxu1 %v2651_v29  ;;  %1882 = vmatprep.subr.bf16.mxu0 %v2656_v40  ;;  %v2725_v29 = vld [vmem:[%s3795_s1 + $0x36c] ss:$16 sps:$4 sm:$0xff]   ;;  %v2726_v40 = vld [vmem:[%s3795_s1 + $0x148] ss:$16 sps:$4 sm:$0xff]  }
  0x85   :  { %1935 = vmatprep.subr.bf16.mxu1 %v2659_v41  ;;  %1816 = vmatprep.mubr.bf16.mxu0 %v3360_v42  ;;  %v2729_v41 = vld [vmem:[%s3795_s1 + $0x348] ss:$16 sps:$4 sm:$0xff]  }
  0x86   :  { %1869 = vmatprep.mubr.bf16.mxu1 %v3362_v43 }
  0x87   :  { %1883 = vmatpush1.bf16.msra.mxu0 %v2654_v44  ;;  %v2734_v44 = vld [vmem:[%s3795_s1 + $0x12c] ss:$16 sps:$4 sm:$0xff]  }
  0x88   :  { %1936 = vmatpush1.bf16.msra.mxu1 %v2657_v45  ;;  %1884 = vmatprep.subr.bf16.mxu0 %v2662_v46  ;;  %v2737_v45 = vld [vmem:[%s3795_s1 + $0x32c] ss:$16 sps:$4 sm:$0xff]   ;;  %v2732_v46 = vld [vmem:[%s3795_s1 + $0x128] ss:$16 sps:$4 sm:$0xff]  }
  0x89   :  { %1937 = vmatprep.subr.bf16.mxu1 %v2665_v47  ;;  %v2735_v47 = vld [vmem:[%s3795_s1 + $0x328] ss:$16 sps:$4 sm:$0xff]  }
  0x8a   :  { %1817 = vmatmul.mubr.bf16.gmra.mxu0 %v3380_v48 }
  0x8b   :  { %1870 = vmatmul.mubr.bf16.gmra.mxu1 %v3388_v54  ;;  %1885 = vmatpush1.bf16.msra.mxu0 %v2660_v50  ;;  %v2740_v50 = vld [vmem:[%s3795_s1 + $0x10c] ss:$16 sps:$4 sm:$0xff]  }
  0x8c   :  { %1938 = vmatpush1.bf16.msra.mxu1 %v2663_v52  ;;  %1886 = vmatprep.subr.bf16.mxu0 %v2668_v56  ;;  %v2743_v52 = vld [vmem:[%s3795_s1 + $0x30c] ss:$16 sps:$4 sm:$0xff]   ;;  %v2738_v56 = vld [vmem:[%s3795_s1 + $0x108] ss:$16 sps:$4 sm:$0xff]  }
  0x8d   :  { %1939 = vmatprep.subr.bf16.mxu1 %v2671_v57  ;;  %1912 = vmatprep.mubr.bf16.mxu0 %v3019_v53  ;;  %v2683_v53 = vld [vmem:[%s3795_s1 + $0x24c] ss:$16 sps:$4 sm:$0xff]   ;;  %v2741_v57 = vld [vmem:[%s3795_s1 + $0x308] ss:$16 sps:$4 sm:$0xff]  }
  0x8e   :  { %1965 = vmatprep.mubr.bf16.mxu1 %v3024_v55  ;;  %v2678_v55 = vld [vmem:[%s3795_s1 + $0x48] ss:$16 sps:$4 sm:$0xff]  }
  0x8f   :  { %1887 = vmatpush1.bf16.msra.mxu0 %v2666_v58  ;;  %v2746_v58 = vld [vmem:[%s3795_s1 + $0x4ec] ss:$16 sps:$4 sm:$0xff]  }
  0x90   :  { %1940 = vmatpush1.bf16.msra.mxu1 %v2669_v59  ;;  %1888 = vmatprep.subr.bf16.mxu0 %v2674_v60  ;;  %v2749_v59 = vld [vmem:[%s3795_s1 + $0x6ec] ss:$16 sps:$4 sm:$0xff]   ;;  %v2744_v60 = vld [vmem:[%s3795_s1 + $0x4e8] ss:$16 sps:$4 sm:$0xff]  }
  0x91   :  { %1941 = vmatprep.subr.bf16.mxu1 %v2677_v61  ;;  %v2747_v61 = vld [vmem:[%s3795_s1 + $0x6e8] ss:$16 sps:$4 sm:$0xff]  }
  0x93   :  { %1889 = vmatpush1.bf16.msra.mxu0 %v2672_v62  ;;  %v2752_v62 = vld [vmem:[%s3795_s1 + $0x4cc] ss:$16 sps:$4 sm:$0xff]  }
  0x94   :  { %1942 = vmatpush1.bf16.msra.mxu1 %v2675_v63  ;;  %1890 = vmatprep.subr.bf16.mxu0 %v2680_v0  ;;  %v2755_v63 = vld [vmem:[%s3795_s1 + $0x6cc] ss:$16 sps:$4 sm:$0xff]   ;;  %v2750_v0 = vld [vmem:[%s3795_s1 + $0x4c8] ss:$16 sps:$4 sm:$0xff]  }
  0x95   :  { %1943 = vmatprep.subr.bf16.mxu1 %v2683_v53  ;;  %v2753_v53 = vld [vmem:[%s3795_s1 + $0x6c8] ss:$16 sps:$4 sm:$0xff]  }
  0x97   :  { %1891 = vmatpush1.bf16.msra.mxu0 %v2678_v55  ;;  %v2758_v55 = vld [vmem:[%s3795_s1 + $0x4ac] ss:$16 sps:$4 sm:$0xff]  }
  0x98   :  { %1944 = vmatpush1.bf16.msra.mxu1 %v2681_v1  ;;  %1892 = vmatprep.subr.bf16.mxu0 %v2686_v2  ;;  %v2759_v1 = vld [vmem:[%s3795_s1 + $0x6a8] ss:$16 sps:$4 sm:$0xff]   ;;  %v2764_v2 = vld [vmem:[%s3795_s1 + $0x48c] ss:$16 sps:$4 sm:$0xff]  }
  0x99   :  { %1945 = vmatprep.subr.bf16.mxu1 %v2689_v3  ;;  %v2765_v3 = vld [vmem:[%s3795_s1 + $0x688] ss:$16 sps:$4 sm:$0xff]  }
  0x9b   :  { %1893 = vmatpush1.bf16.msra.mxu0 %v2684_v4  ;;  %v2770_v4 = vld [vmem:[%s3795_s1 + $0x46c] ss:$16 sps:$4 sm:$0xff]  }
  0x9c   :  { %1946 = vmatpush1.bf16.msra.mxu1 %v2687_v5  ;;  %1894 = vmatprep.subr.bf16.mxu0 %v2692_v6  ;;  %v2771_v5 = vld [vmem:[%s3795_s1 + $0x668] ss:$16 sps:$4 sm:$0xff]   ;;  %v2776_v6 = vld [vmem:[%s3795_s1 + $0x44c] ss:$16 sps:$4 sm:$0xff]  }
  0x9d   :  { %1947 = vmatprep.subr.bf16.mxu1 %v2695_v7  ;;  %v2777_v7 = vld [vmem:[%s3795_s1 + $0x648] ss:$16 sps:$4 sm:$0xff]  }
  0x9f   :  { %1895 = vmatpush1.bf16.msra.mxu0 %v2690_v10  ;;  %v2782_v10 = vld [vmem:[%s3795_s1 + $0x42c] ss:$16 sps:$4 sm:$0xff]  }
  0xa0   :  { %1948 = vmatpush1.bf16.msra.mxu1 %v2693_v11  ;;  %1896 = vmatprep.subr.bf16.mxu0 %v2698_v12  ;;  %v2785_v11 = vld [vmem:[%s3795_s1 + $0x62c] ss:$16 sps:$4 sm:$0xff]   ;;  %v2780_v12 = vld [vmem:[%s3795_s1 + $0x428] ss:$16 sps:$4 sm:$0xff]  }
  0xa1   :  { %1949 = vmatprep.subr.bf16.mxu1 %v2701_v13  ;;  %v2783_v13 = vld [vmem:[%s3795_s1 + $0x628] ss:$16 sps:$4 sm:$0xff]  }
  0xa3   :  { %1897 = vmatpush2.bf16.msra.mxu0 %v2696_v14  ;;  %v2788_v14 = vld [vmem:[%s3795_s1 + $0x40c] ss:$16 sps:$4 sm:$0xff]  }
  0xa4   :  { %1950 = vmatpush2.bf16.msra.mxu1 %v2699_v15  ;;  %1898 = vmatprep.subr.bf16.mxu0 %v2704_v16  ;;  %v2791_v15 = vld [vmem:[%s3795_s1 + $0x60c] ss:$16 sps:$4 sm:$0xff]   ;;  %v2786_v16 = vld [vmem:[%s3795_s1 + $0x408] ss:$16 sps:$4 sm:$0xff]  }
  0xa5   :  { %1951 = vmatprep.subr.bf16.mxu1 %v2707_v17  ;;  %v2789_v17 = vld [vmem:[%s3795_s1 + $0x608] ss:$16 sps:$4 sm:$0xff]  }
  0xa7   :  { %1899 = vmatpush2.bf16.msra.mxu0 %v2702_v18  ;;  %v2794_v18 = vld [vmem:[%s3795_s1 + $0x5ec] ss:$16 sps:$4 sm:$0xff]  }
  0xa8   :  { %1952 = vmatpush2.bf16.msra.mxu1 %v2705_v19  ;;  %1900 = vmatprep.subr.bf16.mxu0 %v2710_v20  ;;  %v2797_v19 = vld [vmem:[%s3795_s1 + $0x7ec] ss:$16 sps:$4 sm:$0xff]   ;;  %v2792_v20 = vld [vmem:[%s3795_s1 + $0x5e8] ss:$16 sps:$4 sm:$0xff]  }
  0xa9   :  { %1953 = vmatprep.subr.bf16.mxu1 %v2713_v21  ;;  %v2795_v21 = vld [vmem:[%s3795_s1 + $0x7e8] ss:$16 sps:$4 sm:$0xff]  }
  0xab   :  { %1901 = vmatpush2.bf16.msra.mxu0 %v2708_v22  ;;  %v2800_v22 = vld [vmem:[%s3795_s1 + $0x5cc] ss:$16 sps:$4 sm:$0xff]  }
  0xac   :  { %1954 = vmatpush2.bf16.msra.mxu1 %v2711_v23  ;;  %1902 = vmatprep.subr.bf16.mxu0 %v2716_v24  ;;  %v2803_v23 = vld [vmem:[%s3795_s1 + $0x7cc] ss:$16 sps:$4 sm:$0xff]   ;;  %v2798_v24 = vld [vmem:[%s3795_s1 + $0x5c8] ss:$16 sps:$4 sm:$0xff]  }
  0xad   :  { %1955 = vmatprep.subr.bf16.mxu1 %v2719_v25  ;;  %v2801_v25 = vld [vmem:[%s3795_s1 + $0x7c8] ss:$16 sps:$4 sm:$0xff]  }
  0xaf   :  { %1903 = vmatpush2.bf16.msra.mxu0 %v2714_v26  ;;  %v2806_v26 = vld [vmem:[%s3795_s1 + $0x5ac] ss:$16 sps:$4 sm:$0xff]  }
  0xb0   :  { %1956 = vmatpush2.bf16.msra.mxu1 %v2717_v27  ;;  %1904 = vmatprep.subr.bf16.mxu0 %v2722_v28  ;;  %v2809_v27 = vld [vmem:[%s3795_s1 + $0x7ac] ss:$16 sps:$4 sm:$0xff]   ;;  %v2804_v28 = vld [vmem:[%s3795_s1 + $0x5a8] ss:$16 sps:$4 sm:$0xff]  }
  0xb1   :  { %1957 = vmatprep.subr.bf16.mxu1 %v2725_v29  ;;  %v2807_v29 = vld [vmem:[%s3795_s1 + $0x7a8] ss:$16 sps:$4 sm:$0xff]  }
  0xb3   :  { %1905 = vmatpush2.bf16.msra.mxu0 %v2720_v30  ;;  %v2812_v30 = vld [vmem:[%s3795_s1 + $0x58c] ss:$16 sps:$4 sm:$0xff]  }
  0xb4   :  { %1958 = vmatpush2.bf16.msra.mxu1 %v2723_v31  ;;  %1906 = vmatprep.subr.bf16.mxu0 %v2728_v38  ;;  %v2815_v31 = vld [vmem:[%s3795_s1 + $0x78c] ss:$16 sps:$4 sm:$0xff]   ;;  %v2810_v38 = vld [vmem:[%s3795_s1 + $0x588] ss:$16 sps:$4 sm:$0xff]  }
  0xb5   :  { %1959 = vmatprep.subr.bf16.mxu1 %v2731_v39  ;;  %v2813_v39 = vld [vmem:[%s3795_s1 + $0x788] ss:$16 sps:$4 sm:$0xff]  }
  0xb7   :  { %1907 = vmatpush2.bf16.msra.mxu0 %v2726_v40  ;;  %v2818_v40 = vld [vmem:[%s3795_s1 + $0x56c] ss:$16 sps:$4 sm:$0xff]  }
  0xb8   :  { %1960 = vmatpush2.bf16.msra.mxu1 %v2729_v41  ;;  %1908 = vmatprep.subr.bf16.mxu0 %v2734_v44  ;;  %v2821_v41 = vld [vmem:[%s3795_s1 + $0x76c] ss:$16 sps:$4 sm:$0xff]   ;;  %v2816_v44 = vld [vmem:[%s3795_s1 + $0x568] ss:$16 sps:$4 sm:$0xff]  }
  0xb9   :  { %1961 = vmatprep.subr.bf16.mxu1 %v2737_v45  ;;  %v2819_v45 = vld [vmem:[%s3795_s1 + $0x768] ss:$16 sps:$4 sm:$0xff]  }
  0xbb   :  { %1909 = vmatpush2.bf16.msra.mxu0 %v2732_v46  ;;  %v2824_v46 = vld [vmem:[%s3795_s1 + $0x54c] ss:$16 sps:$4 sm:$0xff]  }
  0xbc   :  { %1962 = vmatpush2.bf16.msra.mxu1 %v2735_v47  ;;  %1910 = vmatprep.subr.bf16.mxu0 %v2740_v50  ;;  %v2827_v47 = vld [vmem:[%s3795_s1 + $0x74c] ss:$16 sps:$4 sm:$0xff]   ;;  %v2822_v50 = vld [vmem:[%s3795_s1 + $0x548] ss:$16 sps:$4 sm:$0xff]  }
  0xbd   :  { %1963 = vmatprep.subr.bf16.mxu1 %v2743_v52  ;;  %v2825_v52 = vld [vmem:[%s3795_s1 + $0x748] ss:$16 sps:$4 sm:$0xff]  }
  0xbf   :  { %1911 = vmatpush2.bf16.msra.mxu0 %v2738_v56  ;;  %v2830_v56 = vld [vmem:[%s3795_s1 + $0x52c] ss:$16 sps:$4 sm:$0xff]  }
  0xc0   :  { %1964 = vmatpush2.bf16.msra.mxu1 %v2741_v57  ;;  %1986 = vmatprep.subr.bf16.mxu0 %v2746_v58  ;;  %v2833_v57 = vld [vmem:[%s3795_s1 + $0x72c] ss:$16 sps:$4 sm:$0xff]   ;;  %v2828_v58 = vld [vmem:[%s3795_s1 + $0x528] ss:$16 sps:$4 sm:$0xff]  }
  0xc1   :  { %2039 = vmatprep.subr.bf16.mxu1 %v2749_v59  ;;  %v2831_v59 = vld [vmem:[%s3795_s1 + $0x728] ss:$16 sps:$4 sm:$0xff]  }
  0xc2   :  { %1913 = vmatmul.mubr.bf16.vlgmr.msra.gmra.mxu0 %v3076_v8  ;;  %v2761_v8 = vld [vmem:[%s3795_s1 + $0x6ac] ss:$16 sps:$4 sm:$0xff]  }
  0xc3   :  { %1966 = vmatmul.mubr.bf16.vlgmr.msra.gmra.mxu1 %v3078_v9  ;;  %1987 = vmatpush1.bf16.msra.mxu0 %v2744_v60  ;;  %v2756_v9 = vld [vmem:[%s3795_s1 + $0x4a8] ss:$16 sps:$4 sm:$0xff]   ;;  %v2836_v60 = vld [vmem:[%s3795_s1 + $0x50c] ss:$16 sps:$4 sm:$0xff]  }
  0xc4   :  { %2040 = vmatpush1.bf16.msra.mxu1 %v2747_v61  ;;  %1988 = vmatprep.subr.bf16.mxu0 %v2752_v62  ;;  %v2839_v61 = vld [vmem:[%s3795_s1 + $0x70c] ss:$16 sps:$4 sm:$0xff]   ;;  %v2834_v62 = vld [vmem:[%s3795_s1 + $0x508] ss:$16 sps:$4 sm:$0xff]  }
  0xc5   :  { %2041 = vmatprep.subr.bf16.mxu1 %v2755_v63  ;;  %1922 = vmatprep.mubr.bf16.mxu0 %v3151_v33  ;;  %v2767_v33 = vld [vmem:[%s3795_s1 + $0x68c] ss:$16 sps:$4 sm:$0xff]   ;;  %v2837_v63 = vld [vmem:[%s3795_s1 + $0x708] ss:$16 sps:$4 sm:$0xff]  }
  0xc6   :  { %1975 = vmatprep.mubr.bf16.mxu1 %v3155_v35  ;;  %v2762_v35 = vld [vmem:[%s3795_s1 + $0x488] ss:$16 sps:$4 sm:$0xff]  }
  0xc7   :  { %1989 = vmatpush1.bf16.msra.mxu0 %v2750_v0 }
  0xc8   :  { %2042 = vmatpush1.bf16.msra.mxu1 %v2753_v53  ;;  %1990 = vmatprep.subr.bf16.mxu0 %v2758_v55 }
  0xc9   :  { %2043 = vmatprep.subr.bf16.mxu1 %v2761_v8 }
  0xca   :  { %1923 = vmatmul.mubr.bf16.gmra.mxu0 %v3153_v34  ;;  %v2773_v34 = vld [vmem:[%s3795_s1 + $0x66c] ss:$16 sps:$4 sm:$0xff]  }
  0xcb   :  { %1976 = vmatmul.mubr.bf16.gmra.mxu1 %v3160_v37  ;;  %1991 = vmatpush1.bf16.msra.mxu0 %v2756_v9  ;;  %v2768_v37 = vld [vmem:[%s3795_s1 + $0x468] ss:$16 sps:$4 sm:$0xff]   ;;  %v288_v9 = vlaneseq }
  0xcc   :  { %2044 = vmatpush1.bf16.msra.mxu1 %v2759_v1  ;;  %1992 = vmatprep.subr.bf16.mxu0 %v2764_v2 }
  0xcd   :  { %2045 = vmatprep.subr.bf16.mxu1 %v2767_v33  ;;  %2018 = vmatprep.mubr.bf16.mxu0 %v3207_v49  ;;  %v2779_v49 = vld [vmem:[%s3795_s1 + $0x64c] ss:$16 sps:$4 sm:$0xff]   ;;  %v3756_v33 = vshrl.u32 %v288_v9, 7 }
  0xce   :  { %2071 = vmatprep.mubr.bf16.mxu1 %v3216_v51  ;;  %v2774_v51 = vld [vmem:[%s3795_s1 + $0x448] ss:$16 sps:$4 sm:$0xff]  }
  0xcf   :  { %1993 = vmatpush1.bf16.msra.mxu0 %v2762_v35 }
  0xd0   :  { %2046 = vmatpush1.bf16.msra.mxu1 %v2765_v3  ;;  %1994 = vmatprep.subr.bf16.mxu0 %v2770_v4 }
  0xd1   :  { %2047 = vmatprep.subr.bf16.mxu1 %v2773_v34 }
  0xd3   :  { %1995 = vmatpush1.bf16.msra.mxu0 %v2768_v37 }
  0xd4   :  { %2048 = vmatpush1.bf16.msra.mxu1 %v2771_v5  ;;  %1996 = vmatprep.subr.bf16.mxu0 %v2776_v6 }
  0xd5   :  { %2049 = vmatprep.subr.bf16.mxu1 %v2779_v49 }
  0xd7   :  { %1997 = vmatpush1.bf16.msra.mxu0 %v2774_v51 }
  0xd8   :  { %2050 = vmatpush1.bf16.msra.mxu1 %v2777_v7  ;;  %1998 = vmatprep.subr.bf16.mxu0 %v2782_v10 }
  0xd9   :  { %2051 = vmatprep.subr.bf16.mxu1 %v2785_v11 }
  0xdb   :  { %1999 = vmatpush1.bf16.msra.mxu0 %v2780_v12 }
  0xdc   :  { %2052 = vmatpush1.bf16.msra.mxu1 %v2783_v13  ;;  %2000 = vmatprep.subr.bf16.mxu0 %v2788_v14 }
  0xdd   :  { %2053 = vmatprep.subr.bf16.mxu1 %v2791_v15 }
  0xdf   :  { %2001 = vmatpush1.bf16.msra.mxu0 %v2786_v16 }
  0xe0   :  { %2054 = vmatpush1.bf16.msra.mxu1 %v2789_v17  ;;  %2002 = vmatprep.subr.bf16.mxu0 %v2794_v18 }
  0xe1   :  { %2055 = vmatprep.subr.bf16.mxu1 %v2797_v19 }
  0xe3   :  { %2003 = vmatpush2.bf16.msra.mxu0 %v2792_v20 }
  0xe4   :  { %2056 = vmatpush2.bf16.msra.mxu1 %v2795_v21  ;;  %2004 = vmatprep.subr.bf16.mxu0 %v2800_v22 }
  0xe5   :  { %2057 = vmatprep.subr.bf16.mxu1 %v2803_v23 }
  0xe7   :  { %2005 = vmatpush2.bf16.msra.mxu0 %v2798_v24 }
  0xe8   :  { %2058 = vmatpush2.bf16.msra.mxu1 %v2801_v25  ;;  %2006 = vmatprep.subr.bf16.mxu0 %v2806_v26 }
  0xe9   :  { %2059 = vmatprep.subr.bf16.mxu1 %v2809_v27 }
  0xeb   :  { %2007 = vmatpush2.bf16.msra.mxu0 %v2804_v28 }
  0xec   :  { %2060 = vmatpush2.bf16.msra.mxu1 %v2807_v29  ;;  %2008 = vmatprep.subr.bf16.mxu0 %v2812_v30 }
  0xed   :  { %2061 = vmatprep.subr.bf16.mxu1 %v2815_v31 }
  0xef   :  { %2009 = vmatpush2.bf16.msra.mxu0 %v2810_v38 }
  0xf0   :  { %2062 = vmatpush2.bf16.msra.mxu1 %v2813_v39  ;;  %2010 = vmatprep.subr.bf16.mxu0 %v2818_v40 }
  0xf1   :  { %2063 = vmatprep.subr.bf16.mxu1 %v2821_v41 }
  0xf3   :  { %2011 = vmatpush2.bf16.msra.mxu0 %v2816_v44 }
  0xf4   :  { %2064 = vmatpush2.bf16.msra.mxu1 %v2819_v45  ;;  %2012 = vmatprep.subr.bf16.mxu0 %v2824_v46 }
  0xf5   :  { %2065 = vmatprep.subr.bf16.mxu1 %v2827_v47 }
  0xf7   :  { %2013 = vmatpush2.bf16.msra.mxu0 %v2822_v50 }
  0xf8   :  { %2066 = vmatpush2.bf16.msra.mxu1 %v2825_v52  ;;  %2014 = vmatprep.subr.bf16.mxu0 %v2830_v56 }
  0xf9   :  { %2067 = vmatprep.subr.bf16.mxu1 %v2833_v57 }
  0xfb   :  { %2015 = vmatpush2.bf16.msra.mxu0 %v2828_v58 }
  0xfc   :  { %2068 = vmatpush2.bf16.msra.mxu1 %v2831_v59  ;;  %2016 = vmatprep.subr.bf16.mxu0 %v2836_v60 }
  0xfd   :  { %2069 = vmatprep.subr.bf16.mxu1 %v2839_v61 }
  0xff   :  { %2017 = vmatpush2.bf16.msra.mxu0 %v2834_v62 }
 0x100   :  { %2070 = vmatpush2.bf16.msra.mxu1 %v2837_v63 }
 0x102   :  { %2019 = vmatmul.mubr.bf16.vlgmr.msra.gmra.mxu0 %v3342_v32  ;;  %v1702_v0 = vpop.f32.mrf.mxu0 }
 0x103   :  { %2072 = vmatmul.mubr.bf16.vlgmr.msra.gmra.mxu1 %v3346_v36  ;;  %2028 = vmatprep.mubr.bf16.mxu0 %v3360_v42  ;;  %v1755_v53 = vpop.f32.mrf.mxu1  ;;  %v290_v42 = vsub.s32 0, %v3756_v33 }
 0x104   :  { %2081 = vmatprep.mubr.bf16.mxu1 %v3362_v43  ;;  %v1704_v55 = vpop.f32.mrf.mxu0  ;;  %v3762_v43 = vld [vmem:[%s3797_s2] sm:$0xf] }
 0x105   :  { %v1757_v8 = vpop.f32.mrf.mxu1  ;;  %v291_v34 = vrot.slane %v3762_v43, %v290_v42 }
 0x106   :  { %v1706_v1 = vpop.f32.mrf.mxu0 }
 0x107   :  { %v1759_v2 = vpop.f32.mrf.mxu1  ;;  %v1703_v49 = vadd.f32 %v1702_v0, %v291_v34  ;;  %v1707_v12 = vadd.f32 %v1706_v1, %v291_v34 }
 0x108   :  { %v1708_v32 = vpop.f32.mrf.mxu0 }
 0x109   :  { %v1761_v35 = vpop.f32.mrf.mxu1  ;;  %v1756_v11 = vadd.f32 %v1755_v53, %v1703_v49  ;;  %v1760_v21 = vadd.f32 %v1759_v2, %v1707_v12 }
 0x10a   :  { %2029 = vmatmul.mubr.bf16.gmra.mxu0 %v3380_v48  ;;  %v1712_v36 = vpop.f32.mrf.mxu0  ;;  %v294_v48 = vsub.s32 1, %v3756_v33 }
 0x10b   :  { %2082 = vmatmul.mubr.bf16.gmra.mxu1 %v3388_v54  ;;  %v1765_v3 = vpop.f32.mrf.mxu1  ;;  %v1713_v18 = vadd.f32 %v1712_v36, %v291_v34 }
 0x10c   :  { %v1714_v54 = vpop.f32.mrf.mxu0  ;;  %v295_v37 = vrot.slane %v3762_v43, %v294_v48 }
 0x10d   :  { %v1767_v4 = vpop.f32.mrf.mxu1  ;;  %v1766_v30 = vadd.f32 %v1765_v3, %v1713_v18  ;;  %v302_v18 = vsub.s32 3, %v3756_v33 }
 0x10e   :  { %v1716_v5 = vpop.f32.mrf.mxu0  ;;  %v1705_v51 = vadd.f32 %v1704_v55, %v295_v37  ;;  %v1709_v16 = vadd.f32 %v1708_v32, %v295_v37  ;;  %v1715_v24 = vadd.f32 %v1714_v54, %v295_v37 }
 0x10f   :  { %v1769_v6 = vpop.f32.mrf.mxu1  ;;  %v1717_v31 = vadd.f32 %v1716_v5, %v291_v34 }
 0x110   :  { %v1718_v7 = vpop.f32.mrf.mxu0  ;;  %v1758_v15 = vadd.f32 %v1757_v8, %v1705_v51  ;;  %v1762_v27 = vadd.f32 %v1761_v35, %v1709_v16  ;;  %v1768_v46 = vadd.f32 %v1767_v4, %v1715_v24 }
 0x111   :  { %v1771_v10 = vpop.f32.mrf.mxu1  ;;  %v1719_v52 = vadd.f32 %v1718_v7, %v295_v37  ;;  %v1770_v59 = vadd.f32 %v1769_v6, %v1717_v31 }
 0x113   :  { %v1772_v9 = vadd.f32 %v1771_v10, %v1719_v52 }
 0x142   :  { %v1808_v13 = vpop.f32.mrf.mxu0 }
 0x143   :  { %v1861_v14 = vpop.f32.mrf.mxu1  ;;  %v1809_v17 = vadd.f32 %v1808_v13, %v1756_v11 }
 0x144   :  { %v1810_v19 = vpop.f32.mrf.mxu0 }
 0x145   :  { %v1863_v20 = vpop.f32.mrf.mxu1  ;;  %v1862_v22 = vadd.f32 %v1861_v14, %v1809_v17  ;;  %v1811_v23 = vadd.f32 %v1810_v19, %v1758_v15  ;;  %v298_v17 = vsub.s32 2, %v3756_v33 }
 0x146   :  { %v1812_v25 = vpop.f32.mrf.mxu0 }
 0x147   :  { %v1865_v26 = vpop.f32.mrf.mxu1  ;;  %v1864_v28 = vadd.f32 %v1863_v20, %v1811_v23  ;;  %v1813_v29 = vadd.f32 %v1812_v25, %v1760_v21  ;;  %v2092_v40 = vmax.f32 %v1862_v22, 0.0  ;;  %v299_v21 = vrot.slane %v3762_v43, %v298_v17 }
 0x148   :  { %v1814_v38 = vpop.f32.mrf.mxu0  ;;  %v303_v22 = vrot.slane %v3762_v43, %v302_v18 }
 0x149   :  { %v1867_v39 = vpop.f32.mrf.mxu1  ;;  %v2093_v41 = vmax.f32 %v1864_v28, 0.0  ;;  %v1866_v44 = vadd.f32 %v1865_v26, %v1813_v29  ;;  %v1815_v45 = vadd.f32 %v1814_v38, %v1762_v27 }
 0x14a   :  { %v1818_v47 = vpop.f32.mrf.mxu0 }
 0x14b   :  { %v1871_v50 = vpop.f32.mrf.mxu1  ;;  %v2448_v56 = vpack.c.bf16 %v2093_v41, %v2092_v40  ;;  %v1868_v57 = vadd.f32 %v1867_v39, %v1815_v45  ;;  %v1819_v58 = vadd.f32 %v1818_v47, %v1766_v30  ;;  %v2096_v62 = vmax.f32 %v1866_v44, 0.0 }
 0x14c   :  { %v1820_v60 = vpop.f32.mrf.mxu0 }
 0x14d   :  { %v1873_v61 = vpop.f32.mrf.mxu1  ;;  %2156 = vst [vmem:[%s3798_s3] sm:$0xff] %v2448_v56  ;;  %v2097_v63 = vmax.f32 %v1868_v57, 0.0  ;;  %v1821_v0 = vadd.f32 %v1820_v60, %v1768_v46  ;;  %v1872_v53 = vadd.f32 %v1871_v50, %v1819_v58 }
 0x14e   :  { %v1822_v55 = vpop.f32.mrf.mxu0 }
 0x14f   :  { %v1875_v8 = vpop.f32.mrf.mxu1  ;;  %v2450_v1 = vpack.c.bf16 %v2097_v63, %v2096_v62  ;;  %v1823_v2 = vadd.f32 %v1822_v55, %v1770_v59  ;;  %v1874_v32 = vadd.f32 %v1873_v61, %v1821_v0  ;;  %v2100_v3 = vmax.f32 %v1872_v53, 0.0 }
 0x150   :  { %v1824_v35 = vpop.f32.mrf.mxu0 }
 0x151   :  { %v1877_v36 = vpop.f32.mrf.mxu1  ;;  %2158 = vst [vmem:[%s3798_s3 + $0x10] sm:$0xff] %v2450_v1  ;;  %v2101_v42 = vmax.f32 %v1874_v32, 0.0  ;;  %v1825_v48 = vadd.f32 %v1824_v35, %v1772_v9  ;;  %v1876_v54 = vadd.f32 %v1875_v8, %v1823_v2 }
 0x153   :  { %v2452_v4 = vpack.c.bf16 %v2101_v42, %v2100_v3  ;;  %v1878_v34 = vadd.f32 %v1877_v36, %v1825_v48  ;;  %v2104_v37 = vmax.f32 %v1876_v54, 0.0 }
 0x155   :  { %2160 = vst [vmem:[%s3798_s3 + $0x20] sm:$0xff] %v2452_v4  ;;  %v2105_v5 = vmax.f32 %v1878_v34, 0.0 }
 0x157   :  { %v2454_v6 = vpack.c.bf16 %v2105_v5, %v2104_v37 }
 0x159   :  { %2162 = vst [vmem:[%s3798_s3 + $0x30] sm:$0xff] %v2454_v6 }
 0x182   :  { %v1914_v49 = vpop.f32.mrf.mxu0 }
 0x183   :  { %v1967_v51 = vpop.f32.mrf.mxu1  ;;  %v1915_v25 = vadd.f32 %v1914_v49, %v299_v21 }
 0x184   :  { %v1916_v7 = vpop.f32.mrf.mxu0 }
 0x185   :  { %v1969_v10 = vpop.f32.mrf.mxu1  ;;  %v1917_v26 = vadd.f32 %v1916_v7, %v303_v22  ;;  %v1968_v29 = vadd.f32 %v1967_v51, %v1915_v25 }
 0x186   :  { %v1918_v11 = vpop.f32.mrf.mxu0 }
 0x187   :  { %v1971_v12 = vpop.f32.mrf.mxu1  ;;  %v1919_v30 = vadd.f32 %v1918_v11, %v299_v21  ;;  %v1970_v39 = vadd.f32 %v1969_v10, %v1917_v26 }
 0x188   :  { %v1920_v13 = vpop.f32.mrf.mxu0 }
 0x189   :  { %v1973_v14 = vpop.f32.mrf.mxu1  ;;  %v1921_v40 = vadd.f32 %v1920_v13, %v303_v22  ;;  %v1972_v46 = vadd.f32 %v1971_v12, %v1919_v30 }
 0x18a   :  { %v1924_v15 = vpop.f32.mrf.mxu0 }
 0x18b   :  { %v1977_v16 = vpop.f32.mrf.mxu1  ;;  %v1925_v33 = vadd.f32 %v1924_v15, %v299_v21  ;;  %v1974_v57 = vadd.f32 %v1973_v14, %v1921_v40 }
 0x18c   :  { %v1926_v19 = vpop.f32.mrf.mxu0 }
 0x18d   :  { %v1979_v20 = vpop.f32.mrf.mxu1  ;;  %v1927_v43 = vadd.f32 %v1926_v19, %v303_v22  ;;  %v1978_v60 = vadd.f32 %v1977_v16, %v1925_v33 }
 0x18e   :  { %v1928_v23 = vpop.f32.mrf.mxu0 }
 0x18f   :  { %v1981_v24 = vpop.f32.mrf.mxu1  ;;  %v1929_v61 = vadd.f32 %v1928_v23, %v299_v21  ;;  %v1980_v9 = vadd.f32 %v1979_v20, %v1927_v43 }
 0x190   :  { %v1930_v27 = vpop.f32.mrf.mxu0 }
 0x191   :  { %v1983_v28 = vpop.f32.mrf.mxu1  ;;  %v1931_v32 = vadd.f32 %v1930_v27, %v303_v22  ;;  %v1982_v42 = vadd.f32 %v1981_v24, %v1929_v61 }
 0x193   :  { %v1984_v51 = vadd.f32 %v1983_v28, %v1931_v32 }
 0x1c2   :  { %v2020_v31 = vpop.f32.mrf.mxu0 }
 0x1c3   :  { %v2073_v38 = vpop.f32.mrf.mxu1  ;;  %v2021_v41 = vadd.f32 %v2020_v31, %v1968_v29 }
 0x1c4   :  { %v2022_v44 = vpop.f32.mrf.mxu0 }
 0x1c5   :  { %v2075_v45 = vpop.f32.mrf.mxu1  ;;  %v2074_v47 = vadd.f32 %v2073_v38, %v2021_v41  ;;  %v2023_v50 = vadd.f32 %v2022_v44, %v1970_v39 }
 0x1c6   :  { %v2024_v52 = vpop.f32.mrf.mxu0 }
 0x1c7   :  { %v2077_v56 = vpop.f32.mrf.mxu1  ;;  %v2076_v58 = vadd.f32 %v2075_v45, %v2023_v50  ;;  %v2025_v59 = vadd.f32 %v2024_v52, %v1972_v46  ;;  %v2094_v0 = vmax.f32 %v2074_v47, 0.0 }
 0x1c8   :  { %v2026_v62 = vpop.f32.mrf.mxu0 }
 0x1c9   :  { %v2079_v63 = vpop.f32.mrf.mxu1  ;;  %v2095_v53 = vmax.f32 %v2076_v58, 0.0  ;;  %v2078_v55 = vadd.f32 %v2077_v56, %v2025_v59  ;;  %v2027_v8 = vadd.f32 %v2026_v62, %v1974_v57 }
 0x1ca   :  { %v2030_v1 = vpop.f32.mrf.mxu0 }
 0x1cb   :  { %v2083_v2 = vpop.f32.mrf.mxu1  ;;  %v2449_v35 = vpack.c.bf16 %v2095_v53, %v2094_v0  ;;  %v2080_v36 = vadd.f32 %v2079_v63, %v2027_v8  ;;  %v2031_v3 = vadd.f32 %v2030_v1, %v1978_v60  ;;  %v2098_v4 = vmax.f32 %v2078_v55, 0.0 }
 0x1cc   :  { %v2032_v48 = vpop.f32.mrf.mxu0 }
 0x1cd   :  { %v2085_v54 = vpop.f32.mrf.mxu1  ;;  %2157 = vst [vmem:[%s3798_s3 + $0x8] sm:$0xff] %v2449_v35  ;;  %v2099_v34 = vmax.f32 %v2080_v36, 0.0  ;;  %v2084_v37 = vadd.f32 %v2083_v2, %v2031_v3  ;;  %v2033_v5 = vadd.f32 %v2032_v48, %v1980_v9 }
 0x1ce   :  { %v2034_v6 = vpop.f32.mrf.mxu0 }
 0x1cf   :  { %v2087_v49 = vpop.f32.mrf.mxu1  ;;  %v2451_v7 = vpack.c.bf16 %v2099_v34, %v2098_v4  ;;  %v2086_v10 = vadd.f32 %v2085_v54, %v2033_v5  ;;  %v2035_v11 = vadd.f32 %v2034_v6, %v1982_v42  ;;  %v2102_v13 = vmax.f32 %v2084_v37, 0.0 }
 0x1d0   :  { %v2036_v12 = vpop.f32.mrf.mxu0 }
 0x1d1   :  { %2159 = vst [vmem:[%s3798_s3 + $0x18] sm:$0xff] %v2451_v7  ;;  %v2103_v14 = vmax.f32 %v2086_v10, 0.0  ;;  %v2088_v15 = vadd.f32 %v2087_v49, %v2035_v11  ;;  %v2037_v16 = vadd.f32 %v2036_v12, %v1984_v51  ;;  %v2089_v17 = vpop.f32.mrf.mxu1 }
 0x1d3   :  { %v2453_v18 = vpack.c.bf16 %v2103_v14, %v2102_v13  ;;  %v2090_v19 = vadd.f32 %v2089_v17, %v2037_v16  ;;  %v2106_v20 = vmax.f32 %v2088_v15, 0.0 }
 0x1d5   :  { %2161 = vst [vmem:[%s3798_s3 + $0x28] sm:$0xff] %v2453_v18  ;;  %v2107_v21 = vmax.f32 %v2090_v19, 0.0 }
 0x1d7   :  { %v2455_v22 = vpack.c.bf16 %v2107_v21, %v2106_v20 }
 0x1d9   :  { %2163 = vst [vmem:[%s3798_s3 + $0x38] sm:$0xff] %v2455_v22 }

// kernel: generator_forward.15
= control target key start
LH: loop header
LB: loop body
LE: loop exit
PB: predicated region body
PF: predicated region fallthrough
CT: control target
= control target key end

     0   :  { %s908_s1 = inlined_call_operand.vmem [shape: bf16[256,128], index: 1, kind: input, shape index: {}]   ;;  %s909_s0 = inlined_call_operand.vmem [shape: bf16[176,256], index: 0, kind: input, shape index: {}]   ;;  %s910_s2 = inlined_call_operand.vmem [shape: f32[1,128], index: 2, kind: input, shape index: {}]   ;;  %s911_s3 = inlined_call_operand.vmem [shape: f32[176,128], index: 3, kind: output, shape index: {}]  }
   0x1   :  { %v588_v0 = vld [vmem:[%s908_s1 + $0x78] sm:$0xff]   ;;  %v590_v2 = vld [vmem:[%s908_s1 + $0x70] sm:$0xff]   ;;  %v592_v4 = vld [vmem:[%s908_s1 + $0x68] sm:$0xff]  }
   0x2   :  { %v589_v1 = vld [vmem:[%s908_s1 + $0x38] sm:$0xff]   ;;  %490 = vmatprep.subr.bf16.mxu0 %v588_v0  ;;  %572 = vmatprep.subr.bf16.mxu1 %v588_v0  ;;  %v591_v3 = vld [vmem:[%s908_s1 + $0x30] sm:$0xff]   ;;  %v593_v5 = vld [vmem:[%s908_s1 + $0x28] sm:$0xff]  }
   0x3   :  { %491 = vmatpush3.bf16.msra.mxu0 %v589_v1  ;;  %580 = vmatpush3.bf16.msra.mxu1 %v589_v1  ;;  %v594_v6 = vld [vmem:[%s908_s1 + $0x60] sm:$0xff]   ;;  %v596_v8 = vld [vmem:[%s908_s1 + $0x58] sm:$0xff]   ;;  %v598_v10 = vld [vmem:[%s908_s1 + $0x50] sm:$0xff]  }
   0x4   :  { %492 = vmatprep.subr.bf16.mxu0 %v590_v2  ;;  %573 = vmatprep.subr.bf16.mxu1 %v590_v2  ;;  %v595_v7 = vld [vmem:[%s908_s1 + $0x20] sm:$0xff]   ;;  %v597_v9 = vld [vmem:[%s908_s1 + $0x18] sm:$0xff]   ;;  %v599_v13 = vld [vmem:[%s908_s1 + $0x10] sm:$0xff]  }
   0x5   :  { %v606_v11 = vld [vmem:[%s909_s0 + $0x4] ss:$8 sps:$4 sm:$0xff]   ;;  %v604_v18 = vld [vmem:[%s909_s0] ss:$8 sps:$4 sm:$0xff]   ;;  %v610_v20 = vld [vmem:[%s909_s0 + $0x14] ss:$8 sps:$4 sm:$0xff]  }
   0x6   :  { %v609_v12 = vld [vmem:[%s909_s0 + $0x64] ss:$8 sps:$4 sm:$0xff]   ;;  %314 = vmatprep.mubr.bf16.mxu0 %v606_v11  ;;  %v607_v19 = vld [vmem:[%s909_s0 + $0x60] ss:$8 sps:$4 sm:$0xff]   ;;  %v613_v21 = vld [vmem:[%s909_s0 + $0x74] ss:$8 sps:$4 sm:$0xff]  }
   0x7   :  { %493 = vmatpush3.bf16.msra.mxu0 %v591_v3  ;;  %581 = vmatpush3.bf16.msra.mxu1 %v591_v3  ;;  %v600_v14 = vld [vmem:[%s908_s1 + $0x48] sm:$0xff]   ;;  %v602_v16 = vld [vmem:[%s908_s1 + $0x40] sm:$0xff]   ;;  %v612_v22 = vld [vmem:[%s909_s0 + $0x10] ss:$8 sps:$4 sm:$0xff]  }
   0x8   :  { %494 = vmatprep.subr.bf16.mxu0 %v592_v4  ;;  %574 = vmatprep.subr.bf16.mxu1 %v592_v4  ;;  %v601_v15 = vld [vmem:[%s908_s1 + $0x8] sm:$0xff]   ;;  %v603_v17 = vld [vmem:[%s908_s1] sm:$0xff]   ;;  %v615_v23 = vld [vmem:[%s909_s0 + $0x70] ss:$8 sps:$4 sm:$0xff]  }
   0x9   :  { %362 = vmatprep.mubr.bf16.mxu1 %v609_v12  ;;  %v616_v24 = vld [vmem:[%s909_s0 + $0x24] ss:$8 sps:$4 sm:$0xff]   ;;  %v618_v26 = vld [vmem:[%s909_s0 + $0x20] ss:$8 sps:$4 sm:$0xff]   ;;  %v622_v28 = vld [vmem:[%s909_s0 + $0x34] ss:$8 sps:$4 sm:$0xff]  }
   0xa   :  { %v619_v25 = vld [vmem:[%s909_s0 + $0x84] ss:$8 sps:$4 sm:$0xff]   ;;  %v621_v27 = vld [vmem:[%s909_s0 + $0x80] ss:$8 sps:$4 sm:$0xff]   ;;  %v625_v29 = vld [vmem:[%s909_s0 + $0x94] ss:$8 sps:$4 sm:$0xff]  }
   0xb   :  { %495 = vmatpush3.bf16.msra.mxu0 %v593_v5  ;;  %582 = vmatpush3.bf16.msra.mxu1 %v593_v5  ;;  %v624_v30 = vld [vmem:[%s909_s0 + $0x30] ss:$8 sps:$4 sm:$0xff]   ;;  %v628_v32 = vld [vmem:[%s909_s0 + $0x44] ss:$8 sps:$4 sm:$0xff]   ;;  %v630_v34 = vld [vmem:[%s909_s0 + $0x40] ss:$8 sps:$4 sm:$0xff]  }
   0xc   :  { %496 = vmatprep.subr.bf16.mxu0 %v594_v6  ;;  %575 = vmatprep.subr.bf16.mxu1 %v594_v6  ;;  %v627_v31 = vld [vmem:[%s909_s0 + $0x90] ss:$8 sps:$4 sm:$0xff]   ;;  %v631_v33 = vld [vmem:[%s909_s0 + $0xa4] ss:$8 sps:$4 sm:$0xff]   ;;  %v633_v35 = vld [vmem:[%s909_s0 + $0xa0] ss:$8 sps:$4 sm:$0xff]  }
   0xd   :  { %v634_v36 = vld [vmem:[%s909_s0 + $0x54] ss:$8 sps:$4 sm:$0xff]   ;;  %v636_v37 = vld [vmem:[%s909_s0 + $0x50] ss:$8 sps:$4 sm:$0xff]   ;;  %v818_v40 = vld [vmem:[%s910_s2] ss:$0 sm:$0xff] }
   0xf   :  { %497 = vmatpush3.bf16.msra.mxu0 %v595_v7  ;;  %583 = vmatpush3.bf16.msra.mxu1 %v595_v7 }
  0x10   :  { %498 = vmatprep.subr.bf16.mxu0 %v596_v8  ;;  %576 = vmatprep.subr.bf16.mxu1 %v596_v8 }
  0x13   :  { %499 = vmatpush3.bf16.msra.mxu0 %v597_v9  ;;  %584 = vmatpush3.bf16.msra.mxu1 %v597_v9 }
  0x14   :  { %500 = vmatprep.subr.bf16.mxu0 %v598_v10  ;;  %577 = vmatprep.subr.bf16.mxu1 %v598_v10 }
  0x17   :  { %501 = vmatpush3.bf16.msra.mxu0 %v599_v13  ;;  %585 = vmatpush3.bf16.msra.mxu1 %v599_v13 }
  0x18   :  { %502 = vmatprep.subr.bf16.mxu0 %v600_v14  ;;  %578 = vmatprep.subr.bf16.mxu1 %v600_v14 }
  0x1b   :  { %503 = vmatpush3.bf16.msra.mxu0 %v601_v15  ;;  %586 = vmatpush3.bf16.msra.mxu1 %v601_v15 }
  0x1c   :  { %504 = vmatprep.subr.bf16.mxu0 %v602_v16  ;;  %579 = vmatprep.subr.bf16.mxu1 %v602_v16 }
  0x1f   :  { %505 = vmatpush3.bf16.msra.mxu0 %v603_v17  ;;  %587 = vmatpush3.bf16.msra.mxu1 %v603_v17 }
  0x22   :  { %315 = vmatmul.mubr.bf16.vlgmr.msra.gmra.mxu0 %v604_v18  ;;  %363 = vmatmul.mubr.bf16.vlgmr.msra.gmra.mxu1 %v607_v19 }
  0x23   :  { %322 = vmatprep.mubr.bf16.mxu0 %v610_v20  ;;  %370 = vmatprep.mubr.bf16.mxu1 %v613_v21 }
  0x2a   :  { %323 = vmatmul.mubr.bf16.gmra.mxu0 %v612_v22  ;;  %371 = vmatmul.mubr.bf16.gmra.mxu1 %v615_v23 }
  0x2b   :  { %330 = vmatprep.mubr.bf16.mxu0 %v616_v24  ;;  %378 = vmatprep.mubr.bf16.mxu1 %v619_v25 }
  0x32   :  { %331 = vmatmul.mubr.bf16.gmra.mxu0 %v618_v26  ;;  %379 = vmatmul.mubr.bf16.gmra.mxu1 %v621_v27 }
  0x33   :  { %338 = vmatprep.mubr.bf16.mxu0 %v622_v28  ;;  %386 = vmatprep.mubr.bf16.mxu1 %v625_v29 }
  0x3a   :  { %339 = vmatmul.mubr.bf16.gmra.mxu0 %v624_v30  ;;  %387 = vmatmul.mubr.bf16.gmra.mxu1 %v627_v31 }
  0x3b   :  { %346 = vmatprep.mubr.bf16.mxu0 %v628_v32  ;;  %394 = vmatprep.mubr.bf16.mxu1 %v631_v33 }
  0x42   :  { %347 = vmatmul.mubr.bf16.gmra.mxu0 %v630_v34  ;;  %395 = vmatmul.mubr.bf16.gmra.mxu1 %v633_v35 }
  0x43   :  { %354 = vmatprep.mubr.bf16.mxu0 %v634_v36 }
  0x4a   :  { %355 = vmatmul.mubr.bf16.gmra.mxu0 %v636_v37 }
  0xe2   :  { %v506_v38 = vpop.f32.mrf.mxu0  ;;  %v542_v39 = vpop.f32.mrf.mxu1 }
  0xe4   :  { %v507_v41 = vpop.f32.mrf.mxu0  ;;  %v543_v42 = vpop.f32.mrf.mxu1 }
  0xe5   :  { %v508_v43 = vadd.f32 %v507_v41, %v506_v38  ;;  %v544_v44 = vadd.f32 %v543_v42, %v542_v39 }
  0xe6   :  { %v509_v45 = vpop.f32.mrf.mxu0  ;;  %v545_v46 = vpop.f32.mrf.mxu1 }
  0xe7   :  { %v317_v47 = vadd.f32 %v508_v43, %v818_v40  ;;  %v365_v48 = vadd.f32 %v544_v44, %v818_v40 }
  0xe8   :  { %v510_v49 = vpop.f32.mrf.mxu0  ;;  %v546_v50 = vpop.f32.mrf.mxu1 }
  0xe9   :  { %637 = vtanh.f32 %v317_v47  ;;  %v511_v51 = vadd.f32 %v510_v49, %v509_v45  ;;  %v547_v52 = vadd.f32 %v546_v50, %v545_v46 }
  0xea   :  { %639 = vtanh.f32 %v365_v48  ;;  %v512_v53 = vpop.f32.mrf.mxu0  ;;  %v548_v54 = vpop.f32.mrf.mxu1 }
  0xeb   :  { %v320_v55 = vadd.f32 %v511_v51, %v818_v40  ;;  %v368_v56 = vadd.f32 %v547_v52, %v818_v40 }
  0xec   :  { %v513_v57 = vpop.f32.mrf.mxu0  ;;  %v549_v58 = vpop.f32.mrf.mxu1 }
  0xed   :  { %641 = vtanh.f32 %v320_v55  ;;  %v514_v59 = vadd.f32 %v513_v57, %v512_v53  ;;  %v550_v60 = vadd.f32 %v549_v58, %v548_v54 }
  0xee   :  { %643 = vtanh.f32 %v368_v56  ;;  %v515_v61 = vpop.f32.mrf.mxu0  ;;  %v551_v62 = vpop.f32.mrf.mxu1 }
  0xef   :  { %v325_v63 = vadd.f32 %v514_v59, %v818_v40  ;;  %v373_v0 = vadd.f32 %v550_v60, %v818_v40 }
  0xf0   :  { %v516_v1 = vpop.f32.mrf.mxu0  ;;  %v552_v2 = vpop.f32.mrf.mxu1 }
  0xf1   :  { %645 = vtanh.f32 %v325_v63  ;;  %v517_v3 = vadd.f32 %v516_v1, %v515_v61  ;;  %v553_v4 = vadd.f32 %v552_v2, %v551_v62 }
  0xf2   :  { %647 = vtanh.f32 %v373_v0  ;;  %v518_v5 = vpop.f32.mrf.mxu0  ;;  %v554_v6 = vpop.f32.mrf.mxu1 }
  0xf3   :  { %v328_v7 = vadd.f32 %v517_v3, %v818_v40  ;;  %v376_v8 = vadd.f32 %v553_v4, %v818_v40 }
  0xf4   :  { %v519_v9 = vpop.f32.mrf.mxu0  ;;  %v555_v10 = vpop.f32.mrf.mxu1 }
  0xf5   :  { %649 = vtanh.f32 %v328_v7  ;;  %v520_v11 = vadd.f32 %v519_v9, %v518_v5  ;;  %v556_v12 = vadd.f32 %v555_v10, %v554_v6 }
  0xf6   :  { %v638_v13 = vpop.eup %637  ;;  %651 = vtanh.f32 %v376_v8  ;;  %v521_v14 = vpop.f32.mrf.mxu0 }
  0xf7   :  { %v557_v15 = vpop.f32.mrf.mxu1  ;;  %v640_v16 = vpop.eup %639  ;;  %425 = vst [vmem:[%s911_s3] sm:$0xff] %v638_v13  ;;  %v333_v17 = vadd.f32 %v520_v11, %v818_v40  ;;  %v381_v18 = vadd.f32 %v556_v12, %v818_v40 }
  0xf8   :  { %437 = vst [vmem:[%s911_s3 + $0x60] sm:$0xff] %v640_v16  ;;  %v522_v19 = vpop.f32.mrf.mxu0 }
  0xf9   :  { %v558_v20 = vpop.f32.mrf.mxu1  ;;  %653 = vtanh.f32 %v333_v17  ;;  %v523_v21 = vadd.f32 %v522_v19, %v521_v14 }
  0xfa   :  { %v559_v22 = vadd.f32 %v558_v20, %v557_v15  ;;  %v642_v23 = vpop.eup %641  ;;  %655 = vtanh.f32 %v381_v18  ;;  %v524_v24 = vpop.f32.mrf.mxu0 }
  0xfb   :  { %v560_v25 = vpop.f32.mrf.mxu1  ;;  %v644_v26 = vpop.eup %643  ;;  %426 = vst [vmem:[%s911_s3 + $0x8] sm:$0xff] %v642_v23  ;;  %v336_v27 = vadd.f32 %v523_v21, %v818_v40 }
  0xfc   :  { %v384_v28 = vadd.f32 %v559_v22, %v818_v40  ;;  %438 = vst [vmem:[%s911_s3 + $0x68] sm:$0xff] %v644_v26  ;;  %v525_v29 = vpop.f32.mrf.mxu0 }
  0xfd   :  { %v561_v30 = vpop.f32.mrf.mxu1  ;;  %657 = vtanh.f32 %v336_v27  ;;  %v526_v31 = vadd.f32 %v525_v29, %v524_v24 }
  0xfe   :  { %v562_v32 = vadd.f32 %v561_v30, %v560_v25  ;;  %v646_v33 = vpop.eup %645  ;;  %659 = vtanh.f32 %v384_v28  ;;  %v527_v34 = vpop.f32.mrf.mxu0 }
  0xff   :  { %v563_v35 = vpop.f32.mrf.mxu1  ;;  %v648_v36 = vpop.eup %647  ;;  %427 = vst [vmem:[%s911_s3 + $0x10] sm:$0xff] %v646_v33  ;;  %v341_v37 = vadd.f32 %v526_v31, %v818_v40 }
 0x100   :  { %v389_v38 = vadd.f32 %v562_v32, %v818_v40  ;;  %439 = vst [vmem:[%s911_s3 + $0x70] sm:$0xff] %v648_v36  ;;  %v528_v39 = vpop.f32.mrf.mxu0 }
 0x101   :  { %v564_v41 = vpop.f32.mrf.mxu1  ;;  %661 = vtanh.f32 %v341_v37  ;;  %v529_v42 = vadd.f32 %v528_v39, %v527_v34 }
 0x102   :  { %v565_v43 = vadd.f32 %v564_v41, %v563_v35  ;;  %v650_v44 = vpop.eup %649  ;;  %663 = vtanh.f32 %v389_v38  ;;  %v530_v45 = vpop.f32.mrf.mxu0 }
 0x103   :  { %v566_v46 = vpop.f32.mrf.mxu1  ;;  %v652_v47 = vpop.eup %651  ;;  %428 = vst [vmem:[%s911_s3 + $0x18] sm:$0xff] %v650_v44  ;;  %v344_v48 = vadd.f32 %v529_v42, %v818_v40 }
 0x104   :  { %v392_v49 = vadd.f32 %v565_v43, %v818_v40  ;;  %440 = vst [vmem:[%s911_s3 + $0x78] sm:$0xff] %v652_v47  ;;  %v531_v50 = vpop.f32.mrf.mxu0 }
 0x105   :  { %v567_v51 = vpop.f32.mrf.mxu1  ;;  %665 = vtanh.f32 %v344_v48  ;;  %v532_v52 = vadd.f32 %v531_v50, %v530_v45 }
 0x106   :  { %v568_v53 = vadd.f32 %v567_v51, %v566_v46  ;;  %v654_v54 = vpop.eup %653  ;;  %667 = vtanh.f32 %v392_v49  ;;  %v533_v55 = vpop.f32.mrf.mxu0 }
 0x107   :  { %v569_v56 = vpop.f32.mrf.mxu1  ;;  %v656_v57 = vpop.eup %655  ;;  %429 = vst [vmem:[%s911_s3 + $0x20] sm:$0xff] %v654_v54  ;;  %v349_v58 = vadd.f32 %v532_v52, %v818_v40 }
 0x108   :  { %v397_v59 = vadd.f32 %v568_v53, %v818_v40  ;;  %441 = vst [vmem:[%s911_s3 + $0x80] sm:$0xff] %v656_v57  ;;  %v534_v60 = vpop.f32.mrf.mxu0 }
 0x109   :  { %v570_v61 = vpop.f32.mrf.mxu1  ;;  %669 = vtanh.f32 %v349_v58  ;;  %v535_v62 = vadd.f32 %v534_v60, %v533_v55 }
 0x10a   :  { %v571_v63 = vadd.f32 %v570_v61, %v569_v56  ;;  %v658_v0 = vpop.eup %657  ;;  %671 = vtanh.f32 %v397_v59  ;;  %v536_v1 = vpop.f32.mrf.mxu0 }
 0x10b   :  { %v660_v2 = vpop.eup %659  ;;  %430 = vst [vmem:[%s911_s3 + $0x28] sm:$0xff] %v658_v0  ;;  %v352_v3 = vadd.f32 %v535_v62, %v818_v40 }
 0x10c   :  { %v400_v4 = vadd.f32 %v571_v63, %v818_v40  ;;  %442 = vst [vmem:[%s911_s3 + $0x88] sm:$0xff] %v660_v2  ;;  %v537_v5 = vpop.f32.mrf.mxu0 }
 0x10d   :  { %673 = vtanh.f32 %v352_v3  ;;  %v538_v6 = vadd.f32 %v537_v5, %v536_v1 }
 0x10e   :  { %v662_v7 = vpop.eup %661  ;;  %675 = vtanh.f32 %v400_v4  ;;  %v539_v8 = vpop.f32.mrf.mxu0 }
 0x10f   :  { %v664_v9 = vpop.eup %663  ;;  %431 = vst [vmem:[%s911_s3 + $0x30] sm:$0xff] %v662_v7  ;;  %v357_v10 = vadd.f32 %v538_v6, %v818_v40 }
 0x110   :  { %443 = vst [vmem:[%s911_s3 + $0x90] sm:$0xff] %v664_v9  ;;  %v540_v11 = vpop.f32.mrf.mxu0 }
 0x111   :  { %677 = vtanh.f32 %v357_v10  ;;  %v541_v12 = vadd.f32 %v540_v11, %v539_v8 }
 0x112   :  { %v666_v13 = vpop.eup %665 }
 0x113   :  { %v668_v14 = vpop.eup %667  ;;  %432 = vst [vmem:[%s911_s3 + $0x38] sm:$0xff] %v666_v13  ;;  %v360_v15 = vadd.f32 %v541_v12, %v818_v40 }
 0x114   :  { %444 = vst [vmem:[%s911_s3 + $0x98] sm:$0xff] %v668_v14 }
 0x115   :  { %679 = vtanh.f32 %v360_v15 }
 0x116   :  { %v670_v16 = vpop.eup %669 }
 0x117   :  { %v672_v17 = vpop.eup %671  ;;  %433 = vst [vmem:[%s911_s3 + $0x40] sm:$0xff] %v670_v16 }
 0x118   :  { %445 = vst [vmem:[%s911_s3 + $0xa0] sm:$0xff] %v672_v17 }
 0x11a   :  { %v674_v18 = vpop.eup %673 }
 0x11b   :  { %v676_v19 = vpop.eup %675  ;;  %434 = vst [vmem:[%s911_s3 + $0x48] sm:$0xff] %v674_v18 }
 0x11c   :  { %446 = vst [vmem:[%s911_s3 + $0xa8] sm:$0xff] %v676_v19 }
 0x11e   :  { %v678_v40 = vpop.eup %677 }
 0x11f   :  { %435 = vst [vmem:[%s911_s3 + $0x50] sm:$0xff] %v678_v40 }
 0x122   :  { %v680_v20 = vpop.eup %679 }
 0x123   :  { %436 = vst [vmem:[%s911_s3 + $0x58] sm:$0xff] %v680_v20 }

// kernel: generator_forward.11
= control target key start
LH: loop header
LB: loop body
LE: loop exit
PB: predicated region body
PF: predicated region fallthrough
CT: control target
= control target key end

     0   :  { %s13973_s1 = inlined_call_operand.vmem [shape: bf16[4096,512], index: 1, kind: input, shape index: {}]   ;;  %s13974_s0 = inlined_call_operand.vmem [shape: bf16[16,4096], index: 0, kind: input, shape index: {}]   ;;  %s13975_s2 = inlined_call_operand.vmem [shape: f32[1,512], index: 2, kind: input, shape index: {}]   ;;  %s13976_s3 = inlined_call_operand.vmem [shape: bf16[16,512], index: 3, kind: output, shape index: {}]  }
   0x1   :  { %v8852_v0 = vld [vmem:[%s13973_s1 + $0xe4] ss:$16 sps:$4 sm:$0xff]   ;;  %v8856_v2 = vld [vmem:[%s13973_s1 + $0xe0] ss:$16 sps:$4 sm:$0xff]   ;;  %v15_v50 = vld [vmem:[%s13974_s0 + $0x8] sm:$0xff] }
   0x2   :  { %v8854_v1 = vld [vmem:[%s13973_s1 + $0x2e4] ss:$16 sps:$4 sm:$0xff]   ;;  %6372 = vmatprep.subr.bf16.mxu0 %v8852_v0  ;;  %v8857_v3 = vld [vmem:[%s13973_s1 + $0x2e0] ss:$16 sps:$4 sm:$0xff]   ;;  %v31_v51 = vld [vmem:[%s13974_s0 + $0x88] sm:$0xff] }
   0x3   :  { %6415 = vmatprep.subr.bf16.mxu1 %v8854_v1  ;;  %v8858_v4 = vld [vmem:[%s13973_s1 + $0xc4] ss:$16 sps:$4 sm:$0xff]   ;;  %6373 = vmatpush1.bf16.msra.mxu0 %v8856_v2  ;;  %v8862_v6 = vld [vmem:[%s13973_s1 + $0xc0] ss:$16 sps:$4 sm:$0xff]   ;;  %v10573_v55 = vcombine.high %v15_v50, %v31_v51 }
   0x4   :  { %6416 = vmatpush1.bf16.msra.mxu1 %v8857_v3  ;;  %v8860_v5 = vld [vmem:[%s13973_s1 + $0x2c4] ss:$16 sps:$4 sm:$0xff]   ;;  %6374 = vmatprep.subr.bf16.mxu0 %v8858_v4  ;;  %v8863_v7 = vld [vmem:[%s13973_s1 + $0x2c0] ss:$16 sps:$4 sm:$0xff]  }
   0x5   :  { %6417 = vmatprep.subr.bf16.mxu1 %v8860_v5  ;;  %v8864_v8 = vld [vmem:[%s13973_s1 + $0xa4] ss:$16 sps:$4 sm:$0xff]   ;;  %v8868_v10 = vld [vmem:[%s13973_s1 + $0xa0] ss:$16 sps:$4 sm:$0xff]   ;;  %6447 = vmatprep.mubr.bf16.mxu1 %v10573_v55 }
   0x6   :  { %v8866_v9 = vld [vmem:[%s13973_s1 + $0x2a4] ss:$16 sps:$4 sm:$0xff]   ;;  %v8869_v11 = vld [vmem:[%s13973_s1 + $0x2a0] ss:$16 sps:$4 sm:$0xff]  }
   0x7   :  { %6375 = vmatpush1.bf16.msra.mxu0 %v8862_v6  ;;  %v8870_v12 = vld [vmem:[%s13973_s1 + $0x84] ss:$16 sps:$4 sm:$0xff]   ;;  %v8874_v14 = vld [vmem:[%s13973_s1 + $0x80] ss:$16 sps:$4 sm:$0xff]  }
   0x8   :  { %6418 = vmatpush1.bf16.msra.mxu1 %v8863_v7  ;;  %6376 = vmatprep.subr.bf16.mxu0 %v8864_v8  ;;  %v8872_v13 = vld [vmem:[%s13973_s1 + $0x284] ss:$16 sps:$4 sm:$0xff]   ;;  %v8875_v15 = vld [vmem:[%s13973_s1 + $0x280] ss:$16 sps:$4 sm:$0xff]  }
   0x9   :  { %6419 = vmatprep.subr.bf16.mxu1 %v8866_v9  ;;  %v8876_v16 = vld [vmem:[%s13973_s1 + $0x64] ss:$16 sps:$4 sm:$0xff]   ;;  %v8880_v18 = vld [vmem:[%s13973_s1 + $0x60] ss:$16 sps:$4 sm:$0xff]   ;;  %v10627_v9 = vcombine.low %v15_v50, %v31_v51 }
   0xa   :  { %v8878_v17 = vld [vmem:[%s13973_s1 + $0x264] ss:$16 sps:$4 sm:$0xff]   ;;  %v8881_v19 = vld [vmem:[%s13973_s1 + $0x260] ss:$16 sps:$4 sm:$0xff]  }
   0xb   :  { %6377 = vmatpush1.bf16.msra.mxu0 %v8868_v10  ;;  %v8882_v20 = vld [vmem:[%s13973_s1 + $0x44] ss:$16 sps:$4 sm:$0xff]   ;;  %v8886_v22 = vld [vmem:[%s13973_s1 + $0x40] ss:$16 sps:$4 sm:$0xff]  }
   0xc   :  { %6420 = vmatpush1.bf16.msra.mxu1 %v8869_v11  ;;  %6378 = vmatprep.subr.bf16.mxu0 %v8870_v12  ;;  %v8884_v21 = vld [vmem:[%s13973_s1 + $0x244] ss:$16 sps:$4 sm:$0xff]   ;;  %v8887_v23 = vld [vmem:[%s13973_s1 + $0x240] ss:$16 sps:$4 sm:$0xff]  }
   0xd   :  { %6421 = vmatprep.subr.bf16.mxu1 %v8872_v13  ;;  %v8888_v24 = vld [vmem:[%s13973_s1 + $0x24] ss:$16 sps:$4 sm:$0xff]   ;;  %v8892_v26 = vld [vmem:[%s13973_s1 + $0x20] ss:$16 sps:$4 sm:$0xff]  }
   0xe   :  { %v8890_v25 = vld [vmem:[%s13973_s1 + $0x224] ss:$16 sps:$4 sm:$0xff]   ;;  %v8893_v27 = vld [vmem:[%s13973_s1 + $0x220] ss:$16 sps:$4 sm:$0xff]  }
   0xf   :  { %6379 = vmatpush1.bf16.msra.mxu0 %v8874_v14  ;;  %v8894_v28 = vld [vmem:[%s13973_s1 + $0x4] ss:$16 sps:$4 sm:$0xff]   ;;  %v8898_v30 = vld [vmem:[%s13973_s1] ss:$16 sps:$4 sm:$0xff]  }
  0x10   :  { %6422 = vmatpush1.bf16.msra.mxu1 %v8875_v15  ;;  %6380 = vmatprep.subr.bf16.mxu0 %v8876_v16  ;;  %v8896_v29 = vld [vmem:[%s13973_s1 + $0x204] ss:$16 sps:$4 sm:$0xff]   ;;  %v8899_v31 = vld [vmem:[%s13973_s1 + $0x200] ss:$16 sps:$4 sm:$0xff]  }
  0x11   :  { %6423 = vmatprep.subr.bf16.mxu1 %v8878_v17  ;;  %v8900_v32 = vld [vmem:[%s13973_s1 + $0x1e4] ss:$16 sps:$4 sm:$0xff]   ;;  %v8904_v34 = vld [vmem:[%s13973_s1 + $0x1e0] ss:$16 sps:$4 sm:$0xff]  }
  0x12   :  { %v8902_v33 = vld [vmem:[%s13973_s1 + $0x3e4] ss:$16 sps:$4 sm:$0xff]   ;;  %v8905_v35 = vld [vmem:[%s13973_s1 + $0x3e0] ss:$16 sps:$4 sm:$0xff]  }
  0x13   :  { %6381 = vmatpush1.bf16.msra.mxu0 %v8880_v18  ;;  %v8906_v36 = vld [vmem:[%s13973_s1 + $0x1c4] ss:$16 sps:$4 sm:$0xff]   ;;  %v8910_v38 = vld [vmem:[%s13973_s1 + $0x1c0] ss:$16 sps:$4 sm:$0xff]  }
  0x14   :  { %6424 = vmatpush1.bf16.msra.mxu1 %v8881_v19  ;;  %6382 = vmatprep.subr.bf16.mxu0 %v8882_v20  ;;  %v8908_v37 = vld [vmem:[%s13973_s1 + $0x3c4] ss:$16 sps:$4 sm:$0xff]   ;;  %v8911_v39 = vld [vmem:[%s13973_s1 + $0x3c0] ss:$16 sps:$4 sm:$0xff]  }
  0x15   :  { %6425 = vmatprep.subr.bf16.mxu1 %v8884_v21  ;;  %v8912_v40 = vld [vmem:[%s13973_s1 + $0x1a4] ss:$16 sps:$4 sm:$0xff]   ;;  %v8916_v42 = vld [vmem:[%s13973_s1 + $0x1a0] ss:$16 sps:$4 sm:$0xff]  }
  0x16   :  { %v8914_v41 = vld [vmem:[%s13973_s1 + $0x3a4] ss:$16 sps:$4 sm:$0xff]   ;;  %v8917_v43 = vld [vmem:[%s13973_s1 + $0x3a0] ss:$16 sps:$4 sm:$0xff]  }
  0x17   :  { %6383 = vmatpush1.bf16.msra.mxu0 %v8886_v22  ;;  %v8918_v44 = vld [vmem:[%s13973_s1 + $0x184] ss:$16 sps:$4 sm:$0xff]   ;;  %v8922_v46 = vld [vmem:[%s13973_s1 + $0x180] ss:$16 sps:$4 sm:$0xff]  }
  0x18   :  { %6426 = vmatpush1.bf16.msra.mxu1 %v8887_v23  ;;  %6384 = vmatprep.subr.bf16.mxu0 %v8888_v24  ;;  %v8920_v45 = vld [vmem:[%s13973_s1 + $0x384] ss:$16 sps:$4 sm:$0xff]   ;;  %v8923_v47 = vld [vmem:[%s13973_s1 + $0x380] ss:$16 sps:$4 sm:$0xff]  }
  0x19   :  { %6427 = vmatprep.subr.bf16.mxu1 %v8890_v25  ;;  %v14_v48 = vld [vmem:[%s13974_s0] sm:$0xff] }
  0x1a   :  { %v30_v49 = vld [vmem:[%s13974_s0 + $0x80] sm:$0xff] }
  0x1b   :  { %6385 = vmatpush1.bf16.msra.mxu0 %v8892_v26  ;;  %v8924_v52 = vld [vmem:[%s13973_s1 + $0x164] ss:$16 sps:$4 sm:$0xff]   ;;  %v10568_v53 = vcombine.high %v14_v48, %v30_v49  ;;  %v8928_v56 = vld [vmem:[%s13973_s1 + $0x160] ss:$16 sps:$4 sm:$0xff]   ;;  %v10625_v8 = vcombine.low %v14_v48, %v30_v49 }
  0x1c   :  { %6428 = vmatpush1.bf16.msra.mxu1 %v8893_v27  ;;  %6386 = vmatprep.subr.bf16.mxu0 %v8894_v28  ;;  %v8926_v54 = vld [vmem:[%s13973_s1 + $0x364] ss:$16 sps:$4 sm:$0xff]   ;;  %v8929_v57 = vld [vmem:[%s13973_s1 + $0x360] ss:$16 sps:$4 sm:$0xff]  }
  0x1d   :  { %6429 = vmatprep.subr.bf16.mxu1 %v8896_v29  ;;  %6404 = vmatprep.mubr.bf16.mxu0 %v10568_v53  ;;  %v8930_v58 = vld [vmem:[%s13973_s1 + $0x144] ss:$16 sps:$4 sm:$0xff]   ;;  %v8934_v60 = vld [vmem:[%s13973_s1 + $0x140] ss:$16 sps:$4 sm:$0xff]  }
  0x1e   :  { %v8932_v59 = vld [vmem:[%s13973_s1 + $0x344] ss:$16 sps:$4 sm:$0xff]   ;;  %v8935_v61 = vld [vmem:[%s13973_s1 + $0x340] ss:$16 sps:$4 sm:$0xff]  }
  0x1f   :  { %6387 = vmatpush1.bf16.msra.mxu0 %v8898_v30  ;;  %v8936_v62 = vld [vmem:[%s13973_s1 + $0x124] ss:$16 sps:$4 sm:$0xff]   ;;  %v8940_v0 = vld [vmem:[%s13973_s1 + $0x120] ss:$16 sps:$4 sm:$0xff]  }
  0x20   :  { %6430 = vmatpush1.bf16.msra.mxu1 %v8899_v31  ;;  %6388 = vmatprep.subr.bf16.mxu0 %v8900_v32  ;;  %v8938_v63 = vld [vmem:[%s13973_s1 + $0x324] ss:$16 sps:$4 sm:$0xff]   ;;  %v8941_v1 = vld [vmem:[%s13973_s1 + $0x320] ss:$16 sps:$4 sm:$0xff]  }
  0x21   :  { %6431 = vmatprep.subr.bf16.mxu1 %v8902_v33  ;;  %v8942_v2 = vld [vmem:[%s13973_s1 + $0x104] ss:$16 sps:$4 sm:$0xff]   ;;  %v8946_v4 = vld [vmem:[%s13973_s1 + $0x100] ss:$16 sps:$4 sm:$0xff]  }
  0x22   :  { %v8944_v3 = vld [vmem:[%s13973_s1 + $0x304] ss:$16 sps:$4 sm:$0xff]   ;;  %v8947_v5 = vld [vmem:[%s13973_s1 + $0x300] ss:$16 sps:$4 sm:$0xff]  }
  0x23   :  { %6389 = vmatpush2.bf16.msra.mxu0 %v8904_v34  ;;  %v8950_v6 = vld [vmem:[%s13973_s1 + $0x4e4] ss:$16 sps:$4 sm:$0xff]   ;;  %v8948_v10 = vld [vmem:[%s13973_s1 + $0x4e0] ss:$16 sps:$4 sm:$0xff]  }
  0x24   :  { %6432 = vmatpush2.bf16.msra.mxu1 %v8905_v35  ;;  %6390 = vmatprep.subr.bf16.mxu0 %v8906_v36  ;;  %v8953_v7 = vld [vmem:[%s13973_s1 + $0x6e4] ss:$16 sps:$4 sm:$0xff]   ;;  %v8951_v11 = vld [vmem:[%s13973_s1 + $0x6e0] ss:$16 sps:$4 sm:$0xff]  }
  0x25   :  { %6433 = vmatprep.subr.bf16.mxu1 %v8908_v37  ;;  %v8956_v12 = vld [vmem:[%s13973_s1 + $0x4c4] ss:$16 sps:$4 sm:$0xff]   ;;  %v8954_v14 = vld [vmem:[%s13973_s1 + $0x4c0] ss:$16 sps:$4 sm:$0xff]  }
  0x26   :  { %v8959_v13 = vld [vmem:[%s13973_s1 + $0x6c4] ss:$16 sps:$4 sm:$0xff]   ;;  %v8957_v15 = vld [vmem:[%s13973_s1 + $0x6c0] ss:$16 sps:$4 sm:$0xff]  }
  0x27   :  { %6391 = vmatpush2.bf16.msra.mxu0 %v8910_v38  ;;  %v8962_v16 = vld [vmem:[%s13973_s1 + $0x4a4] ss:$16 sps:$4 sm:$0xff]   ;;  %v8960_v18 = vld [vmem:[%s13973_s1 + $0x4a0] ss:$16 sps:$4 sm:$0xff]   ;;  %v10722_v38 = vld [vmem:[%s13974_s0 + $0x18] sm:$0xff] }
  0x28   :  { %6434 = vmatpush2.bf16.msra.mxu1 %v8911_v39  ;;  %6392 = vmatprep.subr.bf16.mxu0 %v8912_v40  ;;  %v8965_v17 = vld [vmem:[%s13973_s1 + $0x6a4] ss:$16 sps:$4 sm:$0xff]   ;;  %v8963_v19 = vld [vmem:[%s13973_s1 + $0x6a0] ss:$16 sps:$4 sm:$0xff]   ;;  %v10727_v39 = vld [vmem:[%s13974_s0 + $0x98] sm:$0xff] }
  0x29   :  { %6435 = vmatprep.subr.bf16.mxu1 %v8914_v41  ;;  %v8968_v20 = vld [vmem:[%s13973_s1 + $0x484] ss:$16 sps:$4 sm:$0xff]   ;;  %v8966_v22 = vld [vmem:[%s13973_s1 + $0x480] ss:$16 sps:$4 sm:$0xff]  }
  0x2a   :  { %v8971_v21 = vld [vmem:[%s13973_s1 + $0x684] ss:$16 sps:$4 sm:$0xff]   ;;  %v8969_v23 = vld [vmem:[%s13973_s1 + $0x680] ss:$16 sps:$4 sm:$0xff]  }
  0x2b   :  { %6393 = vmatpush2.bf16.msra.mxu0 %v8916_v42  ;;  %v8974_v24 = vld [vmem:[%s13973_s1 + $0x464] ss:$16 sps:$4 sm:$0xff]   ;;  %v8972_v26 = vld [vmem:[%s13973_s1 + $0x460] ss:$16 sps:$4 sm:$0xff]  }
  0x2c   :  { %6436 = vmatpush2.bf16.msra.mxu1 %v8917_v43  ;;  %6394 = vmatprep.subr.bf16.mxu0 %v8918_v44  ;;  %v8977_v25 = vld [vmem:[%s13973_s1 + $0x664] ss:$16 sps:$4 sm:$0xff]   ;;  %v8975_v27 = vld [vmem:[%s13973_s1 + $0x660] ss:$16 sps:$4 sm:$0xff]   ;;  %v10741_v43 = vcombine.high %v10722_v38, %v10727_v39 }
  0x2d   :  { %6437 = vmatprep.subr.bf16.mxu1 %v8920_v45  ;;  %v8980_v28 = vld [vmem:[%s13973_s1 + $0x444] ss:$16 sps:$4 sm:$0xff]   ;;  %v8978_v30 = vld [vmem:[%s13973_s1 + $0x440] ss:$16 sps:$4 sm:$0xff]  }
  0x2e   :  { %v8983_v29 = vld [vmem:[%s13973_s1 + $0x644] ss:$16 sps:$4 sm:$0xff]   ;;  %v8981_v31 = vld [vmem:[%s13973_s1 + $0x640] ss:$16 sps:$4 sm:$0xff]  }
  0x2f   :  { %6395 = vmatpush2.bf16.msra.mxu0 %v8922_v46  ;;  %v8986_v32 = vld [vmem:[%s13973_s1 + $0x424] ss:$16 sps:$4 sm:$0xff]   ;;  %v8984_v34 = vld [vmem:[%s13973_s1 + $0x420] ss:$16 sps:$4 sm:$0xff]  }
  0x30   :  { %6438 = vmatpush2.bf16.msra.mxu1 %v8923_v47  ;;  %6396 = vmatprep.subr.bf16.mxu0 %v8924_v52  ;;  %v8989_v33 = vld [vmem:[%s13973_s1 + $0x624] ss:$16 sps:$4 sm:$0xff]   ;;  %v8987_v35 = vld [vmem:[%s13973_s1 + $0x620] ss:$16 sps:$4 sm:$0xff]  }
  0x31   :  { %6439 = vmatprep.subr.bf16.mxu1 %v8926_v54  ;;  %v10712_v36 = vld [vmem:[%s13974_s0 + $0x10] sm:$0xff] }
  0x32   :  { %v10717_v37 = vld [vmem:[%s13974_s0 + $0x90] sm:$0xff] }
  0x33   :  { %6397 = vmatpush2.bf16.msra.mxu0 %v8928_v56  ;;  %v8992_v40 = vld [vmem:[%s13973_s1 + $0x404] ss:$16 sps:$4 sm:$0xff]   ;;  %v10734_v41 = vcombine.high %v10712_v36, %v10717_v37  ;;  %v8990_v44 = vld [vmem:[%s13973_s1 + $0x400] ss:$16 sps:$4 sm:$0xff]  }
  0x34   :  { %6440 = vmatpush2.bf16.msra.mxu1 %v8929_v57  ;;  %6398 = vmatprep.subr.bf16.mxu0 %v8930_v58  ;;  %v8995_v42 = vld [vmem:[%s13973_s1 + $0x604] ss:$16 sps:$4 sm:$0xff]   ;;  %v8993_v45 = vld [vmem:[%s13973_s1 + $0x600] ss:$16 sps:$4 sm:$0xff]  }
  0x35   :  { %6441 = vmatprep.subr.bf16.mxu1 %v8932_v59  ;;  %v8998_v46 = vld [vmem:[%s13973_s1 + $0x5e4] ss:$16 sps:$4 sm:$0xff]   ;;  %v8996_v48 = vld [vmem:[%s13973_s1 + $0x5e0] ss:$16 sps:$4 sm:$0xff]  }
  0x36   :  { %v9001_v47 = vld [vmem:[%s13973_s1 + $0x7e4] ss:$16 sps:$4 sm:$0xff]   ;;  %v8999_v49 = vld [vmem:[%s13973_s1 + $0x7e0] ss:$16 sps:$4 sm:$0xff]  }
  0x37   :  { %6399 = vmatpush2.bf16.msra.mxu0 %v8934_v60  ;;  %v9004_v50 = vld [vmem:[%s13973_s1 + $0x5c4] ss:$16 sps:$4 sm:$0xff]   ;;  %v9002_v52 = vld [vmem:[%s13973_s1 + $0x5c0] ss:$16 sps:$4 sm:$0xff]  }
  0x38   :  { %6442 = vmatpush2.bf16.msra.mxu1 %v8935_v61  ;;  %6400 = vmatprep.subr.bf16.mxu0 %v8936_v62  ;;  %v9007_v51 = vld [vmem:[%s13973_s1 + $0x7c4] ss:$16 sps:$4 sm:$0xff]   ;;  %v9005_v54 = vld [vmem:[%s13973_s1 + $0x7c0] ss:$16 sps:$4 sm:$0xff]  }
  0x39   :  { %6443 = vmatprep.subr.bf16.mxu1 %v8938_v63  ;;  %v9010_v56 = vld [vmem:[%s13973_s1 + $0x5a4] ss:$16 sps:$4 sm:$0xff]   ;;  %v9008_v58 = vld [vmem:[%s13973_s1 + $0x5a0] ss:$16 sps:$4 sm:$0xff]  }
  0x3a   :  { %v9013_v57 = vld [vmem:[%s13973_s1 + $0x7a4] ss:$16 sps:$4 sm:$0xff]   ;;  %v9011_v59 = vld [vmem:[%s13973_s1 + $0x7a0] ss:$16 sps:$4 sm:$0xff]  }
  0x3b   :  { %6401 = vmatpush2.bf16.msra.mxu0 %v8940_v0  ;;  %v9016_v60 = vld [vmem:[%s13973_s1 + $0x584] ss:$16 sps:$4 sm:$0xff]   ;;  %v9014_v62 = vld [vmem:[%s13973_s1 + $0x580] ss:$16 sps:$4 sm:$0xff]  }
  0x3c   :  { %6444 = vmatpush2.bf16.msra.mxu1 %v8941_v1  ;;  %6402 = vmatprep.subr.bf16.mxu0 %v8942_v2  ;;  %v9019_v61 = vld [vmem:[%s13973_s1 + $0x784] ss:$16 sps:$4 sm:$0xff]   ;;  %v9017_v63 = vld [vmem:[%s13973_s1 + $0x780] ss:$16 sps:$4 sm:$0xff]  }
  0x3d   :  { %6445 = vmatprep.subr.bf16.mxu1 %v8944_v3  ;;  %v9022_v0 = vld [vmem:[%s13973_s1 + $0x564] ss:$16 sps:$4 sm:$0xff]   ;;  %v9020_v2 = vld [vmem:[%s13973_s1 + $0x560] ss:$16 sps:$4 sm:$0xff]  }
  0x3e   :  { %v9025_v1 = vld [vmem:[%s13973_s1 + $0x764] ss:$16 sps:$4 sm:$0xff]   ;;  %v9023_v3 = vld [vmem:[%s13973_s1 + $0x760] ss:$16 sps:$4 sm:$0xff]  }
  0x3f   :  { %6403 = vmatpush2.bf16.msra.mxu0 %v8946_v4  ;;  %v9028_v4 = vld [vmem:[%s13973_s1 + $0x544] ss:$16 sps:$4 sm:$0xff]  }
  0x40   :  { %6446 = vmatpush2.bf16.msra.mxu1 %v8947_v5  ;;  %6458 = vmatprep.subr.bf16.mxu0 %v8950_v6  ;;  %v9031_v5 = vld [vmem:[%s13973_s1 + $0x744] ss:$16 sps:$4 sm:$0xff]   ;;  %v9026_v6 = vld [vmem:[%s13973_s1 + $0x540] ss:$16 sps:$4 sm:$0xff]  }
  0x41   :  { %6501 = vmatprep.subr.bf16.mxu1 %v8953_v7  ;;  %v9029_v7 = vld [vmem:[%s13973_s1 + $0x740] ss:$16 sps:$4 sm:$0xff]  }
  0x42   :  { %6405 = vmatmul.mubr.bf16.vlgmr.msra.gmra.mxu0 %v10625_v8 }
  0x43   :  { %6448 = vmatmul.mubr.bf16.vlgmr.msra.gmra.mxu1 %v10627_v9  ;;  %6459 = vmatpush1.bf16.msra.mxu0 %v8948_v10  ;;  %v9034_v10 = vld [vmem:[%s13973_s1 + $0x524] ss:$16 sps:$4 sm:$0xff]  }
  0x44   :  { %6502 = vmatpush1.bf16.msra.mxu1 %v8951_v11  ;;  %6460 = vmatprep.subr.bf16.mxu0 %v8956_v12  ;;  %v9037_v11 = vld [vmem:[%s13973_s1 + $0x724] ss:$16 sps:$4 sm:$0xff]   ;;  %v9032_v12 = vld [vmem:[%s13973_s1 + $0x520] ss:$16 sps:$4 sm:$0xff]  }
  0x45   :  { %6503 = vmatprep.subr.bf16.mxu1 %v8959_v13  ;;  %6490 = vmatprep.mubr.bf16.mxu0 %v10734_v41  ;;  %v9035_v13 = vld [vmem:[%s13973_s1 + $0x720] ss:$16 sps:$4 sm:$0xff]  }
  0x46   :  { %6533 = vmatprep.mubr.bf16.mxu1 %v10741_v43 }
  0x47   :  { %6461 = vmatpush1.bf16.msra.mxu0 %v8954_v14  ;;  %v9040_v14 = vld [vmem:[%s13973_s1 + $0x504] ss:$16 sps:$4 sm:$0xff]  }
  0x48   :  { %6504 = vmatpush1.bf16.msra.mxu1 %v8957_v15  ;;  %6462 = vmatprep.subr.bf16.mxu0 %v8962_v16  ;;  %v9043_v15 = vld [vmem:[%s13973_s1 + $0x704] ss:$16 sps:$4 sm:$0xff]   ;;  %v9038_v16 = vld [vmem:[%s13973_s1 + $0x500] ss:$16 sps:$4 sm:$0xff]  }
  0x49   :  { %6505 = vmatprep.subr.bf16.mxu1 %v8965_v17  ;;  %v9041_v17 = vld [vmem:[%s13973_s1 + $0x700] ss:$16 sps:$4 sm:$0xff]  }
  0x4b   :  { %6463 = vmatpush1.bf16.msra.mxu0 %v8960_v18  ;;  %v9046_v18 = vld [vmem:[%s13973_s1 + $0x8e4] ss:$16 sps:$4 sm:$0xff]  }
  0x4c   :  { %6506 = vmatpush1.bf16.msra.mxu1 %v8963_v19  ;;  %6464 = vmatprep.subr.bf16.mxu0 %v8968_v20  ;;  %v9049_v19 = vld [vmem:[%s13973_s1 + $0xae4] ss:$16 sps:$4 sm:$0xff]   ;;  %v10855_v20 = vcombine.low %v10712_v36, %v10717_v37  ;;  %v9056_v36 = vld [vmem:[%s13973_s1 + $0x8a0] ss:$16 sps:$4 sm:$0xff]  }
  0x4d   :  { %6507 = vmatprep.subr.bf16.mxu1 %v8971_v21  ;;  %v10859_v21 = vcombine.low %v10722_v38, %v10727_v39  ;;  %v9059_v37 = vld [vmem:[%s13973_s1 + $0xaa0] ss:$16 sps:$4 sm:$0xff]   ;;  %v9064_v38 = vld [vmem:[%s13973_s1 + $0x884] ss:$16 sps:$4 sm:$0xff]  }
  0x4e   :  { %v9067_v39 = vld [vmem:[%s13973_s1 + $0xa84] ss:$16 sps:$4 sm:$0xff]  }
  0x4f   :  { %6465 = vmatpush1.bf16.msra.mxu0 %v8966_v22  ;;  %v9044_v22 = vld [vmem:[%s13973_s1 + $0x8e0] ss:$16 sps:$4 sm:$0xff]  }
  0x50   :  { %6508 = vmatpush1.bf16.msra.mxu1 %v8969_v23  ;;  %6466 = vmatprep.subr.bf16.mxu0 %v8974_v24  ;;  %v9047_v23 = vld [vmem:[%s13973_s1 + $0xae0] ss:$16 sps:$4 sm:$0xff]   ;;  %v9052_v24 = vld [vmem:[%s13973_s1 + $0x8c4] ss:$16 sps:$4 sm:$0xff]  }
  0x51   :  { %6509 = vmatprep.subr.bf16.mxu1 %v8977_v25  ;;  %v9055_v25 = vld [vmem:[%s13973_s1 + $0xac4] ss:$16 sps:$4 sm:$0xff]  }
  0x53   :  { %6467 = vmatpush1.bf16.msra.mxu0 %v8972_v26  ;;  %v9050_v26 = vld [vmem:[%s13973_s1 + $0x8c0] ss:$16 sps:$4 sm:$0xff]  }
  0x54   :  { %6510 = vmatpush1.bf16.msra.mxu1 %v8975_v27  ;;  %6468 = vmatprep.subr.bf16.mxu0 %v8980_v28  ;;  %v9053_v27 = vld [vmem:[%s13973_s1 + $0xac0] ss:$16 sps:$4 sm:$0xff]  }
  0x55   :  { %6511 = vmatprep.subr.bf16.mxu1 %v8983_v29  ;;  %v10882_v28 = vld [vmem:[%s13974_s0 + $0x20] sm:$0xff] }
  0x56   :  { %v10889_v29 = vld [vmem:[%s13974_s0 + $0xa0] sm:$0xff] }
  0x57   :  { %6469 = vmatpush1.bf16.msra.mxu0 %v8978_v30  ;;  %v10894_v30 = vld [vmem:[%s13974_s0 + $0x28] sm:$0xff] }
  0x58   :  { %6512 = vmatpush1.bf16.msra.mxu1 %v8981_v31  ;;  %6470 = vmatprep.subr.bf16.mxu0 %v8986_v32  ;;  %v10899_v31 = vld [vmem:[%s13974_s0 + $0xa8] sm:$0xff]  ;;  %v9058_v32 = vld [vmem:[%s13973_s1 + $0x8a4] ss:$16 sps:$4 sm:$0xff]  }
  0x59   :  { %6513 = vmatprep.subr.bf16.mxu1 %v8989_v33  ;;  %v10906_v33 = vcombine.high %v10882_v28, %v10889_v29 }
  0x5b   :  { %6471 = vmatpush1.bf16.msra.mxu0 %v8984_v34  ;;  %v9061_v34 = vld [vmem:[%s13973_s1 + $0xaa4] ss:$16 sps:$4 sm:$0xff]  }
  0x5c   :  { %6514 = vmatpush1.bf16.msra.mxu1 %v8987_v35  ;;  %6472 = vmatprep.subr.bf16.mxu0 %v8992_v40  ;;  %v10913_v35 = vcombine.high %v10894_v30, %v10899_v31  ;;  %v9062_v40 = vld [vmem:[%s13973_s1 + $0x880] ss:$16 sps:$4 sm:$0xff]  }
  0x5d   :  { %6515 = vmatprep.subr.bf16.mxu1 %v8995_v42  ;;  %v9065_v42 = vld [vmem:[%s13973_s1 + $0xa80] ss:$16 sps:$4 sm:$0xff]  }
  0x5f   :  { %6473 = vmatpush1.bf16.msra.mxu0 %v8990_v44  ;;  %v9070_v44 = vld [vmem:[%s13973_s1 + $0x864] ss:$16 sps:$4 sm:$0xff]  }
  0x60   :  { %6516 = vmatpush1.bf16.msra.mxu1 %v8993_v45  ;;  %6474 = vmatprep.subr.bf16.mxu0 %v8998_v46  ;;  %v9073_v45 = vld [vmem:[%s13973_s1 + $0xa64] ss:$16 sps:$4 sm:$0xff]   ;;  %v9068_v46 = vld [vmem:[%s13973_s1 + $0x860] ss:$16 sps:$4 sm:$0xff]  }
  0x61   :  { %6517 = vmatprep.subr.bf16.mxu1 %v9001_v47  ;;  %v9071_v47 = vld [vmem:[%s13973_s1 + $0xa60] ss:$16 sps:$4 sm:$0xff]  }
  0x63   :  { %6475 = vmatpush2.bf16.msra.mxu0 %v8996_v48  ;;  %v9076_v48 = vld [vmem:[%s13973_s1 + $0x844] ss:$16 sps:$4 sm:$0xff]  }
  0x64   :  { %6518 = vmatpush2.bf16.msra.mxu1 %v8999_v49  ;;  %6476 = vmatprep.subr.bf16.mxu0 %v9004_v50  ;;  %v9079_v49 = vld [vmem:[%s13973_s1 + $0xa44] ss:$16 sps:$4 sm:$0xff]   ;;  %v9074_v50 = vld [vmem:[%s13973_s1 + $0x840] ss:$16 sps:$4 sm:$0xff]  }
  0x65   :  { %6519 = vmatprep.subr.bf16.mxu1 %v9007_v51  ;;  %v9077_v51 = vld [vmem:[%s13973_s1 + $0xa40] ss:$16 sps:$4 sm:$0xff]  }
  0x67   :  { %6477 = vmatpush2.bf16.msra.mxu0 %v9002_v52  ;;  %v9082_v52 = vld [vmem:[%s13973_s1 + $0x824] ss:$16 sps:$4 sm:$0xff]  }
  0x68   :  { %6520 = vmatpush2.bf16.msra.mxu1 %v9005_v54  ;;  %6478 = vmatprep.subr.bf16.mxu0 %v9010_v56  ;;  %v9085_v54 = vld [vmem:[%s13973_s1 + $0xa24] ss:$16 sps:$4 sm:$0xff]   ;;  %v9080_v56 = vld [vmem:[%s13973_s1 + $0x820] ss:$16 sps:$4 sm:$0xff]  }
  0x69   :  { %6521 = vmatprep.subr.bf16.mxu1 %v9013_v57  ;;  %v9083_v57 = vld [vmem:[%s13973_s1 + $0xa20] ss:$16 sps:$4 sm:$0xff]  }
  0x6b   :  { %6479 = vmatpush2.bf16.msra.mxu0 %v9008_v58  ;;  %v9088_v58 = vld [vmem:[%s13973_s1 + $0x804] ss:$16 sps:$4 sm:$0xff]  }
  0x6c   :  { %6522 = vmatpush2.bf16.msra.mxu1 %v9011_v59  ;;  %6480 = vmatprep.subr.bf16.mxu0 %v9016_v60  ;;  %v9091_v59 = vld [vmem:[%s13973_s1 + $0xa04] ss:$16 sps:$4 sm:$0xff]   ;;  %v9086_v60 = vld [vmem:[%s13973_s1 + $0x800] ss:$16 sps:$4 sm:$0xff]  }
  0x6d   :  { %6523 = vmatprep.subr.bf16.mxu1 %v9019_v61  ;;  %v9089_v61 = vld [vmem:[%s13973_s1 + $0xa00] ss:$16 sps:$4 sm:$0xff]  }
  0x6f   :  { %6481 = vmatpush2.bf16.msra.mxu0 %v9014_v62  ;;  %v9094_v62 = vld [vmem:[%s13973_s1 + $0x9e4] ss:$16 sps:$4 sm:$0xff]  }
  0x70   :  { %6524 = vmatpush2.bf16.msra.mxu1 %v9017_v63  ;;  %6482 = vmatprep.subr.bf16.mxu0 %v9022_v0  ;;  %v9097_v63 = vld [vmem:[%s13973_s1 + $0xbe4] ss:$16 sps:$4 sm:$0xff]   ;;  %v9092_v0 = vld [vmem:[%s13973_s1 + $0x9e0] ss:$16 sps:$4 sm:$0xff]  }
  0x71   :  { %6525 = vmatprep.subr.bf16.mxu1 %v9025_v1  ;;  %v9095_v1 = vld [vmem:[%s13973_s1 + $0xbe0] ss:$16 sps:$4 sm:$0xff]  }
  0x73   :  { %6483 = vmatpush2.bf16.msra.mxu0 %v9020_v2  ;;  %v9100_v2 = vld [vmem:[%s13973_s1 + $0x9c4] ss:$16 sps:$4 sm:$0xff]  }
  0x74   :  { %6526 = vmatpush2.bf16.msra.mxu1 %v9023_v3  ;;  %6484 = vmatprep.subr.bf16.mxu0 %v9028_v4  ;;  %v9103_v3 = vld [vmem:[%s13973_s1 + $0xbc4] ss:$16 sps:$4 sm:$0xff]   ;;  %v9098_v4 = vld [vmem:[%s13973_s1 + $0x9c0] ss:$16 sps:$4 sm:$0xff]  }
  0x75   :  { %6527 = vmatprep.subr.bf16.mxu1 %v9031_v5  ;;  %v9101_v5 = vld [vmem:[%s13973_s1 + $0xbc0] ss:$16 sps:$4 sm:$0xff]  }
  0x77   :  { %6485 = vmatpush2.bf16.msra.mxu0 %v9026_v6  ;;  %v9106_v6 = vld [vmem:[%s13973_s1 + $0x9a4] ss:$16 sps:$4 sm:$0xff]  }
  0x78   :  { %6528 = vmatpush2.bf16.msra.mxu1 %v9029_v7  ;;  %6486 = vmatprep.subr.bf16.mxu0 %v9034_v10  ;;  %v9109_v7 = vld [vmem:[%s13973_s1 + $0xba4] ss:$16 sps:$4 sm:$0xff]   ;;  %v9104_v10 = vld [vmem:[%s13973_s1 + $0x9a0] ss:$16 sps:$4 sm:$0xff]  }
  0x79   :  { %6529 = vmatprep.subr.bf16.mxu1 %v9037_v11  ;;  %v9107_v11 = vld [vmem:[%s13973_s1 + $0xba0] ss:$16 sps:$4 sm:$0xff]  }
  0x7b   :  { %6487 = vmatpush2.bf16.msra.mxu0 %v9032_v12  ;;  %v9112_v12 = vld [vmem:[%s13973_s1 + $0x984] ss:$16 sps:$4 sm:$0xff]  }
  0x7c   :  { %6530 = vmatpush2.bf16.msra.mxu1 %v9035_v13  ;;  %6488 = vmatprep.subr.bf16.mxu0 %v9040_v14  ;;  %v9115_v13 = vld [vmem:[%s13973_s1 + $0xb84] ss:$16 sps:$4 sm:$0xff]   ;;  %v9110_v14 = vld [vmem:[%s13973_s1 + $0x980] ss:$16 sps:$4 sm:$0xff]  }
  0x7d   :  { %6531 = vmatprep.subr.bf16.mxu1 %v9043_v15  ;;  %v9113_v15 = vld [vmem:[%s13973_s1 + $0xb80] ss:$16 sps:$4 sm:$0xff]  }
  0x7f   :  { %6489 = vmatpush2.bf16.msra.mxu0 %v9038_v16  ;;  %v9118_v16 = vld [vmem:[%s13973_s1 + $0x964] ss:$16 sps:$4 sm:$0xff]  }
  0x80   :  { %6532 = vmatpush2.bf16.msra.mxu1 %v9041_v17  ;;  %6544 = vmatprep.subr.bf16.mxu0 %v9046_v18  ;;  %v9121_v17 = vld [vmem:[%s13973_s1 + $0xb64] ss:$16 sps:$4 sm:$0xff]   ;;  %v9116_v18 = vld [vmem:[%s13973_s1 + $0x960] ss:$16 sps:$4 sm:$0xff]  }
  0x81   :  { %6587 = vmatprep.subr.bf16.mxu1 %v9049_v19  ;;  %v9119_v19 = vld [vmem:[%s13973_s1 + $0xb60] ss:$16 sps:$4 sm:$0xff]  }
  0x82   :  { %6491 = vmatmul.mubr.bf16.vlgmr.msra.gmra.mxu0 %v10855_v20 }
  0x83   :  { %6534 = vmatmul.mubr.bf16.vlgmr.msra.gmra.mxu1 %v10859_v21  ;;  %6545 = vmatpush1.bf16.msra.mxu0 %v9044_v22  ;;  %v9124_v22 = vld [vmem:[%s13973_s1 + $0x944] ss:$16 sps:$4 sm:$0xff]  }
  0x84   :  { %6588 = vmatpush1.bf16.msra.mxu1 %v9047_v23  ;;  %6546 = vmatprep.subr.bf16.mxu0 %v9052_v24  ;;  %v9127_v23 = vld [vmem:[%s13973_s1 + $0xb44] ss:$16 sps:$4 sm:$0xff]   ;;  %v9122_v24 = vld [vmem:[%s13973_s1 + $0x940] ss:$16 sps:$4 sm:$0xff]  }
  0x85   :  { %6589 = vmatprep.subr.bf16.mxu1 %v9055_v25  ;;  %6576 = vmatprep.mubr.bf16.mxu0 %v10906_v33  ;;  %v9125_v25 = vld [vmem:[%s13973_s1 + $0xb40] ss:$16 sps:$4 sm:$0xff]  }
  0x86   :  { %6619 = vmatprep.mubr.bf16.mxu1 %v10913_v35 }
  0x87   :  { %6547 = vmatpush1.bf16.msra.mxu0 %v9050_v26  ;;  %v9130_v26 = vld [vmem:[%s13973_s1 + $0x924] ss:$16 sps:$4 sm:$0xff]  }
  0x88   :  { %6590 = vmatpush1.bf16.msra.mxu1 %v9053_v27  ;;  %6548 = vmatprep.subr.bf16.mxu0 %v9058_v32  ;;  %v9133_v27 = vld [vmem:[%s13973_s1 + $0xb24] ss:$16 sps:$4 sm:$0xff]   ;;  %v9128_v32 = vld [vmem:[%s13973_s1 + $0x920] ss:$16 sps:$4 sm:$0xff]  }
  0x89   :  { %6591 = vmatprep.subr.bf16.mxu1 %v9061_v34  ;;  %v9131_v34 = vld [vmem:[%s13973_s1 + $0xb20] ss:$16 sps:$4 sm:$0xff]  }
  0x8b   :  { %6549 = vmatpush1.bf16.msra.mxu0 %v9056_v36  ;;  %v9136_v36 = vld [vmem:[%s13973_s1 + $0x904] ss:$16 sps:$4 sm:$0xff]  }
  0x8c   :  { %6592 = vmatpush1.bf16.msra.mxu1 %v9059_v37  ;;  %6550 = vmatprep.subr.bf16.mxu0 %v9064_v38  ;;  %v9139_v37 = vld [vmem:[%s13973_s1 + $0xb04] ss:$16 sps:$4 sm:$0xff]   ;;  %v9134_v38 = vld [vmem:[%s13973_s1 + $0x900] ss:$16 sps:$4 sm:$0xff]  }
  0x8d   :  { %6593 = vmatprep.subr.bf16.mxu1 %v9067_v39  ;;  %v9137_v39 = vld [vmem:[%s13973_s1 + $0xb00] ss:$16 sps:$4 sm:$0xff]  }
  0x8f   :  { %6551 = vmatpush1.bf16.msra.mxu0 %v9062_v40  ;;  %v9142_v40 = vld [vmem:[%s13973_s1 + $0xce4] ss:$16 sps:$4 sm:$0xff]  }
  0x90   :  { %6594 = vmatpush1.bf16.msra.mxu1 %v9065_v42  ;;  %6552 = vmatprep.subr.bf16.mxu0 %v9070_v44  ;;  %v9145_v42 = vld [vmem:[%s13973_s1 + $0xee4] ss:$16 sps:$4 sm:$0xff]  }
  0x91   :  { %6595 = vmatprep.subr.bf16.mxu1 %v9073_v45  ;;  %v11088_v44 = vld [vmem:[%s13974_s0 + $0x30] sm:$0xff] }
  0x92   :  { %v9140_v45 = vld [vmem:[%s13973_s1 + $0xce0] ss:$16 sps:$4 sm:$0xff]  }
  0x93   :  { %6553 = vmatpush1.bf16.msra.mxu0 %v9068_v46  ;;  %v11096_v46 = vld [vmem:[%s13974_s0 + $0xb0] sm:$0xff] }
  0x94   :  { %6596 = vmatpush1.bf16.msra.mxu1 %v9071_v47  ;;  %6554 = vmatprep.subr.bf16.mxu0 %v9076_v48  ;;  %v11101_v47 = vld [vmem:[%s13974_s0 + $0x38] sm:$0xff]  ;;  %v11105_v48 = vcombine.low %v10882_v28, %v10889_v29  ;;  %v9148_v28 = vld [vmem:[%s13973_s1 + $0xcc4] ss:$16 sps:$4 sm:$0xff]  }
  0x95   :  { %6597 = vmatprep.subr.bf16.mxu1 %v9079_v49  ;;  %v11109_v49 = vcombine.low %v10894_v30, %v10899_v31  ;;  %v9151_v29 = vld [vmem:[%s13973_s1 + $0xec4] ss:$16 sps:$4 sm:$0xff]   ;;  %v11127_v30 = vcombine.high %v11088_v44, %v11096_v46 }
  0x97   :  { %6555 = vmatpush1.bf16.msra.mxu0 %v9074_v50  ;;  %v11114_v50 = vld [vmem:[%s13974_s0 + $0xb8] sm:$0xff] }
  0x98   :  { %6598 = vmatpush1.bf16.msra.mxu1 %v9077_v51  ;;  %6556 = vmatprep.subr.bf16.mxu0 %v9082_v52  ;;  %v9143_v51 = vld [vmem:[%s13973_s1 + $0xee0] ss:$16 sps:$4 sm:$0xff]   ;;  %v11131_v31 = vcombine.high %v11101_v47, %v11114_v50 }
  0x99   :  { %6599 = vmatprep.subr.bf16.mxu1 %v9085_v54  ;;  %v9146_v52 = vld [vmem:[%s13973_s1 + $0xcc0] ss:$16 sps:$4 sm:$0xff]  }
  0x9a   :  { %v9149_v54 = vld [vmem:[%s13973_s1 + $0xec0] ss:$16 sps:$4 sm:$0xff]  }
  0x9b   :  { %6557 = vmatpush1.bf16.msra.mxu0 %v9080_v56  ;;  %v9154_v56 = vld [vmem:[%s13973_s1 + $0xca4] ss:$16 sps:$4 sm:$0xff]  }
  0x9c   :  { %6600 = vmatpush1.bf16.msra.mxu1 %v9083_v57  ;;  %6558 = vmatprep.subr.bf16.mxu0 %v9088_v58  ;;  %v9157_v57 = vld [vmem:[%s13973_s1 + $0xea4] ss:$16 sps:$4 sm:$0xff]   ;;  %v9152_v58 = vld [vmem:[%s13973_s1 + $0xca0] ss:$16 sps:$4 sm:$0xff]  }
  0x9d   :  { %6601 = vmatprep.subr.bf16.mxu1 %v9091_v59  ;;  %v9155_v59 = vld [vmem:[%s13973_s1 + $0xea0] ss:$16 sps:$4 sm:$0xff]  }
  0x9f   :  { %6559 = vmatpush1.bf16.msra.mxu0 %v9086_v60  ;;  %v9160_v60 = vld [vmem:[%s13973_s1 + $0xc84] ss:$16 sps:$4 sm:$0xff]  }
  0xa0   :  { %6602 = vmatpush1.bf16.msra.mxu1 %v9089_v61  ;;  %6560 = vmatprep.subr.bf16.mxu0 %v9094_v62  ;;  %v9163_v61 = vld [vmem:[%s13973_s1 + $0xe84] ss:$16 sps:$4 sm:$0xff]   ;;  %v9158_v62 = vld [vmem:[%s13973_s1 + $0xc80] ss:$16 sps:$4 sm:$0xff]  }
  0xa1   :  { %6603 = vmatprep.subr.bf16.mxu1 %v9097_v63  ;;  %v9161_v63 = vld [vmem:[%s13973_s1 + $0xe80] ss:$16 sps:$4 sm:$0xff]  }
  0xa3   :  { %6561 = vmatpush2.bf16.msra.mxu0 %v9092_v0  ;;  %v9166_v0 = vld [vmem:[%s13973_s1 + $0xc64] ss:$16 sps:$4 sm:$0xff]  }
  0xa4   :  { %6604 = vmatpush2.bf16.msra.mxu1 %v9095_v1  ;;  %6562 = vmatprep.subr.bf16.mxu0 %v9100_v2  ;;  %v9169_v1 = vld [vmem:[%s13973_s1 + $0xe64] ss:$16 sps:$4 sm:$0xff]   ;;  %v9164_v2 = vld [vmem:[%s13973_s1 + $0xc60] ss:$16 sps:$4 sm:$0xff]  }
  0xa5   :  { %6605 = vmatprep.subr.bf16.mxu1 %v9103_v3  ;;  %v9167_v3 = vld [vmem:[%s13973_s1 + $0xe60] ss:$16 sps:$4 sm:$0xff]  }
  0xa7   :  { %6563 = vmatpush2.bf16.msra.mxu0 %v9098_v4  ;;  %v9172_v4 = vld [vmem:[%s13973_s1 + $0xc44] ss:$16 sps:$4 sm:$0xff]  }
  0xa8   :  { %6606 = vmatpush2.bf16.msra.mxu1 %v9101_v5  ;;  %6564 = vmatprep.subr.bf16.mxu0 %v9106_v6  ;;  %v9175_v5 = vld [vmem:[%s13973_s1 + $0xe44] ss:$16 sps:$4 sm:$0xff]   ;;  %v9170_v6 = vld [vmem:[%s13973_s1 + $0xc40] ss:$16 sps:$4 sm:$0xff]  }
  0xa9   :  { %6607 = vmatprep.subr.bf16.mxu1 %v9109_v7  ;;  %v9173_v7 = vld [vmem:[%s13973_s1 + $0xe40] ss:$16 sps:$4 sm:$0xff]  }
  0xab   :  { %6565 = vmatpush2.bf16.msra.mxu0 %v9104_v10  ;;  %v9178_v10 = vld [vmem:[%s13973_s1 + $0xc24] ss:$16 sps:$4 sm:$0xff]  }
  0xac   :  { %6608 = vmatpush2.bf16.msra.mxu1 %v9107_v11  ;;  %6566 = vmatprep.subr.bf16.mxu0 %v9112_v12  ;;  %v9181_v11 = vld [vmem:[%s13973_s1 + $0xe24] ss:$16 sps:$4 sm:$0xff]   ;;  %v9176_v12 = vld [vmem:[%s13973_s1 + $0xc20] ss:$16 sps:$4 sm:$0xff]  }
  0xad   :  { %6609 = vmatprep.subr.bf16.mxu1 %v9115_v13  ;;  %v9179_v13 = vld [vmem:[%s13973_s1 + $0xe20] ss:$16 sps:$4 sm:$0xff]  }
  0xaf   :  { %6567 = vmatpush2.bf16.msra.mxu0 %v9110_v14  ;;  %v9184_v14 = vld [vmem:[%s13973_s1 + $0xc04] ss:$16 sps:$4 sm:$0xff]  }
  0xb0   :  { %6610 = vmatpush2.bf16.msra.mxu1 %v9113_v15  ;;  %6568 = vmatprep.subr.bf16.mxu0 %v9118_v16  ;;  %v9187_v15 = vld [vmem:[%s13973_s1 + $0xe04] ss:$16 sps:$4 sm:$0xff]   ;;  %v9182_v16 = vld [vmem:[%s13973_s1 + $0xc00] ss:$16 sps:$4 sm:$0xff]  }
  0xb1   :  { %6611 = vmatprep.subr.bf16.mxu1 %v9121_v17  ;;  %v9185_v17 = vld [vmem:[%s13973_s1 + $0xe00] ss:$16 sps:$4 sm:$0xff]  }
  0xb3   :  { %6569 = vmatpush2.bf16.msra.mxu0 %v9116_v18  ;;  %v9190_v18 = vld [vmem:[%s13973_s1 + $0xde4] ss:$16 sps:$4 sm:$0xff]  }
  0xb4   :  { %6612 = vmatpush2.bf16.msra.mxu1 %v9119_v19  ;;  %6570 = vmatprep.subr.bf16.mxu0 %v9124_v22  ;;  %v9193_v19 = vld [vmem:[%s13973_s1 + $0xfe4] ss:$16 sps:$4 sm:$0xff]   ;;  %v9188_v22 = vld [vmem:[%s13973_s1 + $0xde0] ss:$16 sps:$4 sm:$0xff]  }
  0xb5   :  { %6613 = vmatprep.subr.bf16.mxu1 %v9127_v23  ;;  %v9191_v23 = vld [vmem:[%s13973_s1 + $0xfe0] ss:$16 sps:$4 sm:$0xff]  }
  0xb7   :  { %6571 = vmatpush2.bf16.msra.mxu0 %v9122_v24  ;;  %v9196_v24 = vld [vmem:[%s13973_s1 + $0xdc4] ss:$16 sps:$4 sm:$0xff]  }
  0xb8   :  { %6614 = vmatpush2.bf16.msra.mxu1 %v9125_v25  ;;  %6572 = vmatprep.subr.bf16.mxu0 %v9130_v26  ;;  %v9199_v25 = vld [vmem:[%s13973_s1 + $0xfc4] ss:$16 sps:$4 sm:$0xff]   ;;  %v9194_v26 = vld [vmem:[%s13973_s1 + $0xdc0] ss:$16 sps:$4 sm:$0xff]  }
  0xb9   :  { %6615 = vmatprep.subr.bf16.mxu1 %v9133_v27  ;;  %v9197_v27 = vld [vmem:[%s13973_s1 + $0xfc0] ss:$16 sps:$4 sm:$0xff]  }
  0xbb   :  { %6573 = vmatpush2.bf16.msra.mxu0 %v9128_v32  ;;  %v9202_v32 = vld [vmem:[%s13973_s1 + $0xda4] ss:$16 sps:$4 sm:$0xff]  }
  0xbc   :  { %6616 = vmatpush2.bf16.msra.mxu1 %v9131_v34  ;;  %6574 = vmatprep.subr.bf16.mxu0 %v9136_v36  ;;  %v9205_v34 = vld [vmem:[%s13973_s1 + $0xfa4] ss:$16 sps:$4 sm:$0xff]   ;;  %v9200_v36 = vld [vmem:[%s13973_s1 + $0xda0] ss:$16 sps:$4 sm:$0xff]  }
  0xbd   :  { %6617 = vmatprep.subr.bf16.mxu1 %v9139_v37  ;;  %v9203_v37 = vld [vmem:[%s13973_s1 + $0xfa0] ss:$16 sps:$4 sm:$0xff]  }
  0xbf   :  { %6575 = vmatpush2.bf16.msra.mxu0 %v9134_v38  ;;  %v9208_v38 = vld [vmem:[%s13973_s1 + $0xd84] ss:$16 sps:$4 sm:$0xff]  }
  0xc0   :  { %6618 = vmatpush2.bf16.msra.mxu1 %v9137_v39  ;;  %6630 = vmatprep.subr.bf16.mxu0 %v9142_v40  ;;  %v9211_v39 = vld [vmem:[%s13973_s1 + $0xf84] ss:$16 sps:$4 sm:$0xff]   ;;  %v9206_v40 = vld [vmem:[%s13973_s1 + $0xd80] ss:$16 sps:$4 sm:$0xff]  }
  0xc1   :  { %6673 = vmatprep.subr.bf16.mxu1 %v9145_v42  ;;  %v9209_v42 = vld [vmem:[%s13973_s1 + $0xf80] ss:$16 sps:$4 sm:$0xff]  }
  0xc2   :  { %6577 = vmatmul.mubr.bf16.vlgmr.msra.gmra.mxu0 %v11105_v48 }
  0xc3   :  { %6620 = vmatmul.mubr.bf16.vlgmr.msra.gmra.mxu1 %v11109_v49  ;;  %6631 = vmatpush1.bf16.msra.mxu0 %v9140_v45  ;;  %v9214_v45 = vld [vmem:[%s13973_s1 + $0xd64] ss:$16 sps:$4 sm:$0xff]  }
  0xc4   :  { %6674 = vmatpush1.bf16.msra.mxu1 %v9143_v51  ;;  %6632 = vmatprep.subr.bf16.mxu0 %v9148_v28  ;;  %v9217_v51 = vld [vmem:[%s13973_s1 + $0xf64] ss:$16 sps:$4 sm:$0xff]   ;;  %v9212_v28 = vld [vmem:[%s13973_s1 + $0xd60] ss:$16 sps:$4 sm:$0xff]  }
  0xc5   :  { %6675 = vmatprep.subr.bf16.mxu1 %v9151_v29  ;;  %6662 = vmatprep.mubr.bf16.mxu0 %v11127_v30  ;;  %v9215_v29 = vld [vmem:[%s13973_s1 + $0xf60] ss:$16 sps:$4 sm:$0xff]  }
  0xc6   :  { %6705 = vmatprep.mubr.bf16.mxu1 %v11131_v31 }
  0xc7   :  { %6633 = vmatpush1.bf16.msra.mxu0 %v9146_v52  ;;  %v9220_v52 = vld [vmem:[%s13973_s1 + $0xd44] ss:$16 sps:$4 sm:$0xff]  }
  0xc8   :  { %6676 = vmatpush1.bf16.msra.mxu1 %v9149_v54  ;;  %6634 = vmatprep.subr.bf16.mxu0 %v9154_v56  ;;  %v9223_v54 = vld [vmem:[%s13973_s1 + $0xf44] ss:$16 sps:$4 sm:$0xff]   ;;  %v9218_v56 = vld [vmem:[%s13973_s1 + $0xd40] ss:$16 sps:$4 sm:$0xff]  }
  0xc9   :  { %6677 = vmatprep.subr.bf16.mxu1 %v9157_v57  ;;  %v9221_v57 = vld [vmem:[%s13973_s1 + $0xf40] ss:$16 sps:$4 sm:$0xff]  }
  0xcb   :  { %6635 = vmatpush1.bf16.msra.mxu0 %v9152_v58  ;;  %v9226_v58 = vld [vmem:[%s13973_s1 + $0xd24] ss:$16 sps:$4 sm:$0xff]  }
  0xcc   :  { %6678 = vmatpush1.bf16.msra.mxu1 %v9155_v59  ;;  %6636 = vmatprep.subr.bf16.mxu0 %v9160_v60  ;;  %v9229_v59 = vld [vmem:[%s13973_s1 + $0xf24] ss:$16 sps:$4 sm:$0xff]   ;;  %v9224_v60 = vld [vmem:[%s13973_s1 + $0xd20] ss:$16 sps:$4 sm:$0xff]  }
  0xcd   :  { %6679 = vmatprep.subr.bf16.mxu1 %v9163_v61  ;;  %v9227_v61 = vld [vmem:[%s13973_s1 + $0xf20] ss:$16 sps:$4 sm:$0xff]  }
  0xcf   :  { %6637 = vmatpush1.bf16.msra.mxu0 %v9158_v62  ;;  %v9232_v62 = vld [vmem:[%s13973_s1 + $0xd04] ss:$16 sps:$4 sm:$0xff]  }
  0xd0   :  { %6680 = vmatpush1.bf16.msra.mxu1 %v9161_v63  ;;  %6638 = vmatprep.subr.bf16.mxu0 %v9166_v0  ;;  %v9235_v63 = vld [vmem:[%s13973_s1 + $0xf04] ss:$16 sps:$4 sm:$0xff]   ;;  %v9230_v0 = vld [vmem:[%s13973_s1 + $0xd00] ss:$16 sps:$4 sm:$0xff]  }
  0xd1   :  { %6681 = vmatprep.subr.bf16.mxu1 %v9169_v1  ;;  %v9233_v1 = vld [vmem:[%s13973_s1 + $0xf00] ss:$16 sps:$4 sm:$0xff]  }
  0xd3   :  { %6639 = vmatpush1.bf16.msra.mxu0 %v9164_v2  ;;  %v9238_v2 = vld [vmem:[%s13973_s1 + $0x10e4] ss:$16 sps:$4 sm:$0xff]  }
  0xd4   :  { %6682 = vmatpush1.bf16.msra.mxu1 %v9167_v3  ;;  %6640 = vmatprep.subr.bf16.mxu0 %v9172_v4  ;;  %v9241_v3 = vld [vmem:[%s13973_s1 + $0x12e4] ss:$16 sps:$4 sm:$0xff]  }
  0xd5   :  { %6683 = vmatprep.subr.bf16.mxu1 %v9175_v5  ;;  %v11320_v4 = vld [vmem:[%s13974_s0 + $0x40] sm:$0xff] }
  0xd6   :  { %v9236_v5 = vld [vmem:[%s13973_s1 + $0x10e0] ss:$16 sps:$4 sm:$0xff]  }
  0xd7   :  { %6641 = vmatpush1.bf16.msra.mxu0 %v9170_v6  ;;  %v11328_v6 = vld [vmem:[%s13974_s0 + $0xc0] sm:$0xff] }
  0xd8   :  { %6684 = vmatpush1.bf16.msra.mxu1 %v9173_v7  ;;  %6642 = vmatprep.subr.bf16.mxu0 %v9178_v10  ;;  %v11333_v7 = vld [vmem:[%s13974_s0 + $0x48] sm:$0xff]  ;;  %v11337_v10 = vcombine.low %v11088_v44, %v11096_v46  ;;  %v9244_v44 = vld [vmem:[%s13973_s1 + $0x10c4] ss:$16 sps:$4 sm:$0xff]  }
  0xd9   :  { %6685 = vmatprep.subr.bf16.mxu1 %v9181_v11  ;;  %v11341_v11 = vcombine.low %v11101_v47, %v11114_v50  ;;  %v9247_v46 = vld [vmem:[%s13973_s1 + $0x12c4] ss:$16 sps:$4 sm:$0xff]   ;;  %v11359_v47 = vcombine.high %v11320_v4, %v11328_v6 }
  0xdb   :  { %6643 = vmatpush1.bf16.msra.mxu0 %v9176_v12  ;;  %v11346_v12 = vld [vmem:[%s13974_s0 + $0xc8] sm:$0xff] }
  0xdc   :  { %6686 = vmatpush1.bf16.msra.mxu1 %v9179_v13  ;;  %6644 = vmatprep.subr.bf16.mxu0 %v9184_v14  ;;  %v9239_v13 = vld [vmem:[%s13973_s1 + $0x12e0] ss:$16 sps:$4 sm:$0xff]   ;;  %v11363_v50 = vcombine.high %v11333_v7, %v11346_v12 }
  0xdd   :  { %6687 = vmatprep.subr.bf16.mxu1 %v9187_v15  ;;  %v9242_v14 = vld [vmem:[%s13973_s1 + $0x10c0] ss:$16 sps:$4 sm:$0xff]  }
  0xde   :  { %v9245_v15 = vld [vmem:[%s13973_s1 + $0x12c0] ss:$16 sps:$4 sm:$0xff]  }
  0xdf   :  { %6645 = vmatpush1.bf16.msra.mxu0 %v9182_v16  ;;  %v9250_v16 = vld [vmem:[%s13973_s1 + $0x10a4] ss:$16 sps:$4 sm:$0xff]  }
  0xe0   :  { %6688 = vmatpush1.bf16.msra.mxu1 %v9185_v17  ;;  %6646 = vmatprep.subr.bf16.mxu0 %v9190_v18  ;;  %v9253_v17 = vld [vmem:[%s13973_s1 + $0x12a4] ss:$16 sps:$4 sm:$0xff]   ;;  %v9248_v18 = vld [vmem:[%s13973_s1 + $0x10a0] ss:$16 sps:$4 sm:$0xff]  }
  0xe1   :  { %6689 = vmatprep.subr.bf16.mxu1 %v9193_v19  ;;  %v9251_v19 = vld [vmem:[%s13973_s1 + $0x12a0] ss:$16 sps:$4 sm:$0xff]  }
  0xe3   :  { %6647 = vmatpush2.bf16.msra.mxu0 %v9188_v22  ;;  %v9256_v22 = vld [vmem:[%s13973_s1 + $0x1084] ss:$16 sps:$4 sm:$0xff]  }
  0xe4   :  { %6690 = vmatpush2.bf16.msra.mxu1 %v9191_v23  ;;  %6648 = vmatprep.subr.bf16.mxu0 %v9196_v24  ;;  %v9259_v23 = vld [vmem:[%s13973_s1 + $0x1284] ss:$16 sps:$4 sm:$0xff]   ;;  %v9254_v24 = vld [vmem:[%s13973_s1 + $0x1080] ss:$16 sps:$4 sm:$0xff]  }
  0xe5   :  { %6691 = vmatprep.subr.bf16.mxu1 %v9199_v25  ;;  %v9257_v25 = vld [vmem:[%s13973_s1 + $0x1280] ss:$16 sps:$4 sm:$0xff]  }
  0xe7   :  { %6649 = vmatpush2.bf16.msra.mxu0 %v9194_v26  ;;  %v9262_v26 = vld [vmem:[%s13973_s1 + $0x1064] ss:$16 sps:$4 sm:$0xff]  }
  0xe8   :  { %6692 = vmatpush2.bf16.msra.mxu1 %v9197_v27  ;;  %6650 = vmatprep.subr.bf16.mxu0 %v9202_v32  ;;  %v9265_v27 = vld [vmem:[%s13973_s1 + $0x1264] ss:$16 sps:$4 sm:$0xff]   ;;  %v9260_v32 = vld [vmem:[%s13973_s1 + $0x1060] ss:$16 sps:$4 sm:$0xff]  }
  0xe9   :  { %6693 = vmatprep.subr.bf16.mxu1 %v9205_v34  ;;  %v9263_v34 = vld [vmem:[%s13973_s1 + $0x1260] ss:$16 sps:$4 sm:$0xff]  }
  0xeb   :  { %6651 = vmatpush2.bf16.msra.mxu0 %v9200_v36  ;;  %v9268_v36 = vld [vmem:[%s13973_s1 + $0x1044] ss:$16 sps:$4 sm:$0xff]  }
  0xec   :  { %6694 = vmatpush2.bf16.msra.mxu1 %v9203_v37  ;;  %6652 = vmatprep.subr.bf16.mxu0 %v9208_v38  ;;  %v9271_v37 = vld [vmem:[%s13973_s1 + $0x1244] ss:$16 sps:$4 sm:$0xff]   ;;  %v9266_v38 = vld [vmem:[%s13973_s1 + $0x1040] ss:$16 sps:$4 sm:$0xff]  }
  0xed   :  { %6695 = vmatprep.subr.bf16.mxu1 %v9211_v39  ;;  %v9269_v39 = vld [vmem:[%s13973_s1 + $0x1240] ss:$16 sps:$4 sm:$0xff]  }
  0xef   :  { %6653 = vmatpush2.bf16.msra.mxu0 %v9206_v40  ;;  %v9274_v40 = vld [vmem:[%s13973_s1 + $0x1024] ss:$16 sps:$4 sm:$0xff]  }
  0xf0   :  { %6696 = vmatpush2.bf16.msra.mxu1 %v9209_v42  ;;  %6654 = vmatprep.subr.bf16.mxu0 %v9214_v45  ;;  %v9277_v42 = vld [vmem:[%s13973_s1 + $0x1224] ss:$16 sps:$4 sm:$0xff]   ;;  %v9272_v45 = vld [vmem:[%s13973_s1 + $0x1020] ss:$16 sps:$4 sm:$0xff]  }
  0xf1   :  { %6697 = vmatprep.subr.bf16.mxu1 %v9217_v51  ;;  %v9275_v51 = vld [vmem:[%s13973_s1 + $0x1220] ss:$16 sps:$4 sm:$0xff]  }
  0xf3   :  { %6655 = vmatpush2.bf16.msra.mxu0 %v9212_v28  ;;  %v9280_v28 = vld [vmem:[%s13973_s1 + $0x1004] ss:$16 sps:$4 sm:$0xff]  }
  0xf4   :  { %6698 = vmatpush2.bf16.msra.mxu1 %v9215_v29  ;;  %6656 = vmatprep.subr.bf16.mxu0 %v9220_v52  ;;  %v9283_v29 = vld [vmem:[%s13973_s1 + $0x1204] ss:$16 sps:$4 sm:$0xff]   ;;  %v9278_v52 = vld [vmem:[%s13973_s1 + $0x1000] ss:$16 sps:$4 sm:$0xff]  }
  0xf5   :  { %6699 = vmatprep.subr.bf16.mxu1 %v9223_v54  ;;  %v9281_v54 = vld [vmem:[%s13973_s1 + $0x1200] ss:$16 sps:$4 sm:$0xff]  }
  0xf7   :  { %6657 = vmatpush2.bf16.msra.mxu0 %v9218_v56  ;;  %v9286_v56 = vld [vmem:[%s13973_s1 + $0x11e4] ss:$16 sps:$4 sm:$0xff]  }
  0xf8   :  { %6700 = vmatpush2.bf16.msra.mxu1 %v9221_v57  ;;  %6658 = vmatprep.subr.bf16.mxu0 %v9226_v58  ;;  %v9289_v57 = vld [vmem:[%s13973_s1 + $0x13e4] ss:$16 sps:$4 sm:$0xff]   ;;  %v9284_v58 = vld [vmem:[%s13973_s1 + $0x11e0] ss:$16 sps:$4 sm:$0xff]  }
  0xf9   :  { %6701 = vmatprep.subr.bf16.mxu1 %v9229_v59  ;;  %v9287_v59 = vld [vmem:[%s13973_s1 + $0x13e0] ss:$16 sps:$4 sm:$0xff]  }
  0xfb   :  { %6659 = vmatpush2.bf16.msra.mxu0 %v9224_v60  ;;  %v9292_v60 = vld [vmem:[%s13973_s1 + $0x11c4] ss:$16 sps:$4 sm:$0xff]  }
  0xfc   :  { %6702 = vmatpush2.bf16.msra.mxu1 %v9227_v61  ;;  %6660 = vmatprep.subr.bf16.mxu0 %v9232_v62  ;;  %v9295_v61 = vld [vmem:[%s13973_s1 + $0x13c4] ss:$16 sps:$4 sm:$0xff]   ;;  %v9290_v62 = vld [vmem:[%s13973_s1 + $0x11c0] ss:$16 sps:$4 sm:$0xff]  }
  0xfd   :  { %6703 = vmatprep.subr.bf16.mxu1 %v9235_v63  ;;  %v9293_v63 = vld [vmem:[%s13973_s1 + $0x13c0] ss:$16 sps:$4 sm:$0xff]  }
  0xff   :  { %6661 = vmatpush2.bf16.msra.mxu0 %v9230_v0  ;;  %v9298_v0 = vld [vmem:[%s13973_s1 + $0x11a4] ss:$16 sps:$4 sm:$0xff]  }
 0x100   :  { %6704 = vmatpush2.bf16.msra.mxu1 %v9233_v1  ;;  %6716 = vmatprep.subr.bf16.mxu0 %v9238_v2  ;;  %v9301_v1 = vld [vmem:[%s13973_s1 + $0x13a4] ss:$16 sps:$4 sm:$0xff]   ;;  %v9296_v2 = vld [vmem:[%s13973_s1 + $0x11a0] ss:$16 sps:$4 sm:$0xff]  }
 0x101   :  { %6759 = vmatprep.subr.bf16.mxu1 %v9241_v3  ;;  %v9299_v3 = vld [vmem:[%s13973_s1 + $0x13a0] ss:$16 sps:$4 sm:$0xff]  }
 0x102   :  { %6663 = vmatmul.mubr.bf16.vlgmr.msra.gmra.mxu0 %v11337_v10 }
 0x103   :  { %6706 = vmatmul.mubr.bf16.vlgmr.msra.gmra.mxu1 %v11341_v11  ;;  %6717 = vmatpush1.bf16.msra.mxu0 %v9236_v5  ;;  %v9304_v5 = vld [vmem:[%s13973_s1 + $0x1184] ss:$16 sps:$4 sm:$0xff]  }
 0x104   :  { %6760 = vmatpush1.bf16.msra.mxu1 %v9239_v13  ;;  %6718 = vmatprep.subr.bf16.mxu0 %v9244_v44  ;;  %v9307_v13 = vld [vmem:[%s13973_s1 + $0x1384] ss:$16 sps:$4 sm:$0xff]   ;;  %v9302_v44 = vld [vmem:[%s13973_s1 + $0x1180] ss:$16 sps:$4 sm:$0xff]  }
 0x105   :  { %6761 = vmatprep.subr.bf16.mxu1 %v9247_v46  ;;  %6748 = vmatprep.mubr.bf16.mxu0 %v11359_v47  ;;  %v9305_v46 = vld [vmem:[%s13973_s1 + $0x1380] ss:$16 sps:$4 sm:$0xff]  }
 0x106   :  { %6791 = vmatprep.mubr.bf16.mxu1 %v11363_v50 }
 0x107   :  { %6719 = vmatpush1.bf16.msra.mxu0 %v9242_v14  ;;  %v9310_v14 = vld [vmem:[%s13973_s1 + $0x1164] ss:$16 sps:$4 sm:$0xff]  }
 0x108   :  { %6762 = vmatpush1.bf16.msra.mxu1 %v9245_v15  ;;  %6720 = vmatprep.subr.bf16.mxu0 %v9250_v16  ;;  %v9313_v15 = vld [vmem:[%s13973_s1 + $0x1364] ss:$16 sps:$4 sm:$0xff]   ;;  %v9308_v16 = vld [vmem:[%s13973_s1 + $0x1160] ss:$16 sps:$4 sm:$0xff]  }
 0x109   :  { %6763 = vmatprep.subr.bf16.mxu1 %v9253_v17  ;;  %v9311_v17 = vld [vmem:[%s13973_s1 + $0x1360] ss:$16 sps:$4 sm:$0xff]  }
 0x10b   :  { %6721 = vmatpush1.bf16.msra.mxu0 %v9248_v18  ;;  %v9316_v18 = vld [vmem:[%s13973_s1 + $0x1144] ss:$16 sps:$4 sm:$0xff]  }
 0x10c   :  { %6764 = vmatpush1.bf16.msra.mxu1 %v9251_v19  ;;  %6722 = vmatprep.subr.bf16.mxu0 %v9256_v22  ;;  %v9319_v19 = vld [vmem:[%s13973_s1 + $0x1344] ss:$16 sps:$4 sm:$0xff]   ;;  %v9314_v22 = vld [vmem:[%s13973_s1 + $0x1140] ss:$16 sps:$4 sm:$0xff]  }
 0x10d   :  { %6765 = vmatprep.subr.bf16.mxu1 %v9259_v23  ;;  %v9317_v23 = vld [vmem:[%s13973_s1 + $0x1340] ss:$16 sps:$4 sm:$0xff]  }
 0x10f   :  { %6723 = vmatpush1.bf16.msra.mxu0 %v9254_v24  ;;  %v9322_v24 = vld [vmem:[%s13973_s1 + $0x1124] ss:$16 sps:$4 sm:$0xff]  }
 0x110   :  { %6766 = vmatpush1.bf16.msra.mxu1 %v9257_v25  ;;  %6724 = vmatprep.subr.bf16.mxu0 %v9262_v26  ;;  %v9325_v25 = vld [vmem:[%s13973_s1 + $0x1324] ss:$16 sps:$4 sm:$0xff]   ;;  %v9320_v26 = vld [vmem:[%s13973_s1 + $0x1120] ss:$16 sps:$4 sm:$0xff]  }
 0x111   :  { %6767 = vmatprep.subr.bf16.mxu1 %v9265_v27  ;;  %v9323_v27 = vld [vmem:[%s13973_s1 + $0x1320] ss:$16 sps:$4 sm:$0xff]  }
 0x113   :  { %6725 = vmatpush1.bf16.msra.mxu0 %v9260_v32  ;;  %v9328_v32 = vld [vmem:[%s13973_s1 + $0x1104] ss:$16 sps:$4 sm:$0xff]  }
 0x114   :  { %6768 = vmatpush1.bf16.msra.mxu1 %v9263_v34  ;;  %6726 = vmatprep.subr.bf16.mxu0 %v9268_v36  ;;  %v9331_v34 = vld [vmem:[%s13973_s1 + $0x1304] ss:$16 sps:$4 sm:$0xff]   ;;  %v9326_v36 = vld [vmem:[%s13973_s1 + $0x1100] ss:$16 sps:$4 sm:$0xff]  }
 0x115   :  { %6769 = vmatprep.subr.bf16.mxu1 %v9271_v37  ;;  %v9329_v37 = vld [vmem:[%s13973_s1 + $0x1300] ss:$16 sps:$4 sm:$0xff]  }
 0x117   :  { %6727 = vmatpush1.bf16.msra.mxu0 %v9266_v38  ;;  %v9334_v38 = vld [vmem:[%s13973_s1 + $0x14e4] ss:$16 sps:$4 sm:$0xff]  }
 0x118   :  { %6770 = vmatpush1.bf16.msra.mxu1 %v9269_v39  ;;  %6728 = vmatprep.subr.bf16.mxu0 %v9274_v40  ;;  %v9337_v39 = vld [vmem:[%s13973_s1 + $0x16e4] ss:$16 sps:$4 sm:$0xff]  }
 0x119   :  { %6771 = vmatprep.subr.bf16.mxu1 %v9277_v42  ;;  %v11552_v40 = vld [vmem:[%s13974_s0 + $0x50] sm:$0xff] }
 0x11a   :  { %v9332_v42 = vld [vmem:[%s13973_s1 + $0x14e0] ss:$16 sps:$4 sm:$0xff]  }
 0x11b   :  { %6729 = vmatpush1.bf16.msra.mxu0 %v9272_v45  ;;  %v11559_v45 = vcombine.low %v11320_v4, %v11328_v6  ;;  %v9335_v4 = vld [vmem:[%s13973_s1 + $0x16e0] ss:$16 sps:$4 sm:$0xff]   ;;  %v9340_v6 = vld [vmem:[%s13973_s1 + $0x14c4] ss:$16 sps:$4 sm:$0xff]  }
 0x11c   :  { %6772 = vmatpush1.bf16.msra.mxu1 %v9275_v51  ;;  %6730 = vmatprep.subr.bf16.mxu0 %v9280_v28  ;;  %v11563_v51 = vcombine.low %v11333_v7, %v11346_v12  ;;  %v11568_v28 = vld [vmem:[%s13974_s0 + $0xd0] sm:$0xff] }
 0x11d   :  { %6773 = vmatprep.subr.bf16.mxu1 %v9283_v29  ;;  %v11573_v29 = vld [vmem:[%s13974_s0 + $0x58] sm:$0xff]  ;;  %v9343_v7 = vld [vmem:[%s13973_s1 + $0x16c4] ss:$16 sps:$4 sm:$0xff]   ;;  %v9338_v12 = vld [vmem:[%s13973_s1 + $0x14c0] ss:$16 sps:$4 sm:$0xff]  }
 0x11f   :  { %6731 = vmatpush1.bf16.msra.mxu0 %v9278_v52  ;;  %v11578_v52 = vld [vmem:[%s13974_s0 + $0xd8] sm:$0xff] }
 0x120   :  { %6774 = vmatpush1.bf16.msra.mxu1 %v9281_v54  ;;  %6732 = vmatprep.subr.bf16.mxu0 %v9286_v56  ;;  %v9341_v54 = vld [vmem:[%s13973_s1 + $0x16c0] ss:$16 sps:$4 sm:$0xff]   ;;  %v11597_v56 = vcombine.high %v11552_v40, %v11568_v28 }
 0x121   :  { %6775 = vmatprep.subr.bf16.mxu1 %v9289_v57  ;;  %v11601_v57 = vcombine.high %v11573_v29, %v11578_v52 }
 0x123   :  { %6733 = vmatpush2.bf16.msra.mxu0 %v9284_v58  ;;  %v9346_v58 = vld [vmem:[%s13973_s1 + $0x14a4] ss:$16 sps:$4 sm:$0xff]  }
 0x124   :  { %6776 = vmatpush2.bf16.msra.mxu1 %v9287_v59  ;;  %6734 = vmatprep.subr.bf16.mxu0 %v9292_v60  ;;  %v9349_v59 = vld [vmem:[%s13973_s1 + $0x16a4] ss:$16 sps:$4 sm:$0xff]   ;;  %v9344_v60 = vld [vmem:[%s13973_s1 + $0x14a0] ss:$16 sps:$4 sm:$0xff]  }
 0x125   :  { %6777 = vmatprep.subr.bf16.mxu1 %v9295_v61  ;;  %v9347_v61 = vld [vmem:[%s13973_s1 + $0x16a0] ss:$16 sps:$4 sm:$0xff]  }
 0x127   :  { %6735 = vmatpush2.bf16.msra.mxu0 %v9290_v62  ;;  %v9352_v62 = vld [vmem:[%s13973_s1 + $0x1484] ss:$16 sps:$4 sm:$0xff]  }
 0x128   :  { %6778 = vmatpush2.bf16.msra.mxu1 %v9293_v63  ;;  %6736 = vmatprep.subr.bf16.mxu0 %v9298_v0  ;;  %v9355_v63 = vld [vmem:[%s13973_s1 + $0x1684] ss:$16 sps:$4 sm:$0xff]   ;;  %v9350_v0 = vld [vmem:[%s13973_s1 + $0x1480] ss:$16 sps:$4 sm:$0xff]  }
 0x129   :  { %6779 = vmatprep.subr.bf16.mxu1 %v9301_v1  ;;  %v9353_v1 = vld [vmem:[%s13973_s1 + $0x1680] ss:$16 sps:$4 sm:$0xff]  }
 0x12b   :  { %6737 = vmatpush2.bf16.msra.mxu0 %v9296_v2  ;;  %v9358_v2 = vld [vmem:[%s13973_s1 + $0x1464] ss:$16 sps:$4 sm:$0xff]  }
 0x12c   :  { %6780 = vmatpush2.bf16.msra.mxu1 %v9299_v3  ;;  %6738 = vmatprep.subr.bf16.mxu0 %v9304_v5  ;;  %v9361_v3 = vld [vmem:[%s13973_s1 + $0x1664] ss:$16 sps:$4 sm:$0xff]   ;;  %v9356_v5 = vld [vmem:[%s13973_s1 + $0x1460] ss:$16 sps:$4 sm:$0xff]  }
 0x12d   :  { %6781 = vmatprep.subr.bf16.mxu1 %v9307_v13  ;;  %v9359_v13 = vld [vmem:[%s13973_s1 + $0x1660] ss:$16 sps:$4 sm:$0xff]  }
 0x12f   :  { %6739 = vmatpush2.bf16.msra.mxu0 %v9302_v44  ;;  %v9364_v44 = vld [vmem:[%s13973_s1 + $0x1444] ss:$16 sps:$4 sm:$0xff]  }
 0x130   :  { %6782 = vmatpush2.bf16.msra.mxu1 %v9305_v46  ;;  %6740 = vmatprep.subr.bf16.mxu0 %v9310_v14  ;;  %v9367_v46 = vld [vmem:[%s13973_s1 + $0x1644] ss:$16 sps:$4 sm:$0xff]   ;;  %v9362_v14 = vld [vmem:[%s13973_s1 + $0x1440] ss:$16 sps:$4 sm:$0xff]  }
 0x131   :  { %6783 = vmatprep.subr.bf16.mxu1 %v9313_v15  ;;  %v9365_v15 = vld [vmem:[%s13973_s1 + $0x1640] ss:$16 sps:$4 sm:$0xff]  }
 0x133   :  { %6741 = vmatpush2.bf16.msra.mxu0 %v9308_v16  ;;  %v9370_v16 = vld [vmem:[%s13973_s1 + $0x1424] ss:$16 sps:$4 sm:$0xff]  }
 0x134   :  { %6784 = vmatpush2.bf16.msra.mxu1 %v9311_v17  ;;  %6742 = vmatprep.subr.bf16.mxu0 %v9316_v18  ;;  %v9373_v17 = vld [vmem:[%s13973_s1 + $0x1624] ss:$16 sps:$4 sm:$0xff]   ;;  %v9368_v18 = vld [vmem:[%s13973_s1 + $0x1420] ss:$16 sps:$4 sm:$0xff]  }
 0x135   :  { %6785 = vmatprep.subr.bf16.mxu1 %v9319_v19  ;;  %v9371_v19 = vld [vmem:[%s13973_s1 + $0x1620] ss:$16 sps:$4 sm:$0xff]  }
 0x137   :  { %6743 = vmatpush2.bf16.msra.mxu0 %v9314_v22  ;;  %v9376_v22 = vld [vmem:[%s13973_s1 + $0x1404] ss:$16 sps:$4 sm:$0xff]  }
 0x138   :  { %6786 = vmatpush2.bf16.msra.mxu1 %v9317_v23  ;;  %6744 = vmatprep.subr.bf16.mxu0 %v9322_v24  ;;  %v9379_v23 = vld [vmem:[%s13973_s1 + $0x1604] ss:$16 sps:$4 sm:$0xff]   ;;  %v9374_v24 = vld [vmem:[%s13973_s1 + $0x1400] ss:$16 sps:$4 sm:$0xff]  }
 0x139   :  { %6787 = vmatprep.subr.bf16.mxu1 %v9325_v25  ;;  %v9377_v25 = vld [vmem:[%s13973_s1 + $0x1600] ss:$16 sps:$4 sm:$0xff]  }
 0x13b   :  { %6745 = vmatpush2.bf16.msra.mxu0 %v9320_v26  ;;  %v9382_v26 = vld [vmem:[%s13973_s1 + $0x15e4] ss:$16 sps:$4 sm:$0xff]  }
 0x13c   :  { %6788 = vmatpush2.bf16.msra.mxu1 %v9323_v27  ;;  %6746 = vmatprep.subr.bf16.mxu0 %v9328_v32  ;;  %v9385_v27 = vld [vmem:[%s13973_s1 + $0x17e4] ss:$16 sps:$4 sm:$0xff]   ;;  %v9380_v32 = vld [vmem:[%s13973_s1 + $0x15e0] ss:$16 sps:$4 sm:$0xff]  }
 0x13d   :  { %6789 = vmatprep.subr.bf16.mxu1 %v9331_v34  ;;  %v9383_v34 = vld [vmem:[%s13973_s1 + $0x17e0] ss:$16 sps:$4 sm:$0xff]  }
 0x13f   :  { %6747 = vmatpush2.bf16.msra.mxu0 %v9326_v36  ;;  %v9388_v36 = vld [vmem:[%s13973_s1 + $0x15c4] ss:$16 sps:$4 sm:$0xff]  }
 0x140   :  { %6790 = vmatpush2.bf16.msra.mxu1 %v9329_v37  ;;  %6802 = vmatprep.subr.bf16.mxu0 %v9334_v38  ;;  %v9391_v37 = vld [vmem:[%s13973_s1 + $0x17c4] ss:$16 sps:$4 sm:$0xff]   ;;  %v9386_v38 = vld [vmem:[%s13973_s1 + $0x15c0] ss:$16 sps:$4 sm:$0xff]  }
 0x141   :  { %6845 = vmatprep.subr.bf16.mxu1 %v9337_v39  ;;  %v9389_v39 = vld [vmem:[%s13973_s1 + $0x17c0] ss:$16 sps:$4 sm:$0xff]  }
 0x142   :  { %6749 = vmatmul.mubr.bf16.vlgmr.msra.gmra.mxu0 %v11559_v45 }
 0x143   :  { %6792 = vmatmul.mubr.bf16.vlgmr.msra.gmra.mxu1 %v11563_v51  ;;  %6803 = vmatpush1.bf16.msra.mxu0 %v9332_v42  ;;  %v9394_v42 = vld [vmem:[%s13973_s1 + $0x15a4] ss:$16 sps:$4 sm:$0xff]  }
 0x144   :  { %6846 = vmatpush1.bf16.msra.mxu1 %v9335_v4  ;;  %6804 = vmatprep.subr.bf16.mxu0 %v9340_v6  ;;  %v9397_v4 = vld [vmem:[%s13973_s1 + $0x17a4] ss:$16 sps:$4 sm:$0xff]   ;;  %v9392_v6 = vld [vmem:[%s13973_s1 + $0x15a0] ss:$16 sps:$4 sm:$0xff]  }
 0x145   :  { %6847 = vmatprep.subr.bf16.mxu1 %v9343_v7  ;;  %6834 = vmatprep.mubr.bf16.mxu0 %v11597_v56  ;;  %v9395_v7 = vld [vmem:[%s13973_s1 + $0x17a0] ss:$16 sps:$4 sm:$0xff]  }
 0x146   :  { %6877 = vmatprep.mubr.bf16.mxu1 %v11601_v57 }
 0x147   :  { %6805 = vmatpush1.bf16.msra.mxu0 %v9338_v12  ;;  %v9400_v12 = vld [vmem:[%s13973_s1 + $0x1584] ss:$16 sps:$4 sm:$0xff]  }
 0x148   :  { %6848 = vmatpush1.bf16.msra.mxu1 %v9341_v54  ;;  %6806 = vmatprep.subr.bf16.mxu0 %v9346_v58  ;;  %v9403_v54 = vld [vmem:[%s13973_s1 + $0x1784] ss:$16 sps:$4 sm:$0xff]   ;;  %v9398_v58 = vld [vmem:[%s13973_s1 + $0x1580] ss:$16 sps:$4 sm:$0xff]  }
 0x149   :  { %6849 = vmatprep.subr.bf16.mxu1 %v9349_v59  ;;  %v9401_v59 = vld [vmem:[%s13973_s1 + $0x1780] ss:$16 sps:$4 sm:$0xff]  }
 0x14b   :  { %6807 = vmatpush1.bf16.msra.mxu0 %v9344_v60  ;;  %v9406_v60 = vld [vmem:[%s13973_s1 + $0x1564] ss:$16 sps:$4 sm:$0xff]  }
 0x14c   :  { %6850 = vmatpush1.bf16.msra.mxu1 %v9347_v61  ;;  %6808 = vmatprep.subr.bf16.mxu0 %v9352_v62  ;;  %v9409_v61 = vld [vmem:[%s13973_s1 + $0x1764] ss:$16 sps:$4 sm:$0xff]   ;;  %v9404_v62 = vld [vmem:[%s13973_s1 + $0x1560] ss:$16 sps:$4 sm:$0xff]  }
 0x14d   :  { %6851 = vmatprep.subr.bf16.mxu1 %v9355_v63  ;;  %v9407_v63 = vld [vmem:[%s13973_s1 + $0x1760] ss:$16 sps:$4 sm:$0xff]  }
 0x14f   :  { %6809 = vmatpush1.bf16.msra.mxu0 %v9350_v0  ;;  %v9412_v0 = vld [vmem:[%s13973_s1 + $0x1544] ss:$16 sps:$4 sm:$0xff]  }
 0x150   :  { %6852 = vmatpush1.bf16.msra.mxu1 %v9353_v1  ;;  %6810 = vmatprep.subr.bf16.mxu0 %v9358_v2  ;;  %v9415_v1 = vld [vmem:[%s13973_s1 + $0x1744] ss:$16 sps:$4 sm:$0xff]   ;;  %v9410_v2 = vld [vmem:[%s13973_s1 + $0x1540] ss:$16 sps:$4 sm:$0xff]  }
 0x151   :  { %6853 = vmatprep.subr.bf16.mxu1 %v9361_v3  ;;  %v9413_v3 = vld [vmem:[%s13973_s1 + $0x1740] ss:$16 sps:$4 sm:$0xff]  }
 0x153   :  { %6811 = vmatpush1.bf16.msra.mxu0 %v9356_v5  ;;  %v9418_v5 = vld [vmem:[%s13973_s1 + $0x1524] ss:$16 sps:$4 sm:$0xff]  }
 0x154   :  { %6854 = vmatpush1.bf16.msra.mxu1 %v9359_v13  ;;  %6812 = vmatprep.subr.bf16.mxu0 %v9364_v44  ;;  %v9421_v13 = vld [vmem:[%s13973_s1 + $0x1724] ss:$16 sps:$4 sm:$0xff]   ;;  %v9416_v44 = vld [vmem:[%s13973_s1 + $0x1520] ss:$16 sps:$4 sm:$0xff]  }
 0x155   :  { %6855 = vmatprep.subr.bf16.mxu1 %v9367_v46  ;;  %v9419_v46 = vld [vmem:[%s13973_s1 + $0x1720] ss:$16 sps:$4 sm:$0xff]  }
 0x157   :  { %6813 = vmatpush1.bf16.msra.mxu0 %v9362_v14  ;;  %v9424_v14 = vld [vmem:[%s13973_s1 + $0x1504] ss:$16 sps:$4 sm:$0xff]  }
 0x158   :  { %6856 = vmatpush1.bf16.msra.mxu1 %v9365_v15  ;;  %6814 = vmatprep.subr.bf16.mxu0 %v9370_v16  ;;  %v9427_v15 = vld [vmem:[%s13973_s1 + $0x1704] ss:$16 sps:$4 sm:$0xff]   ;;  %v9422_v16 = vld [vmem:[%s13973_s1 + $0x1500] ss:$16 sps:$4 sm:$0xff]  }
 0x159   :  { %6857 = vmatprep.subr.bf16.mxu1 %v9373_v17  ;;  %v9425_v17 = vld [vmem:[%s13973_s1 + $0x1700] ss:$16 sps:$4 sm:$0xff]  }
 0x15b   :  { %6815 = vmatpush1.bf16.msra.mxu0 %v9368_v18  ;;  %v9430_v18 = vld [vmem:[%s13973_s1 + $0x18e4] ss:$16 sps:$4 sm:$0xff]  }
 0x15c   :  { %6858 = vmatpush1.bf16.msra.mxu1 %v9371_v19  ;;  %6816 = vmatprep.subr.bf16.mxu0 %v9376_v22  ;;  %v9433_v19 = vld [vmem:[%s13973_s1 + $0x1ae4] ss:$16 sps:$4 sm:$0xff]  }
 0x15d   :  { %6859 = vmatprep.subr.bf16.mxu1 %v9379_v23  ;;  %v11784_v22 = vld [vmem:[%s13974_s0 + $0x60] sm:$0xff] }
 0x15e   :  { %v9428_v23 = vld [vmem:[%s13973_s1 + $0x18e0] ss:$16 sps:$4 sm:$0xff]  }
 0x15f   :  { %6817 = vmatpush1.bf16.msra.mxu0 %v9374_v24  ;;  %v11791_v24 = vcombine.low %v11552_v40, %v11568_v28  ;;  %v9431_v40 = vld [vmem:[%s13973_s1 + $0x1ae0] ss:$16 sps:$4 sm:$0xff]   ;;  %v9436_v28 = vld [vmem:[%s13973_s1 + $0x18c4] ss:$16 sps:$4 sm:$0xff]  }
 0x160   :  { %6860 = vmatpush1.bf16.msra.mxu1 %v9377_v25  ;;  %6818 = vmatprep.subr.bf16.mxu0 %v9382_v26  ;;  %v11795_v25 = vcombine.low %v11573_v29, %v11578_v52  ;;  %v11800_v26 = vld [vmem:[%s13974_s0 + $0xe0] sm:$0xff] }
 0x161   :  { %6861 = vmatprep.subr.bf16.mxu1 %v9385_v27  ;;  %v11805_v27 = vld [vmem:[%s13974_s0 + $0x68] sm:$0xff]  ;;  %v9439_v29 = vld [vmem:[%s13973_s1 + $0x1ac4] ss:$16 sps:$4 sm:$0xff]   ;;  %v9434_v52 = vld [vmem:[%s13973_s1 + $0x18c0] ss:$16 sps:$4 sm:$0xff]  }
 0x163   :  { %6819 = vmatpush2.bf16.msra.mxu0 %v9380_v32  ;;  %v11810_v32 = vld [vmem:[%s13974_s0 + $0xe8] sm:$0xff] }
 0x164   :  { %6862 = vmatpush2.bf16.msra.mxu1 %v9383_v34  ;;  %6820 = vmatprep.subr.bf16.mxu0 %v9388_v36  ;;  %v9437_v34 = vld [vmem:[%s13973_s1 + $0x1ac0] ss:$16 sps:$4 sm:$0xff]   ;;  %v11829_v36 = vcombine.high %v11784_v22, %v11800_v26 }
 0x165   :  { %6863 = vmatprep.subr.bf16.mxu1 %v9391_v37  ;;  %v11833_v37 = vcombine.high %v11805_v27, %v11810_v32 }
 0x166   :  { %13987 = vst [vmem:[#allocation2_spill] sm:$0xff] %v11829_v36 }
 0x167   :  { %6821 = vmatpush2.bf16.msra.mxu0 %v9386_v38  ;;  %13988 = vst [vmem:[#allocation3_spill] sm:$0xff] %v11833_v37  ;;  %v9442_v38 = vld [vmem:[%s13973_s1 + $0x18a4] ss:$16 sps:$4 sm:$0xff]  }
 0x168   :  { %6864 = vmatpush2.bf16.msra.mxu1 %v9389_v39  ;;  %6822 = vmatprep.subr.bf16.mxu0 %v9394_v42  ;;  %v9445_v39 = vld [vmem:[%s13973_s1 + $0x1aa4] ss:$16 sps:$4 sm:$0xff]   ;;  %v9440_v42 = vld [vmem:[%s13973_s1 + $0x18a0] ss:$16 sps:$4 sm:$0xff]  }
 0x169   :  { %6865 = vmatprep.subr.bf16.mxu1 %v9397_v4  ;;  %v9443_v4 = vld [vmem:[%s13973_s1 + $0x1aa0] ss:$16 sps:$4 sm:$0xff]  }
 0x16b   :  { %6823 = vmatpush2.bf16.msra.mxu0 %v9392_v6  ;;  %v9448_v6 = vld [vmem:[%s13973_s1 + $0x1884] ss:$16 sps:$4 sm:$0xff]  }
 0x16c   :  { %6866 = vmatpush2.bf16.msra.mxu1 %v9395_v7  ;;  %6824 = vmatprep.subr.bf16.mxu0 %v9400_v12  ;;  %v9451_v7 = vld [vmem:[%s13973_s1 + $0x1a84] ss:$16 sps:$4 sm:$0xff]   ;;  %v9446_v12 = vld [vmem:[%s13973_s1 + $0x1880] ss:$16 sps:$4 sm:$0xff]  }
 0x16d   :  { %6867 = vmatprep.subr.bf16.mxu1 %v9403_v54  ;;  %v9449_v54 = vld [vmem:[%s13973_s1 + $0x1a80] ss:$16 sps:$4 sm:$0xff]  }
 0x16f   :  { %6825 = vmatpush2.bf16.msra.mxu0 %v9398_v58  ;;  %v9454_v58 = vld [vmem:[%s13973_s1 + $0x1864] ss:$16 sps:$4 sm:$0xff]  }
 0x170   :  { %6868 = vmatpush2.bf16.msra.mxu1 %v9401_v59  ;;  %6826 = vmatprep.subr.bf16.mxu0 %v9406_v60  ;;  %v9457_v59 = vld [vmem:[%s13973_s1 + $0x1a64] ss:$16 sps:$4 sm:$0xff]   ;;  %v9452_v60 = vld [vmem:[%s13973_s1 + $0x1860] ss:$16 sps:$4 sm:$0xff]  }
 0x171   :  { %6869 = vmatprep.subr.bf16.mxu1 %v9409_v61  ;;  %v9455_v61 = vld [vmem:[%s13973_s1 + $0x1a60] ss:$16 sps:$4 sm:$0xff]  }
 0x173   :  { %6827 = vmatpush2.bf16.msra.mxu0 %v9404_v62  ;;  %v9460_v62 = vld [vmem:[%s13973_s1 + $0x1844] ss:$16 sps:$4 sm:$0xff]  }
 0x174   :  { %6870 = vmatpush2.bf16.msra.mxu1 %v9407_v63  ;;  %6828 = vmatprep.subr.bf16.mxu0 %v9412_v0  ;;  %v9463_v63 = vld [vmem:[%s13973_s1 + $0x1a44] ss:$16 sps:$4 sm:$0xff]   ;;  %v9458_v0 = vld [vmem:[%s13973_s1 + $0x1840] ss:$16 sps:$4 sm:$0xff]  }
 0x175   :  { %6871 = vmatprep.subr.bf16.mxu1 %v9415_v1  ;;  %v9461_v1 = vld [vmem:[%s13973_s1 + $0x1a40] ss:$16 sps:$4 sm:$0xff]  }
 0x177   :  { %6829 = vmatpush2.bf16.msra.mxu0 %v9410_v2  ;;  %v9466_v2 = vld [vmem:[%s13973_s1 + $0x1824] ss:$16 sps:$4 sm:$0xff]  }
 0x178   :  { %6872 = vmatpush2.bf16.msra.mxu1 %v9413_v3  ;;  %6830 = vmatprep.subr.bf16.mxu0 %v9418_v5  ;;  %v9469_v3 = vld [vmem:[%s13973_s1 + $0x1a24] ss:$16 sps:$4 sm:$0xff]   ;;  %v9464_v5 = vld [vmem:[%s13973_s1 + $0x1820] ss:$16 sps:$4 sm:$0xff]  }
 0x179   :  { %6873 = vmatprep.subr.bf16.mxu1 %v9421_v13  ;;  %v9467_v13 = vld [vmem:[%s13973_s1 + $0x1a20] ss:$16 sps:$4 sm:$0xff]  }
 0x17b   :  { %6831 = vmatpush2.bf16.msra.mxu0 %v9416_v44  ;;  %v9472_v44 = vld [vmem:[%s13973_s1 + $0x1804] ss:$16 sps:$4 sm:$0xff]  }
 0x17c   :  { %6874 = vmatpush2.bf16.msra.mxu1 %v9419_v46  ;;  %6832 = vmatprep.subr.bf16.mxu0 %v9424_v14  ;;  %v9475_v46 = vld [vmem:[%s13973_s1 + $0x1a04] ss:$16 sps:$4 sm:$0xff]   ;;  %v9470_v14 = vld [vmem:[%s13973_s1 + $0x1800] ss:$16 sps:$4 sm:$0xff]  }
 0x17d   :  { %6875 = vmatprep.subr.bf16.mxu1 %v9427_v15  ;;  %v9473_v15 = vld [vmem:[%s13973_s1 + $0x1a00] ss:$16 sps:$4 sm:$0xff]  }
 0x17f   :  { %6833 = vmatpush2.bf16.msra.mxu0 %v9422_v16  ;;  %v9478_v16 = vld [vmem:[%s13973_s1 + $0x19e4] ss:$16 sps:$4 sm:$0xff]  }
 0x180   :  { %6876 = vmatpush2.bf16.msra.mxu1 %v9425_v17  ;;  %6888 = vmatprep.subr.bf16.mxu0 %v9430_v18  ;;  %v9481_v17 = vld [vmem:[%s13973_s1 + $0x1be4] ss:$16 sps:$4 sm:$0xff]   ;;  %v9476_v18 = vld [vmem:[%s13973_s1 + $0x19e0] ss:$16 sps:$4 sm:$0xff]  }
 0x181   :  { %6931 = vmatprep.subr.bf16.mxu1 %v9433_v19  ;;  %v9479_v19 = vld [vmem:[%s13973_s1 + $0x1be0] ss:$16 sps:$4 sm:$0xff]  }
 0x182   :  { %6835 = vmatmul.mubr.bf16.vlgmr.msra.gmra.mxu0 %v11791_v24 }
 0x183   :  { %6878 = vmatmul.mubr.bf16.vlgmr.msra.gmra.mxu1 %v11795_v25  ;;  %6889 = vmatpush1.bf16.msra.mxu0 %v9428_v23  ;;  %v9484_v23 = vld [vmem:[%s13973_s1 + $0x19c4] ss:$16 sps:$4 sm:$0xff]  }
 0x184   :  { %6932 = vmatpush1.bf16.msra.mxu1 %v9431_v40  ;;  %6890 = vmatprep.subr.bf16.mxu0 %v9436_v28  ;;  %v9487_v40 = vld [vmem:[%s13973_s1 + $0x1bc4] ss:$16 sps:$4 sm:$0xff]   ;;  %v9482_v28 = vld [vmem:[%s13973_s1 + $0x19c0] ss:$16 sps:$4 sm:$0xff]  }
 0x185   :  { %6933 = vmatprep.subr.bf16.mxu1 %v9439_v29  ;;  %6920 = vmatprep.mubr.bf16.mxu0 %v11829_v36  ;;  %v9485_v29 = vld [vmem:[%s13973_s1 + $0x1bc0] ss:$16 sps:$4 sm:$0xff]  }
 0x186   :  { %6963 = vmatprep.mubr.bf16.mxu1 %v11833_v37 }
 0x187   :  { %6891 = vmatpush1.bf16.msra.mxu0 %v9434_v52  ;;  %v9490_v52 = vld [vmem:[%s13973_s1 + $0x19a4] ss:$16 sps:$4 sm:$0xff]  }
 0x188   :  { %6934 = vmatpush1.bf16.msra.mxu1 %v9437_v34  ;;  %6892 = vmatprep.subr.bf16.mxu0 %v9442_v38  ;;  %v9493_v34 = vld [vmem:[%s13973_s1 + $0x1ba4] ss:$16 sps:$4 sm:$0xff]   ;;  %v9488_v38 = vld [vmem:[%s13973_s1 + $0x19a0] ss:$16 sps:$4 sm:$0xff]  }
 0x189   :  { %6935 = vmatprep.subr.bf16.mxu1 %v9445_v39  ;;  %v9491_v39 = vld [vmem:[%s13973_s1 + $0x1ba0] ss:$16 sps:$4 sm:$0xff]  }
 0x18b   :  { %6893 = vmatpush1.bf16.msra.mxu0 %v9440_v42  ;;  %v9496_v42 = vld [vmem:[%s13973_s1 + $0x1984] ss:$16 sps:$4 sm:$0xff]  }
 0x18c   :  { %6936 = vmatpush1.bf16.msra.mxu1 %v9443_v4  ;;  %6894 = vmatprep.subr.bf16.mxu0 %v9448_v6  ;;  %v9499_v4 = vld [vmem:[%s13973_s1 + $0x1b84] ss:$16 sps:$4 sm:$0xff]   ;;  %v9494_v6 = vld [vmem:[%s13973_s1 + $0x1980] ss:$16 sps:$4 sm:$0xff]  }
 0x18d   :  { %6937 = vmatprep.subr.bf16.mxu1 %v9451_v7  ;;  %v9497_v7 = vld [vmem:[%s13973_s1 + $0x1b80] ss:$16 sps:$4 sm:$0xff]  }
 0x18f   :  { %6895 = vmatpush1.bf16.msra.mxu0 %v9446_v12  ;;  %v9502_v12 = vld [vmem:[%s13973_s1 + $0x1964] ss:$16 sps:$4 sm:$0xff]  }
 0x190   :  { %6938 = vmatpush1.bf16.msra.mxu1 %v9449_v54  ;;  %6896 = vmatprep.subr.bf16.mxu0 %v9454_v58  ;;  %v9505_v54 = vld [vmem:[%s13973_s1 + $0x1b64] ss:$16 sps:$4 sm:$0xff]   ;;  %v9500_v58 = vld [vmem:[%s13973_s1 + $0x1960] ss:$16 sps:$4 sm:$0xff]  }
 0x191   :  { %6939 = vmatprep.subr.bf16.mxu1 %v9457_v59  ;;  %v9503_v59 = vld [vmem:[%s13973_s1 + $0x1b60] ss:$16 sps:$4 sm:$0xff]  }
 0x193   :  { %6897 = vmatpush1.bf16.msra.mxu0 %v9452_v60  ;;  %v9508_v60 = vld [vmem:[%s13973_s1 + $0x1944] ss:$16 sps:$4 sm:$0xff]  }
 0x194   :  { %6940 = vmatpush1.bf16.msra.mxu1 %v9455_v61  ;;  %6898 = vmatprep.subr.bf16.mxu0 %v9460_v62  ;;  %v9511_v61 = vld [vmem:[%s13973_s1 + $0x1b44] ss:$16 sps:$4 sm:$0xff]   ;;  %v9506_v62 = vld [vmem:[%s13973_s1 + $0x1940] ss:$16 sps:$4 sm:$0xff]  }
 0x195   :  { %6941 = vmatprep.subr.bf16.mxu1 %v9463_v63  ;;  %v9509_v63 = vld [vmem:[%s13973_s1 + $0x1b40] ss:$16 sps:$4 sm:$0xff]  }
 0x197   :  { %6899 = vmatpush1.bf16.msra.mxu0 %v9458_v0  ;;  %v9514_v0 = vld [vmem:[%s13973_s1 + $0x1924] ss:$16 sps:$4 sm:$0xff]  }
 0x198   :  { %6942 = vmatpush1.bf16.msra.mxu1 %v9461_v1  ;;  %6900 = vmatprep.subr.bf16.mxu0 %v9466_v2  ;;  %v9517_v1 = vld [vmem:[%s13973_s1 + $0x1b24] ss:$16 sps:$4 sm:$0xff]   ;;  %v9512_v2 = vld [vmem:[%s13973_s1 + $0x1920] ss:$16 sps:$4 sm:$0xff]  }
 0x199   :  { %6943 = vmatprep.subr.bf16.mxu1 %v9469_v3  ;;  %v9515_v3 = vld [vmem:[%s13973_s1 + $0x1b20] ss:$16 sps:$4 sm:$0xff]  }
 0x19b   :  { %6901 = vmatpush1.bf16.msra.mxu0 %v9464_v5  ;;  %v9520_v5 = vld [vmem:[%s13973_s1 + $0x1904] ss:$16 sps:$4 sm:$0xff]  }
 0x19c   :  { %6944 = vmatpush1.bf16.msra.mxu1 %v9467_v13  ;;  %6902 = vmatprep.subr.bf16.mxu0 %v9472_v44  ;;  %v9523_v13 = vld [vmem:[%s13973_s1 + $0x1b04] ss:$16 sps:$4 sm:$0xff]   ;;  %v9518_v44 = vld [vmem:[%s13973_s1 + $0x1900] ss:$16 sps:$4 sm:$0xff]  }
 0x19d   :  { %6945 = vmatprep.subr.bf16.mxu1 %v9475_v46  ;;  %v9521_v46 = vld [vmem:[%s13973_s1 + $0x1b00] ss:$16 sps:$4 sm:$0xff]  }
 0x19f   :  { %6903 = vmatpush1.bf16.msra.mxu0 %v9470_v14  ;;  %v9526_v14 = vld [vmem:[%s13973_s1 + $0x1ce4] ss:$16 sps:$4 sm:$0xff]  }
 0x1a0   :  { %6946 = vmatpush1.bf16.msra.mxu1 %v9473_v15  ;;  %6904 = vmatprep.subr.bf16.mxu0 %v9478_v16  ;;  %v9529_v15 = vld [vmem:[%s13973_s1 + $0x1ee4] ss:$16 sps:$4 sm:$0xff]  }
 0x1a1   :  { %6947 = vmatprep.subr.bf16.mxu1 %v9481_v17  ;;  %v12016_v16 = vld [vmem:[%s13974_s0 + $0x70] sm:$0xff] }
 0x1a2   :  { %v12021_v17 = vld [vmem:[%s13974_s0 + $0xf0] sm:$0xff] }
 0x1a3   :  { %6905 = vmatpush2.bf16.msra.mxu0 %v9476_v18  ;;  %v12026_v18 = vld [vmem:[%s13974_s0 + $0x78] sm:$0xff] }
 0x1a4   :  { %6948 = vmatpush2.bf16.msra.mxu1 %v9479_v19  ;;  %6906 = vmatprep.subr.bf16.mxu0 %v9484_v23  ;;  %v12031_v19 = vld [vmem:[%s13974_s0 + $0xf8] sm:$0xff]  ;;  %v9524_v23 = vld [vmem:[%s13973_s1 + $0x1ce0] ss:$16 sps:$4 sm:$0xff]  }
 0x1a5   :  { %6949 = vmatprep.subr.bf16.mxu1 %v9487_v40  ;;  %v9527_v40 = vld [vmem:[%s13973_s1 + $0x1ee0] ss:$16 sps:$4 sm:$0xff]  }
 0x1a7   :  { %6907 = vmatpush2.bf16.msra.mxu0 %v9482_v28  ;;  %v12041_v28 = vcombine.low %v11784_v22, %v11800_v26  ;;  %v9530_v22 = vld [vmem:[%s13973_s1 + $0x1cc0] ss:$16 sps:$4 sm:$0xff]  }
 0x1a8   :  { %6950 = vmatpush2.bf16.msra.mxu1 %v9485_v29  ;;  %6908 = vmatprep.subr.bf16.mxu0 %v9490_v52  ;;  %v12045_v29 = vcombine.low %v11805_v27, %v11810_v32  ;;  %v9532_v52 = vld [vmem:[%s13973_s1 + $0x1cc4] ss:$16 sps:$4 sm:$0xff]   ;;  %v9533_v26 = vld [vmem:[%s13973_s1 + $0x1ec0] ss:$16 sps:$4 sm:$0xff]   ;;  %v12061_v27 = vcombine.high %v12016_v16, %v12021_v17  ;;  %v12065_v32 = vcombine.high %v12026_v18, %v12031_v19 }
 0x1a9   :  { %6951 = vmatprep.subr.bf16.mxu1 %v9493_v34  ;;  %13989 = vst [vmem:[#allocation4_spill] sm:$0xff] %v12041_v28  ;;  %v9535_v34 = vld [vmem:[%s13973_s1 + $0x1ec4] ss:$16 sps:$4 sm:$0xff]  }
 0x1aa   :  { %13990 = vst [vmem:[#allocation5_spill] sm:$0xff] %v12045_v29  ;;  %13991 = vst [vmem:[#allocation6_spill] sm:$0xff] %v12061_v27 }
 0x1ab   :  { %6909 = vmatpush2.bf16.msra.mxu0 %v9488_v38  ;;  %13992 = vst [vmem:[#allocation7_spill] sm:$0xff] %v12065_v32  ;;  %v9538_v38 = vld [vmem:[%s13973_s1 + $0x1ca4] ss:$16 sps:$4 sm:$0xff]  }
 0x1ac   :  { %6952 = vmatpush2.bf16.msra.mxu1 %v9491_v39  ;;  %6910 = vmatprep.subr.bf16.mxu0 %v9496_v42  ;;  %v9541_v39 = vld [vmem:[%s13973_s1 + $0x1ea4] ss:$16 sps:$4 sm:$0xff]   ;;  %v9536_v42 = vld [vmem:[%s13973_s1 + $0x1ca0] ss:$16 sps:$4 sm:$0xff]  }
 0x1ad   :  { %6953 = vmatprep.subr.bf16.mxu1 %v9499_v4  ;;  %v9539_v4 = vld [vmem:[%s13973_s1 + $0x1ea0] ss:$16 sps:$4 sm:$0xff]  }
 0x1af   :  { %6911 = vmatpush2.bf16.msra.mxu0 %v9494_v6  ;;  %v9544_v6 = vld [vmem:[%s13973_s1 + $0x1c84] ss:$16 sps:$4 sm:$0xff]  }
 0x1b0   :  { %6954 = vmatpush2.bf16.msra.mxu1 %v9497_v7  ;;  %6912 = vmatprep.subr.bf16.mxu0 %v9502_v12  ;;  %v9547_v7 = vld [vmem:[%s13973_s1 + $0x1e84] ss:$16 sps:$4 sm:$0xff]   ;;  %v9542_v12 = vld [vmem:[%s13973_s1 + $0x1c80] ss:$16 sps:$4 sm:$0xff]  }
 0x1b1   :  { %6955 = vmatprep.subr.bf16.mxu1 %v9505_v54  ;;  %v9545_v54 = vld [vmem:[%s13973_s1 + $0x1e80] ss:$16 sps:$4 sm:$0xff]  }
 0x1b3   :  { %6913 = vmatpush2.bf16.msra.mxu0 %v9500_v58  ;;  %v9550_v58 = vld [vmem:[%s13973_s1 + $0x1c64] ss:$16 sps:$4 sm:$0xff]  }
 0x1b4   :  { %6956 = vmatpush2.bf16.msra.mxu1 %v9503_v59  ;;  %6914 = vmatprep.subr.bf16.mxu0 %v9508_v60  ;;  %v9553_v59 = vld [vmem:[%s13973_s1 + $0x1e64] ss:$16 sps:$4 sm:$0xff]   ;;  %v9548_v60 = vld [vmem:[%s13973_s1 + $0x1c60] ss:$16 sps:$4 sm:$0xff]  }
 0x1b5   :  { %6957 = vmatprep.subr.bf16.mxu1 %v9511_v61  ;;  %v9551_v61 = vld [vmem:[%s13973_s1 + $0x1e60] ss:$16 sps:$4 sm:$0xff]  }
 0x1b7   :  { %6915 = vmatpush2.bf16.msra.mxu0 %v9506_v62  ;;  %v9556_v62 = vld [vmem:[%s13973_s1 + $0x1c44] ss:$16 sps:$4 sm:$0xff]  }
 0x1b8   :  { %6958 = vmatpush2.bf16.msra.mxu1 %v9509_v63  ;;  %6916 = vmatprep.subr.bf16.mxu0 %v9514_v0  ;;  %v9559_v63 = vld [vmem:[%s13973_s1 + $0x1e44] ss:$16 sps:$4 sm:$0xff]   ;;  %v9554_v0 = vld [vmem:[%s13973_s1 + $0x1c40] ss:$16 sps:$4 sm:$0xff]  }
 0x1b9   :  { %6959 = vmatprep.subr.bf16.mxu1 %v9517_v1  ;;  %v9557_v1 = vld [vmem:[%s13973_s1 + $0x1e40] ss:$16 sps:$4 sm:$0xff]  }
 0x1bb   :  { %6917 = vmatpush2.bf16.msra.mxu0 %v9512_v2  ;;  %v9562_v2 = vld [vmem:[%s13973_s1 + $0x1c24] ss:$16 sps:$4 sm:$0xff]  }
 0x1bc   :  { %6960 = vmatpush2.bf16.msra.mxu1 %v9515_v3  ;;  %6918 = vmatprep.subr.bf16.mxu0 %v9520_v5  ;;  %v9565_v3 = vld [vmem:[%s13973_s1 + $0x1e24] ss:$16 sps:$4 sm:$0xff]   ;;  %v9560_v5 = vld [vmem:[%s13973_s1 + $0x1c20] ss:$16 sps:$4 sm:$0xff]  }
 0x1bd   :  { %6961 = vmatprep.subr.bf16.mxu1 %v9523_v13  ;;  %v9563_v13 = vld [vmem:[%s13973_s1 + $0x1e20] ss:$16 sps:$4 sm:$0xff]  }
 0x1bf   :  { %6919 = vmatpush2.bf16.msra.mxu0 %v9518_v44  ;;  %v9568_v44 = vld [vmem:[%s13973_s1 + $0x1c04] ss:$16 sps:$4 sm:$0xff]  }
 0x1c0   :  { %6962 = vmatpush2.bf16.msra.mxu1 %v9521_v46  ;;  %6974 = vmatprep.subr.bf16.mxu0 %v9526_v14  ;;  %v9571_v46 = vld [vmem:[%s13973_s1 + $0x1e04] ss:$16 sps:$4 sm:$0xff]   ;;  %v9566_v14 = vld [vmem:[%s13973_s1 + $0x1c00] ss:$16 sps:$4 sm:$0xff]  }
 0x1c1   :  { %7017 = vmatprep.subr.bf16.mxu1 %v9529_v15  ;;  %v9569_v15 = vld [vmem:[%s13973_s1 + $0x1e00] ss:$16 sps:$4 sm:$0xff]  }
 0x1c2   :  { %6921 = vmatmul.mubr.bf16.vlgmr.msra.gmra.mxu0 %v12041_v28 }
 0x1c3   :  { %6964 = vmatmul.mubr.bf16.vlgmr.msra.gmra.mxu1 %v12045_v29  ;;  %6975 = vmatpush1.bf16.msra.mxu0 %v9524_v23  ;;  %v9574_v23 = vld [vmem:[%s13973_s1 + $0x1de4] ss:$16 sps:$4 sm:$0xff]  }
 0x1c4   :  { %7018 = vmatpush1.bf16.msra.mxu1 %v9527_v40  ;;  %6976 = vmatprep.subr.bf16.mxu0 %v9532_v52  ;;  %v9577_v40 = vld [vmem:[%s13973_s1 + $0x1fe4] ss:$16 sps:$4 sm:$0xff]   ;;  %v9572_v52 = vld [vmem:[%s13973_s1 + $0x1de0] ss:$16 sps:$4 sm:$0xff]  }
 0x1c5   :  { %7019 = vmatprep.subr.bf16.mxu1 %v9535_v34  ;;  %7006 = vmatprep.mubr.bf16.mxu0 %v12061_v27  ;;  %v9575_v34 = vld [vmem:[%s13973_s1 + $0x1fe0] ss:$16 sps:$4 sm:$0xff]  }
 0x1c6   :  { %7049 = vmatprep.mubr.bf16.mxu1 %v12065_v32 }
 0x1c7   :  { %6977 = vmatpush1.bf16.msra.mxu0 %v9530_v22  ;;  %v9580_v22 = vld [vmem:[%s13973_s1 + $0x1dc4] ss:$16 sps:$4 sm:$0xff]  }
 0x1c8   :  { %7020 = vmatpush1.bf16.msra.mxu1 %v9533_v26  ;;  %6978 = vmatprep.subr.bf16.mxu0 %v9538_v38  ;;  %v9583_v26 = vld [vmem:[%s13973_s1 + $0x1fc4] ss:$16 sps:$4 sm:$0xff]   ;;  %v9578_v38 = vld [vmem:[%s13973_s1 + $0x1dc0] ss:$16 sps:$4 sm:$0xff]  }
 0x1c9   :  { %7021 = vmatprep.subr.bf16.mxu1 %v9541_v39  ;;  %v9581_v39 = vld [vmem:[%s13973_s1 + $0x1fc0] ss:$16 sps:$4 sm:$0xff]  }
 0x1cb   :  { %6979 = vmatpush1.bf16.msra.mxu0 %v9536_v42  ;;  %v9586_v42 = vld [vmem:[%s13973_s1 + $0x1da4] ss:$16 sps:$4 sm:$0xff]  }
 0x1cc   :  { %7022 = vmatpush1.bf16.msra.mxu1 %v9539_v4  ;;  %6980 = vmatprep.subr.bf16.mxu0 %v9544_v6  ;;  %v9589_v4 = vld [vmem:[%s13973_s1 + $0x1fa4] ss:$16 sps:$4 sm:$0xff]   ;;  %v9584_v6 = vld [vmem:[%s13973_s1 + $0x1da0] ss:$16 sps:$4 sm:$0xff]  }
 0x1cd   :  { %7023 = vmatprep.subr.bf16.mxu1 %v9547_v7  ;;  %v9587_v7 = vld [vmem:[%s13973_s1 + $0x1fa0] ss:$16 sps:$4 sm:$0xff]  }
 0x1cf   :  { %6981 = vmatpush1.bf16.msra.mxu0 %v9542_v12  ;;  %v9592_v12 = vld [vmem:[%s13973_s1 + $0x1d84] ss:$16 sps:$4 sm:$0xff]  }
 0x1d0   :  { %7024 = vmatpush1.bf16.msra.mxu1 %v9545_v54  ;;  %6982 = vmatprep.subr.bf16.mxu0 %v9550_v58  ;;  %v9595_v54 = vld [vmem:[%s13973_s1 + $0x1f84] ss:$16 sps:$4 sm:$0xff]   ;;  %v9590_v58 = vld [vmem:[%s13973_s1 + $0x1d80] ss:$16 sps:$4 sm:$0xff]  }
 0x1d1   :  { %7025 = vmatprep.subr.bf16.mxu1 %v9553_v59  ;;  %v9593_v59 = vld [vmem:[%s13973_s1 + $0x1f80] ss:$16 sps:$4 sm:$0xff]  }
 0x1d3   :  { %6983 = vmatpush1.bf16.msra.mxu0 %v9548_v60  ;;  %v9598_v60 = vld [vmem:[%s13973_s1 + $0x1d64] ss:$16 sps:$4 sm:$0xff]  }
 0x1d4   :  { %7026 = vmatpush1.bf16.msra.mxu1 %v9551_v61  ;;  %6984 = vmatprep.subr.bf16.mxu0 %v9556_v62  ;;  %v9601_v61 = vld [vmem:[%s13973_s1 + $0x1f64] ss:$16 sps:$4 sm:$0xff]   ;;  %v9596_v62 = vld [vmem:[%s13973_s1 + $0x1d60] ss:$16 sps:$4 sm:$0xff]  }
 0x1d5   :  { %7027 = vmatprep.subr.bf16.mxu1 %v9559_v63  ;;  %v9599_v63 = vld [vmem:[%s13973_s1 + $0x1f60] ss:$16 sps:$4 sm:$0xff]  }
 0x1d7   :  { %6985 = vmatpush1.bf16.msra.mxu0 %v9554_v0  ;;  %v9604_v0 = vld [vmem:[%s13973_s1 + $0x1d44] ss:$16 sps:$4 sm:$0xff]  }
 0x1d8   :  { %7028 = vmatpush1.bf16.msra.mxu1 %v9557_v1  ;;  %6986 = vmatprep.subr.bf16.mxu0 %v9562_v2  ;;  %v9607_v1 = vld [vmem:[%s13973_s1 + $0x1f44] ss:$16 sps:$4 sm:$0xff]   ;;  %v9602_v2 = vld [vmem:[%s13973_s1 + $0x1d40] ss:$16 sps:$4 sm:$0xff]  }
 0x1d9   :  { %7029 = vmatprep.subr.bf16.mxu1 %v9565_v3  ;;  %v9605_v3 = vld [vmem:[%s13973_s1 + $0x1f40] ss:$16 sps:$4 sm:$0xff]  }
 0x1db   :  { %6987 = vmatpush1.bf16.msra.mxu0 %v9560_v5  ;;  %v9610_v5 = vld [vmem:[%s13973_s1 + $0x1d24] ss:$16 sps:$4 sm:$0xff]  }
 0x1dc   :  { %7030 = vmatpush1.bf16.msra.mxu1 %v9563_v13  ;;  %6988 = vmatprep.subr.bf16.mxu0 %v9568_v44  ;;  %v9613_v13 = vld [vmem:[%s13973_s1 + $0x1f24] ss:$16 sps:$4 sm:$0xff]   ;;  %v9608_v44 = vld [vmem:[%s13973_s1 + $0x1d20] ss:$16 sps:$4 sm:$0xff]  }
 0x1dd   :  { %7031 = vmatprep.subr.bf16.mxu1 %v9571_v46  ;;  %v9611_v46 = vld [vmem:[%s13973_s1 + $0x1f20] ss:$16 sps:$4 sm:$0xff]  }
 0x1df   :  { %6989 = vmatpush1.bf16.msra.mxu0 %v9566_v14  ;;  %v9616_v14 = vld [vmem:[%s13973_s1 + $0x1d04] ss:$16 sps:$4 sm:$0xff]  }
 0x1e0   :  { %7032 = vmatpush1.bf16.msra.mxu1 %v9569_v15  ;;  %6990 = vmatprep.subr.bf16.mxu0 %v9574_v23  ;;  %v9619_v15 = vld [vmem:[%s13973_s1 + $0x1f04] ss:$16 sps:$4 sm:$0xff]   ;;  %v9614_v23 = vld [vmem:[%s13973_s1 + $0x1d00] ss:$16 sps:$4 sm:$0xff]  }
 0x1e1   :  { %7033 = vmatprep.subr.bf16.mxu1 %v9577_v40  ;;  %v9617_v40 = vld [vmem:[%s13973_s1 + $0x1f00] ss:$16 sps:$4 sm:$0xff]  }
 0x1e3   :  { %6991 = vmatpush2.bf16.msra.mxu0 %v9572_v52  ;;  %v9622_v52 = vld [vmem:[%s13973_s1 + $0xec] ss:$16 sps:$4 sm:$0xff]  }
 0x1e4   :  { %7034 = vmatpush2.bf16.msra.mxu1 %v9575_v34  ;;  %6992 = vmatprep.subr.bf16.mxu0 %v9580_v22  ;;  %v9625_v34 = vld [vmem:[%s13973_s1 + $0x2ec] ss:$16 sps:$4 sm:$0xff]   ;;  %v9620_v22 = vld [vmem:[%s13973_s1 + $0xe8] ss:$16 sps:$4 sm:$0xff]  }
 0x1e5   :  { %7035 = vmatprep.subr.bf16.mxu1 %v9583_v26  ;;  %v9623_v26 = vld [vmem:[%s13973_s1 + $0x2e8] ss:$16 sps:$4 sm:$0xff]  }
 0x1e7   :  { %6993 = vmatpush2.bf16.msra.mxu0 %v9578_v38  ;;  %v12253_v38 = vcombine.low %v12016_v16, %v12021_v17  ;;  %v9626_v16 = vld [vmem:[%s13973_s1 + $0xc8] ss:$16 sps:$4 sm:$0xff]  }
 0x1e8   :  { %7036 = vmatpush2.bf16.msra.mxu1 %v9581_v39  ;;  %6994 = vmatprep.subr.bf16.mxu0 %v9586_v42  ;;  %v12257_v39 = vcombine.low %v12026_v18, %v12031_v19  ;;  %v9628_v42 = vld [vmem:[%s13973_s1 + $0xcc] ss:$16 sps:$4 sm:$0xff]   ;;  %v9629_v17 = vld [vmem:[%s13973_s1 + $0x2c8] ss:$16 sps:$4 sm:$0xff]  }
 0x1e9   :  { %7037 = vmatprep.subr.bf16.mxu1 %v9589_v4  ;;  %13993 = vst [vmem:[#allocation8_spill] sm:$0xff] %v12253_v38  ;;  %v9631_v4 = vld [vmem:[%s13973_s1 + $0x2cc] ss:$16 sps:$4 sm:$0xff]  }
 0x1ea   :  { %13994 = vst [vmem:[#allocation9_spill] sm:$0xff] %v12257_v39  ;;  %v9634_v18 = vld [vmem:[%s13973_s1 + $0xac] ss:$16 sps:$4 sm:$0xff]  }
 0x1eb   :  { %6995 = vmatpush2.bf16.msra.mxu0 %v9584_v6  ;;  %v9637_v19 = vld [vmem:[%s13973_s1 + $0x2ac] ss:$16 sps:$4 sm:$0xff]   ;;  %v9632_v6 = vld [vmem:[%s13973_s1 + $0xa8] ss:$16 sps:$4 sm:$0xff]  }
 0x1ec   :  { %7038 = vmatpush2.bf16.msra.mxu1 %v9587_v7  ;;  %6996 = vmatprep.subr.bf16.mxu0 %v9592_v12  ;;  %v9635_v7 = vld [vmem:[%s13973_s1 + $0x2a8] ss:$16 sps:$4 sm:$0xff]   ;;  %v9640_v12 = vld [vmem:[%s13973_s1 + $0x8c] ss:$16 sps:$4 sm:$0xff]  }
 0x1ed   :  { %7039 = vmatprep.subr.bf16.mxu1 %v9595_v54  ;;  %v9643_v54 = vld [vmem:[%s13973_s1 + $0x28c] ss:$16 sps:$4 sm:$0xff]  }
 0x1ef   :  { %6997 = vmatpush2.bf16.msra.mxu0 %v9590_v58  ;;  %v9646_v58 = vld [vmem:[%s13973_s1 + $0x6c] ss:$16 sps:$4 sm:$0xff]  }
 0x1f0   :  { %7040 = vmatpush2.bf16.msra.mxu1 %v9593_v59  ;;  %6998 = vmatprep.subr.bf16.mxu0 %v9598_v60  ;;  %v9649_v59 = vld [vmem:[%s13973_s1 + $0x26c] ss:$16 sps:$4 sm:$0xff]   ;;  %v9644_v60 = vld [vmem:[%s13973_s1 + $0x68] ss:$16 sps:$4 sm:$0xff]  }
 0x1f1   :  { %7041 = vmatprep.subr.bf16.mxu1 %v9601_v61  ;;  %v9647_v61 = vld [vmem:[%s13973_s1 + $0x268] ss:$16 sps:$4 sm:$0xff]  }
 0x1f3   :  { %6999 = vmatpush2.bf16.msra.mxu0 %v9596_v62  ;;  %v9652_v62 = vld [vmem:[%s13973_s1 + $0x4c] ss:$16 sps:$4 sm:$0xff]  }
 0x1f4   :  { %7042 = vmatpush2.bf16.msra.mxu1 %v9599_v63  ;;  %7000 = vmatprep.subr.bf16.mxu0 %v9604_v0  ;;  %v9655_v63 = vld [vmem:[%s13973_s1 + $0x24c] ss:$16 sps:$4 sm:$0xff]   ;;  %v9650_v0 = vld [vmem:[%s13973_s1 + $0x48] ss:$16 sps:$4 sm:$0xff]  }
 0x1f5   :  { %7043 = vmatprep.subr.bf16.mxu1 %v9607_v1  ;;  %v9653_v1 = vld [vmem:[%s13973_s1 + $0x248] ss:$16 sps:$4 sm:$0xff]  }
 0x1f7   :  { %7001 = vmatpush2.bf16.msra.mxu0 %v9602_v2  ;;  %v9658_v2 = vld [vmem:[%s13973_s1 + $0x2c] ss:$16 sps:$4 sm:$0xff]  }
 0x1f8   :  { %7044 = vmatpush2.bf16.msra.mxu1 %v9605_v3  ;;  %7002 = vmatprep.subr.bf16.mxu0 %v9610_v5  ;;  %v9661_v3 = vld [vmem:[%s13973_s1 + $0x22c] ss:$16 sps:$4 sm:$0xff]   ;;  %v9656_v5 = vld [vmem:[%s13973_s1 + $0x28] ss:$16 sps:$4 sm:$0xff]  }
 0x1f9   :  { %7045 = vmatprep.subr.bf16.mxu1 %v9613_v13  ;;  %v9659_v13 = vld [vmem:[%s13973_s1 + $0x228] ss:$16 sps:$4 sm:$0xff]  }
 0x1fb   :  { %7003 = vmatpush2.bf16.msra.mxu0 %v9608_v44  ;;  %v9664_v44 = vld [vmem:[%s13973_s1 + $0xc] ss:$16 sps:$4 sm:$0xff]  }
 0x1fc   :  { %7046 = vmatpush2.bf16.msra.mxu1 %v9611_v46  ;;  %7004 = vmatprep.subr.bf16.mxu0 %v9616_v14  ;;  %v9667_v46 = vld [vmem:[%s13973_s1 + $0x20c] ss:$16 sps:$4 sm:$0xff]   ;;  %v9662_v14 = vld [vmem:[%s13973_s1 + $0x8] ss:$16 sps:$4 sm:$0xff]  }
 0x1fd   :  { %7047 = vmatprep.subr.bf16.mxu1 %v9619_v15  ;;  %v9665_v15 = vld [vmem:[%s13973_s1 + $0x208] ss:$16 sps:$4 sm:$0xff]  }
 0x1ff   :  { %7005 = vmatpush2.bf16.msra.mxu0 %v9614_v23  ;;  %v9670_v23 = vld [vmem:[%s13973_s1 + $0x1ec] ss:$16 sps:$4 sm:$0xff]  }
 0x200   :  { %7048 = vmatpush2.bf16.msra.mxu1 %v9617_v40  ;;  %7060 = vmatprep.subr.bf16.mxu0 %v9622_v52  ;;  %v9673_v40 = vld [vmem:[%s13973_s1 + $0x3ec] ss:$16 sps:$4 sm:$0xff]   ;;  %v9668_v52 = vld [vmem:[%s13973_s1 + $0x1e8] ss:$16 sps:$4 sm:$0xff]  }
 0x201   :  { %7103 = vmatprep.subr.bf16.mxu1 %v9625_v34  ;;  %v9671_v34 = vld [vmem:[%s13973_s1 + $0x3e8] ss:$16 sps:$4 sm:$0xff]  }
 0x202   :  { %7007 = vmatmul.mubr.bf16.vlgmr.msra.gmra.mxu0 %v12253_v38 }
 0x203   :  { %7050 = vmatmul.mubr.bf16.vlgmr.msra.gmra.mxu1 %v12257_v39  ;;  %7061 = vmatpush1.bf16.msra.mxu0 %v9620_v22  ;;  %v9676_v22 = vld [vmem:[%s13973_s1 + $0x1cc] ss:$16 sps:$4 sm:$0xff]  }
 0x204   :  { %7104 = vmatpush1.bf16.msra.mxu1 %v9623_v26  ;;  %7062 = vmatprep.subr.bf16.mxu0 %v9628_v42  ;;  %v9679_v26 = vld [vmem:[%s13973_s1 + $0x3cc] ss:$16 sps:$4 sm:$0xff]   ;;  %v9674_v42 = vld [vmem:[%s13973_s1 + $0x1c8] ss:$16 sps:$4 sm:$0xff]  }
 0x205   :  { %7105 = vmatprep.subr.bf16.mxu1 %v9631_v4  ;;  %7092 = vmatprep.mubr.bf16.mxu0 %v10568_v53  ;;  %v9638_v53 = vld [vmem:[%s13973_s1 + $0x88] ss:$16 sps:$4 sm:$0xff]  }
 0x206   :  { %7135 = vmatprep.mubr.bf16.mxu1 %v10573_v55  ;;  %v9641_v55 = vld [vmem:[%s13973_s1 + $0x288] ss:$16 sps:$4 sm:$0xff]  }
 0x207   :  { %7063 = vmatpush1.bf16.msra.mxu0 %v9626_v16  ;;  %v9677_v4 = vld [vmem:[%s13973_s1 + $0x3c8] ss:$16 sps:$4 sm:$0xff]   ;;  %v9682_v16 = vld [vmem:[%s13973_s1 + $0x1ac] ss:$16 sps:$4 sm:$0xff]  }
 0x208   :  { %7106 = vmatpush1.bf16.msra.mxu1 %v9629_v17  ;;  %7064 = vmatprep.subr.bf16.mxu0 %v9634_v18  ;;  %v9685_v17 = vld [vmem:[%s13973_s1 + $0x3ac] ss:$16 sps:$4 sm:$0xff]   ;;  %v9680_v18 = vld [vmem:[%s13973_s1 + $0x1a8] ss:$16 sps:$4 sm:$0xff]  }
 0x209   :  { %7107 = vmatprep.subr.bf16.mxu1 %v9637_v19  ;;  %v9683_v19 = vld [vmem:[%s13973_s1 + $0x3a8] ss:$16 sps:$4 sm:$0xff]  }
 0x20b   :  { %7065 = vmatpush1.bf16.msra.mxu0 %v9632_v6  ;;  %v9688_v6 = vld [vmem:[%s13973_s1 + $0x18c] ss:$16 sps:$4 sm:$0xff]  }
 0x20c   :  { %7108 = vmatpush1.bf16.msra.mxu1 %v9635_v7  ;;  %7066 = vmatprep.subr.bf16.mxu0 %v9640_v12  ;;  %v9691_v7 = vld [vmem:[%s13973_s1 + $0x38c] ss:$16 sps:$4 sm:$0xff]   ;;  %v9686_v12 = vld [vmem:[%s13973_s1 + $0x188] ss:$16 sps:$4 sm:$0xff]  }
 0x20d   :  { %7109 = vmatprep.subr.bf16.mxu1 %v9643_v54  ;;  %v9689_v54 = vld [vmem:[%s13973_s1 + $0x388] ss:$16 sps:$4 sm:$0xff]  }
 0x20f   :  { %7067 = vmatpush1.bf16.msra.mxu0 %v9638_v53  ;;  %v9694_v53 = vld [vmem:[%s13973_s1 + $0x16c] ss:$16 sps:$4 sm:$0xff]  }
 0x210   :  { %7110 = vmatpush1.bf16.msra.mxu1 %v9641_v55  ;;  %7068 = vmatprep.subr.bf16.mxu0 %v9646_v58  ;;  %v9697_v55 = vld [vmem:[%s13973_s1 + $0x36c] ss:$16 sps:$4 sm:$0xff]   ;;  %v9692_v58 = vld [vmem:[%s13973_s1 + $0x168] ss:$16 sps:$4 sm:$0xff]  }
 0x211   :  { %7111 = vmatprep.subr.bf16.mxu1 %v9649_v59  ;;  %v9695_v59 = vld [vmem:[%s13973_s1 + $0x368] ss:$16 sps:$4 sm:$0xff]  }
 0x213   :  { %7069 = vmatpush1.bf16.msra.mxu0 %v9644_v60  ;;  %v9700_v60 = vld [vmem:[%s13973_s1 + $0x14c] ss:$16 sps:$4 sm:$0xff]  }
 0x214   :  { %7112 = vmatpush1.bf16.msra.mxu1 %v9647_v61  ;;  %7070 = vmatprep.subr.bf16.mxu0 %v9652_v62  ;;  %v9703_v61 = vld [vmem:[%s13973_s1 + $0x34c] ss:$16 sps:$4 sm:$0xff]   ;;  %v9698_v62 = vld [vmem:[%s13973_s1 + $0x148] ss:$16 sps:$4 sm:$0xff]  }
 0x215   :  { %7113 = vmatprep.subr.bf16.mxu1 %v9655_v63  ;;  %v9701_v63 = vld [vmem:[%s13973_s1 + $0x348] ss:$16 sps:$4 sm:$0xff]  }
 0x217   :  { %7071 = vmatpush1.bf16.msra.mxu0 %v9650_v0  ;;  %v9706_v0 = vld [vmem:[%s13973_s1 + $0x12c] ss:$16 sps:$4 sm:$0xff]  }
 0x218   :  { %7114 = vmatpush1.bf16.msra.mxu1 %v9653_v1  ;;  %7072 = vmatprep.subr.bf16.mxu0 %v9658_v2  ;;  %v9709_v1 = vld [vmem:[%s13973_s1 + $0x32c] ss:$16 sps:$4 sm:$0xff]   ;;  %v9704_v2 = vld [vmem:[%s13973_s1 + $0x128] ss:$16 sps:$4 sm:$0xff]  }
 0x219   :  { %7115 = vmatprep.subr.bf16.mxu1 %v9661_v3  ;;  %v9707_v3 = vld [vmem:[%s13973_s1 + $0x328] ss:$16 sps:$4 sm:$0xff]  }
 0x21b   :  { %7073 = vmatpush1.bf16.msra.mxu0 %v9656_v5  ;;  %v9712_v5 = vld [vmem:[%s13973_s1 + $0x10c] ss:$16 sps:$4 sm:$0xff]  }
 0x21c   :  { %7116 = vmatpush1.bf16.msra.mxu1 %v9659_v13  ;;  %7074 = vmatprep.subr.bf16.mxu0 %v9664_v44  ;;  %v9715_v13 = vld [vmem:[%s13973_s1 + $0x30c] ss:$16 sps:$4 sm:$0xff]   ;;  %v9710_v44 = vld [vmem:[%s13973_s1 + $0x108] ss:$16 sps:$4 sm:$0xff]  }
 0x21d   :  { %7117 = vmatprep.subr.bf16.mxu1 %v9667_v46  ;;  %v9713_v46 = vld [vmem:[%s13973_s1 + $0x308] ss:$16 sps:$4 sm:$0xff]  }
 0x21f   :  { %7075 = vmatpush1.bf16.msra.mxu0 %v9662_v14  ;;  %v9718_v14 = vld [vmem:[%s13973_s1 + $0x4ec] ss:$16 sps:$4 sm:$0xff]  }
 0x220   :  { %7118 = vmatpush1.bf16.msra.mxu1 %v9665_v15  ;;  %7076 = vmatprep.subr.bf16.mxu0 %v9670_v23  ;;  %v9721_v15 = vld [vmem:[%s13973_s1 + $0x6ec] ss:$16 sps:$4 sm:$0xff]   ;;  %v9716_v23 = vld [vmem:[%s13973_s1 + $0x4e8] ss:$16 sps:$4 sm:$0xff]  }
 0x221   :  { %7119 = vmatprep.subr.bf16.mxu1 %v9673_v40  ;;  %v9719_v40 = vld [vmem:[%s13973_s1 + $0x6e8] ss:$16 sps:$4 sm:$0xff]  }
 0x223   :  { %7077 = vmatpush2.bf16.msra.mxu0 %v9668_v52  ;;  %v9724_v52 = vld [vmem:[%s13973_s1 + $0x4cc] ss:$16 sps:$4 sm:$0xff]  }
 0x224   :  { %7120 = vmatpush2.bf16.msra.mxu1 %v9671_v34  ;;  %7078 = vmatprep.subr.bf16.mxu0 %v9676_v22  ;;  %v9727_v34 = vld [vmem:[%s13973_s1 + $0x6cc] ss:$16 sps:$4 sm:$0xff]   ;;  %v9722_v22 = vld [vmem:[%s13973_s1 + $0x4c8] ss:$16 sps:$4 sm:$0xff]  }
 0x225   :  { %7121 = vmatprep.subr.bf16.mxu1 %v9679_v26  ;;  %v9725_v26 = vld [vmem:[%s13973_s1 + $0x6c8] ss:$16 sps:$4 sm:$0xff]  }
 0x227   :  { %7079 = vmatpush2.bf16.msra.mxu0 %v9674_v42  ;;  %v9730_v42 = vld [vmem:[%s13973_s1 + $0x4ac] ss:$16 sps:$4 sm:$0xff]  }
 0x228   :  { %7122 = vmatpush2.bf16.msra.mxu1 %v9677_v4  ;;  %7080 = vmatprep.subr.bf16.mxu0 %v9682_v16  ;;  %v9733_v4 = vld [vmem:[%s13973_s1 + $0x6ac] ss:$16 sps:$4 sm:$0xff]   ;;  %v9728_v16 = vld [vmem:[%s13973_s1 + $0x4a8] ss:$16 sps:$4 sm:$0xff]  }
 0x229   :  { %7123 = vmatprep.subr.bf16.mxu1 %v9685_v17  ;;  %v9739_v17 = vld [vmem:[%s13973_s1 + $0x68c] ss:$16 sps:$4 sm:$0xff]  }
 0x22b   :  { %7081 = vmatpush2.bf16.msra.mxu0 %v9680_v18  ;;  %v9734_v18 = vld [vmem:[%s13973_s1 + $0x488] ss:$16 sps:$4 sm:$0xff]  }
 0x22c   :  { %7124 = vmatpush2.bf16.msra.mxu1 %v9683_v19  ;;  %7082 = vmatprep.subr.bf16.mxu0 %v9688_v6  ;;  %v9745_v19 = vld [vmem:[%s13973_s1 + $0x66c] ss:$16 sps:$4 sm:$0xff]   ;;  %v9740_v6 = vld [vmem:[%s13973_s1 + $0x468] ss:$16 sps:$4 sm:$0xff]  }
 0x22d   :  { %7125 = vmatprep.subr.bf16.mxu1 %v9691_v7  ;;  %v9743_v7 = vld [vmem:[%s13973_s1 + $0x668] ss:$16 sps:$4 sm:$0xff]  }
 0x22f   :  { %7083 = vmatpush2.bf16.msra.mxu0 %v9686_v12  ;;  %v9748_v12 = vld [vmem:[%s13973_s1 + $0x44c] ss:$16 sps:$4 sm:$0xff]  }
 0x230   :  { %7126 = vmatpush2.bf16.msra.mxu1 %v9689_v54  ;;  %7084 = vmatprep.subr.bf16.mxu0 %v9694_v53  ;;  %v9751_v54 = vld [vmem:[%s13973_s1 + $0x64c] ss:$16 sps:$4 sm:$0xff]   ;;  %v9746_v53 = vld [vmem:[%s13973_s1 + $0x448] ss:$16 sps:$4 sm:$0xff]  }
 0x231   :  { %7127 = vmatprep.subr.bf16.mxu1 %v9697_v55  ;;  %v9749_v55 = vld [vmem:[%s13973_s1 + $0x648] ss:$16 sps:$4 sm:$0xff]  }
 0x233   :  { %7085 = vmatpush2.bf16.msra.mxu0 %v9692_v58  ;;  %v9754_v58 = vld [vmem:[%s13973_s1 + $0x42c] ss:$16 sps:$4 sm:$0xff]  }
 0x234   :  { %7128 = vmatpush2.bf16.msra.mxu1 %v9695_v59  ;;  %7086 = vmatprep.subr.bf16.mxu0 %v9700_v60  ;;  %v9757_v59 = vld [vmem:[%s13973_s1 + $0x62c] ss:$16 sps:$4 sm:$0xff]   ;;  %v9752_v60 = vld [vmem:[%s13973_s1 + $0x428] ss:$16 sps:$4 sm:$0xff]  }
 0x235   :  { %7129 = vmatprep.subr.bf16.mxu1 %v9703_v61  ;;  %v9755_v61 = vld [vmem:[%s13973_s1 + $0x628] ss:$16 sps:$4 sm:$0xff]  }
 0x237   :  { %7087 = vmatpush2.bf16.msra.mxu0 %v9698_v62  ;;  %v9760_v62 = vld [vmem:[%s13973_s1 + $0x40c] ss:$16 sps:$4 sm:$0xff]  }
 0x238   :  { %7130 = vmatpush2.bf16.msra.mxu1 %v9701_v63  ;;  %7088 = vmatprep.subr.bf16.mxu0 %v9706_v0  ;;  %v9763_v63 = vld [vmem:[%s13973_s1 + $0x60c] ss:$16 sps:$4 sm:$0xff]   ;;  %v9758_v0 = vld [vmem:[%s13973_s1 + $0x408] ss:$16 sps:$4 sm:$0xff]  }
 0x239   :  { %7131 = vmatprep.subr.bf16.mxu1 %v9709_v1  ;;  %v9761_v1 = vld [vmem:[%s13973_s1 + $0x608] ss:$16 sps:$4 sm:$0xff]  }
 0x23b   :  { %7089 = vmatpush2.bf16.msra.mxu0 %v9704_v2  ;;  %v9766_v2 = vld [vmem:[%s13973_s1 + $0x5ec] ss:$16 sps:$4 sm:$0xff]  }
 0x23c   :  { %7132 = vmatpush2.bf16.msra.mxu1 %v9707_v3  ;;  %7090 = vmatprep.subr.bf16.mxu0 %v9712_v5  ;;  %v9769_v3 = vld [vmem:[%s13973_s1 + $0x7ec] ss:$16 sps:$4 sm:$0xff]   ;;  %v9764_v5 = vld [vmem:[%s13973_s1 + $0x5e8] ss:$16 sps:$4 sm:$0xff]  }
 0x23d   :  { %7133 = vmatprep.subr.bf16.mxu1 %v9715_v13  ;;  %v9767_v13 = vld [vmem:[%s13973_s1 + $0x7e8] ss:$16 sps:$4 sm:$0xff]  }
 0x23f   :  { %7091 = vmatpush2.bf16.msra.mxu0 %v9710_v44  ;;  %v12555_v44 = vpop.f32.mrf.mxu0 }
 0x240   :  { %7134 = vmatpush2.bf16.msra.mxu1 %v9713_v46  ;;  %7146 = vmatprep.subr.bf16.mxu0 %v9718_v14  ;;  %v12557_v46 = vpop.f32.mrf.mxu1  ;;  %v9772_v14 = vld [vmem:[%s13973_s1 + $0x5cc] ss:$16 sps:$4 sm:$0xff]  }
 0x241   :  { %7189 = vmatprep.subr.bf16.mxu1 %v9721_v15  ;;  %v9775_v15 = vld [vmem:[%s13973_s1 + $0x7cc] ss:$16 sps:$4 sm:$0xff]  }
 0x242   :  { %7093 = vmatmul.mubr.bf16.vlgmr.msra.gmra.mxu0 %v10625_v8  ;;  %v9731_v8 = vld [vmem:[%s13973_s1 + $0x6a8] ss:$16 sps:$4 sm:$0xff]  }
 0x243   :  { %7136 = vmatmul.mubr.bf16.vlgmr.msra.gmra.mxu1 %v10627_v9  ;;  %7147 = vmatpush1.bf16.msra.mxu0 %v9716_v23  ;;  %v9736_v9 = vld [vmem:[%s13973_s1 + $0x48c] ss:$16 sps:$4 sm:$0xff]   ;;  %v9770_v23 = vld [vmem:[%s13973_s1 + $0x5c8] ss:$16 sps:$4 sm:$0xff]  }
 0x244   :  { %7190 = vmatpush1.bf16.msra.mxu1 %v9719_v40  ;;  %7148 = vmatprep.subr.bf16.mxu0 %v9724_v52  ;;  %v9773_v40 = vld [vmem:[%s13973_s1 + $0x7c8] ss:$16 sps:$4 sm:$0xff]   ;;  %v12571_v52 = vpop.f32.mrf.mxu0 }
 0x245   :  { %7191 = vmatprep.subr.bf16.mxu1 %v9727_v34  ;;  %7178 = vmatprep.mubr.bf16.mxu0 %v10734_v41  ;;  %v9737_v41 = vld [vmem:[%s13973_s1 + $0x688] ss:$16 sps:$4 sm:$0xff]   ;;  %v12573_v34 = vpop.f32.mrf.mxu1 }
 0x246   :  { %7221 = vmatprep.mubr.bf16.mxu1 %v10741_v43  ;;  %v9742_v43 = vld [vmem:[%s13973_s1 + $0x46c] ss:$16 sps:$4 sm:$0xff]  }
 0x247   :  { %7149 = vmatpush1.bf16.msra.mxu0 %v9722_v22  ;;  %v9778_v22 = vld [vmem:[%s13973_s1 + $0x5ac] ss:$16 sps:$4 sm:$0xff]  }
 0x248   :  { %7192 = vmatpush1.bf16.msra.mxu1 %v9725_v26  ;;  %7150 = vmatprep.subr.bf16.mxu0 %v9730_v42  ;;  %v9781_v26 = vld [vmem:[%s13973_s1 + $0x7ac] ss:$16 sps:$4 sm:$0xff]   ;;  %v9776_v42 = vld [vmem:[%s13973_s1 + $0x5a8] ss:$16 sps:$4 sm:$0xff]  }
 0x249   :  { %7193 = vmatprep.subr.bf16.mxu1 %v9733_v4  ;;  %v9779_v4 = vld [vmem:[%s13973_s1 + $0x7a8] ss:$16 sps:$4 sm:$0xff]  }
 0x24b   :  { %7151 = vmatpush1.bf16.msra.mxu0 %v9728_v16  ;;  %v12587_v16 = vpop.f32.mrf.mxu0 }
 0x24c   :  { %7194 = vmatpush1.bf16.msra.mxu1 %v9731_v8  ;;  %7152 = vmatprep.subr.bf16.mxu0 %v9736_v9  ;;  %v12589_v8 = vpop.f32.mrf.mxu1  ;;  %v9784_v9 = vld [vmem:[%s13973_s1 + $0x58c] ss:$16 sps:$4 sm:$0xff]  }
 0x24d   :  { %7195 = vmatprep.subr.bf16.mxu1 %v9739_v17  ;;  %v9787_v17 = vld [vmem:[%s13973_s1 + $0x78c] ss:$16 sps:$4 sm:$0xff]  }
 0x24f   :  { %7153 = vmatpush1.bf16.msra.mxu0 %v9734_v18  ;;  %v9782_v18 = vld [vmem:[%s13973_s1 + $0x588] ss:$16 sps:$4 sm:$0xff]  }
 0x250   :  { %7196 = vmatpush1.bf16.msra.mxu1 %v9737_v41  ;;  %7154 = vmatprep.subr.bf16.mxu0 %v9742_v43  ;;  %v9785_v41 = vld [vmem:[%s13973_s1 + $0x788] ss:$16 sps:$4 sm:$0xff]   ;;  %v12603_v43 = vpop.f32.mrf.mxu0 }
 0x251   :  { %7197 = vmatprep.subr.bf16.mxu1 %v9745_v19  ;;  %v12605_v19 = vpop.f32.mrf.mxu1 }
 0x253   :  { %7155 = vmatpush1.bf16.msra.mxu0 %v9740_v6  ;;  %v9790_v6 = vld [vmem:[%s13973_s1 + $0x56c] ss:$16 sps:$4 sm:$0xff]  }
 0x254   :  { %7198 = vmatpush1.bf16.msra.mxu1 %v9743_v7  ;;  %7156 = vmatprep.subr.bf16.mxu0 %v9748_v12  ;;  %v9793_v7 = vld [vmem:[%s13973_s1 + $0x76c] ss:$16 sps:$4 sm:$0xff]   ;;  %v12613_v12 = vpop.f32.mrf.mxu0 }
 0x255   :  { %7199 = vmatprep.subr.bf16.mxu1 %v9751_v54  ;;  %v12615_v54 = vpop.f32.mrf.mxu1 }
 0x257   :  { %7157 = vmatpush1.bf16.msra.mxu0 %v9746_v53  ;;  %v9788_v53 = vld [vmem:[%s13973_s1 + $0x568] ss:$16 sps:$4 sm:$0xff]  }
 0x258   :  { %7200 = vmatpush1.bf16.msra.mxu1 %v9749_v55  ;;  %7158 = vmatprep.subr.bf16.mxu0 %v9754_v58  ;;  %v9791_v55 = vld [vmem:[%s13973_s1 + $0x768] ss:$16 sps:$4 sm:$0xff]   ;;  %v9796_v58 = vld [vmem:[%s13973_s1 + $0x54c] ss:$16 sps:$4 sm:$0xff]  }
 0x259   :  { %7201 = vmatprep.subr.bf16.mxu1 %v9757_v59  ;;  %v9799_v59 = vld [vmem:[%s13973_s1 + $0x74c] ss:$16 sps:$4 sm:$0xff]  }
 0x25b   :  { %7159 = vmatpush1.bf16.msra.mxu0 %v9752_v60  ;;  %v12629_v60 = vpop.f32.mrf.mxu0 }
 0x25c   :  { %7202 = vmatpush1.bf16.msra.mxu1 %v9755_v61  ;;  %7160 = vmatprep.subr.bf16.mxu0 %v9760_v62  ;;  %v12631_v61 = vpop.f32.mrf.mxu1  ;;  %v9794_v62 = vld [vmem:[%s13973_s1 + $0x548] ss:$16 sps:$4 sm:$0xff]  }
 0x25d   :  { %7203 = vmatprep.subr.bf16.mxu1 %v9763_v63  ;;  %v9797_v63 = vld [vmem:[%s13973_s1 + $0x748] ss:$16 sps:$4 sm:$0xff]  }
 0x25f   :  { %7161 = vmatpush1.bf16.msra.mxu0 %v9758_v0  ;;  %v9802_v0 = vld [vmem:[%s13973_s1 + $0x52c] ss:$16 sps:$4 sm:$0xff]  }
 0x260   :  { %7204 = vmatpush1.bf16.msra.mxu1 %v9761_v1  ;;  %7162 = vmatprep.subr.bf16.mxu0 %v9766_v2  ;;  %v9805_v1 = vld [vmem:[%s13973_s1 + $0x72c] ss:$16 sps:$4 sm:$0xff]   ;;  %v12645_v2 = vpop.f32.mrf.mxu0 }
 0x261   :  { %7205 = vmatprep.subr.bf16.mxu1 %v9769_v3  ;;  %v12647_v3 = vpop.f32.mrf.mxu1 }
 0x263   :  { %7163 = vmatpush2.bf16.msra.mxu0 %v9764_v5  ;;  %v9800_v5 = vld [vmem:[%s13973_s1 + $0x528] ss:$16 sps:$4 sm:$0xff]  }
 0x264   :  { %7206 = vmatpush2.bf16.msra.mxu1 %v9767_v13  ;;  %7164 = vmatprep.subr.bf16.mxu0 %v9772_v14  ;;  %v9803_v13 = vld [vmem:[%s13973_s1 + $0x728] ss:$16 sps:$4 sm:$0xff]   ;;  %v9808_v14 = vld [vmem:[%s13973_s1 + $0x50c] ss:$16 sps:$4 sm:$0xff]  }
 0x265   :  { %7207 = vmatprep.subr.bf16.mxu1 %v9775_v15  ;;  %v9811_v15 = vld [vmem:[%s13973_s1 + $0x70c] ss:$16 sps:$4 sm:$0xff]  }
 0x267   :  { %7165 = vmatpush2.bf16.msra.mxu0 %v9770_v23  ;;  %v12661_v23 = vpop.f32.mrf.mxu0 }
 0x268   :  { %7208 = vmatpush2.bf16.msra.mxu1 %v9773_v40  ;;  %7166 = vmatprep.subr.bf16.mxu0 %v9778_v22  ;;  %v12663_v40 = vpop.f32.mrf.mxu1  ;;  %v9806_v22 = vld [vmem:[%s13973_s1 + $0x508] ss:$16 sps:$4 sm:$0xff]  }
 0x269   :  { %7209 = vmatprep.subr.bf16.mxu1 %v9781_v26  ;;  %v9809_v26 = vld [vmem:[%s13973_s1 + $0x708] ss:$16 sps:$4 sm:$0xff]  }
 0x26b   :  { %7167 = vmatpush2.bf16.msra.mxu0 %v9776_v42  ;;  %v12671_v42 = vpop.f32.mrf.mxu0 }
 0x26c   :  { %7210 = vmatpush2.bf16.msra.mxu1 %v9779_v4  ;;  %7168 = vmatprep.subr.bf16.mxu0 %v9784_v9  ;;  %v12673_v4 = vpop.f32.mrf.mxu1  ;;  %v9814_v9 = vld [vmem:[%s13973_s1 + $0x8ec] ss:$16 sps:$4 sm:$0xff]  }
 0x26d   :  { %7211 = vmatprep.subr.bf16.mxu1 %v9787_v17  ;;  %v9817_v17 = vld [vmem:[%s13973_s1 + $0xaec] ss:$16 sps:$4 sm:$0xff]  }
 0x26f   :  { %7169 = vmatpush2.bf16.msra.mxu0 %v9782_v18  ;;  %v9812_v18 = vld [vmem:[%s13973_s1 + $0x8e8] ss:$16 sps:$4 sm:$0xff]  }
 0x270   :  { %7212 = vmatpush2.bf16.msra.mxu1 %v9785_v41  ;;  %7170 = vmatprep.subr.bf16.mxu0 %v9790_v6  ;;  %v9815_v41 = vld [vmem:[%s13973_s1 + $0xae8] ss:$16 sps:$4 sm:$0xff]   ;;  %v12687_v6 = vpop.f32.mrf.mxu0 }
 0x271   :  { %7213 = vmatprep.subr.bf16.mxu1 %v9793_v7  ;;  %v12689_v7 = vpop.f32.mrf.mxu1 }
 0x273   :  { %7171 = vmatpush2.bf16.msra.mxu0 %v9788_v53  ;;  %v9820_v53 = vld [vmem:[%s13973_s1 + $0x8cc] ss:$16 sps:$4 sm:$0xff]  }
 0x274   :  { %7214 = vmatpush2.bf16.msra.mxu1 %v9791_v55  ;;  %7172 = vmatprep.subr.bf16.mxu0 %v9796_v58  ;;  %v9823_v55 = vld [vmem:[%s13973_s1 + $0xacc] ss:$16 sps:$4 sm:$0xff]   ;;  %v9818_v58 = vld [vmem:[%s13973_s1 + $0x8c8] ss:$16 sps:$4 sm:$0xff]  }
 0x275   :  { %7215 = vmatprep.subr.bf16.mxu1 %v9799_v59  ;;  %v9821_v59 = vld [vmem:[%s13973_s1 + $0xac8] ss:$16 sps:$4 sm:$0xff]  }
 0x277   :  { %7173 = vmatpush2.bf16.msra.mxu0 %v9794_v62  ;;  %v12705_v62 = vpop.f32.mrf.mxu0 }
 0x278   :  { %7216 = vmatpush2.bf16.msra.mxu1 %v9797_v63  ;;  %7174 = vmatprep.subr.bf16.mxu0 %v9802_v0  ;;  %v12707_v63 = vpop.f32.mrf.mxu1  ;;  %v9824_v0 = vld [vmem:[%s13973_s1 + $0x8a8] ss:$16 sps:$4 sm:$0xff]  }
 0x279   :  { %7217 = vmatprep.subr.bf16.mxu1 %v9805_v1  ;;  %v9827_v1 = vld [vmem:[%s13973_s1 + $0xaa8] ss:$16 sps:$4 sm:$0xff]  }
 0x27b   :  { %7175 = vmatpush2.bf16.msra.mxu0 %v9800_v5  ;;  %v12723_v5 = vpop.f32.mrf.mxu0 }
 0x27c   :  { %7218 = vmatpush2.bf16.msra.mxu1 %v9803_v13  ;;  %7176 = vmatprep.subr.bf16.mxu0 %v9808_v14  ;;  %v12725_v13 = vpop.f32.mrf.mxu1  ;;  %v1072_v14 = vlaneseq }
 0x27d   :  { %7219 = vmatprep.subr.bf16.mxu1 %v9811_v15  ;;  %v12733_v15 = vpop.f32.mrf.mxu0 }
 0x27f   :  { %7177 = vmatpush2.bf16.msra.mxu0 %v9806_v22  ;;  %v12735_v22 = vpop.f32.mrf.mxu1 }
 0x280   :  { %7220 = vmatpush2.bf16.msra.mxu1 %v9809_v26  ;;  %7232 = vmatprep.subr.bf16.mxu0 %v9814_v9  ;;  %v9830_v26 = vld [vmem:[%s13973_s1 + $0x888] ss:$16 sps:$4 sm:$0xff]  }
 0x281   :  { %7275 = vmatprep.subr.bf16.mxu1 %v9817_v17  ;;  %v9833_v9 = vld [vmem:[%s13973_s1 + $0xa88] ss:$16 sps:$4 sm:$0xff]   ;;  %v9838_v17 = vld [vmem:[%s13973_s1 + $0x86c] ss:$16 sps:$4 sm:$0xff]  }
 0x282   :  { %7179 = vmatmul.mubr.bf16.vlgmr.msra.gmra.mxu0 %v10855_v20  ;;  %v9826_v20 = vld [vmem:[%s13973_s1 + $0x8ac] ss:$16 sps:$4 sm:$0xff]  }
 0x283   :  { %7222 = vmatmul.mubr.bf16.vlgmr.msra.gmra.mxu1 %v10859_v21  ;;  %7233 = vmatpush1.bf16.msra.mxu0 %v9812_v18  ;;  %v9829_v21 = vld [vmem:[%s13973_s1 + $0xaac] ss:$16 sps:$4 sm:$0xff]  }
 0x284   :  { %7276 = vmatpush1.bf16.msra.mxu1 %v9815_v41  ;;  %7234 = vmatprep.subr.bf16.mxu0 %v9820_v53  ;;  %v9841_v18 = vld [vmem:[%s13973_s1 + $0xa6c] ss:$16 sps:$4 sm:$0xff]   ;;  %v12749_v41 = vshrl.u32 %v1072_v14, 7  ;;  %v12751_v53 = vpop.f32.mrf.mxu0 }
 0x285   :  { %7277 = vmatprep.subr.bf16.mxu1 %v9823_v55  ;;  %7264 = vmatprep.mubr.bf16.mxu0 %v10906_v33  ;;  %v9832_v33 = vld [vmem:[%s13973_s1 + $0x88c] ss:$16 sps:$4 sm:$0xff]   ;;  %v12753_v55 = vpop.f32.mrf.mxu1 }
 0x286   :  { %7307 = vmatprep.mubr.bf16.mxu1 %v10913_v35  ;;  %v9835_v35 = vld [vmem:[%s13973_s1 + $0xa8c] ss:$16 sps:$4 sm:$0xff]   ;;  %13995 = vst [vmem:[#allocation10_spill] sm:$0xff] %v12749_v41  ;;  %v1078_v14 = vsub.s32 1, %v12749_v41 }
 0x287   :  { %7235 = vmatpush1.bf16.msra.mxu0 %v9818_v58  ;;  %v9836_v58 = vld [vmem:[%s13973_s1 + $0x868] ss:$16 sps:$4 sm:$0xff]  }
 0x288   :  { %7278 = vmatpush1.bf16.msra.mxu1 %v9821_v59  ;;  %7236 = vmatprep.subr.bf16.mxu0 %v9826_v20  ;;  %v9839_v59 = vld [vmem:[%s13973_s1 + $0xa68] ss:$16 sps:$4 sm:$0xff]   ;;  %v9844_v20 = vld [vmem:[%s13973_s1 + $0x84c] ss:$16 sps:$4 sm:$0xff]  }
 0x289   :  { %7279 = vmatprep.subr.bf16.mxu1 %v9829_v21  ;;  %v9847_v21 = vld [vmem:[%s13973_s1 + $0xa4c] ss:$16 sps:$4 sm:$0xff]  }
 0x28b   :  { %7237 = vmatpush1.bf16.msra.mxu0 %v9824_v0  ;;  %v1074_v0 = vsub.s32 0, %v12749_v41 }
 0x28c   :  { %7280 = vmatpush1.bf16.msra.mxu1 %v9827_v1  ;;  %7238 = vmatprep.subr.bf16.mxu0 %v9832_v33  ;;  %v1070_v1 = vld [vmem:[%s13975_s2] sm:$0xf]  ;;  %v12771_v33 = vpop.f32.mrf.mxu0 }
 0x28d   :  { %7281 = vmatprep.subr.bf16.mxu1 %v9835_v35  ;;  %v12773_v35 = vpop.f32.mrf.mxu1  ;;  %v1079_v39 = vrot.slane %v1070_v1, %v1078_v14 }
 0x28f   :  { %7239 = vmatpush1.bf16.msra.mxu0 %v9830_v26  ;;  %v9842_v26 = vld [vmem:[%s13973_s1 + $0x848] ss:$16 sps:$4 sm:$0xff]   ;;  %v12790_v41 = vpop.f32.mrf.mxu1  ;;  %v6413_v28 = vadd.f32 %v12603_v43, %v1079_v39 }
 0x290   :  { %7282 = vmatpush1.bf16.msra.mxu1 %v9833_v9  ;;  %7240 = vmatprep.subr.bf16.mxu0 %v9838_v17  ;;  %v9845_v9 = vld [vmem:[%s13973_s1 + $0xa48] ss:$16 sps:$4 sm:$0xff]   ;;  %v9850_v17 = vld [vmem:[%s13973_s1 + $0x82c] ss:$16 sps:$4 sm:$0xff]  }
 0x291   :  { %7283 = vmatprep.subr.bf16.mxu1 %v9841_v18  ;;  %v9853_v18 = vld [vmem:[%s13973_s1 + $0xa2c] ss:$16 sps:$4 sm:$0xff]   ;;  %v12800_v32 = vpop.f32.mrf.mxu1 }
 0x293   :  { %7241 = vmatpush1.bf16.msra.mxu0 %v9836_v58  ;;  %v1075_v58 = vrot.slane %v1070_v1, %v1074_v0  ;;  %v9856_v0 = vld [vmem:[%s13973_s1 + $0x80c] ss:$16 sps:$4 sm:$0xff]   ;;  %v12818_v27 = vpop.f32.mrf.mxu1 }
 0x294   :  { %7284 = vmatpush1.bf16.msra.mxu1 %v9839_v59  ;;  %7242 = vmatprep.subr.bf16.mxu0 %v9844_v20  ;;  %v12788_v59 = vpop.f32.mrf.mxu0  ;;  %v9848_v20 = vld [vmem:[%s13973_s1 + $0x828] ss:$16 sps:$4 sm:$0xff]   ;;  %v9859_v1 = vld [vmem:[%s13973_s1 + $0xa0c] ss:$16 sps:$4 sm:$0xff]  }
 0x295   :  { %7285 = vmatprep.subr.bf16.mxu1 %v9847_v21  ;;  %v9851_v21 = vld [vmem:[%s13973_s1 + $0xa28] ss:$16 sps:$4 sm:$0xff]   ;;  %v6407_v14 = vadd.f32 %v12555_v44, %v1075_v58  ;;  %v9862_v44 = vld [vmem:[%s13973_s1 + $0x9ec] ss:$16 sps:$4 sm:$0xff]  }
 0x296   :  { %v12798_v38 = vpop.f32.mrf.mxu0 }
 0x297   :  { %7243 = vmatpush1.bf16.msra.mxu0 %v9842_v26  ;;  %v6409_v26 = vadd.f32 %v12571_v52, %v1079_v39  ;;  %v9865_v52 = vld [vmem:[%s13973_s1 + $0xbec] ss:$16 sps:$4 sm:$0xff]  }
 0x298   :  { %7286 = vmatpush1.bf16.msra.mxu1 %v9845_v9  ;;  %7244 = vmatprep.subr.bf16.mxu0 %v9850_v17  ;;  %v9854_v9 = vld [vmem:[%s13973_s1 + $0x808] ss:$16 sps:$4 sm:$0xff]   ;;  %v9868_v39 = vld [vmem:[%s13973_s1 + $0x9cc] ss:$16 sps:$4 sm:$0xff]  }
 0x299   :  { %7287 = vmatprep.subr.bf16.mxu1 %v9853_v18  ;;  %v9857_v17 = vld [vmem:[%s13973_s1 + $0xa08] ss:$16 sps:$4 sm:$0xff]   ;;  %v12816_v18 = vpop.f32.mrf.mxu0  ;;  %v6452_v29 = vadd.f32 %v12573_v34, %v6409_v26  ;;  %v9871_v34 = vld [vmem:[%s13973_s1 + $0xbcc] ss:$16 sps:$4 sm:$0xff]  }
 0x29a   :  { %v9866_v26 = vld [vmem:[%s13973_s1 + $0x9c8] ss:$16 sps:$4 sm:$0xff]  }
 0x29b   :  { %7245 = vmatpush1.bf16.msra.mxu0 %v9848_v20  ;;  %v6450_v20 = vadd.f32 %v12557_v46, %v6407_v14  ;;  %v12837_v36 = vpop.f32.mrf.mxu0  ;;  %v12839_v46 = vpop.f32.mrf.mxu1  ;;  %v6495_v43 = vadd.f32 %v12629_v60, %v6452_v29 }
 0x29c   :  { %7288 = vmatpush1.bf16.msra.mxu1 %v9851_v21  ;;  %7246 = vmatprep.subr.bf16.mxu0 %v9856_v0  ;;  %v6411_v21 = vadd.f32 %v12587_v16, %v1075_v58  ;;  %v9860_v0 = vld [vmem:[%s13973_s1 + $0x9e8] ss:$16 sps:$4 sm:$0xff]  }
 0x29d   :  { %7289 = vmatprep.subr.bf16.mxu1 %v9859_v1  ;;  %v6493_v37 = vadd.f32 %v12613_v12, %v6450_v20  ;;  %v9863_v1 = vld [vmem:[%s13973_s1 + $0xbe8] ss:$16 sps:$4 sm:$0xff]   ;;  %v6456_v12 = vadd.f32 %v12605_v19, %v6413_v28  ;;  %v9877_v28 = vld [vmem:[%s13973_s1 + $0xbac] ss:$16 sps:$4 sm:$0xff]   ;;  %v6538_v29 = vadd.f32 %v12631_v61, %v6495_v43 }
 0x29e   :  { %v6454_v16 = vadd.f32 %v12589_v8, %v6411_v21  ;;  %v12860_v8 = vpop.f32.mrf.mxu1  ;;  %v9872_v20 = vld [vmem:[%s13973_s1 + $0x9a8] ss:$16 sps:$4 sm:$0xff]  }
 0x29f   :  { %7247 = vmatpush1.bf16.msra.mxu0 %v9854_v9  ;;  %v6536_v58 = vadd.f32 %v12615_v54, %v6493_v37  ;;  %v9869_v9 = vld [vmem:[%s13973_s1 + $0xbc8] ss:$16 sps:$4 sm:$0xff]   ;;  %v9874_v37 = vld [vmem:[%s13973_s1 + $0x9ac] ss:$16 sps:$4 sm:$0xff]   ;;  %v6499_v19 = vadd.f32 %v12661_v23, %v6456_v12 }
 0x2a0   :  { %7290 = vmatpush1.bf16.msra.mxu1 %v9857_v17  ;;  %7248 = vmatprep.subr.bf16.mxu0 %v9862_v44  ;;  %v6497_v14 = vadd.f32 %v12645_v2, %v6454_v16  ;;  %v12858_v17 = vpop.f32.mrf.mxu0  ;;  %v12873_v2 = vpop.f32.mrf.mxu1  ;;  %v9875_v61 = vld [vmem:[%s13973_s1 + $0xba8] ss:$16 sps:$4 sm:$0xff]   ;;  %v9880_v23 = vld [vmem:[%s13973_s1 + $0x98c] ss:$16 sps:$4 sm:$0xff]  }
 0x2a1   :  { %7291 = vmatprep.subr.bf16.mxu1 %v9865_v52  ;;  %v6579_v54 = vadd.f32 %v12671_v42, %v6536_v58  ;;  %v6581_v52 = vadd.f32 %v12687_v6, %v6538_v29  ;;  %v6542_v42 = vadd.f32 %v12663_v40, %v6499_v19  ;;  %v9878_v43 = vld [vmem:[%s13973_s1 + $0x988] ss:$16 sps:$4 sm:$0xff]  }
 0x2a2   :  { %v12871_v60 = vpop.f32.mrf.mxu0  ;;  %v6540_v44 = vadd.f32 %v12647_v3, %v6497_v14  ;;  %v9883_v3 = vld [vmem:[%s13973_s1 + $0xb8c] ss:$16 sps:$4 sm:$0xff]   ;;  %v9881_v40 = vld [vmem:[%s13973_s1 + $0xb88] ss:$16 sps:$4 sm:$0xff]  }
 0x2a3   :  { %7249 = vmatpush2.bf16.msra.mxu0 %v9860_v0  ;;  %v6622_v6 = vadd.f32 %v12673_v4, %v6579_v54  ;;  %v9886_v4 = vld [vmem:[%s13973_s1 + $0x96c] ss:$16 sps:$4 sm:$0xff]  }
 0x2a4   :  { %7292 = vmatpush2.bf16.msra.mxu1 %v9863_v1  ;;  %7250 = vmatprep.subr.bf16.mxu0 %v9868_v39  ;;  %v6583_v21 = vadd.f32 %v12705_v62, %v6540_v44  ;;  %v6838_v0 = vpop.f32.mrf.mxu0  ;;  %v12892_v1 = vpop.f32.mrf.mxu1  ;;  %v6624_v39 = vadd.f32 %v12689_v7, %v6581_v52  ;;  %v9889_v7 = vld [vmem:[%s13973_s1 + $0xb6c] ss:$16 sps:$4 sm:$0xff]   ;;  %v9890_v44 = vld [vmem:[%s13973_s1 + $0x948] ss:$16 sps:$4 sm:$0xff]  }
 0x2a5   :  { %7293 = vmatprep.subr.bf16.mxu1 %v9871_v34  ;;  %v6585_v34 = vadd.f32 %v12723_v5, %v6542_v42  ;;  %v6665_v16 = vadd.f32 %v12733_v15, %v6622_v6  ;;  %v9896_v6 = vld [vmem:[%s13973_s1 + $0x928] ss:$16 sps:$4 sm:$0xff]  }
 0x2a6   :  { %v6626_v62 = vadd.f32 %v12707_v63, %v6583_v21  ;;  %v6667_v5 = vadd.f32 %v12751_v53, %v6624_v39  ;;  %v6840_v15 = vpop.f32.mrf.mxu0  ;;  %v12911_v12 = vpop.f32.mrf.mxu1  ;;  %v9887_v63 = vld [vmem:[%s13973_s1 + $0xb68] ss:$16 sps:$4 sm:$0xff]  }
 0x2a7   :  { %7251 = vmatpush2.bf16.msra.mxu0 %v9866_v26  ;;  %v6628_v58 = vadd.f32 %v12725_v13, %v6585_v34  ;;  %v6708_v14 = vadd.f32 %v12735_v22, %v6665_v16  ;;  %v9892_v13 = vld [vmem:[%s13973_s1 + $0x94c] ss:$16 sps:$4 sm:$0xff]  }
 0x2a8   :  { %7294 = vmatpush2.bf16.msra.mxu1 %v9869_v9  ;;  %7252 = vmatprep.subr.bf16.mxu0 %v9874_v37  ;;  %v6669_v26 = vadd.f32 %v12771_v33, %v6626_v62  ;;  %v9884_v9 = vld [vmem:[%s13973_s1 + $0x968] ss:$16 sps:$4 sm:$0xff]   ;;  %v9895_v22 = vld [vmem:[%s13973_s1 + $0xb4c] ss:$16 sps:$4 sm:$0xff]   ;;  %v6710_v53 = vadd.f32 %v12753_v55, %v6667_v5  ;;  %v6885_v29 = vpop.f32.mrf.mxu1 }
 0x2a9   :  { %7295 = vmatprep.subr.bf16.mxu1 %v9877_v28  ;;  %v6671_v33 = vadd.f32 %v12788_v59, %v6628_v58  ;;  %v6751_v37 = vadd.f32 %v12798_v38, %v6708_v14  ;;  %v6842_v28 = vpop.f32.mrf.mxu0  ;;  %v9893_v55 = vld [vmem:[%s13973_s1 + $0xb48] ss:$16 sps:$4 sm:$0xff]   ;;  %v9898_v38 = vld [vmem:[%s13973_s1 + $0x92c] ss:$16 sps:$4 sm:$0xff]  }
 0x2aa   :  { %v6712_v19 = vadd.f32 %v12773_v35, %v6669_v26  ;;  %v6753_v54 = vadd.f32 %v12816_v18, %v6710_v53  ;;  %v6965_v59 = vpop.f32.mrf.mxu1  ;;  %v9901_v35 = vld [vmem:[%s13973_s1 + $0xb2c] ss:$16 sps:$4 sm:$0xff]   ;;  %v9908_v58 = vld [vmem:[%s13973_s1 + $0xce8] ss:$16 sps:$4 sm:$0xff]  }
 0x2ab   :  { %7253 = vmatpush2.bf16.msra.mxu0 %v9872_v20  ;;  %v6922_v52 = vpop.f32.mrf.mxu0  ;;  %v6714_v18 = vadd.f32 %v12790_v41, %v6671_v33  ;;  %v6794_v20 = vadd.f32 %v12800_v32, %v6751_v37  ;;  %v9899_v41 = vld [vmem:[%s13973_s1 + $0xb28] ss:$16 sps:$4 sm:$0xff]  }
 0x2ac   :  { %7296 = vmatpush2.bf16.msra.mxu1 %v9875_v61  ;;  %7254 = vmatprep.subr.bf16.mxu0 %v9880_v23  ;;  %v6755_v61 = vadd.f32 %v12837_v36, %v6712_v19  ;;  %v6796_v23 = vadd.f32 %v12818_v27, %v6753_v54  ;;  %v6967_v32 = vpop.f32.mrf.mxu1  ;;  %v9904_v36 = vld [vmem:[%s13973_s1 + $0x90c] ss:$16 sps:$4 sm:$0xff]   ;;  %v9911_v14 = vld [vmem:[%s13973_s1 + $0xee8] ss:$16 sps:$4 sm:$0xff]  }
 0x2ad   :  { %7297 = vmatprep.subr.bf16.mxu1 %v9883_v3  ;;  %v6757_v3 = vadd.f32 %v12858_v17, %v6714_v18  ;;  %v6837_v42 = vadd.f32 %v12871_v60, %v6794_v20  ;;  %v6924_v21 = vpop.f32.mrf.mxu0  ;;  %v9907_v27 = vld [vmem:[%s13973_s1 + $0xb0c] ss:$16 sps:$4 sm:$0xff]   ;;  %v9914_v54 = vld [vmem:[%s13973_s1 + $0xcc8] ss:$16 sps:$4 sm:$0xff]  }
 0x2ae   :  { %v6798_v17 = vadd.f32 %v12839_v46, %v6755_v61  ;;  %v6839_v60 = vadd.f32 %v6838_v0, %v6796_v23  ;;  %v9910_v46 = vld [vmem:[%s13973_s1 + $0xcec] ss:$16 sps:$4 sm:$0xff]  }
 0x2af   :  { %7255 = vmatpush2.bf16.msra.mxu0 %v9878_v43  ;;  %v6800_v39 = vadd.f32 %v12860_v8, %v6757_v3  ;;  %v6880_v34 = vadd.f32 %v12873_v2, %v6837_v42  ;;  %v9902_v43 = vld [vmem:[%s13973_s1 + $0x908] ss:$16 sps:$4 sm:$0xff]   ;;  %v9913_v8 = vld [vmem:[%s13973_s1 + $0xeec] ss:$16 sps:$4 sm:$0xff]  }
 0x2b0   :  { %7298 = vmatpush2.bf16.msra.mxu1 %v9881_v40  ;;  %7256 = vmatprep.subr.bf16.mxu0 %v9886_v4  ;;  %v6841_v16 = vadd.f32 %v6840_v15, %v6798_v17  ;;  %v9905_v40 = vld [vmem:[%s13973_s1 + $0xb08] ss:$16 sps:$4 sm:$0xff]   ;;  %v6926_v4 = vpop.f32.mrf.mxu0  ;;  %v6882_v2 = vadd.f32 %v12892_v1, %v6839_v60  ;;  %v9916_v1 = vld [vmem:[%s13973_s1 + $0xccc] ss:$16 sps:$4 sm:$0xff]  }
 0x2b1   :  { %7299 = vmatprep.subr.bf16.mxu1 %v9889_v7  ;;  %v6969_v7 = vpop.f32.mrf.mxu1  ;;  %v6843_v0 = vadd.f32 %v6842_v28, %v6800_v39  ;;  %v6923_v62 = vadd.f32 %v6922_v52, %v6880_v34  ;;  %v9920_v3 = vld [vmem:[%s13973_s1 + $0xca8] ss:$16 sps:$4 sm:$0xff]  }
 0x2b2   :  { %v6884_v5 = vadd.f32 %v12911_v12, %v6841_v16  ;;  %v6925_v15 = vadd.f32 %v6924_v21, %v6882_v2  ;;  %v6928_v26 = vpop.f32.mrf.mxu0  ;;  %v9919_v12 = vld [vmem:[%s13973_s1 + $0xecc] ss:$16 sps:$4 sm:$0xff]   ;;  %v9923_v42 = vld [vmem:[%s13973_s1 + $0xea8] ss:$16 sps:$4 sm:$0xff]  }
 0x2b3   :  { %7257 = vmatpush2.bf16.msra.mxu0 %v9884_v9  ;;  %v6971_v9 = vpop.f32.mrf.mxu1  ;;  %v9926_v39 = vld [vmem:[%s13973_s1 + $0xc88] ss:$16 sps:$4 sm:$0xff]   ;;  %v9934_v16 = vld [vmem:[%s13973_s1 + $0xc6c] ss:$16 sps:$4 sm:$0xff]  }
 0x2b4   :  { %7300 = vmatpush2.bf16.msra.mxu1 %v9887_v63  ;;  %7258 = vmatprep.subr.bf16.mxu0 %v9892_v13  ;;  %v6886_v63 = vadd.f32 %v6885_v29, %v6843_v0  ;;  %v6966_v13 = vadd.f32 %v6965_v59, %v6923_v62  ;;  %v6968_v37 = vadd.f32 %v6967_v32, %v6925_v15  ;;  %v9917_v29 = vld [vmem:[%s13973_s1 + $0xec8] ss:$16 sps:$4 sm:$0xff]   ;;  %v9940_v2 = vld [vmem:[%s13973_s1 + $0xc4c] ss:$16 sps:$4 sm:$0xff]  }
 0x2b5   :  { %7301 = vmatprep.subr.bf16.mxu1 %v9895_v22  ;;  %v6927_v22 = vadd.f32 %v6926_v4, %v6884_v5  ;;  %v9929_v34 = vld [vmem:[%s13973_s1 + $0xe88] ss:$16 sps:$4 sm:$0xff]   ;;  %v9943_v0 = vld [vmem:[%s13973_s1 + $0xe4c] ss:$16 sps:$4 sm:$0xff]  }
 0x2b6   :  { %v6929_v28 = vadd.f32 %v6928_v26, %v6886_v63  ;;  %v9938_v62 = vld [vmem:[%s13973_s1 + $0xc48] ss:$16 sps:$4 sm:$0xff]   ;;  %v9946_v15 = vld [vmem:[%s13973_s1 + $0xc2c] ss:$16 sps:$4 sm:$0xff]  }
 0x2b7   :  { %7259 = vmatpush2.bf16.msra.mxu0 %v9890_v44  ;;  %v6970_v52 = vadd.f32 %v6969_v7, %v6927_v22  ;;  %v9941_v5 = vld [vmem:[%s13973_s1 + $0xe48] ss:$16 sps:$4 sm:$0xff]   ;;  %v9961_v22 = vld [vmem:[%s13973_s1 + $0xfec] ss:$16 sps:$4 sm:$0xff]  }
 0x2b8   :  { %7302 = vmatpush2.bf16.msra.mxu1 %v9893_v55  ;;  %7260 = vmatprep.subr.bf16.mxu0 %v9898_v38  ;;  %v6972_v20 = vadd.f32 %v6971_v9, %v6929_v28  ;;  %v9947_v26 = vld [vmem:[%s13973_s1 + $0xe28] ss:$16 sps:$4 sm:$0xff]   ;;  %v9952_v9 = vld [vmem:[%s13973_s1 + $0xc0c] ss:$16 sps:$4 sm:$0xff]  }
 0x2b9   :  { %7303 = vmatprep.subr.bf16.mxu1 %v9901_v35  ;;  %v9953_v63 = vld [vmem:[%s13973_s1 + $0xe08] ss:$16 sps:$4 sm:$0xff]   ;;  %v9967_v28 = vld [vmem:[%s13973_s1 + $0xfcc] ss:$16 sps:$4 sm:$0xff]  }
 0x2bb   :  { %7261 = vmatpush2.bf16.msra.mxu0 %v9896_v6 }
 0x2bc   :  { %7304 = vmatpush2.bf16.msra.mxu1 %v9899_v41  ;;  %7262 = vmatprep.subr.bf16.mxu0 %v9904_v36 }
 0x2bd   :  { %7305 = vmatprep.subr.bf16.mxu1 %v9907_v27 }
 0x2bf   :  { %7263 = vmatpush2.bf16.msra.mxu0 %v9902_v43  ;;  %v9937_v43 = vld [vmem:[%s13973_s1 + $0xe6c] ss:$16 sps:$4 sm:$0xff]  }
 0x2c0   :  { %7306 = vmatpush2.bf16.msra.mxu1 %v9905_v40  ;;  %7318 = vmatprep.subr.bf16.mxu0 %v9910_v46  ;;  %v9932_v46 = vld [vmem:[%s13973_s1 + $0xc68] ss:$16 sps:$4 sm:$0xff]  }
 0x2c1   :  { %7361 = vmatprep.subr.bf16.mxu1 %v9913_v8  ;;  %v9935_v8 = vld [vmem:[%s13973_s1 + $0xe68] ss:$16 sps:$4 sm:$0xff]  }
 0x2c2   :  { %v7008_v53 = vpop.f32.mrf.mxu0  ;;  %7265 = vmatmul.mubr.bf16.vlgmr.msra.gmra.mxu0 %v11105_v48  ;;  %v9922_v48 = vld [vmem:[%s13973_s1 + $0xcac] ss:$16 sps:$4 sm:$0xff]  }
 0x2c3   :  { %v7051_v33 = vpop.f32.mrf.mxu1  ;;  %7308 = vmatmul.mubr.bf16.vlgmr.msra.gmra.mxu1 %v11109_v49  ;;  %v7009_v19 = vadd.f32 %v7008_v53, %v6966_v13  ;;  %7319 = vmatpush1.bf16.msra.mxu0 %v9908_v58  ;;  %v9925_v49 = vld [vmem:[%s13973_s1 + $0xeac] ss:$16 sps:$4 sm:$0xff]   ;;  %v9956_v53 = vld [vmem:[%s13973_s1 + $0xde8] ss:$16 sps:$4 sm:$0xff]  }
 0x2c4   :  { %7362 = vmatpush1.bf16.msra.mxu1 %v9911_v14  ;;  %v7010_v44 = vpop.f32.mrf.mxu0  ;;  %7320 = vmatprep.subr.bf16.mxu0 %v9916_v1  ;;  %v9949_v58 = vld [vmem:[%s13973_s1 + $0xe2c] ss:$16 sps:$4 sm:$0xff]   ;;  %v9944_v14 = vld [vmem:[%s13973_s1 + $0xc28] ss:$16 sps:$4 sm:$0xff]  }
 0x2c5   :  { %v7053_v55 = vpop.f32.mrf.mxu1  ;;  %7363 = vmatprep.subr.bf16.mxu1 %v9919_v12  ;;  %v7052_v59 = vadd.f32 %v7051_v33, %v7009_v19  ;;  %v7011_v38 = vadd.f32 %v7010_v44, %v6968_v37  ;;  %7350 = vmatprep.mubr.bf16.mxu0 %v11127_v30  ;;  %v9928_v30 = vld [vmem:[%s13973_s1 + $0xc8c] ss:$16 sps:$4 sm:$0xff]   ;;  %v9950_v12 = vld [vmem:[%s13973_s1 + $0xc08] ss:$16 sps:$4 sm:$0xff]  }
 0x2c6   :  { %7393 = vmatprep.mubr.bf16.mxu1 %v11131_v31  ;;  %v7012_v35 = vpop.f32.mrf.mxu0  ;;  %v9931_v31 = vld [vmem:[%s13973_s1 + $0xe8c] ss:$16 sps:$4 sm:$0xff]   ;;  %v9959_v33 = vld [vmem:[%s13973_s1 + $0xfe8] ss:$16 sps:$4 sm:$0xff]  }
 0x2c7   :  { %v7055_v18 = vpop.f32.mrf.mxu1  ;;  %v7054_v61 = vadd.f32 %v7053_v55, %v7011_v38  ;;  %v7013_v23 = vadd.f32 %v7012_v35, %v6970_v52  ;;  %7321 = vmatpush1.bf16.msra.mxu0 %v9914_v54  ;;  %v7748_v41 = vmax.f32 %v7052_v59, 0.0  ;;  %v9955_v1 = vld [vmem:[%s13973_s1 + $0xe0c] ss:$16 sps:$4 sm:$0xff]   ;;  %v9962_v19 = vld [vmem:[%s13973_s1 + $0xdc8] ss:$16 sps:$4 sm:$0xff]  }
 0x2c8   :  { %7364 = vmatpush1.bf16.msra.mxu1 %v9917_v29  ;;  %v7014_v6 = vpop.f32.mrf.mxu0  ;;  %7322 = vmatprep.subr.bf16.mxu0 %v9922_v48  ;;  %v9958_v13 = vld [vmem:[%s13973_s1 + $0xdec] ss:$16 sps:$4 sm:$0xff]   ;;  %v9965_v54 = vld [vmem:[%s13973_s1 + $0xfc8] ss:$16 sps:$4 sm:$0xff]  }
 0x2c9   :  { %7365 = vmatprep.subr.bf16.mxu1 %v9925_v49  ;;  %v7749_v21 = vmax.f32 %v7054_v61, 0.0  ;;  %v7056_v32 = vadd.f32 %v7055_v18, %v7013_v23  ;;  %v7015_v36 = vadd.f32 %v7014_v6, %v6972_v20  ;;  %v7057_v27 = vpop.f32.mrf.mxu1  ;;  %v9964_v37 = vld [vmem:[%s13973_s1 + $0xdcc] ss:$16 sps:$4 sm:$0xff]   ;;  %v9968_v55 = vld [vmem:[%s13973_s1 + $0xda8] ss:$16 sps:$4 sm:$0xff]  }
 0x2ca   :  { %v9970_v29 = vld [vmem:[%s13973_s1 + $0xdac] ss:$16 sps:$4 sm:$0xff]   ;;  %v9971_v48 = vld [vmem:[%s13973_s1 + $0xfa8] ss:$16 sps:$4 sm:$0xff]  }
 0x2cb   :  { %v8848_v17 = vpack.c.bf16 %v7749_v21, %v7748_v41  ;;  %v7058_v60 = vadd.f32 %v7057_v27, %v7015_v36  ;;  %7323 = vmatpush1.bf16.msra.mxu0 %v9920_v3  ;;  %v7752_v40 = vmax.f32 %v7056_v32, 0.0  ;;  %v9973_v44 = vld [vmem:[%s13973_s1 + $0xfac] ss:$16 sps:$4 sm:$0xff]   ;;  %v9974_v59 = vld [vmem:[%s13973_s1 + $0xd88] ss:$16 sps:$4 sm:$0xff]  }
 0x2cc   :  { %7366 = vmatpush1.bf16.msra.mxu1 %v9923_v42  ;;  %7324 = vmatprep.subr.bf16.mxu0 %v9928_v30  ;;  %v9976_v49 = vld [vmem:[%s13973_s1 + $0xd8c] ss:$16 sps:$4 sm:$0xff]   ;;  %v9977_v38 = vld [vmem:[%s13973_s1 + $0xf88] ss:$16 sps:$4 sm:$0xff]  }
 0x2cd   :  { %7367 = vmatprep.subr.bf16.mxu1 %v9931_v31  ;;  %7780 = vst [vmem:[%s13976_s3] sm:$0xff] %v8848_v17  ;;  %v7753_v4 = vmax.f32 %v7058_v60, 0.0  ;;  %v9979_v52 = vld [vmem:[%s13973_s1 + $0xf8c] ss:$16 sps:$4 sm:$0xff]   ;;  %v9980_v20 = vld [vmem:[%s13973_s1 + $0xd68] ss:$16 sps:$4 sm:$0xff]  }
 0x2ce   :  { %v9982_v35 = vld [vmem:[%s13973_s1 + $0xd6c] ss:$16 sps:$4 sm:$0xff]   ;;  %v9983_v61 = vld [vmem:[%s13973_s1 + $0xf68] ss:$16 sps:$4 sm:$0xff]  }
 0x2cf   :  { %v8850_v7 = vpack.c.bf16 %v7753_v4, %v7752_v40  ;;  %7325 = vmatpush1.bf16.msra.mxu0 %v9926_v39  ;;  %v9985_v18 = vld [vmem:[%s13973_s1 + $0xf6c] ss:$16 sps:$4 sm:$0xff]   ;;  %v9986_v42 = vld [vmem:[%s13973_s1 + $0xd48] ss:$16 sps:$4 sm:$0xff]  }
 0x2d0   :  { %7368 = vmatpush1.bf16.msra.mxu1 %v9929_v34  ;;  %7326 = vmatprep.subr.bf16.mxu0 %v9934_v16  ;;  %v9988_v23 = vld [vmem:[%s13973_s1 + $0xd4c] ss:$16 sps:$4 sm:$0xff]   ;;  %v9989_v6 = vld [vmem:[%s13973_s1 + $0xf48] ss:$16 sps:$4 sm:$0xff]  }
 0x2d1   :  { %7369 = vmatprep.subr.bf16.mxu1 %v9937_v43  ;;  %7782 = vst [vmem:[%s13976_s3 + $0x10] sm:$0xff] %v8850_v7  ;;  %v9991_v3 = vld [vmem:[%s13973_s1 + $0xf4c] ss:$16 sps:$4 sm:$0xff]   ;;  %v9992_v41 = vld [vmem:[%s13973_s1 + $0xd28] ss:$16 sps:$4 sm:$0xff]  }
 0x2d2   :  { %v9994_v30 = vld [vmem:[%s13973_s1 + $0xd2c] ss:$16 sps:$4 sm:$0xff]   ;;  %v9995_v21 = vld [vmem:[%s13973_s1 + $0xf28] ss:$16 sps:$4 sm:$0xff]  }
 0x2d3   :  { %7327 = vmatpush1.bf16.msra.mxu0 %v9932_v46  ;;  %v9997_v31 = vld [vmem:[%s13973_s1 + $0xf2c] ss:$16 sps:$4 sm:$0xff]   ;;  %v9998_v27 = vld [vmem:[%s13973_s1 + $0xd08] ss:$16 sps:$4 sm:$0xff]  }
 0x2d4   :  { %7370 = vmatpush1.bf16.msra.mxu1 %v9935_v8  ;;  %7328 = vmatprep.subr.bf16.mxu0 %v9940_v2  ;;  %v10000_v32 = vld [vmem:[%s13973_s1 + $0xd0c] ss:$16 sps:$4 sm:$0xff]   ;;  %v10001_v17 = vld [vmem:[%s13973_s1 + $0xf08] ss:$16 sps:$4 sm:$0xff]  }
 0x2d5   :  { %7371 = vmatprep.subr.bf16.mxu1 %v9943_v0  ;;  %v10003_v36 = vld [vmem:[%s13973_s1 + $0xf0c] ss:$16 sps:$4 sm:$0xff]   ;;  %v10004_v34 = vld [vmem:[%s13973_s1 + $0x10e8] ss:$16 sps:$4 sm:$0xff]  }
 0x2d6   :  { %v10006_v60 = vld [vmem:[%s13973_s1 + $0x10ec] ss:$16 sps:$4 sm:$0xff]   ;;  %v10007_v16 = vld [vmem:[%s13973_s1 + $0x12e8] ss:$16 sps:$4 sm:$0xff]  }
 0x2d7   :  { %7329 = vmatpush1.bf16.msra.mxu0 %v9938_v62  ;;  %v10009_v39 = vld [vmem:[%s13973_s1 + $0x12ec] ss:$16 sps:$4 sm:$0xff]   ;;  %v10010_v4 = vld [vmem:[%s13973_s1 + $0x10c8] ss:$16 sps:$4 sm:$0xff]  }
 0x2d8   :  { %7372 = vmatpush1.bf16.msra.mxu1 %v9941_v5  ;;  %7330 = vmatprep.subr.bf16.mxu0 %v9946_v15  ;;  %v10012_v43 = vld [vmem:[%s13973_s1 + $0x10cc] ss:$16 sps:$4 sm:$0xff]   ;;  %v10013_v7 = vld [vmem:[%s13973_s1 + $0x12c8] ss:$16 sps:$4 sm:$0xff]  }
 0x2d9   :  { %7373 = vmatprep.subr.bf16.mxu1 %v9949_v58  ;;  %v10015_v40 = vld [vmem:[%s13973_s1 + $0x12cc] ss:$16 sps:$4 sm:$0xff]   ;;  %v10019_v8 = vld [vmem:[%s13973_s1 + $0x12a8] ss:$16 sps:$4 sm:$0xff]  }
 0x2da   :  { %v10018_v46 = vld [vmem:[%s13973_s1 + $0x10ac] ss:$16 sps:$4 sm:$0xff]   ;;  %v10025_v0 = vld [vmem:[%s13973_s1 + $0x1288] ss:$16 sps:$4 sm:$0xff]  }
 0x2db   :  { %7331 = vmatpush1.bf16.msra.mxu0 %v9944_v14  ;;  %v10024_v2 = vld [vmem:[%s13973_s1 + $0x108c] ss:$16 sps:$4 sm:$0xff]   ;;  %v10028_v15 = vld [vmem:[%s13973_s1 + $0x1068] ss:$16 sps:$4 sm:$0xff]  }
 0x2dc   :  { %7374 = vmatpush1.bf16.msra.mxu1 %v9947_v26  ;;  %7332 = vmatprep.subr.bf16.mxu0 %v9952_v9  ;;  %v10030_v62 = vld [vmem:[%s13973_s1 + $0x106c] ss:$16 sps:$4 sm:$0xff]   ;;  %v10031_v58 = vld [vmem:[%s13973_s1 + $0x1268] ss:$16 sps:$4 sm:$0xff]  }
 0x2dd   :  { %7375 = vmatprep.subr.bf16.mxu1 %v9955_v1  ;;  %v10033_v5 = vld [vmem:[%s13973_s1 + $0x126c] ss:$16 sps:$4 sm:$0xff]   ;;  %v10034_v9 = vld [vmem:[%s13973_s1 + $0x1048] ss:$16 sps:$4 sm:$0xff]  }
 0x2de   :  { %v10036_v14 = vld [vmem:[%s13973_s1 + $0x104c] ss:$16 sps:$4 sm:$0xff]   ;;  %v10037_v1 = vld [vmem:[%s13973_s1 + $0x1248] ss:$16 sps:$4 sm:$0xff]  }
 0x2df   :  { %7333 = vmatpush1.bf16.msra.mxu0 %v9950_v12  ;;  %v10039_v26 = vld [vmem:[%s13973_s1 + $0x124c] ss:$16 sps:$4 sm:$0xff]  }
 0x2e0   :  { %7376 = vmatpush1.bf16.msra.mxu1 %v9953_v63  ;;  %7334 = vmatprep.subr.bf16.mxu0 %v9958_v13  ;;  %v10042_v12 = vld [vmem:[%s13973_s1 + $0x102c] ss:$16 sps:$4 sm:$0xff]   ;;  %v10040_v13 = vld [vmem:[%s13973_s1 + $0x1028] ss:$16 sps:$4 sm:$0xff]  }
 0x2e1   :  { %7377 = vmatprep.subr.bf16.mxu1 %v9961_v22  ;;  %v10045_v63 = vld [vmem:[%s13973_s1 + $0x122c] ss:$16 sps:$4 sm:$0xff]   ;;  %v10043_v22 = vld [vmem:[%s13973_s1 + $0x1228] ss:$16 sps:$4 sm:$0xff]  }
 0x2e3   :  { %7335 = vmatpush2.bf16.msra.mxu0 %v9956_v53  ;;  %v10048_v53 = vld [vmem:[%s13973_s1 + $0x100c] ss:$16 sps:$4 sm:$0xff]  }
 0x2e4   :  { %7378 = vmatpush2.bf16.msra.mxu1 %v9959_v33  ;;  %7336 = vmatprep.subr.bf16.mxu0 %v9964_v37  ;;  %v10051_v33 = vld [vmem:[%s13973_s1 + $0x120c] ss:$16 sps:$4 sm:$0xff]   ;;  %v10046_v37 = vld [vmem:[%s13973_s1 + $0x1008] ss:$16 sps:$4 sm:$0xff]  }
 0x2e5   :  { %7379 = vmatprep.subr.bf16.mxu1 %v9967_v28  ;;  %v10049_v28 = vld [vmem:[%s13973_s1 + $0x1208] ss:$16 sps:$4 sm:$0xff]  }
 0x2e7   :  { %7337 = vmatpush2.bf16.msra.mxu0 %v9962_v19  ;;  %v10054_v19 = vld [vmem:[%s13973_s1 + $0x11ec] ss:$16 sps:$4 sm:$0xff]  }
 0x2e8   :  { %7380 = vmatpush2.bf16.msra.mxu1 %v9965_v54  ;;  %7338 = vmatprep.subr.bf16.mxu0 %v9970_v29  ;;  %v10057_v54 = vld [vmem:[%s13973_s1 + $0x13ec] ss:$16 sps:$4 sm:$0xff]   ;;  %v10052_v29 = vld [vmem:[%s13973_s1 + $0x11e8] ss:$16 sps:$4 sm:$0xff]  }
 0x2e9   :  { %7381 = vmatprep.subr.bf16.mxu1 %v9973_v44  ;;  %v10055_v44 = vld [vmem:[%s13973_s1 + $0x13e8] ss:$16 sps:$4 sm:$0xff]  }
 0x2eb   :  { %7339 = vmatpush2.bf16.msra.mxu0 %v9968_v55  ;;  %v10060_v55 = vld [vmem:[%s13973_s1 + $0x11cc] ss:$16 sps:$4 sm:$0xff]  }
 0x2ec   :  { %7382 = vmatpush2.bf16.msra.mxu1 %v9971_v48  ;;  %7340 = vmatprep.subr.bf16.mxu0 %v9976_v49  ;;  %v10063_v48 = vld [vmem:[%s13973_s1 + $0x13cc] ss:$16 sps:$4 sm:$0xff]   ;;  %v10058_v49 = vld [vmem:[%s13973_s1 + $0x11c8] ss:$16 sps:$4 sm:$0xff]  }
 0x2ed   :  { %7383 = vmatprep.subr.bf16.mxu1 %v9979_v52  ;;  %v10061_v52 = vld [vmem:[%s13973_s1 + $0x13c8] ss:$16 sps:$4 sm:$0xff]  }
 0x2ef   :  { %7341 = vmatpush2.bf16.msra.mxu0 %v9974_v59  ;;  %v10066_v59 = vld [vmem:[%s13973_s1 + $0x11ac] ss:$16 sps:$4 sm:$0xff]  }
 0x2f0   :  { %7384 = vmatpush2.bf16.msra.mxu1 %v9977_v38  ;;  %7342 = vmatprep.subr.bf16.mxu0 %v9982_v35  ;;  %v10069_v38 = vld [vmem:[%s13973_s1 + $0x13ac] ss:$16 sps:$4 sm:$0xff]   ;;  %v10064_v35 = vld [vmem:[%s13973_s1 + $0x11a8] ss:$16 sps:$4 sm:$0xff]  }
 0x2f1   :  { %7385 = vmatprep.subr.bf16.mxu1 %v9985_v18  ;;  %v10067_v18 = vld [vmem:[%s13973_s1 + $0x13a8] ss:$16 sps:$4 sm:$0xff]  }
 0x2f3   :  { %7343 = vmatpush2.bf16.msra.mxu0 %v9980_v20  ;;  %v10072_v20 = vld [vmem:[%s13973_s1 + $0x118c] ss:$16 sps:$4 sm:$0xff]  }
 0x2f4   :  { %7386 = vmatpush2.bf16.msra.mxu1 %v9983_v61  ;;  %7344 = vmatprep.subr.bf16.mxu0 %v9988_v23  ;;  %v10075_v61 = vld [vmem:[%s13973_s1 + $0x138c] ss:$16 sps:$4 sm:$0xff]   ;;  %v10070_v23 = vld [vmem:[%s13973_s1 + $0x1188] ss:$16 sps:$4 sm:$0xff]  }
 0x2f5   :  { %7387 = vmatprep.subr.bf16.mxu1 %v9991_v3  ;;  %v10073_v3 = vld [vmem:[%s13973_s1 + $0x1388] ss:$16 sps:$4 sm:$0xff]  }
 0x2f7   :  { %7345 = vmatpush2.bf16.msra.mxu0 %v9986_v42  ;;  %v10078_v42 = vld [vmem:[%s13973_s1 + $0x116c] ss:$16 sps:$4 sm:$0xff]  }
 0x2f8   :  { %7388 = vmatpush2.bf16.msra.mxu1 %v9989_v6  ;;  %7346 = vmatprep.subr.bf16.mxu0 %v9994_v30  ;;  %v10081_v6 = vld [vmem:[%s13973_s1 + $0x136c] ss:$16 sps:$4 sm:$0xff]   ;;  %v10076_v30 = vld [vmem:[%s13973_s1 + $0x1168] ss:$16 sps:$4 sm:$0xff]  }
 0x2f9   :  { %7389 = vmatprep.subr.bf16.mxu1 %v9997_v31  ;;  %v10079_v31 = vld [vmem:[%s13973_s1 + $0x1368] ss:$16 sps:$4 sm:$0xff]  }
 0x2fb   :  { %7347 = vmatpush2.bf16.msra.mxu0 %v9992_v41  ;;  %v10084_v41 = vld [vmem:[%s13973_s1 + $0x114c] ss:$16 sps:$4 sm:$0xff]  }
 0x2fc   :  { %7390 = vmatpush2.bf16.msra.mxu1 %v9995_v21  ;;  %7348 = vmatprep.subr.bf16.mxu0 %v10000_v32  ;;  %v10087_v21 = vld [vmem:[%s13973_s1 + $0x134c] ss:$16 sps:$4 sm:$0xff]   ;;  %v10082_v32 = vld [vmem:[%s13973_s1 + $0x1148] ss:$16 sps:$4 sm:$0xff]  }
 0x2fd   :  { %7391 = vmatprep.subr.bf16.mxu1 %v10003_v36  ;;  %v10085_v36 = vld [vmem:[%s13973_s1 + $0x1348] ss:$16 sps:$4 sm:$0xff]  }
 0x2ff   :  { %7349 = vmatpush2.bf16.msra.mxu0 %v9998_v27  ;;  %v10090_v27 = vld [vmem:[%s13973_s1 + $0x112c] ss:$16 sps:$4 sm:$0xff]  }
 0x300   :  { %7392 = vmatpush2.bf16.msra.mxu1 %v10001_v17  ;;  %7404 = vmatprep.subr.bf16.mxu0 %v10006_v60  ;;  %v10093_v17 = vld [vmem:[%s13973_s1 + $0x132c] ss:$16 sps:$4 sm:$0xff]   ;;  %v10088_v60 = vld [vmem:[%s13973_s1 + $0x1128] ss:$16 sps:$4 sm:$0xff]  }
 0x301   :  { %7447 = vmatprep.subr.bf16.mxu1 %v10009_v39  ;;  %v10091_v39 = vld [vmem:[%s13973_s1 + $0x1328] ss:$16 sps:$4 sm:$0xff]  }
 0x302   :  { %7351 = vmatmul.mubr.bf16.vlgmr.msra.gmra.mxu0 %v11337_v10  ;;  %v10021_v10 = vld [vmem:[%s13973_s1 + $0x12ac] ss:$16 sps:$4 sm:$0xff]  }
 0x303   :  { %7394 = vmatmul.mubr.bf16.vlgmr.msra.gmra.mxu1 %v11341_v11  ;;  %7405 = vmatpush1.bf16.msra.mxu0 %v10004_v34  ;;  %v10016_v11 = vld [vmem:[%s13973_s1 + $0x10a8] ss:$16 sps:$4 sm:$0xff]   ;;  %v10096_v34 = vld [vmem:[%s13973_s1 + $0x110c] ss:$16 sps:$4 sm:$0xff]  }
 0x304   :  { %7448 = vmatpush1.bf16.msra.mxu1 %v10007_v16  ;;  %7406 = vmatprep.subr.bf16.mxu0 %v10012_v43  ;;  %v10099_v16 = vld [vmem:[%s13973_s1 + $0x130c] ss:$16 sps:$4 sm:$0xff]   ;;  %v10094_v43 = vld [vmem:[%s13973_s1 + $0x1108] ss:$16 sps:$4 sm:$0xff]  }
 0x305   :  { %7449 = vmatprep.subr.bf16.mxu1 %v10015_v40  ;;  %7436 = vmatprep.mubr.bf16.mxu0 %v11359_v47  ;;  %v10027_v47 = vld [vmem:[%s13973_s1 + $0x128c] ss:$16 sps:$4 sm:$0xff]   ;;  %v10097_v40 = vld [vmem:[%s13973_s1 + $0x1308] ss:$16 sps:$4 sm:$0xff]  }
 0x306   :  { %7479 = vmatprep.mubr.bf16.mxu1 %v11363_v50  ;;  %v10022_v50 = vld [vmem:[%s13973_s1 + $0x1088] ss:$16 sps:$4 sm:$0xff]  }
 0x307   :  { %7407 = vmatpush1.bf16.msra.mxu0 %v10010_v4  ;;  %v10102_v4 = vld [vmem:[%s13973_s1 + $0x14ec] ss:$16 sps:$4 sm:$0xff]  }
 0x308   :  { %7450 = vmatpush1.bf16.msra.mxu1 %v10013_v7  ;;  %7408 = vmatprep.subr.bf16.mxu0 %v10018_v46  ;;  %v10105_v7 = vld [vmem:[%s13973_s1 + $0x16ec] ss:$16 sps:$4 sm:$0xff]   ;;  %v10100_v46 = vld [vmem:[%s13973_s1 + $0x14e8] ss:$16 sps:$4 sm:$0xff]  }
 0x309   :  { %7451 = vmatprep.subr.bf16.mxu1 %v10021_v10  ;;  %v10103_v10 = vld [vmem:[%s13973_s1 + $0x16e8] ss:$16 sps:$4 sm:$0xff]  }
 0x30b   :  { %7409 = vmatpush1.bf16.msra.mxu0 %v10016_v11  ;;  %v10108_v11 = vld [vmem:[%s13973_s1 + $0x14cc] ss:$16 sps:$4 sm:$0xff]  }
 0x30c   :  { %7452 = vmatpush1.bf16.msra.mxu1 %v10019_v8  ;;  %7410 = vmatprep.subr.bf16.mxu0 %v10024_v2  ;;  %v10111_v8 = vld [vmem:[%s13973_s1 + $0x16cc] ss:$16 sps:$4 sm:$0xff]   ;;  %v10106_v2 = vld [vmem:[%s13973_s1 + $0x14c8] ss:$16 sps:$4 sm:$0xff]  }
 0x30d   :  { %7453 = vmatprep.subr.bf16.mxu1 %v10027_v47  ;;  %v10109_v47 = vld [vmem:[%s13973_s1 + $0x16c8] ss:$16 sps:$4 sm:$0xff]  }
 0x30f   :  { %7411 = vmatpush1.bf16.msra.mxu0 %v10022_v50  ;;  %v10114_v50 = vld [vmem:[%s13973_s1 + $0x14ac] ss:$16 sps:$4 sm:$0xff]  }
 0x310   :  { %7454 = vmatpush1.bf16.msra.mxu1 %v10025_v0  ;;  %7412 = vmatprep.subr.bf16.mxu0 %v10030_v62  ;;  %v10115_v0 = vld [vmem:[%s13973_s1 + $0x16a8] ss:$16 sps:$4 sm:$0xff]   ;;  %v10120_v62 = vld [vmem:[%s13973_s1 + $0x148c] ss:$16 sps:$4 sm:$0xff]  }
 0x311   :  { %7455 = vmatprep.subr.bf16.mxu1 %v10033_v5  ;;  %v10121_v5 = vld [vmem:[%s13973_s1 + $0x1688] ss:$16 sps:$4 sm:$0xff]  }
 0x313   :  { %7413 = vmatpush1.bf16.msra.mxu0 %v10028_v15  ;;  %v10126_v15 = vld [vmem:[%s13973_s1 + $0x146c] ss:$16 sps:$4 sm:$0xff]  }
 0x314   :  { %7456 = vmatpush1.bf16.msra.mxu1 %v10031_v58  ;;  %7414 = vmatprep.subr.bf16.mxu0 %v10036_v14  ;;  %v10129_v58 = vld [vmem:[%s13973_s1 + $0x166c] ss:$16 sps:$4 sm:$0xff]   ;;  %v10124_v14 = vld [vmem:[%s13973_s1 + $0x1468] ss:$16 sps:$4 sm:$0xff]  }
 0x315   :  { %7457 = vmatprep.subr.bf16.mxu1 %v10039_v26  ;;  %v10127_v26 = vld [vmem:[%s13973_s1 + $0x1668] ss:$16 sps:$4 sm:$0xff]  }
 0x317   :  { %7415 = vmatpush1.bf16.msra.mxu0 %v10034_v9  ;;  %v10132_v9 = vld [vmem:[%s13973_s1 + $0x144c] ss:$16 sps:$4 sm:$0xff]  }
 0x318   :  { %7458 = vmatpush1.bf16.msra.mxu1 %v10037_v1  ;;  %7416 = vmatprep.subr.bf16.mxu0 %v10042_v12  ;;  %v10135_v1 = vld [vmem:[%s13973_s1 + $0x164c] ss:$16 sps:$4 sm:$0xff]   ;;  %v10130_v12 = vld [vmem:[%s13973_s1 + $0x1448] ss:$16 sps:$4 sm:$0xff]  }
 0x319   :  { %7459 = vmatprep.subr.bf16.mxu1 %v10045_v63  ;;  %v10133_v63 = vld [vmem:[%s13973_s1 + $0x1648] ss:$16 sps:$4 sm:$0xff]  }
 0x31b   :  { %7417 = vmatpush1.bf16.msra.mxu0 %v10040_v13  ;;  %v10138_v13 = vld [vmem:[%s13973_s1 + $0x142c] ss:$16 sps:$4 sm:$0xff]  }
 0x31c   :  { %7460 = vmatpush1.bf16.msra.mxu1 %v10043_v22  ;;  %7418 = vmatprep.subr.bf16.mxu0 %v10048_v53  ;;  %v10141_v22 = vld [vmem:[%s13973_s1 + $0x162c] ss:$16 sps:$4 sm:$0xff]   ;;  %v10136_v53 = vld [vmem:[%s13973_s1 + $0x1428] ss:$16 sps:$4 sm:$0xff]  }
 0x31d   :  { %7461 = vmatprep.subr.bf16.mxu1 %v10051_v33  ;;  %v10139_v33 = vld [vmem:[%s13973_s1 + $0x1628] ss:$16 sps:$4 sm:$0xff]  }
 0x31f   :  { %7419 = vmatpush1.bf16.msra.mxu0 %v10046_v37  ;;  %v10144_v37 = vld [vmem:[%s13973_s1 + $0x140c] ss:$16 sps:$4 sm:$0xff]  }
 0x320   :  { %7462 = vmatpush1.bf16.msra.mxu1 %v10049_v28  ;;  %7420 = vmatprep.subr.bf16.mxu0 %v10054_v19  ;;  %v10147_v28 = vld [vmem:[%s13973_s1 + $0x160c] ss:$16 sps:$4 sm:$0xff]   ;;  %v10142_v19 = vld [vmem:[%s13973_s1 + $0x1408] ss:$16 sps:$4 sm:$0xff]  }
 0x321   :  { %7463 = vmatprep.subr.bf16.mxu1 %v10057_v54  ;;  %v10145_v54 = vld [vmem:[%s13973_s1 + $0x1608] ss:$16 sps:$4 sm:$0xff]  }
 0x323   :  { %7421 = vmatpush2.bf16.msra.mxu0 %v10052_v29  ;;  %v10150_v29 = vld [vmem:[%s13973_s1 + $0x15ec] ss:$16 sps:$4 sm:$0xff]  }
 0x324   :  { %7464 = vmatpush2.bf16.msra.mxu1 %v10055_v44  ;;  %7422 = vmatprep.subr.bf16.mxu0 %v10060_v55  ;;  %v10153_v44 = vld [vmem:[%s13973_s1 + $0x17ec] ss:$16 sps:$4 sm:$0xff]   ;;  %v10148_v55 = vld [vmem:[%s13973_s1 + $0x15e8] ss:$16 sps:$4 sm:$0xff]  }
 0x325   :  { %7465 = vmatprep.subr.bf16.mxu1 %v10063_v48  ;;  %v10151_v48 = vld [vmem:[%s13973_s1 + $0x17e8] ss:$16 sps:$4 sm:$0xff]  }
 0x327   :  { %7423 = vmatpush2.bf16.msra.mxu0 %v10058_v49  ;;  %v10156_v49 = vld [vmem:[%s13973_s1 + $0x15cc] ss:$16 sps:$4 sm:$0xff]  }
 0x328   :  { %7466 = vmatpush2.bf16.msra.mxu1 %v10061_v52  ;;  %7424 = vmatprep.subr.bf16.mxu0 %v10066_v59  ;;  %v10159_v52 = vld [vmem:[%s13973_s1 + $0x17cc] ss:$16 sps:$4 sm:$0xff]   ;;  %v10154_v59 = vld [vmem:[%s13973_s1 + $0x15c8] ss:$16 sps:$4 sm:$0xff]  }
 0x329   :  { %7467 = vmatprep.subr.bf16.mxu1 %v10069_v38  ;;  %v10157_v38 = vld [vmem:[%s13973_s1 + $0x17c8] ss:$16 sps:$4 sm:$0xff]  }
 0x32b   :  { %7425 = vmatpush2.bf16.msra.mxu0 %v10064_v35  ;;  %v10162_v35 = vld [vmem:[%s13973_s1 + $0x15ac] ss:$16 sps:$4 sm:$0xff]  }
 0x32c   :  { %7468 = vmatpush2.bf16.msra.mxu1 %v10067_v18  ;;  %7426 = vmatprep.subr.bf16.mxu0 %v10072_v20  ;;  %v10165_v18 = vld [vmem:[%s13973_s1 + $0x17ac] ss:$16 sps:$4 sm:$0xff]   ;;  %v10160_v20 = vld [vmem:[%s13973_s1 + $0x15a8] ss:$16 sps:$4 sm:$0xff]  }
 0x32d   :  { %7469 = vmatprep.subr.bf16.mxu1 %v10075_v61  ;;  %v10163_v61 = vld [vmem:[%s13973_s1 + $0x17a8] ss:$16 sps:$4 sm:$0xff]  }
 0x32f   :  { %7427 = vmatpush2.bf16.msra.mxu0 %v10070_v23  ;;  %v10168_v23 = vld [vmem:[%s13973_s1 + $0x158c] ss:$16 sps:$4 sm:$0xff]  }
 0x330   :  { %7470 = vmatpush2.bf16.msra.mxu1 %v10073_v3  ;;  %7428 = vmatprep.subr.bf16.mxu0 %v10078_v42  ;;  %v10171_v3 = vld [vmem:[%s13973_s1 + $0x178c] ss:$16 sps:$4 sm:$0xff]   ;;  %v10166_v42 = vld [vmem:[%s13973_s1 + $0x1588] ss:$16 sps:$4 sm:$0xff]  }
 0x331   :  { %7471 = vmatprep.subr.bf16.mxu1 %v10081_v6  ;;  %v10169_v6 = vld [vmem:[%s13973_s1 + $0x1788] ss:$16 sps:$4 sm:$0xff]  }
 0x333   :  { %7429 = vmatpush2.bf16.msra.mxu0 %v10076_v30  ;;  %v10174_v30 = vld [vmem:[%s13973_s1 + $0x156c] ss:$16 sps:$4 sm:$0xff]  }
 0x334   :  { %7472 = vmatpush2.bf16.msra.mxu1 %v10079_v31  ;;  %7430 = vmatprep.subr.bf16.mxu0 %v10084_v41  ;;  %v10177_v31 = vld [vmem:[%s13973_s1 + $0x176c] ss:$16 sps:$4 sm:$0xff]   ;;  %v10172_v41 = vld [vmem:[%s13973_s1 + $0x1568] ss:$16 sps:$4 sm:$0xff]  }
 0x335   :  { %7473 = vmatprep.subr.bf16.mxu1 %v10087_v21  ;;  %v10175_v21 = vld [vmem:[%s13973_s1 + $0x1768] ss:$16 sps:$4 sm:$0xff]  }
 0x337   :  { %7431 = vmatpush2.bf16.msra.mxu0 %v10082_v32  ;;  %v10180_v32 = vld [vmem:[%s13973_s1 + $0x154c] ss:$16 sps:$4 sm:$0xff]  }
 0x338   :  { %7474 = vmatpush2.bf16.msra.mxu1 %v10085_v36  ;;  %7432 = vmatprep.subr.bf16.mxu0 %v10090_v27  ;;  %v10183_v36 = vld [vmem:[%s13973_s1 + $0x174c] ss:$16 sps:$4 sm:$0xff]   ;;  %v10178_v27 = vld [vmem:[%s13973_s1 + $0x1548] ss:$16 sps:$4 sm:$0xff]  }
 0x339   :  { %7475 = vmatprep.subr.bf16.mxu1 %v10093_v17  ;;  %v10181_v17 = vld [vmem:[%s13973_s1 + $0x1748] ss:$16 sps:$4 sm:$0xff]  }
 0x33b   :  { %7433 = vmatpush2.bf16.msra.mxu0 %v10088_v60  ;;  %v10186_v60 = vld [vmem:[%s13973_s1 + $0x152c] ss:$16 sps:$4 sm:$0xff]  }
 0x33c   :  { %7476 = vmatpush2.bf16.msra.mxu1 %v10091_v39  ;;  %7434 = vmatprep.subr.bf16.mxu0 %v10096_v34  ;;  %v10189_v39 = vld [vmem:[%s13973_s1 + $0x172c] ss:$16 sps:$4 sm:$0xff]   ;;  %v10184_v34 = vld [vmem:[%s13973_s1 + $0x1528] ss:$16 sps:$4 sm:$0xff]  }
 0x33d   :  { %7477 = vmatprep.subr.bf16.mxu1 %v10099_v16  ;;  %v10187_v16 = vld [vmem:[%s13973_s1 + $0x1728] ss:$16 sps:$4 sm:$0xff]  }
 0x33f   :  { %7435 = vmatpush2.bf16.msra.mxu0 %v10094_v43  ;;  %v10192_v43 = vld [vmem:[%s13973_s1 + $0x150c] ss:$16 sps:$4 sm:$0xff]  }
 0x340   :  { %7478 = vmatpush2.bf16.msra.mxu1 %v10097_v40  ;;  %7490 = vmatprep.subr.bf16.mxu0 %v10102_v4  ;;  %v10195_v40 = vld [vmem:[%s13973_s1 + $0x170c] ss:$16 sps:$4 sm:$0xff]   ;;  %v10190_v4 = vld [vmem:[%s13973_s1 + $0x1508] ss:$16 sps:$4 sm:$0xff]  }
 0x341   :  { %7533 = vmatprep.subr.bf16.mxu1 %v10105_v7  ;;  %v10193_v7 = vld [vmem:[%s13973_s1 + $0x1708] ss:$16 sps:$4 sm:$0xff]  }
 0x342   :  { %7437 = vmatmul.mubr.bf16.vlgmr.msra.gmra.mxu0 %v11559_v45  ;;  %v10117_v45 = vld [vmem:[%s13973_s1 + $0x16ac] ss:$16 sps:$4 sm:$0xff]  }
 0x343   :  { %7480 = vmatmul.mubr.bf16.vlgmr.msra.gmra.mxu1 %v11563_v51  ;;  %7491 = vmatpush1.bf16.msra.mxu0 %v10100_v46  ;;  %v10112_v51 = vld [vmem:[%s13973_s1 + $0x14a8] ss:$16 sps:$4 sm:$0xff]   ;;  %v10198_v46 = vld [vmem:[%s13973_s1 + $0x18ec] ss:$16 sps:$4 sm:$0xff]  }
 0x344   :  { %7534 = vmatpush1.bf16.msra.mxu1 %v10103_v10  ;;  %7492 = vmatprep.subr.bf16.mxu0 %v10108_v11  ;;  %v10201_v10 = vld [vmem:[%s13973_s1 + $0x1aec] ss:$16 sps:$4 sm:$0xff]   ;;  %v10196_v11 = vld [vmem:[%s13973_s1 + $0x18e8] ss:$16 sps:$4 sm:$0xff]  }
 0x345   :  { %7535 = vmatprep.subr.bf16.mxu1 %v10111_v8  ;;  %7522 = vmatprep.mubr.bf16.mxu0 %v11597_v56  ;;  %v10123_v56 = vld [vmem:[%s13973_s1 + $0x168c] ss:$16 sps:$4 sm:$0xff]   ;;  %v10199_v8 = vld [vmem:[%s13973_s1 + $0x1ae8] ss:$16 sps:$4 sm:$0xff]  }
 0x346   :  { %7565 = vmatprep.mubr.bf16.mxu1 %v11601_v57  ;;  %v10118_v57 = vld [vmem:[%s13973_s1 + $0x1488] ss:$16 sps:$4 sm:$0xff]  }
 0x347   :  { %7493 = vmatpush1.bf16.msra.mxu0 %v10106_v2  ;;  %v10204_v2 = vld [vmem:[%s13973_s1 + $0x18cc] ss:$16 sps:$4 sm:$0xff]  }
 0x348   :  { %7536 = vmatpush1.bf16.msra.mxu1 %v10109_v47  ;;  %7494 = vmatprep.subr.bf16.mxu0 %v10114_v50  ;;  %v10207_v47 = vld [vmem:[%s13973_s1 + $0x1acc] ss:$16 sps:$4 sm:$0xff]   ;;  %v10202_v50 = vld [vmem:[%s13973_s1 + $0x18c8] ss:$16 sps:$4 sm:$0xff]  }
 0x349   :  { %7537 = vmatprep.subr.bf16.mxu1 %v10117_v45  ;;  %v10205_v45 = vld [vmem:[%s13973_s1 + $0x1ac8] ss:$16 sps:$4 sm:$0xff]  }
 0x34b   :  { %7495 = vmatpush1.bf16.msra.mxu0 %v10112_v51  ;;  %v10210_v51 = vld [vmem:[%s13973_s1 + $0x18ac] ss:$16 sps:$4 sm:$0xff]  }
 0x34c   :  { %7538 = vmatpush1.bf16.msra.mxu1 %v10115_v0  ;;  %7496 = vmatprep.subr.bf16.mxu0 %v10120_v62  ;;  %v13997_v0 = vld [vmem:[#allocation3_spill] sm:$0xff] }
 0x34d   :  { %7539 = vmatprep.subr.bf16.mxu1 %v10123_v56  ;;  %v10208_v62 = vld [vmem:[%s13973_s1 + $0x18a8] ss:$16 sps:$4 sm:$0xff]  }
 0x34e   :  { %v10211_v56 = vld [vmem:[%s13973_s1 + $0x1aa8] ss:$16 sps:$4 sm:$0xff]  }
 0x34f   :  { %7497 = vmatpush1.bf16.msra.mxu0 %v10118_v57  ;;  %v10216_v57 = vld [vmem:[%s13973_s1 + $0x188c] ss:$16 sps:$4 sm:$0xff]  }
 0x350   :  { %7540 = vmatpush1.bf16.msra.mxu1 %v10121_v5  ;;  %7498 = vmatprep.subr.bf16.mxu0 %v10126_v15  ;;  %v10219_v5 = vld [vmem:[%s13973_s1 + $0x1a8c] ss:$16 sps:$4 sm:$0xff]   ;;  %v10214_v15 = vld [vmem:[%s13973_s1 + $0x1888] ss:$16 sps:$4 sm:$0xff]  }
 0x351   :  { %7541 = vmatprep.subr.bf16.mxu1 %v10129_v58  ;;  %v10217_v58 = vld [vmem:[%s13973_s1 + $0x1a88] ss:$16 sps:$4 sm:$0xff]  }
 0x353   :  { %7499 = vmatpush1.bf16.msra.mxu0 %v10124_v14  ;;  %v10222_v14 = vld [vmem:[%s13973_s1 + $0x186c] ss:$16 sps:$4 sm:$0xff]  }
 0x354   :  { %7542 = vmatpush1.bf16.msra.mxu1 %v10127_v26  ;;  %7500 = vmatprep.subr.bf16.mxu0 %v10132_v9  ;;  %v10225_v26 = vld [vmem:[%s13973_s1 + $0x1a6c] ss:$16 sps:$4 sm:$0xff]   ;;  %v10220_v9 = vld [vmem:[%s13973_s1 + $0x1868] ss:$16 sps:$4 sm:$0xff]  }
 0x355   :  { %7543 = vmatprep.subr.bf16.mxu1 %v10135_v1  ;;  %v10223_v1 = vld [vmem:[%s13973_s1 + $0x1a68] ss:$16 sps:$4 sm:$0xff]  }
 0x357   :  { %7501 = vmatpush1.bf16.msra.mxu0 %v10130_v12  ;;  %v10228_v12 = vld [vmem:[%s13973_s1 + $0x184c] ss:$16 sps:$4 sm:$0xff]  }
 0x358   :  { %7544 = vmatpush1.bf16.msra.mxu1 %v10133_v63  ;;  %7502 = vmatprep.subr.bf16.mxu0 %v10138_v13  ;;  %v10231_v63 = vld [vmem:[%s13973_s1 + $0x1a4c] ss:$16 sps:$4 sm:$0xff]   ;;  %v10226_v13 = vld [vmem:[%s13973_s1 + $0x1848] ss:$16 sps:$4 sm:$0xff]  }
 0x359   :  { %7545 = vmatprep.subr.bf16.mxu1 %v10141_v22  ;;  %v10229_v22 = vld [vmem:[%s13973_s1 + $0x1a48] ss:$16 sps:$4 sm:$0xff]  }
 0x35b   :  { %7503 = vmatpush1.bf16.msra.mxu0 %v10136_v53  ;;  %v10234_v53 = vld [vmem:[%s13973_s1 + $0x182c] ss:$16 sps:$4 sm:$0xff]  }
 0x35c   :  { %7546 = vmatpush1.bf16.msra.mxu1 %v10139_v33  ;;  %7504 = vmatprep.subr.bf16.mxu0 %v10144_v37  ;;  %v10237_v33 = vld [vmem:[%s13973_s1 + $0x1a2c] ss:$16 sps:$4 sm:$0xff]   ;;  %v10232_v37 = vld [vmem:[%s13973_s1 + $0x1828] ss:$16 sps:$4 sm:$0xff]  }
 0x35d   :  { %7547 = vmatprep.subr.bf16.mxu1 %v10147_v28  ;;  %v10235_v28 = vld [vmem:[%s13973_s1 + $0x1a28] ss:$16 sps:$4 sm:$0xff]  }
 0x35f   :  { %7505 = vmatpush1.bf16.msra.mxu0 %v10142_v19  ;;  %v10240_v19 = vld [vmem:[%s13973_s1 + $0x180c] ss:$16 sps:$4 sm:$0xff]  }
 0x360   :  { %7548 = vmatpush1.bf16.msra.mxu1 %v10145_v54  ;;  %7506 = vmatprep.subr.bf16.mxu0 %v10150_v29  ;;  %v10243_v54 = vld [vmem:[%s13973_s1 + $0x1a0c] ss:$16 sps:$4 sm:$0xff]   ;;  %v10238_v29 = vld [vmem:[%s13973_s1 + $0x1808] ss:$16 sps:$4 sm:$0xff]  }
 0x361   :  { %7549 = vmatprep.subr.bf16.mxu1 %v10153_v44  ;;  %v10241_v44 = vld [vmem:[%s13973_s1 + $0x1a08] ss:$16 sps:$4 sm:$0xff]  }
 0x363   :  { %7507 = vmatpush2.bf16.msra.mxu0 %v10148_v55  ;;  %v10246_v55 = vld [vmem:[%s13973_s1 + $0x19ec] ss:$16 sps:$4 sm:$0xff]  }
 0x364   :  { %7550 = vmatpush2.bf16.msra.mxu1 %v10151_v48  ;;  %7508 = vmatprep.subr.bf16.mxu0 %v10156_v49  ;;  %v10249_v48 = vld [vmem:[%s13973_s1 + $0x1bec] ss:$16 sps:$4 sm:$0xff]   ;;  %v10244_v49 = vld [vmem:[%s13973_s1 + $0x19e8] ss:$16 sps:$4 sm:$0xff]  }
 0x365   :  { %7551 = vmatprep.subr.bf16.mxu1 %v10159_v52  ;;  %v10247_v52 = vld [vmem:[%s13973_s1 + $0x1be8] ss:$16 sps:$4 sm:$0xff]  }
 0x367   :  { %7509 = vmatpush2.bf16.msra.mxu0 %v10154_v59  ;;  %v10252_v59 = vld [vmem:[%s13973_s1 + $0x19cc] ss:$16 sps:$4 sm:$0xff]  }
 0x368   :  { %7552 = vmatpush2.bf16.msra.mxu1 %v10157_v38  ;;  %7510 = vmatprep.subr.bf16.mxu0 %v10162_v35  ;;  %v10255_v38 = vld [vmem:[%s13973_s1 + $0x1bcc] ss:$16 sps:$4 sm:$0xff]   ;;  %v10250_v35 = vld [vmem:[%s13973_s1 + $0x19c8] ss:$16 sps:$4 sm:$0xff]  }
 0x369   :  { %7553 = vmatprep.subr.bf16.mxu1 %v10165_v18  ;;  %v10253_v18 = vld [vmem:[%s13973_s1 + $0x1bc8] ss:$16 sps:$4 sm:$0xff]  }
 0x36b   :  { %7511 = vmatpush2.bf16.msra.mxu0 %v10160_v20  ;;  %v10258_v20 = vld [vmem:[%s13973_s1 + $0x19ac] ss:$16 sps:$4 sm:$0xff]  }
 0x36c   :  { %7554 = vmatpush2.bf16.msra.mxu1 %v10163_v61  ;;  %7512 = vmatprep.subr.bf16.mxu0 %v10168_v23  ;;  %v10261_v61 = vld [vmem:[%s13973_s1 + $0x1bac] ss:$16 sps:$4 sm:$0xff]   ;;  %v10256_v23 = vld [vmem:[%s13973_s1 + $0x19a8] ss:$16 sps:$4 sm:$0xff]  }
 0x36d   :  { %7555 = vmatprep.subr.bf16.mxu1 %v10171_v3  ;;  %v10259_v3 = vld [vmem:[%s13973_s1 + $0x1ba8] ss:$16 sps:$4 sm:$0xff]  }
 0x36f   :  { %7513 = vmatpush2.bf16.msra.mxu0 %v10166_v42  ;;  %v10264_v42 = vld [vmem:[%s13973_s1 + $0x198c] ss:$16 sps:$4 sm:$0xff]  }
 0x370   :  { %7556 = vmatpush2.bf16.msra.mxu1 %v10169_v6  ;;  %7514 = vmatprep.subr.bf16.mxu0 %v10174_v30  ;;  %v10267_v6 = vld [vmem:[%s13973_s1 + $0x1b8c] ss:$16 sps:$4 sm:$0xff]   ;;  %v10262_v30 = vld [vmem:[%s13973_s1 + $0x1988] ss:$16 sps:$4 sm:$0xff]  }
 0x371   :  { %7557 = vmatprep.subr.bf16.mxu1 %v10177_v31  ;;  %v10265_v31 = vld [vmem:[%s13973_s1 + $0x1b88] ss:$16 sps:$4 sm:$0xff]  }
 0x373   :  { %7515 = vmatpush2.bf16.msra.mxu0 %v10172_v41  ;;  %v10270_v41 = vld [vmem:[%s13973_s1 + $0x196c] ss:$16 sps:$4 sm:$0xff]  }
 0x374   :  { %7558 = vmatpush2.bf16.msra.mxu1 %v10175_v21  ;;  %7516 = vmatprep.subr.bf16.mxu0 %v10180_v32  ;;  %v10273_v21 = vld [vmem:[%s13973_s1 + $0x1b6c] ss:$16 sps:$4 sm:$0xff]   ;;  %v10268_v32 = vld [vmem:[%s13973_s1 + $0x1968] ss:$16 sps:$4 sm:$0xff]  }
 0x375   :  { %7559 = vmatprep.subr.bf16.mxu1 %v10183_v36  ;;  %v10271_v36 = vld [vmem:[%s13973_s1 + $0x1b68] ss:$16 sps:$4 sm:$0xff]  }
 0x377   :  { %7517 = vmatpush2.bf16.msra.mxu0 %v10178_v27  ;;  %v10276_v27 = vld [vmem:[%s13973_s1 + $0x194c] ss:$16 sps:$4 sm:$0xff]  }
 0x378   :  { %7560 = vmatpush2.bf16.msra.mxu1 %v10181_v17  ;;  %7518 = vmatprep.subr.bf16.mxu0 %v10186_v60  ;;  %v10279_v17 = vld [vmem:[%s13973_s1 + $0x1b4c] ss:$16 sps:$4 sm:$0xff]   ;;  %v10274_v60 = vld [vmem:[%s13973_s1 + $0x1948] ss:$16 sps:$4 sm:$0xff]  }
 0x379   :  { %7561 = vmatprep.subr.bf16.mxu1 %v10189_v39  ;;  %v10277_v39 = vld [vmem:[%s13973_s1 + $0x1b48] ss:$16 sps:$4 sm:$0xff]  }
 0x37b   :  { %7519 = vmatpush2.bf16.msra.mxu0 %v10184_v34  ;;  %v10282_v34 = vld [vmem:[%s13973_s1 + $0x192c] ss:$16 sps:$4 sm:$0xff]  }
 0x37c   :  { %7562 = vmatpush2.bf16.msra.mxu1 %v10187_v16  ;;  %7520 = vmatprep.subr.bf16.mxu0 %v10192_v43  ;;  %v10285_v16 = vld [vmem:[%s13973_s1 + $0x1b2c] ss:$16 sps:$4 sm:$0xff]   ;;  %v10280_v43 = vld [vmem:[%s13973_s1 + $0x1928] ss:$16 sps:$4 sm:$0xff]  }
 0x37d   :  { %7563 = vmatprep.subr.bf16.mxu1 %v10195_v40  ;;  %v10283_v40 = vld [vmem:[%s13973_s1 + $0x1b28] ss:$16 sps:$4 sm:$0xff]  }
 0x37f   :  { %7521 = vmatpush2.bf16.msra.mxu0 %v10190_v4  ;;  %v10288_v4 = vld [vmem:[%s13973_s1 + $0x190c] ss:$16 sps:$4 sm:$0xff]  }
 0x380   :  { %7564 = vmatpush2.bf16.msra.mxu1 %v10193_v7  ;;  %7576 = vmatprep.subr.bf16.mxu0 %v10198_v46  ;;  %v10291_v7 = vld [vmem:[%s13973_s1 + $0x1b0c] ss:$16 sps:$4 sm:$0xff]   ;;  %v10286_v46 = vld [vmem:[%s13973_s1 + $0x1908] ss:$16 sps:$4 sm:$0xff]  }
 0x381   :  { %7619 = vmatprep.subr.bf16.mxu1 %v10201_v10  ;;  %v10289_v10 = vld [vmem:[%s13973_s1 + $0x1b08] ss:$16 sps:$4 sm:$0xff]  }
 0x382   :  { %7523 = vmatmul.mubr.bf16.vlgmr.msra.gmra.mxu0 %v11791_v24  ;;  %v10213_v24 = vld [vmem:[%s13973_s1 + $0x1aac] ss:$16 sps:$4 sm:$0xff]  }
 0x383   :  { %7566 = vmatmul.mubr.bf16.vlgmr.msra.gmra.mxu1 %v11795_v25  ;;  %7577 = vmatpush1.bf16.msra.mxu0 %v10196_v11  ;;  %v13996_v25 = vld [vmem:[#allocation2_spill] sm:$0xff]  ;;  %v10294_v11 = vld [vmem:[%s13973_s1 + $0x1cec] ss:$16 sps:$4 sm:$0xff]  }
 0x384   :  { %7620 = vmatpush1.bf16.msra.mxu1 %v10199_v8  ;;  %7578 = vmatprep.subr.bf16.mxu0 %v10204_v2  ;;  %v10297_v8 = vld [vmem:[%s13973_s1 + $0x1eec] ss:$16 sps:$4 sm:$0xff]   ;;  %v10292_v2 = vld [vmem:[%s13973_s1 + $0x1ce8] ss:$16 sps:$4 sm:$0xff]  }
 0x385   :  { %7621 = vmatprep.subr.bf16.mxu1 %v10207_v47  ;;  %7608 = vmatprep.mubr.bf16.mxu0 %v13996_v25  ;;  %v10295_v47 = vld [vmem:[%s13973_s1 + $0x1ee8] ss:$16 sps:$4 sm:$0xff]  }
 0x386   :  { %7651 = vmatprep.mubr.bf16.mxu1 %v13997_v0  ;;  %v10298_v25 = vld [vmem:[%s13973_s1 + $0x1cc8] ss:$16 sps:$4 sm:$0xff]  }
 0x387   :  { %7579 = vmatpush1.bf16.msra.mxu0 %v10202_v50  ;;  %v10300_v50 = vld [vmem:[%s13973_s1 + $0x1ccc] ss:$16 sps:$4 sm:$0xff]   ;;  %v10301_v0 = vld [vmem:[%s13973_s1 + $0x1ec8] ss:$16 sps:$4 sm:$0xff]  }
 0x388   :  { %7622 = vmatpush1.bf16.msra.mxu1 %v10205_v45  ;;  %7580 = vmatprep.subr.bf16.mxu0 %v10210_v51  ;;  %v10303_v45 = vld [vmem:[%s13973_s1 + $0x1ecc] ss:$16 sps:$4 sm:$0xff]   ;;  %v13998_v51 = vld [vmem:[#allocation4_spill] sm:$0xff] }
 0x389   :  { %7623 = vmatprep.subr.bf16.mxu1 %v10213_v24  ;;  %v13999_v24 = vld [vmem:[#allocation5_spill] sm:$0xff] }
 0x38b   :  { %7581 = vmatpush1.bf16.msra.mxu0 %v10208_v62  ;;  %v10306_v62 = vld [vmem:[%s13973_s1 + $0x1cac] ss:$16 sps:$4 sm:$0xff]  }
 0x38c   :  { %7624 = vmatpush1.bf16.msra.mxu1 %v10211_v56  ;;  %7582 = vmatprep.subr.bf16.mxu0 %v10216_v57  ;;  %v10309_v56 = vld [vmem:[%s13973_s1 + $0x1eac] ss:$16 sps:$4 sm:$0xff]   ;;  %v14000_v57 = vld [vmem:[#allocation6_spill] sm:$0xff] }
 0x38d   :  { %7625 = vmatprep.subr.bf16.mxu1 %v10219_v5  ;;  %v14001_v5 = vld [vmem:[#allocation7_spill] sm:$0xff] }
 0x38f   :  { %7583 = vmatpush1.bf16.msra.mxu0 %v10214_v15  ;;  %v10304_v15 = vld [vmem:[%s13973_s1 + $0x1ca8] ss:$16 sps:$4 sm:$0xff]  }
 0x390   :  { %7626 = vmatpush1.bf16.msra.mxu1 %v10217_v58  ;;  %7584 = vmatprep.subr.bf16.mxu0 %v10222_v14  ;;  %v10307_v58 = vld [vmem:[%s13973_s1 + $0x1ea8] ss:$16 sps:$4 sm:$0xff]   ;;  %v10312_v14 = vld [vmem:[%s13973_s1 + $0x1c8c] ss:$16 sps:$4 sm:$0xff]  }
 0x391   :  { %7627 = vmatprep.subr.bf16.mxu1 %v10225_v26  ;;  %v10315_v26 = vld [vmem:[%s13973_s1 + $0x1e8c] ss:$16 sps:$4 sm:$0xff]  }
 0x393   :  { %7585 = vmatpush1.bf16.msra.mxu0 %v10220_v9  ;;  %v10310_v9 = vld [vmem:[%s13973_s1 + $0x1c88] ss:$16 sps:$4 sm:$0xff]  }
 0x394   :  { %7628 = vmatpush1.bf16.msra.mxu1 %v10223_v1  ;;  %7586 = vmatprep.subr.bf16.mxu0 %v10228_v12  ;;  %v10313_v1 = vld [vmem:[%s13973_s1 + $0x1e88] ss:$16 sps:$4 sm:$0xff]   ;;  %v10318_v12 = vld [vmem:[%s13973_s1 + $0x1c6c] ss:$16 sps:$4 sm:$0xff]  }
 0x395   :  { %7629 = vmatprep.subr.bf16.mxu1 %v10231_v63  ;;  %v10321_v63 = vld [vmem:[%s13973_s1 + $0x1e6c] ss:$16 sps:$4 sm:$0xff]  }
 0x397   :  { %7587 = vmatpush1.bf16.msra.mxu0 %v10226_v13  ;;  %v10316_v13 = vld [vmem:[%s13973_s1 + $0x1c68] ss:$16 sps:$4 sm:$0xff]  }
 0x398   :  { %7630 = vmatpush1.bf16.msra.mxu1 %v10229_v22  ;;  %7588 = vmatprep.subr.bf16.mxu0 %v10234_v53  ;;  %v10319_v22 = vld [vmem:[%s13973_s1 + $0x1e68] ss:$16 sps:$4 sm:$0xff]   ;;  %v10324_v53 = vld [vmem:[%s13973_s1 + $0x1c4c] ss:$16 sps:$4 sm:$0xff]  }
 0x399   :  { %7631 = vmatprep.subr.bf16.mxu1 %v10237_v33  ;;  %v10327_v33 = vld [vmem:[%s13973_s1 + $0x1e4c] ss:$16 sps:$4 sm:$0xff]  }
 0x39b   :  { %7589 = vmatpush1.bf16.msra.mxu0 %v10232_v37  ;;  %v10322_v37 = vld [vmem:[%s13973_s1 + $0x1c48] ss:$16 sps:$4 sm:$0xff]  }
 0x39c   :  { %7632 = vmatpush1.bf16.msra.mxu1 %v10235_v28  ;;  %7590 = vmatprep.subr.bf16.mxu0 %v10240_v19  ;;  %v10325_v28 = vld [vmem:[%s13973_s1 + $0x1e48] ss:$16 sps:$4 sm:$0xff]   ;;  %v10330_v19 = vld [vmem:[%s13973_s1 + $0x1c2c] ss:$16 sps:$4 sm:$0xff]  }
 0x39d   :  { %7633 = vmatprep.subr.bf16.mxu1 %v10243_v54  ;;  %v10333_v54 = vld [vmem:[%s13973_s1 + $0x1e2c] ss:$16 sps:$4 sm:$0xff]  }
 0x39f   :  { %7591 = vmatpush1.bf16.msra.mxu0 %v10238_v29  ;;  %v10328_v29 = vld [vmem:[%s13973_s1 + $0x1c28] ss:$16 sps:$4 sm:$0xff]  }
 0x3a0   :  { %7634 = vmatpush1.bf16.msra.mxu1 %v10241_v44  ;;  %7592 = vmatprep.subr.bf16.mxu0 %v10246_v55  ;;  %v10331_v44 = vld [vmem:[%s13973_s1 + $0x1e28] ss:$16 sps:$4 sm:$0xff]   ;;  %v10336_v55 = vld [vmem:[%s13973_s1 + $0x1c0c] ss:$16 sps:$4 sm:$0xff]  }
 0x3a1   :  { %7635 = vmatprep.subr.bf16.mxu1 %v10249_v48  ;;  %v10339_v48 = vld [vmem:[%s13973_s1 + $0x1e0c] ss:$16 sps:$4 sm:$0xff]  }
 0x3a3   :  { %7593 = vmatpush2.bf16.msra.mxu0 %v10244_v49  ;;  %v10334_v49 = vld [vmem:[%s13973_s1 + $0x1c08] ss:$16 sps:$4 sm:$0xff]  }
 0x3a4   :  { %7636 = vmatpush2.bf16.msra.mxu1 %v10247_v52  ;;  %7594 = vmatprep.subr.bf16.mxu0 %v10252_v59  ;;  %v10337_v52 = vld [vmem:[%s13973_s1 + $0x1e08] ss:$16 sps:$4 sm:$0xff]   ;;  %v10342_v59 = vld [vmem:[%s13973_s1 + $0x1dec] ss:$16 sps:$4 sm:$0xff]  }
 0x3a5   :  { %7637 = vmatprep.subr.bf16.mxu1 %v10255_v38  ;;  %v10345_v38 = vld [vmem:[%s13973_s1 + $0x1fec] ss:$16 sps:$4 sm:$0xff]  }
 0x3a7   :  { %7595 = vmatpush2.bf16.msra.mxu0 %v10250_v35  ;;  %v10340_v35 = vld [vmem:[%s13973_s1 + $0x1de8] ss:$16 sps:$4 sm:$0xff]  }
 0x3a8   :  { %7638 = vmatpush2.bf16.msra.mxu1 %v10253_v18  ;;  %7596 = vmatprep.subr.bf16.mxu0 %v10258_v20  ;;  %v10343_v18 = vld [vmem:[%s13973_s1 + $0x1fe8] ss:$16 sps:$4 sm:$0xff]   ;;  %v10348_v20 = vld [vmem:[%s13973_s1 + $0x1dcc] ss:$16 sps:$4 sm:$0xff]  }
 0x3a9   :  { %7639 = vmatprep.subr.bf16.mxu1 %v10261_v61  ;;  %v10351_v61 = vld [vmem:[%s13973_s1 + $0x1fcc] ss:$16 sps:$4 sm:$0xff]  }
 0x3ab   :  { %7597 = vmatpush2.bf16.msra.mxu0 %v10256_v23  ;;  %v10346_v23 = vld [vmem:[%s13973_s1 + $0x1dc8] ss:$16 sps:$4 sm:$0xff]  }
 0x3ac   :  { %7640 = vmatpush2.bf16.msra.mxu1 %v10259_v3  ;;  %7598 = vmatprep.subr.bf16.mxu0 %v10264_v42  ;;  %v10349_v3 = vld [vmem:[%s13973_s1 + $0x1fc8] ss:$16 sps:$4 sm:$0xff]   ;;  %v10354_v42 = vld [vmem:[%s13973_s1 + $0x1dac] ss:$16 sps:$4 sm:$0xff]  }
 0x3ad   :  { %7641 = vmatprep.subr.bf16.mxu1 %v10267_v6  ;;  %v10357_v6 = vld [vmem:[%s13973_s1 + $0x1fac] ss:$16 sps:$4 sm:$0xff]  }
 0x3af   :  { %7599 = vmatpush2.bf16.msra.mxu0 %v10262_v30  ;;  %v10352_v30 = vld [vmem:[%s13973_s1 + $0x1da8] ss:$16 sps:$4 sm:$0xff]  }
 0x3b0   :  { %7642 = vmatpush2.bf16.msra.mxu1 %v10265_v31  ;;  %7600 = vmatprep.subr.bf16.mxu0 %v10270_v41  ;;  %v10355_v31 = vld [vmem:[%s13973_s1 + $0x1fa8] ss:$16 sps:$4 sm:$0xff]   ;;  %v10360_v41 = vld [vmem:[%s13973_s1 + $0x1d8c] ss:$16 sps:$4 sm:$0xff]  }
 0x3b1   :  { %7643 = vmatprep.subr.bf16.mxu1 %v10273_v21  ;;  %v10363_v21 = vld [vmem:[%s13973_s1 + $0x1f8c] ss:$16 sps:$4 sm:$0xff]  }
 0x3b3   :  { %7601 = vmatpush2.bf16.msra.mxu0 %v10268_v32  ;;  %v10358_v32 = vld [vmem:[%s13973_s1 + $0x1d88] ss:$16 sps:$4 sm:$0xff]  }
 0x3b4   :  { %7644 = vmatpush2.bf16.msra.mxu1 %v10271_v36  ;;  %7602 = vmatprep.subr.bf16.mxu0 %v10276_v27  ;;  %v10361_v36 = vld [vmem:[%s13973_s1 + $0x1f88] ss:$16 sps:$4 sm:$0xff]   ;;  %v10366_v27 = vld [vmem:[%s13973_s1 + $0x1d6c] ss:$16 sps:$4 sm:$0xff]  }
 0x3b5   :  { %7645 = vmatprep.subr.bf16.mxu1 %v10279_v17  ;;  %v10369_v17 = vld [vmem:[%s13973_s1 + $0x1f6c] ss:$16 sps:$4 sm:$0xff]  }
 0x3b7   :  { %7603 = vmatpush2.bf16.msra.mxu0 %v10274_v60  ;;  %v10364_v60 = vld [vmem:[%s13973_s1 + $0x1d68] ss:$16 sps:$4 sm:$0xff]  }
 0x3b8   :  { %7646 = vmatpush2.bf16.msra.mxu1 %v10277_v39  ;;  %7604 = vmatprep.subr.bf16.mxu0 %v10282_v34  ;;  %v10367_v39 = vld [vmem:[%s13973_s1 + $0x1f68] ss:$16 sps:$4 sm:$0xff]   ;;  %v10372_v34 = vld [vmem:[%s13973_s1 + $0x1d4c] ss:$16 sps:$4 sm:$0xff]  }
 0x3b9   :  { %7647 = vmatprep.subr.bf16.mxu1 %v10285_v16  ;;  %v10375_v16 = vld [vmem:[%s13973_s1 + $0x1f4c] ss:$16 sps:$4 sm:$0xff]  }
 0x3bb   :  { %7605 = vmatpush2.bf16.msra.mxu0 %v10280_v43  ;;  %v10370_v43 = vld [vmem:[%s13973_s1 + $0x1d48] ss:$16 sps:$4 sm:$0xff]  }
 0x3bc   :  { %7648 = vmatpush2.bf16.msra.mxu1 %v10283_v40  ;;  %7606 = vmatprep.subr.bf16.mxu0 %v10288_v4  ;;  %v10373_v40 = vld [vmem:[%s13973_s1 + $0x1f48] ss:$16 sps:$4 sm:$0xff]   ;;  %v10378_v4 = vld [vmem:[%s13973_s1 + $0x1d2c] ss:$16 sps:$4 sm:$0xff]  }
 0x3bd   :  { %7649 = vmatprep.subr.bf16.mxu1 %v10291_v7  ;;  %v10381_v7 = vld [vmem:[%s13973_s1 + $0x1f2c] ss:$16 sps:$4 sm:$0xff]  }
 0x3bf   :  { %7607 = vmatpush2.bf16.msra.mxu0 %v10286_v46  ;;  %v10376_v46 = vld [vmem:[%s13973_s1 + $0x1d28] ss:$16 sps:$4 sm:$0xff]  }
 0x3c0   :  { %7650 = vmatpush2.bf16.msra.mxu1 %v10289_v10  ;;  %7662 = vmatprep.subr.bf16.mxu0 %v10294_v11  ;;  %v10379_v10 = vld [vmem:[%s13973_s1 + $0x1f28] ss:$16 sps:$4 sm:$0xff]   ;;  %v10384_v11 = vld [vmem:[%s13973_s1 + $0x1d0c] ss:$16 sps:$4 sm:$0xff]  }
 0x3c1   :  { %7705 = vmatprep.subr.bf16.mxu1 %v10297_v8  ;;  %v10387_v8 = vld [vmem:[%s13973_s1 + $0x1f0c] ss:$16 sps:$4 sm:$0xff]  }
 0x3c2   :  { %7609 = vmatmul.mubr.bf16.vlgmr.msra.gmra.mxu0 %v13998_v51  ;;  %v7094_v51 = vpop.f32.mrf.mxu0 }
 0x3c3   :  { %7652 = vmatmul.mubr.bf16.vlgmr.msra.gmra.mxu1 %v13999_v24  ;;  %7663 = vmatpush1.bf16.msra.mxu0 %v10292_v2  ;;  %v10382_v2 = vld [vmem:[%s13973_s1 + $0x1d08] ss:$16 sps:$4 sm:$0xff]   ;;  %v7137_v24 = vpop.f32.mrf.mxu1 }
 0x3c4   :  { %7706 = vmatpush1.bf16.msra.mxu1 %v10295_v47  ;;  %7664 = vmatprep.subr.bf16.mxu0 %v10300_v50  ;;  %v10385_v47 = vld [vmem:[%s13973_s1 + $0x1f08] ss:$16 sps:$4 sm:$0xff]   ;;  %v14002_v50 = vld [vmem:[#allocation8_spill] sm:$0xff] }
 0x3c5   :  { %7707 = vmatprep.subr.bf16.mxu1 %v10303_v45  ;;  %7694 = vmatprep.mubr.bf16.mxu0 %v14000_v57  ;;  %v14003_v45 = vld [vmem:[#allocation9_spill] sm:$0xff] }
 0x3c6   :  { %7737 = vmatprep.mubr.bf16.mxu1 %v14001_v5 }
 0x3c7   :  { %7665 = vmatpush1.bf16.msra.mxu0 %v10298_v25  ;;  %v7096_v25 = vpop.f32.mrf.mxu0 }
 0x3c8   :  { %7708 = vmatpush1.bf16.msra.mxu1 %v10301_v0  ;;  %7666 = vmatprep.subr.bf16.mxu0 %v10306_v62  ;;  %v7139_v0 = vpop.f32.mrf.mxu1 }
 0x3c9   :  { %7709 = vmatprep.subr.bf16.mxu1 %v10309_v56  ;;  %v7098_v62 = vpop.f32.mrf.mxu0 }
 0x3ca   :  { %v7141_v56 = vpop.f32.mrf.mxu1 }
 0x3cb   :  { %7667 = vmatpush1.bf16.msra.mxu0 %v10304_v15  ;;  %v7100_v57 = vpop.f32.mrf.mxu0 }
 0x3cc   :  { %7710 = vmatpush1.bf16.msra.mxu1 %v10307_v58  ;;  %7668 = vmatprep.subr.bf16.mxu0 %v10312_v14  ;;  %v7143_v5 = vpop.f32.mrf.mxu1 }
 0x3cd   :  { %7711 = vmatprep.subr.bf16.mxu1 %v10315_v26  ;;  %v7180_v15 = vpop.f32.mrf.mxu0 }
 0x3ce   :  { %v7223_v58 = vpop.f32.mrf.mxu1 }
 0x3cf   :  { %7669 = vmatpush1.bf16.msra.mxu0 %v10310_v9  ;;  %v7182_v14 = vpop.f32.mrf.mxu0 }
 0x3d0   :  { %7712 = vmatpush1.bf16.msra.mxu1 %v10313_v1  ;;  %7670 = vmatprep.subr.bf16.mxu0 %v10318_v12  ;;  %v7225_v26 = vpop.f32.mrf.mxu1 }
 0x3d1   :  { %7713 = vmatprep.subr.bf16.mxu1 %v10321_v63  ;;  %v7184_v9 = vpop.f32.mrf.mxu0 }
 0x3d2   :  { %v7227_v1 = vpop.f32.mrf.mxu1 }
 0x3d3   :  { %7671 = vmatpush1.bf16.msra.mxu0 %v10316_v13  ;;  %v7186_v12 = vpop.f32.mrf.mxu0 }
 0x3d4   :  { %7714 = vmatpush1.bf16.msra.mxu1 %v10319_v22  ;;  %7672 = vmatprep.subr.bf16.mxu0 %v10324_v53  ;;  %v7229_v63 = vpop.f32.mrf.mxu1 }
 0x3d5   :  { %7715 = vmatprep.subr.bf16.mxu1 %v10327_v33  ;;  %v7266_v13 = vpop.f32.mrf.mxu0 }
 0x3d6   :  { %v7309_v22 = vpop.f32.mrf.mxu1 }
 0x3d7   :  { %7673 = vmatpush1.bf16.msra.mxu0 %v10322_v37  ;;  %v7268_v53 = vpop.f32.mrf.mxu0 }
 0x3d8   :  { %7716 = vmatpush1.bf16.msra.mxu1 %v10325_v28  ;;  %7674 = vmatprep.subr.bf16.mxu0 %v10330_v19  ;;  %v7311_v33 = vpop.f32.mrf.mxu1 }
 0x3d9   :  { %7717 = vmatprep.subr.bf16.mxu1 %v10333_v54  ;;  %v7270_v37 = vpop.f32.mrf.mxu0 }
 0x3da   :  { %v7313_v28 = vpop.f32.mrf.mxu1 }
 0x3db   :  { %7675 = vmatpush1.bf16.msra.mxu0 %v10328_v29  ;;  %v7272_v19 = vpop.f32.mrf.mxu0 }
 0x3dc   :  { %7718 = vmatpush1.bf16.msra.mxu1 %v10331_v44  ;;  %7676 = vmatprep.subr.bf16.mxu0 %v10336_v55  ;;  %v7315_v54 = vpop.f32.mrf.mxu1 }
 0x3dd   :  { %7719 = vmatprep.subr.bf16.mxu1 %v10339_v48  ;;  %v7352_v29 = vpop.f32.mrf.mxu0 }
 0x3de   :  { %v7395_v44 = vpop.f32.mrf.mxu1 }
 0x3df   :  { %7677 = vmatpush1.bf16.msra.mxu0 %v10334_v49  ;;  %v7354_v55 = vpop.f32.mrf.mxu0  ;;  %v14004_v49 = vld [vmem:[#allocation10_spill] sm:$0xff] }
 0x3e0   :  { %7720 = vmatpush1.bf16.msra.mxu1 %v10337_v52  ;;  %7678 = vmatprep.subr.bf16.mxu0 %v10342_v59  ;;  %v7397_v48 = vpop.f32.mrf.mxu1  ;;  %v1082_v52 = vsub.s32 2, %v14004_v49 }
 0x3e1   :  { %7721 = vmatprep.subr.bf16.mxu1 %v10345_v38  ;;  %v7356_v59 = vpop.f32.mrf.mxu0 }
 0x3e2   :  { %v7399_v38 = vpop.f32.mrf.mxu1 }
 0x3e3   :  { %7679 = vmatpush2.bf16.msra.mxu0 %v10340_v35  ;;  %v1086_v35 = vsub.s32 3, %v14004_v49 }
 0x3e4   :  { %7722 = vmatpush2.bf16.msra.mxu1 %v10343_v18  ;;  %7680 = vmatprep.subr.bf16.mxu0 %v10348_v20  ;;  %v10388_v18 = vld [vmem:[%s13975_s2] sm:$0xf] }
 0x3e5   :  { %7723 = vmatprep.subr.bf16.mxu1 %v10351_v61  ;;  %v1083_v20 = vrot.slane %v10388_v18, %v1082_v52  ;;  %v7358_v61 = vpop.f32.mrf.mxu0 }
 0x3e7   :  { %7681 = vmatpush2.bf16.msra.mxu0 %v10346_v23  ;;  %v7401_v23 = vpop.f32.mrf.mxu1 }
 0x3e8   :  { %7724 = vmatpush2.bf16.msra.mxu1 %v10349_v3  ;;  %7682 = vmatprep.subr.bf16.mxu0 %v10354_v42  ;;  %v1087_v3 = vrot.slane %v10388_v18, %v1086_v35 }
 0x3e9   :  { %7725 = vmatprep.subr.bf16.mxu1 %v10357_v6 }
 0x3eb   :  { %7683 = vmatpush2.bf16.msra.mxu0 %v10352_v30  ;;  %v7095_v30 = vadd.f32 %v7094_v51, %v1083_v20 }
 0x3ec   :  { %7726 = vmatpush2.bf16.msra.mxu1 %v10355_v31  ;;  %7684 = vmatprep.subr.bf16.mxu0 %v10360_v41  ;;  %v7097_v31 = vadd.f32 %v7096_v25, %v1087_v3 }
 0x3ed   :  { %7727 = vmatprep.subr.bf16.mxu1 %v10363_v21 }
 0x3ef   :  { %7685 = vmatpush2.bf16.msra.mxu0 %v10358_v32  ;;  %v7138_v32 = vadd.f32 %v7137_v24, %v7095_v30 }
 0x3f0   :  { %7728 = vmatpush2.bf16.msra.mxu1 %v10361_v36  ;;  %7686 = vmatprep.subr.bf16.mxu0 %v10366_v27  ;;  %v7099_v36 = vadd.f32 %v7098_v62, %v1083_v20  ;;  %v7140_v27 = vadd.f32 %v7139_v0, %v7097_v31 }
 0x3f1   :  { %7729 = vmatprep.subr.bf16.mxu1 %v10369_v17  ;;  %v7101_v17 = vadd.f32 %v7100_v57, %v1087_v3 }
 0x3f3   :  { %7687 = vmatpush2.bf16.msra.mxu0 %v10364_v60  ;;  %v7181_v60 = vadd.f32 %v7180_v15, %v7138_v32 }
 0x3f4   :  { %7730 = vmatpush2.bf16.msra.mxu1 %v10367_v39  ;;  %7688 = vmatprep.subr.bf16.mxu0 %v10372_v34 }
 0x3f5   :  { %7731 = vmatprep.subr.bf16.mxu1 %v10375_v16  ;;  %v7142_v16 = vadd.f32 %v7141_v56, %v7099_v36 }
 0x3f7   :  { %7689 = vmatpush2.bf16.msra.mxu0 %v10370_v43  ;;  %v7183_v43 = vadd.f32 %v7182_v14, %v7140_v27 }
 0x3f8   :  { %7732 = vmatpush2.bf16.msra.mxu1 %v10373_v40  ;;  %7690 = vmatprep.subr.bf16.mxu0 %v10378_v4  ;;  %v7144_v40 = vadd.f32 %v7143_v5, %v7101_v17  ;;  %v7224_v4 = vadd.f32 %v7223_v58, %v7181_v60 }
 0x3f9   :  { %7733 = vmatprep.subr.bf16.mxu1 %v10381_v7  ;;  %v7185_v7 = vadd.f32 %v7184_v9, %v7142_v16 }
 0x3fb   :  { %7691 = vmatpush2.bf16.msra.mxu0 %v10376_v46 }
 0x3fc   :  { %7734 = vmatpush2.bf16.msra.mxu1 %v10379_v10  ;;  %7692 = vmatprep.subr.bf16.mxu0 %v10384_v11  ;;  %v7226_v11 = vadd.f32 %v7225_v26, %v7183_v43 }
 0x3fd   :  { %7735 = vmatprep.subr.bf16.mxu1 %v10387_v8  ;;  %v7187_v8 = vadd.f32 %v7186_v12, %v7144_v40 }
 0x3fe   :  { %v7269_v51 = vadd.f32 %v7268_v53, %v7226_v11 }
 0x3ff   :  { %7693 = vmatpush2.bf16.msra.mxu0 %v10382_v2  ;;  %v7267_v2 = vadd.f32 %v7266_v13, %v7224_v4  ;;  %v7230_v24 = vadd.f32 %v7229_v63, %v7187_v8 }
 0x400   :  { %7736 = vmatpush2.bf16.msra.mxu1 %v10385_v47  ;;  %v7312_v15 = vadd.f32 %v7311_v33, %v7269_v51 }
 0x401   :  { %v7310_v25 = vadd.f32 %v7309_v22, %v7267_v2  ;;  %v7273_v56 = vadd.f32 %v7272_v19, %v7230_v24 }
 0x402   :  { %7695 = vmatmul.mubr.bf16.vlgmr.msra.gmra.mxu0 %v14002_v50  ;;  %v7438_v42 = vpop.f32.mrf.mxu0  ;;  %v7355_v58 = vadd.f32 %v7354_v55, %v7312_v15 }
 0x403   :  { %7738 = vmatmul.mubr.bf16.vlgmr.msra.gmra.mxu1 %v14003_v45  ;;  %v7481_v6 = vpop.f32.mrf.mxu1  ;;  %v7228_v45 = vadd.f32 %v7227_v1, %v7185_v7  ;;  %v7353_v14 = vadd.f32 %v7352_v29, %v7310_v25  ;;  %v7316_v52 = vadd.f32 %v7315_v54, %v7273_v56 }
 0x404   :  { %v7440_v41 = vpop.f32.mrf.mxu0  ;;  %v7398_v13 = vadd.f32 %v7397_v48, %v7355_v58 }
 0x405   :  { %v7483_v21 = vpop.f32.mrf.mxu1  ;;  %v7271_v0 = vadd.f32 %v7270_v37, %v7228_v45  ;;  %v7396_v26 = vadd.f32 %v7395_v44, %v7353_v14  ;;  %v7359_v35 = vadd.f32 %v7358_v61, %v7316_v52 }
 0x406   :  { %v7442_v39 = vpop.f32.mrf.mxu0  ;;  %v7441_v22 = vadd.f32 %v7440_v41, %v7398_v13 }
 0x407   :  { %v7485_v34 = vpop.f32.mrf.mxu1  ;;  %v7314_v5 = vadd.f32 %v7313_v28, %v7271_v0  ;;  %v7439_v18 = vadd.f32 %v7438_v42, %v7396_v26  ;;  %v7402_v3 = vadd.f32 %v7401_v23, %v7359_v35 }
 0x408   :  { %v7444_v46 = vpop.f32.mrf.mxu0  ;;  %v7484_v29 = vadd.f32 %v7483_v21, %v7441_v22 }
 0x409   :  { %v7487_v10 = vpop.f32.mrf.mxu1  ;;  %v7357_v12 = vadd.f32 %v7356_v59, %v7314_v5  ;;  %v7482_v33 = vadd.f32 %v7481_v6, %v7439_v18  ;;  %v7445_v28 = vadd.f32 %v7444_v46, %v7402_v3 }
 0x40b   :  { %v7400_v63 = vadd.f32 %v7399_v38, %v7357_v12  ;;  %v7488_v59 = vadd.f32 %v7487_v10, %v7445_v28 }
 0x40d   :  { %v7443_v19 = vadd.f32 %v7442_v39, %v7400_v63 }
 0x40f   :  { %v7486_v54 = vadd.f32 %v7485_v34, %v7443_v19 }
 0x442   :  { %v7524_v47 = vpop.f32.mrf.mxu0 }
 0x443   :  { %v7567_v50 = vpop.f32.mrf.mxu1  ;;  %v7525_v55 = vadd.f32 %v7524_v47, %v7482_v33 }
 0x444   :  { %v7526_v62 = vpop.f32.mrf.mxu0 }
 0x445   :  { %v7569_v57 = vpop.f32.mrf.mxu1  ;;  %v7527_v44 = vadd.f32 %v7526_v62, %v7484_v29  ;;  %v7568_v48 = vadd.f32 %v7567_v50, %v7525_v55 }
 0x446   :  { %v7528_v9 = vpop.f32.mrf.mxu0 }
 0x447   :  { %v7571_v49 = vpop.f32.mrf.mxu1  ;;  %v7529_v61 = vadd.f32 %v7528_v9, %v7486_v54  ;;  %v7570_v36 = vadd.f32 %v7569_v57, %v7527_v44 }
 0x448   :  { %v7530_v1 = vpop.f32.mrf.mxu0 }
 0x449   :  { %v7573_v53 = vpop.f32.mrf.mxu1  ;;  %v7531_v38 = vadd.f32 %v7530_v1, %v7488_v59  ;;  %v7572_v27 = vadd.f32 %v7571_v49, %v7529_v61 }
 0x44b   :  { %v7574_v60 = vadd.f32 %v7573_v53, %v7531_v38 }
 0x482   :  { %v7610_v37 = vpop.f32.mrf.mxu0 }
 0x483   :  { %v7653_v20 = vpop.f32.mrf.mxu1  ;;  %v7611_v41 = vadd.f32 %v7610_v37, %v7568_v48 }
 0x484   :  { %v7612_v30 = vpop.f32.mrf.mxu0 }
 0x485   :  { %v7655_v31 = vpop.f32.mrf.mxu1  ;;  %v7613_v17 = vadd.f32 %v7612_v30, %v7570_v36  ;;  %v7654_v21 = vadd.f32 %v7653_v20, %v7611_v41 }
 0x486   :  { %v7614_v42 = vpop.f32.mrf.mxu0 }
 0x487   :  { %v7657_v32 = vpop.f32.mrf.mxu1  ;;  %v7615_v39 = vadd.f32 %v7614_v42, %v7572_v27  ;;  %v7656_v40 = vadd.f32 %v7655_v31, %v7613_v17 }
 0x488   :  { %v7616_v23 = vpop.f32.mrf.mxu0 }
 0x489   :  { %v7659_v6 = vpop.f32.mrf.mxu1  ;;  %v7617_v34 = vadd.f32 %v7616_v23, %v7574_v60  ;;  %v7658_v10 = vadd.f32 %v7657_v32, %v7615_v39 }
 0x48b   :  { %v7660_v50 = vadd.f32 %v7659_v6, %v7617_v34 }
 0x4c2   :  { %v7696_v16 = vpop.f32.mrf.mxu0 }
 0x4c3   :  { %v7739_v43 = vpop.f32.mrf.mxu1  ;;  %v7697_v4 = vadd.f32 %v7696_v16, %v7654_v21 }
 0x4c4   :  { %v7698_v7 = vpop.f32.mrf.mxu0 }
 0x4c5   :  { %v7741_v46 = vpop.f32.mrf.mxu1  ;;  %v7740_v11 = vadd.f32 %v7739_v43, %v7697_v4  ;;  %v7699_v8 = vadd.f32 %v7698_v7, %v7656_v40 }
 0x4c6   :  { %v7700_v2 = vpop.f32.mrf.mxu0 }
 0x4c7   :  { %v7743_v47 = vpop.f32.mrf.mxu1  ;;  %v7742_v45 = vadd.f32 %v7741_v46, %v7699_v8  ;;  %v7701_v51 = vadd.f32 %v7700_v2, %v7658_v10  ;;  %v7750_v25 = vmax.f32 %v7740_v11, 0.0 }
 0x4c8   :  { %v7702_v24 = vpop.f32.mrf.mxu0 }
 0x4c9   :  { %v7751_v0 = vmax.f32 %v7742_v45, 0.0  ;;  %v7744_v62 = vadd.f32 %v7743_v47, %v7701_v51  ;;  %v7703_v57 = vadd.f32 %v7702_v24, %v7660_v50  ;;  %v7745_v15 = vpop.f32.mrf.mxu1 }
 0x4cb   :  { %v8849_v56 = vpack.c.bf16 %v7751_v0, %v7750_v25  ;;  %v7746_v14 = vadd.f32 %v7745_v15, %v7703_v57  ;;  %v7754_v5 = vmax.f32 %v7744_v62, 0.0 }
 0x4cd   :  { %7781 = vst [vmem:[%s13976_s3 + $0x8] sm:$0xff] %v8849_v56  ;;  %v7755_v58 = vmax.f32 %v7746_v14, 0.0 }
 0x4cf   :  { %v8851_v9 = vpack.c.bf16 %v7755_v58, %v7754_v5 }
 0x4d1   :  { %7783 = vst [vmem:[%s13976_s3 + $0x18] sm:$0xff] %v8851_v9 }

</bundles_post_ra>
